<compile_context>
chip_gen: v6e
topology: v6e:2x2x1
jax: 0.10.0
libtpu: 0.0.40
codegen_flags: <defaults>
</compile_context>

<pallas_src>
import functools
import math

import jax
import jax.numpy as jnp
from jax.experimental import pallas as pl
from jax.experimental.pallas import tpu as pltpu

# ----------------------------- config (small) --------------------------------
D_MODEL = 32
H = 4
D_K = 8
D_V = 8
D_FF = 64
N_ENC = 2
N_DEC = 2
NUM_CLASSES = 10         # -> class head outputs NUM_CLASSES + 1
NUM_QUERIES = 8
BS = 2
SEQ = 16
LN_EPS = 1e-5
NEG_INF = -1e9


# ----------------------------- fused Pallas kernel ---------------------------
def _fused_detr_kernel(*refs, treedef, n_param_leaves):
    """One grid step == one batch element.  Everything stays in VMEM/vregs."""
    feat_ref, pos_ref, bias_ref = refs[:3]
    param_refs = refs[3:3 + n_param_leaves]
    o_logits, o_boxes, o_hs, o_pose = refs[3 + n_param_leaves:]

    p = jax.tree_util.tree_unflatten(treedef, list(param_refs))

    x = feat_ref[0]          # (S, D)
    pos = pos_ref[0]         # (S, D)
    enc_bias = bias_ref[0]   # (1, S)  additive mask bias (-1e9 on masked keys)

    scale = 1.0 / math.sqrt(D_K)

    # ---- on-chip building blocks (weights loaded lazily at use site) ----
    def linear(x2d, w_ref, b_ref, act=None):
        y = jnp.dot(x2d, w_ref[...], preferred_element_type=jnp.float32)
        y = y + b_ref[...]
        if act == "relu":
            y = jnp.maximum(y, 0.0)
        elif act == "sigmoid":
            y = jax.nn.sigmoid(y)
        return y

    def layernorm(v, g_ref, b_ref):
        mean = jnp.mean(v, axis=-1, keepdims=True)
        var = jnp.mean(jnp.square(v - mean), axis=-1, keepdims=True)
        return (v - mean) * jax.lax.rsqrt(var + LN_EPS) * g_ref[...] + b_ref[...]

    def attention(mp, q_in, k_in, v_in, bias2d):
        # q_in (Lq, D), k_in/v_in (Lk, D), bias2d (1, Lk) or None
        q = linear(q_in, mp["wq"], mp["bq"])      # (Lq, H*Dk)
        k = linear(k_in, mp["wk"], mp["bk"])      # (Lk, H*Dk)
        v = linear(v_in, mp["wv"], mp["bv"])      # (Lk, H*Dv)
        wo = mp["wo"][...]                        # (H*Dv, D)
        out = jnp.zeros((q_in.shape[0], D_MODEL), jnp.float32)
        for h in range(H):                        # static unroll, H = 4
            qh = q[:, h * D_K:(h + 1) * D_K]
            kh = k[:, h * D_K:(h + 1) * D_K]
            vh = v[:, h * D_V:(h + 1) * D_V]
            # qh @ kh^T without an explicit transpose
            s = jax.lax.dot_general(qh, kh, (((1,), (1,)), ((), ())),
                                    preferred_element_type=jnp.float32) * scale
            if bias2d is not None:
                s = s + bias2d
            m = jnp.max(s, axis=-1, keepdims=True)
            e = jnp.exp(s - m)
            pr = e * pl.reciprocal(jnp.sum(e, axis=-1, keepdims=True), approx=True)
            oh = jnp.dot(pr, vh, preferred_element_type=jnp.float32)     # (Lq, Dv)
            out = out + jnp.dot(oh, wo[h * D_V:(h + 1) * D_V, :],
                                preferred_element_type=jnp.float32)
        return out + mp["bo"][...]

    def mha(mp, queries, keys, values, bias2d):
        # m2-style MultiHeadAttention: attention + residual(queries) + LayerNorm
        att = attention(mp, queries, keys, values, bias2d)
        return layernorm(queries + att, mp["ln_g"], mp["ln_b"])

    def pwff(fp, v):
        h1 = linear(v, fp["w1"], fp["b1"], act="relu")
        out = linear(h1, fp["w2"], fp["b2"])
        return layernorm(v + out, fp["ln_g"], fp["ln_b"])

    # -------------------------------- encoder --------------------------------
    out = x
    for lp in p["enc_layers"]:
        qk = out + pos
        att = mha(lp["mhatt"], qk, qk, out, enc_bias)
        out = pwff(lp["pwff"], att)
    memory = layernorm(out, p["norm_g"], p["norm_b"])

    # -------------------------------- decoder --------------------------------
    pos_emb = p["query_embed"][...]                       # (nq, D)
    output = jnp.zeros((NUM_QUERIES, D_MODEL), jnp.float32)   # tgt
    mem_k = memory + pos
    for lp in p["dec_layers"]:
        qd = output + pos_emb
        self_att = mha(lp["self_att"], qd, qd, output, None)      # no self mask
        self_att = layernorm(output + self_att, lp["ln1_g"], lp["ln1_b"])
        self_att = self_att + pos_emb
        enc_att = mha(lp["enc_att"], self_att, mem_k, memory, enc_bias)
        enc_att = layernorm(self_att + enc_att, lp["ln2_g"], lp["ln2_b"])
        output = pwff(lp["pwff"], enc_att)
        output = layernorm(output, p["norm_g"], p["norm_b"])      # shared norm

    # --------------------------------- heads ---------------------------------
    logits = linear(output, p["class_w"], p["class_b"])
    bb = linear(output, p["bbox"]["w0"], p["bbox"]["b0"], act="relu")
    bb = linear(bb, p["bbox"]["w1"], p["bbox"]["b1"], act="relu")
    boxes = linear(bb, p["bbox"]["w2"], p["bbox"]["b2"], act="sigmoid")

    o_logits[0] = logits
    o_boxes[0] = boxes
    o_hs[0] = output
    o_pose[0] = pos_emb


# ----------------------------- wrapper ----------------------------------------
@jax.jit
def detr_transformer_forward(params, features, masks, pos_grid):
    bs, S, D = features.shape

    # mask -> additive bias (True -> -1e9), shaped (bs, 1, S) for clean blocks
    bias_enc = jnp.where(masks[:, 0, 0, :], NEG_INF, 0.0).astype(jnp.float32)
    bias_enc = bias_enc.reshape(bs, 1, S)

    # make every parameter >= 2-D so all kernel operands have clean layouts
    params2 = jax.tree_util.tree_map(
        lambda a: a.reshape(1, -1) if a.ndim == 1 else a, params)
    leaves, treedef = jax.tree_util.tree_flatten(params2)
    n_leaves = len(leaves)

    def const_spec(shape):
        nd = len(shape)
        return pl.BlockSpec(shape, lambda b, _nd=nd: (0,) * _nd)

    in_specs = [
        pl.BlockSpec((1, S, D), lambda b: (b, 0, 0)),    # features
        pl.BlockSpec((1, S, D), lambda b: (b, 0, 0)),    # pos_grid
        pl.BlockSpec((1, 1, S), lambda b: (b, 0, 0)),    # mask bias
    ] + [const_spec(l.shape) for l in leaves]            # weights: fetched once

    out_shape = (
        jax.ShapeDtypeStruct((bs, NUM_QUERIES, NUM_CLASSES + 1), jnp.float32),
        jax.ShapeDtypeStruct((bs, NUM_QUERIES, 4), jnp.float32),
        jax.ShapeDtypeStruct((bs, NUM_QUERIES, D_MODEL), jnp.float32),
        jax.ShapeDtypeStruct((bs, NUM_QUERIES, D_MODEL), jnp.float32),
    )
    out_specs = (
        pl.BlockSpec((1, NUM_QUERIES, NUM_CLASSES + 1), lambda b: (b, 0, 0)),
        pl.BlockSpec((1, NUM_QUERIES, 4), lambda b: (b, 0, 0)),
        pl.BlockSpec((1, NUM_QUERIES, D_MODEL), lambda b: (b, 0, 0)),
        pl.BlockSpec((1, NUM_QUERIES, D_MODEL), lambda b: (b, 0, 0)),
    )

    kernel = functools.partial(_fused_detr_kernel, treedef=treedef,
                               n_param_leaves=n_leaves)

    logits, boxes, hs, pos_emb = pl.pallas_call(
        kernel,
        out_shape=out_shape,
        grid=(bs,),
        in_specs=in_specs,
        out_specs=out_specs,
        compiler_params=pltpu.CompilerParams(
            dimension_semantics=("parallel",)),   # 2 TCs on v7x; ~free on v5e/v6e
    )(features, pos_grid, bias_enc, *leaves)

    out_dict = {"pred_logits": logits, "pred_boxes": boxes}
    # TODO(synk): SetCriterion / matcher / PostProcess are not part of forward().
    return out_dict, hs, pos_emb


# ----------------------------- pure-JAX reference ------------------------------
def reference_forward(params, features, masks, pos_grid):
    bs, S, D = features.shape
    bias = jnp.where(masks[:, 0, 0, :], NEG_INF, 0.0)[:, None, None, :]

    def linear(x, w, b, act=None):
        y = x @ w + b
        if act == "relu":
            y = jnp.maximum(y, 0.0)
        elif act == "sigmoid":
            y = jax.nn.sigmoid(y)
        return y

    def ln(v, g, b):
        m = v.mean(-1, keepdims=True)
        var = ((v - m) ** 2).mean(-1, keepdims=True)
        return (v - m) / jnp.sqrt(var + LN_EPS) * g + b

    def attention(mp, q_in, k_in, v_in, bias4):
        def split(t):
            b_, L, _ = t.shape
            return t.reshape(b_, L, H, -1).transpose(0, 2, 1, 3)
        q = split(linear(q_in, mp["wq"], mp["bq"]))
        k = split(linear(k_in, mp["wk"], mp["bk"]))
        v = split(linear(v_in, mp["wv"], mp["bv"]))
        s = jnp.einsum("bhqd,bhkd->bhqk", q, k) / math.sqrt(D_K)
        if bias4 is not None:
            s = s + bias4
        pr = jax.nn.softmax(s, axis=-1)
        o = jnp.einsum("bhqk,bhkd->bhqd", pr, v)
        o = o.transpose(0, 2, 1, 3).reshape(q_in.shape[0], q_in.shape[1], H * D_V)
        return linear(o, mp["wo"], mp["bo"])

    def mha(mp, q, k, v, bias4):
        return ln(q + attention(mp, q, k, v, bias4), mp["ln_g"], mp["ln_b"])

    def pwff(fp, x):
        return ln(x + linear(linear(x, fp["w1"], fp["b1"], "relu"),
                             fp["w2"], fp["b2"]), fp["ln_g"], fp["ln_b"])

    out = features
    for lp in params["enc_layers"]:
        qk = out + pos_grid
        out = pwff(lp["pwff"], mha(lp["mhatt"], qk, qk, out, bias))
    memory = ln(out, params["norm_g"], params["norm_b"])

    pos_emb = jnp.broadcast_to(params["query_embed"][None], (bs, NUM_QUERIES, D_MODEL))
    output = jnp.zeros_like(pos_emb)
    for lp in params["dec_layers"]:
        qd = output + pos_emb
        sa = mha(lp["self_att"], qd, qd, output, None)
        sa = ln(output + sa, lp["ln1_g"], lp["ln1_b"])
        sa = sa + pos_emb
        ea = mha(lp["enc_att"], sa, memory + pos_grid, memory, bias)
        ea = ln(sa + ea, lp["ln2_g"], lp["ln2_b"])
        output = pwff(lp["pwff"], ea)
        output = ln(output, params["norm_g"], params["norm_b"])

    logits = linear(output, params["class_w"], params["class_b"])
    bbx = linear(output, params["bbox"]["w0"], params["bbox"]["b0"], "relu")
    bbx = linear(bbx, params["bbox"]["w1"], params["bbox"]["b1"], "relu")
    boxes = linear(bbx, params["bbox"]["w2"], params["bbox"]["b2"], "sigmoid")
    return {"pred_logits": logits, "pred_boxes": boxes}, output, pos_emb


# ----------------------------- parameter init ---------------------------------
class KeyGen:
    def __init__(self, key):
        self.key = key

    def __call__(self):
        self.key, sub = jax.random.split(self.key)
        return sub


def xavier(kg, shape):
    fan_in, fan_out = shape[0], shape[1]
    lim = math.sqrt(6.0 / (fan_in + fan_out))
    return jax.random.uniform(kg(), shape, jnp.float32, -lim, lim)


def zeros(shape):
    return jnp.zeros(shape, jnp.float32)


def ones(shape):
    return jnp.ones(shape, jnp.float32)


def init_mha(kg):
    return dict(
        wq=xavier(kg, (D_MODEL, H * D_K)), bq=zeros((H * D_K,)),
        wk=xavier(kg, (D_MODEL, H * D_K)), bk=zeros((H * D_K,)),
        wv=xavier(kg, (D_MODEL, H * D_V)), bv=zeros((H * D_V,)),
        wo=xavier(kg, (H * D_V, D_MODEL)), bo=zeros((D_MODEL,)),
        ln_g=ones((D_MODEL,)), ln_b=zeros((D_MODEL,)),
    )


def init_pwff(kg):
    return dict(
        w1=xavier(kg, (D_MODEL, D_FF)), b1=zeros((D_FF,)),
        w2=xavier(kg, (D_FF, D_MODEL)), b2=zeros((D_MODEL,)),
        ln_g=ones((D_MODEL,)), ln_b=zeros((D_MODEL,)),
    )


def init_params(key):
    kg = KeyGen(key)
    enc_layers = [dict(mhatt=init_mha(kg), pwff=init_pwff(kg)) for _ in range(N_ENC)]
    dec_layers = [
        dict(
            self_att=init_mha(kg),
            enc_att=init_mha(kg),
            ln1_g=ones((D_MODEL,)), ln1_b=zeros((D_MODEL,)),
            ln2_g=ones((D_MODEL,)), ln2_b=zeros((D_MODEL,)),
            pwff=init_pwff(kg),
        )
        for _ in range(N_DEC)
    ]
    return dict(
        enc_layers=enc_layers,
        dec_layers=dec_layers,
        norm_g=ones((D_MODEL,)), norm_b=zeros((D_MODEL,)),   # shared enc/dec LayerNorm
        query_embed=xavier(kg, (NUM_QUERIES, D_MODEL)),
        class_w=xavier(kg, (D_MODEL, NUM_CLASSES + 1)), class_b=zeros((NUM_CLASSES + 1,)),
        bbox=dict(
            w0=xavier(kg, (D_MODEL, D_MODEL)), b0=zeros((D_MODEL,)),
            w1=xavier(kg, (D_MODEL, D_MODEL)), b1=zeros((D_MODEL,)),
            w2=xavier(kg, (D_MODEL, 4)), b2=zeros((4,)),
        ),
    )


# ----------------------------- main --------------------------------------------
if __name__ == "__main__":
    root = jax.random.PRNGKey(0)
    k_params, k_feat, k_pos = jax.random.split(root, 3)

    params = init_params(k_params)

    features = jax.random.normal(k_feat, (BS, SEQ, D_MODEL), jnp.float32)
    pos_grid = jax.random.normal(k_pos, (BS, SEQ, D_MODEL), jnp.float32)
    # mask the last 2 key positions of batch 0, last 3 of batch 1 (True = masked)
    seq_idx = jnp.arange(SEQ)
    masks = jnp.stack([seq_idx >= SEQ - 2, seq_idx >= SEQ - 3], axis=0)
    masks = masks.reshape(BS, 1, 1, SEQ)

    out_dict, hs_last, pos_emb = detr_transformer_forward(params, features, masks, pos_grid)
    jax.block_until_ready((out_dict["pred_logits"], out_dict["pred_boxes"], hs_last, pos_emb))

    assert out_dict["pred_logits"].shape == (BS, NUM_QUERIES, NUM_CLASSES + 1)
    assert out_dict["pred_boxes"].shape == (BS, NUM_QUERIES, 4)
    assert hs_last.shape == (BS, NUM_QUERIES, D_MODEL)
    assert pos_emb.shape == (BS, NUM_QUERIES, D_MODEL)

    # numerical check vs pure-JAX reference (approx softmax reciprocal -> loose tol)
    ref_dict, ref_hs, ref_pe = reference_forward(params, features, masks, pos_grid)
    err = max(
        float(jnp.max(jnp.abs(out_dict["pred_logits"] - ref_dict["pred_logits"]))),
        float(jnp.max(jnp.abs(out_dict["pred_boxes"] - ref_dict["pred_boxes"]))),
        float(jnp.max(jnp.abs(hs_last - ref_hs))),
        float(jnp.max(jnp.abs(pos_emb - ref_pe))),
    )
    assert err < 5e-2, f"mismatch vs reference: {err}"

    print("KERNEL_OK")
</pallas_src>

<mosaic_0001>
module attributes {stable_mosaic.version = 11 : i64} {
  func.func @_fused_detr_kernel(%arg0: i32, %arg1: memref<1x16x32xf32, #tpu.memory_space<vmem>>, %arg2: memref<1x16x32xf32, #tpu.memory_space<vmem>>, %arg3: memref<1x1x16xf32, #tpu.memory_space<vmem>>, %arg4: memref<1x32xf32, #tpu.memory_space<vmem>>, %arg5: memref<1x32xf32, #tpu.memory_space<vmem>>, %arg6: memref<1x4xf32, #tpu.memory_space<vmem>>, %arg7: memref<32x32xf32, #tpu.memory_space<vmem>>, %arg8: memref<32x32xf32, #tpu.memory_space<vmem>>, %arg9: memref<32x4xf32, #tpu.memory_space<vmem>>, %arg10: memref<1x11xf32, #tpu.memory_space<vmem>>, %arg11: memref<32x11xf32, #tpu.memory_space<vmem>>, %arg12: memref<1x32xf32, #tpu.memory_space<vmem>>, %arg13: memref<1x32xf32, #tpu.memory_space<vmem>>, %arg14: memref<1x32xf32, #tpu.memory_space<vmem>>, %arg15: memref<1x32xf32, #tpu.memory_space<vmem>>, %arg16: memref<1x32xf32, #tpu.memory_space<vmem>>, %arg17: memref<1x32xf32, #tpu.memory_space<vmem>>, %arg18: memref<32x32xf32, #tpu.memory_space<vmem>>, %arg19: memref<32x32xf32, #tpu.memory_space<vmem>>, %arg20: memref<32x32xf32, #tpu.memory_space<vmem>>, %arg21: memref<32x32xf32, #tpu.memory_space<vmem>>, %arg22: memref<1x32xf32, #tpu.memory_space<vmem>>, %arg23: memref<1x32xf32, #tpu.memory_space<vmem>>, %arg24: memref<1x32xf32, #tpu.memory_space<vmem>>, %arg25: memref<1x32xf32, #tpu.memory_space<vmem>>, %arg26: memref<1x64xf32, #tpu.memory_space<vmem>>, %arg27: memref<1x32xf32, #tpu.memory_space<vmem>>, %arg28: memref<1x32xf32, #tpu.memory_space<vmem>>, %arg29: memref<1x32xf32, #tpu.memory_space<vmem>>, %arg30: memref<32x64xf32, #tpu.memory_space<vmem>>, %arg31: memref<64x32xf32, #tpu.memory_space<vmem>>, %arg32: memref<1x32xf32, #tpu.memory_space<vmem>>, %arg33: memref<1x32xf32, #tpu.memory_space<vmem>>, %arg34: memref<1x32xf32, #tpu.memory_space<vmem>>, %arg35: memref<1x32xf32, #tpu.memory_space<vmem>>, %arg36: memref<1x32xf32, #tpu.memory_space<vmem>>, %arg37: memref<1x32xf32, #tpu.memory_space<vmem>>, %arg38: memref<32x32xf32, #tpu.memory_space<vmem>>, %arg39: memref<32x32xf32, #tpu.memory_space<vmem>>, %arg40: memref<32x32xf32, #tpu.memory_space<vmem>>, %arg41: memref<32x32xf32, #tpu.memory_space<vmem>>, %arg42: memref<1x32xf32, #tpu.memory_space<vmem>>, %arg43: memref<1x32xf32, #tpu.memory_space<vmem>>, %arg44: memref<1x32xf32, #tpu.memory_space<vmem>>, %arg45: memref<1x32xf32, #tpu.memory_space<vmem>>, %arg46: memref<1x32xf32, #tpu.memory_space<vmem>>, %arg47: memref<1x32xf32, #tpu.memory_space<vmem>>, %arg48: memref<32x32xf32, #tpu.memory_space<vmem>>, %arg49: memref<32x32xf32, #tpu.memory_space<vmem>>, %arg50: memref<32x32xf32, #tpu.memory_space<vmem>>, %arg51: memref<32x32xf32, #tpu.memory_space<vmem>>, %arg52: memref<1x32xf32, #tpu.memory_space<vmem>>, %arg53: memref<1x32xf32, #tpu.memory_space<vmem>>, %arg54: memref<1x32xf32, #tpu.memory_space<vmem>>, %arg55: memref<1x32xf32, #tpu.memory_space<vmem>>, %arg56: memref<1x64xf32, #tpu.memory_space<vmem>>, %arg57: memref<1x32xf32, #tpu.memory_space<vmem>>, %arg58: memref<1x32xf32, #tpu.memory_space<vmem>>, %arg59: memref<1x32xf32, #tpu.memory_space<vmem>>, %arg60: memref<32x64xf32, #tpu.memory_space<vmem>>, %arg61: memref<64x32xf32, #tpu.memory_space<vmem>>, %arg62: memref<1x32xf32, #tpu.memory_space<vmem>>, %arg63: memref<1x32xf32, #tpu.memory_space<vmem>>, %arg64: memref<1x32xf32, #tpu.memory_space<vmem>>, %arg65: memref<1x32xf32, #tpu.memory_space<vmem>>, %arg66: memref<1x32xf32, #tpu.memory_space<vmem>>, %arg67: memref<1x32xf32, #tpu.memory_space<vmem>>, %arg68: memref<32x32xf32, #tpu.memory_space<vmem>>, %arg69: memref<32x32xf32, #tpu.memory_space<vmem>>, %arg70: memref<32x32xf32, #tpu.memory_space<vmem>>, %arg71: memref<32x32xf32, #tpu.memory_space<vmem>>, %arg72: memref<1x32xf32, #tpu.memory_space<vmem>>, %arg73: memref<1x32xf32, #tpu.memory_space<vmem>>, %arg74: memref<1x32xf32, #tpu.memory_space<vmem>>, %arg75: memref<1x32xf32, #tpu.memory_space<vmem>>, %arg76: memref<1x32xf32, #tpu.memory_space<vmem>>, %arg77: memref<1x32xf32, #tpu.memory_space<vmem>>, %arg78: memref<32x32xf32, #tpu.memory_space<vmem>>, %arg79: memref<32x32xf32, #tpu.memory_space<vmem>>, %arg80: memref<32x32xf32, #tpu.memory_space<vmem>>, %arg81: memref<32x32xf32, #tpu.memory_space<vmem>>, %arg82: memref<1x64xf32, #tpu.memory_space<vmem>>, %arg83: memref<1x32xf32, #tpu.memory_space<vmem>>, %arg84: memref<1x32xf32, #tpu.memory_space<vmem>>, %arg85: memref<1x32xf32, #tpu.memory_space<vmem>>, %arg86: memref<32x64xf32, #tpu.memory_space<vmem>>, %arg87: memref<64x32xf32, #tpu.memory_space<vmem>>, %arg88: memref<1x32xf32, #tpu.memory_space<vmem>>, %arg89: memref<1x32xf32, #tpu.memory_space<vmem>>, %arg90: memref<1x32xf32, #tpu.memory_space<vmem>>, %arg91: memref<1x32xf32, #tpu.memory_space<vmem>>, %arg92: memref<1x32xf32, #tpu.memory_space<vmem>>, %arg93: memref<1x32xf32, #tpu.memory_space<vmem>>, %arg94: memref<32x32xf32, #tpu.memory_space<vmem>>, %arg95: memref<32x32xf32, #tpu.memory_space<vmem>>, %arg96: memref<32x32xf32, #tpu.memory_space<vmem>>, %arg97: memref<32x32xf32, #tpu.memory_space<vmem>>, %arg98: memref<1x64xf32, #tpu.memory_space<vmem>>, %arg99: memref<1x32xf32, #tpu.memory_space<vmem>>, %arg100: memref<1x32xf32, #tpu.memory_space<vmem>>, %arg101: memref<1x32xf32, #tpu.memory_space<vmem>>, %arg102: memref<32x64xf32, #tpu.memory_space<vmem>>, %arg103: memref<64x32xf32, #tpu.memory_space<vmem>>, %arg104: memref<1x32xf32, #tpu.memory_space<vmem>>, %arg105: memref<1x32xf32, #tpu.memory_space<vmem>>, %arg106: memref<8x32xf32, #tpu.memory_space<vmem>>, %arg107: memref<1x8x11xf32, #tpu.memory_space<vmem>>, %arg108: memref<1x8x4xf32, #tpu.memory_space<vmem>>, %arg109: memref<1x8x32xf32, #tpu.memory_space<vmem>>, %arg110: memref<1x8x32xf32, #tpu.memory_space<vmem>>) attributes {dimension_semantics = [#tpu.dimension_semantics<parallel>], iteration_bounds = array<i64: 2>, scalar_prefetch = 0 : i64, scratch_operands = 0 : i64, tpu.core_type = #tpu.core_type<tc>, window_params = [{transform_indices = @transform_0, window_bounds = array<i64: 1, 16, 32>}, {transform_indices = @transform_1, window_bounds = array<i64: 1, 16, 32>}, {transform_indices = @transform_2, window_bounds = array<i64: 1, 1, 16>}, {pipeline_mode = #tpu.pipeline_mode<synchronous>, transform_indices = @transform_3, window_bounds = array<i64: 1, 32>}, {pipeline_mode = #tpu.pipeline_mode<synchronous>, transform_indices = @transform_4, window_bounds = array<i64: 1, 32>}, {pipeline_mode = #tpu.pipeline_mode<synchronous>, transform_indices = @transform_5, window_bounds = array<i64: 1, 4>}, {pipeline_mode = #tpu.pipeline_mode<synchronous>, transform_indices = @transform_6, window_bounds = array<i64: 32, 32>}, {pipeline_mode = #tpu.pipeline_mode<synchronous>, transform_indices = @transform_7, window_bounds = array<i64: 32, 32>}, {pipeline_mode = #tpu.pipeline_mode<synchronous>, transform_indices = @transform_8, window_bounds = array<i64: 32, 4>}, {pipeline_mode = #tpu.pipeline_mode<synchronous>, transform_indices = @transform_9, window_bounds = array<i64: 1, 11>}, {pipeline_mode = #tpu.pipeline_mode<synchronous>, transform_indices = @transform_10, window_bounds = array<i64: 32, 11>}, {pipeline_mode = #tpu.pipeline_mode<synchronous>, transform_indices = @transform_11, window_bounds = array<i64: 1, 32>}, {pipeline_mode = #tpu.pipeline_mode<synchronous>, transform_indices = @transform_12, window_bounds = array<i64: 1, 32>}, {pipeline_mode = #tpu.pipeline_mode<synchronous>, transform_indices = @transform_13, window_bounds = array<i64: 1, 32>}, {pipeline_mode = #tpu.pipeline_mode<synchronous>, transform_indices = @transform_14, window_bounds = array<i64: 1, 32>}, {pipeline_mode = #tpu.pipeline_mode<synchronous>, transform_indices = @transform_15, window_bounds = array<i64: 1, 32>}, {pipeline_mode = #tpu.pipeline_mode<synchronous>, transform_indices = @transform_16, window_bounds = array<i64: 1, 32>}, {pipeline_mode = #tpu.pipeline_mode<synchronous>, transform_indices = @transform_17, window_bounds = array<i64: 32, 32>}, {pipeline_mode = #tpu.pipeline_mode<synchronous>, transform_indices = @transform_18, window_bounds = array<i64: 32, 32>}, {pipeline_mode = #tpu.pipeline_mode<synchronous>, transform_indices = @transform_19, window_bounds = array<i64: 32, 32>}, {pipeline_mode = #tpu.pipeline_mode<synchronous>, transform_indices = @transform_20, window_bounds = array<i64: 32, 32>}, {pipeline_mode = #tpu.pipeline_mode<synchronous>, transform_indices = @transform_21, window_bounds = array<i64: 1, 32>}, {pipeline_mode = #tpu.pipeline_mode<synchronous>, transform_indices = @transform_22, window_bounds = array<i64: 1, 32>}, {pipeline_mode = #tpu.pipeline_mode<synchronous>, transform_indices = @transform_23, window_bounds = array<i64: 1, 32>}, {pipeline_mode = #tpu.pipeline_mode<synchronous>, transform_indices = @transform_24, window_bounds = array<i64: 1, 32>}, {pipeline_mode = #tpu.pipeline_mode<synchronous>, transform_indices = @transform_25, window_bounds = array<i64: 1, 64>}, {pipeline_mode = #tpu.pipeline_mode<synchronous>, transform_indices = @transform_26, window_bounds = array<i64: 1, 32>}, {pipeline_mode = #tpu.pipeline_mode<synchronous>, transform_indices = @transform_27, window_bounds = array<i64: 1, 32>}, {pipeline_mode = #tpu.pipeline_mode<synchronous>, transform_indices = @transform_28, window_bounds = array<i64: 1, 32>}, {pipeline_mode = #tpu.pipeline_mode<synchronous>, transform_indices = @transform_29, window_bounds = array<i64: 32, 64>}, {pipeline_mode = #tpu.pipeline_mode<synchronous>, transform_indices = @transform_30, window_bounds = array<i64: 64, 32>}, {pipeline_mode = #tpu.pipeline_mode<synchronous>, transform_indices = @transform_31, window_bounds = array<i64: 1, 32>}, {pipeline_mode = #tpu.pipeline_mode<synchronous>, transform_indices = @transform_32, window_bounds = array<i64: 1, 32>}, {pipeline_mode = #tpu.pipeline_mode<synchronous>, transform_indices = @transform_33, window_bounds = array<i64: 1, 32>}, {pipeline_mode = #tpu.pipeline_mode<synchronous>, transform_indices = @transform_34, window_bounds = array<i64: 1, 32>}, {pipeline_mode = #tpu.pipeline_mode<synchronous>, transform_indices = @transform_35, window_bounds = array<i64: 1, 32>}, {pipeline_mode = #tpu.pipeline_mode<synchronous>, transform_indices = @transform_36, window_bounds = array<i64: 1, 32>}, {pipeline_mode = #tpu.pipeline_mode<synchronous>, transform_indices = @transform_37, window_bounds = array<i64: 32, 32>}, {pipeline_mode = #tpu.pipeline_mode<synchronous>, transform_indices = @transform_38, window_bounds = array<i64: 32, 32>}, {pipeline_mode = #tpu.pipeline_mode<synchronous>, transform_indices = @transform_39, window_bounds = array<i64: 32, 32>}, {pipeline_mode = #tpu.pipeline_mode<synchronous>, transform_indices = @transform_40, window_bounds = array<i64: 32, 32>}, {pipeline_mode = #tpu.pipeline_mode<synchronous>, transform_indices = @transform_41, window_bounds = array<i64: 1, 32>}, {pipeline_mode = #tpu.pipeline_mode<synchronous>, transform_indices = @transform_42, window_bounds = array<i64: 1, 32>}, {pipeline_mode = #tpu.pipeline_mode<synchronous>, transform_indices = @transform_43, window_bounds = array<i64: 1, 32>}, {pipeline_mode = #tpu.pipeline_mode<synchronous>, transform_indices = @transform_44, window_bounds = array<i64: 1, 32>}, {pipeline_mode = #tpu.pipeline_mode<synchronous>, transform_indices = @transform_45, window_bounds = array<i64: 1, 32>}, {pipeline_mode = #tpu.pipeline_mode<synchronous>, transform_indices = @transform_46, window_bounds = array<i64: 1, 32>}, {pipeline_mode = #tpu.pipeline_mode<synchronous>, transform_indices = @transform_47, window_bounds = array<i64: 32, 32>}, {pipeline_mode = #tpu.pipeline_mode<synchronous>, transform_indices = @transform_48, window_bounds = array<i64: 32, 32>}, {pipeline_mode = #tpu.pipeline_mode<synchronous>, transform_indices = @transform_49, window_bounds = array<i64: 32, 32>}, {pipeline_mode = #tpu.pipeline_mode<synchronous>, transform_indices = @transform_50, window_bounds = array<i64: 32, 32>}, {pipeline_mode = #tpu.pipeline_mode<synchronous>, transform_indices = @transform_51, window_bounds = array<i64: 1, 32>}, {pipeline_mode = #tpu.pipeline_mode<synchronous>, transform_indices = @transform_52, window_bounds = array<i64: 1, 32>}, {pipeline_mode = #tpu.pipeline_mode<synchronous>, transform_indices = @transform_53, window_bounds = array<i64: 1, 32>}, {pipeline_mode = #tpu.pipeline_mode<synchronous>, transform_indices = @transform_54, window_bounds = array<i64: 1, 32>}, {pipeline_mode = #tpu.pipeline_mode<synchronous>, transform_indices = @transform_55, window_bounds = array<i64: 1, 64>}, {pipeline_mode = #tpu.pipeline_mode<synchronous>, transform_indices = @transform_56, window_bounds = array<i64: 1, 32>}, {pipeline_mode = #tpu.pipeline_mode<synchronous>, transform_indices = @transform_57, window_bounds = array<i64: 1, 32>}, {pipeline_mode = #tpu.pipeline_mode<synchronous>, transform_indices = @transform_58, window_bounds = array<i64: 1, 32>}, {pipeline_mode = #tpu.pipeline_mode<synchronous>, transform_indices = @transform_59, window_bounds = array<i64: 32, 64>}, {pipeline_mode = #tpu.pipeline_mode<synchronous>, transform_indices = @transform_60, window_bounds = array<i64: 64, 32>}, {pipeline_mode = #tpu.pipeline_mode<synchronous>, transform_indices = @transform_61, window_bounds = array<i64: 1, 32>}, {pipeline_mode = #tpu.pipeline_mode<synchronous>, transform_indices = @transform_62, window_bounds = array<i64: 1, 32>}, {pipeline_mode = #tpu.pipeline_mode<synchronous>, transform_indices = @transform_63, window_bounds = array<i64: 1, 32>}, {pipeline_mode = #tpu.pipeline_mode<synchronous>, transform_indices = @transform_64, window_bounds = array<i64: 1, 32>}, {pipeline_mode = #tpu.pipeline_mode<synchronous>, transform_indices = @transform_65, window_bounds = array<i64: 1, 32>}, {pipeline_mode = #tpu.pipeline_mode<synchronous>, transform_indices = @transform_66, window_bounds = array<i64: 1, 32>}, {pipeline_mode = #tpu.pipeline_mode<synchronous>, transform_indices = @transform_67, window_bounds = array<i64: 32, 32>}, {pipeline_mode = #tpu.pipeline_mode<synchronous>, transform_indices = @transform_68, window_bounds = array<i64: 32, 32>}, {pipeline_mode = #tpu.pipeline_mode<synchronous>, transform_indices = @transform_69, window_bounds = array<i64: 32, 32>}, {pipeline_mode = #tpu.pipeline_mode<synchronous>, transform_indices = @transform_70, window_bounds = array<i64: 32, 32>}, {pipeline_mode = #tpu.pipeline_mode<synchronous>, transform_indices = @transform_71, window_bounds = array<i64: 1, 32>}, {pipeline_mode = #tpu.pipeline_mode<synchronous>, transform_indices = @transform_72, window_bounds = array<i64: 1, 32>}, {pipeline_mode = #tpu.pipeline_mode<synchronous>, transform_indices = @transform_73, window_bounds = array<i64: 1, 32>}, {pipeline_mode = #tpu.pipeline_mode<synchronous>, transform_indices = @transform_74, window_bounds = array<i64: 1, 32>}, {pipeline_mode = #tpu.pipeline_mode<synchronous>, transform_indices = @transform_75, window_bounds = array<i64: 1, 32>}, {pipeline_mode = #tpu.pipeline_mode<synchronous>, transform_indices = @transform_76, window_bounds = array<i64: 1, 32>}, {pipeline_mode = #tpu.pipeline_mode<synchronous>, transform_indices = @transform_77, window_bounds = array<i64: 32, 32>}, {pipeline_mode = #tpu.pipeline_mode<synchronous>, transform_indices = @transform_78, window_bounds = array<i64: 32, 32>}, {pipeline_mode = #tpu.pipeline_mode<synchronous>, transform_indices = @transform_79, window_bounds = array<i64: 32, 32>}, {pipeline_mode = #tpu.pipeline_mode<synchronous>, transform_indices = @transform_80, window_bounds = array<i64: 32, 32>}, {pipeline_mode = #tpu.pipeline_mode<synchronous>, transform_indices = @transform_81, window_bounds = array<i64: 1, 64>}, {pipeline_mode = #tpu.pipeline_mode<synchronous>, transform_indices = @transform_82, window_bounds = array<i64: 1, 32>}, {pipeline_mode = #tpu.pipeline_mode<synchronous>, transform_indices = @transform_83, window_bounds = array<i64: 1, 32>}, {pipeline_mode = #tpu.pipeline_mode<synchronous>, transform_indices = @transform_84, window_bounds = array<i64: 1, 32>}, {pipeline_mode = #tpu.pipeline_mode<synchronous>, transform_indices = @transform_85, window_bounds = array<i64: 32, 64>}, {pipeline_mode = #tpu.pipeline_mode<synchronous>, transform_indices = @transform_86, window_bounds = array<i64: 64, 32>}, {pipeline_mode = #tpu.pipeline_mode<synchronous>, transform_indices = @transform_87, window_bounds = array<i64: 1, 32>}, {pipeline_mode = #tpu.pipeline_mode<synchronous>, transform_indices = @transform_88, window_bounds = array<i64: 1, 32>}, {pipeline_mode = #tpu.pipeline_mode<synchronous>, transform_indices = @transform_89, window_bounds = array<i64: 1, 32>}, {pipeline_mode = #tpu.pipeline_mode<synchronous>, transform_indices = @transform_90, window_bounds = array<i64: 1, 32>}, {pipeline_mode = #tpu.pipeline_mode<synchronous>, transform_indices = @transform_91, window_bounds = array<i64: 1, 32>}, {pipeline_mode = #tpu.pipeline_mode<synchronous>, transform_indices = @transform_92, window_bounds = array<i64: 1, 32>}, {pipeline_mode = #tpu.pipeline_mode<synchronous>, transform_indices = @transform_93, window_bounds = array<i64: 32, 32>}, {pipeline_mode = #tpu.pipeline_mode<synchronous>, transform_indices = @transform_94, window_bounds = array<i64: 32, 32>}, {pipeline_mode = #tpu.pipeline_mode<synchronous>, transform_indices = @transform_95, window_bounds = array<i64: 32, 32>}, {pipeline_mode = #tpu.pipeline_mode<synchronous>, transform_indices = @transform_96, window_bounds = array<i64: 32, 32>}, {pipeline_mode = #tpu.pipeline_mode<synchronous>, transform_indices = @transform_97, window_bounds = array<i64: 1, 64>}, {pipeline_mode = #tpu.pipeline_mode<synchronous>, transform_indices = @transform_98, window_bounds = array<i64: 1, 32>}, {pipeline_mode = #tpu.pipeline_mode<synchronous>, transform_indices = @transform_99, window_bounds = array<i64: 1, 32>}, {pipeline_mode = #tpu.pipeline_mode<synchronous>, transform_indices = @transform_100, window_bounds = array<i64: 1, 32>}, {pipeline_mode = #tpu.pipeline_mode<synchronous>, transform_indices = @transform_101, window_bounds = array<i64: 32, 64>}, {pipeline_mode = #tpu.pipeline_mode<synchronous>, transform_indices = @transform_102, window_bounds = array<i64: 64, 32>}, {pipeline_mode = #tpu.pipeline_mode<synchronous>, transform_indices = @transform_103, window_bounds = array<i64: 1, 32>}, {pipeline_mode = #tpu.pipeline_mode<synchronous>, transform_indices = @transform_104, window_bounds = array<i64: 1, 32>}, {pipeline_mode = #tpu.pipeline_mode<synchronous>, transform_indices = @transform_105, window_bounds = array<i64: 8, 32>}, {transform_indices = @transform_106, window_bounds = array<i64: 1, 8, 11>}, {transform_indices = @transform_107, window_bounds = array<i64: 1, 8, 4>}, {transform_indices = @transform_108, window_bounds = array<i64: 1, 8, 32>}, {transform_indices = @transform_109, window_bounds = array<i64: 1, 8, 32>}]} {
    %c0 = arith.constant 0 : index
    %c0_0 = arith.constant 0 : index
    %c0_1 = arith.constant 0 : index
    %0 = vector.load %arg1[%c0, %c0_0, %c0_1] : memref<1x16x32xf32, #tpu.memory_space<vmem>>, vector<1x16x32xf32>
    %1 = vector.shape_cast %0 : vector<1x16x32xf32> to vector<16x32xf32>
    %c0_2 = arith.constant 0 : index
    %c0_3 = arith.constant 0 : index
    %c0_4 = arith.constant 0 : index
    %2 = vector.load %arg2[%c0_2, %c0_3, %c0_4] : memref<1x16x32xf32, #tpu.memory_space<vmem>>, vector<1x16x32xf32>
    %3 = vector.shape_cast %2 : vector<1x16x32xf32> to vector<16x32xf32>
    %c0_5 = arith.constant 0 : index
    %c0_6 = arith.constant 0 : index
    %c0_7 = arith.constant 0 : index
    %4 = vector.load %arg3[%c0_5, %c0_6, %c0_7] : memref<1x1x16xf32, #tpu.memory_space<vmem>>, vector<1x1x16xf32>
    %5 = vector.shape_cast %4 : vector<1x1x16xf32> to vector<1x16xf32>
    %6 = arith.addf %1, %3 : vector<16x32xf32>
    %c0_8 = arith.constant 0 : index
    %c0_9 = arith.constant 0 : index
    %7 = vector.load %arg80[%c0_8, %c0_9] : memref<32x32xf32, #tpu.memory_space<vmem>>, vector<32x32xf32>
    %cst = arith.constant dense<0.000000e+00> : vector<16x32xf32>
    %8 = tpu.matmul %6, %7, %cst {dimension_numbers = #tpu.dot_dimension_numbers<[1], [0], [0], [1], [0, 0, 1, 1], [], []>} : vector<16x32xf32>, vector<32x32xf32>, vector<16x32xf32> -> vector<16x32xf32>
    %c0_10 = arith.constant 0 : index
    %c0_11 = arith.constant 0 : index
    %9 = vector.load %arg74[%c0_10, %c0_11] : memref<1x32xf32, #tpu.memory_space<vmem>>, vector<1x32xf32>
    %10 = vector.broadcast %9 : vector<1x32xf32> to vector<16x32xf32>
    %11 = arith.addf %8, %10 : vector<16x32xf32>
    %c0_12 = arith.constant 0 : index
    %c0_13 = arith.constant 0 : index
    %12 = vector.load %arg78[%c0_12, %c0_13] : memref<32x32xf32, #tpu.memory_space<vmem>>, vector<32x32xf32>
    %cst_14 = arith.constant dense<0.000000e+00> : vector<16x32xf32>
    %13 = tpu.matmul %6, %12, %cst_14 {dimension_numbers = #tpu.dot_dimension_numbers<[1], [0], [0], [1], [0, 0, 1, 1], [], []>} : vector<16x32xf32>, vector<32x32xf32>, vector<16x32xf32> -> vector<16x32xf32>
    %c0_15 = arith.constant 0 : index
    %c0_16 = arith.constant 0 : index
    %14 = vector.load %arg72[%c0_15, %c0_16] : memref<1x32xf32, #tpu.memory_space<vmem>>, vector<1x32xf32>
    %15 = vector.broadcast %14 : vector<1x32xf32> to vector<16x32xf32>
    %16 = arith.addf %13, %15 : vector<16x32xf32>
    %c0_17 = arith.constant 0 : index
    %c0_18 = arith.constant 0 : index
    %17 = vector.load %arg81[%c0_17, %c0_18] : memref<32x32xf32, #tpu.memory_space<vmem>>, vector<32x32xf32>
    %cst_19 = arith.constant dense<0.000000e+00> : vector<16x32xf32>
    %18 = tpu.matmul %1, %17, %cst_19 {dimension_numbers = #tpu.dot_dimension_numbers<[1], [0], [0], [1], [0, 0, 1, 1], [], []>} : vector<16x32xf32>, vector<32x32xf32>, vector<16x32xf32> -> vector<16x32xf32>
    %c0_20 = arith.constant 0 : index
    %c0_21 = arith.constant 0 : index
    %19 = vector.load %arg75[%c0_20, %c0_21] : memref<1x32xf32, #tpu.memory_space<vmem>>, vector<1x32xf32>
    %20 = vector.broadcast %19 : vector<1x32xf32> to vector<16x32xf32>
    %21 = arith.addf %18, %20 : vector<16x32xf32>
    %c0_22 = arith.constant 0 : index
    %c0_23 = arith.constant 0 : index
    %22 = vector.load %arg79[%c0_22, %c0_23] : memref<32x32xf32, #tpu.memory_space<vmem>>, vector<32x32xf32>
    %cst_24 = arith.constant 0.000000e+00 : f32
    %23 = vector.broadcast %cst_24 : f32 to vector<16x32xf32>
    %24 = vector.extract_strided_slice %11 {offsets = [0, 0], sizes = [16, 8], strides = [1, 1]} : vector<16x32xf32> to vector<16x8xf32>
    %25 = vector.extract_strided_slice %16 {offsets = [0, 0], sizes = [16, 8], strides = [1, 1]} : vector<16x32xf32> to vector<16x8xf32>
    %26 = vector.extract_strided_slice %21 {offsets = [0, 0], sizes = [16, 8], strides = [1, 1]} : vector<16x32xf32> to vector<16x8xf32>
    %cst_25 = arith.constant dense<0.000000e+00> : vector<16x16xf32>
    %27 = tpu.matmul %24, %25, %cst_25 {dimension_numbers = #tpu.dot_dimension_numbers<[1], [1], [0], [0], [0, 0, 1, 0], [], []>} : vector<16x8xf32>, vector<16x8xf32>, vector<16x16xf32> -> vector<16x16xf32>
    %cst_26 = arith.constant 0.353553385 : f32
    %28 = vector.broadcast %cst_26 : f32 to vector<16x16xf32>
    %29 = arith.mulf %27, %28 : vector<16x16xf32>
    %30 = vector.broadcast %5 : vector<1x16xf32> to vector<16x16xf32>
    %31 = arith.addf %29, %30 : vector<16x16xf32>
    %cst_27 = arith.constant dense<0xFF800000> : vector<16xf32>
    %32 = vector.multi_reduction <maximumf>, %31, %cst_27 [1] : vector<16x16xf32> to vector<16xf32>
    %33 = vector.shape_cast %32 : vector<16xf32> to vector<16x1xf32>
    %34 = vector.broadcast %33 : vector<16x1xf32> to vector<16x16xf32>
    %35 = arith.subf %31, %34 : vector<16x16xf32>
    %36 = math.exp %35 : vector<16x16xf32>
    %cst_28 = arith.constant dense<0.000000e+00> : vector<16xf32>
    %37 = vector.multi_reduction <add>, %36, %cst_28 [1] : vector<16x16xf32> to vector<16xf32>
    %38 = vector.shape_cast %37 : vector<16xf32> to vector<16x1xf32>
    %39 = tpu.reciprocal %38 {approx = true} : vector<16x1xf32> -> vector<16x1xf32>
    %40 = vector.broadcast %39 : vector<16x1xf32> to vector<16x16xf32>
    %41 = arith.mulf %36, %40 : vector<16x16xf32>
    %cst_29 = arith.constant dense<0.000000e+00> : vector<16x8xf32>
    %42 = tpu.matmul %41, %26, %cst_29 {dimension_numbers = #tpu.dot_dimension_numbers<[1], [0], [0], [1], [0, 0, 1, 1], [], []>} : vector<16x16xf32>, vector<16x8xf32>, vector<16x8xf32> -> vector<16x8xf32>
    %43 = vector.extract_strided_slice %22 {offsets = [0, 0], sizes = [8, 32], strides = [1, 1]} : vector<32x32xf32> to vector<8x32xf32>
    %cst_30 = arith.constant dense<0.000000e+00> : vector<16x32xf32>
    %44 = tpu.matmul %42, %43, %cst_30 {dimension_numbers = #tpu.dot_dimension_numbers<[1], [0], [0], [1], [0, 0, 1, 1], [], []>} : vector<16x8xf32>, vector<8x32xf32>, vector<16x32xf32> -> vector<16x32xf32>
    %45 = arith.addf %23, %44 : vector<16x32xf32>
    %46 = vector.extract_strided_slice %11 {offsets = [0, 8], sizes = [16, 8], strides = [1, 1]} : vector<16x32xf32> to vector<16x8xf32>
    %47 = vector.extract_strided_slice %16 {offsets = [0, 8], sizes = [16, 8], strides = [1, 1]} : vector<16x32xf32> to vector<16x8xf32>
    %48 = vector.extract_strided_slice %21 {offsets = [0, 8], sizes = [16, 8], strides = [1, 1]} : vector<16x32xf32> to vector<16x8xf32>
    %cst_31 = arith.constant dense<0.000000e+00> : vector<16x16xf32>
    %49 = tpu.matmul %46, %47, %cst_31 {dimension_numbers = #tpu.dot_dimension_numbers<[1], [1], [0], [0], [0, 0, 1, 0], [], []>} : vector<16x8xf32>, vector<16x8xf32>, vector<16x16xf32> -> vector<16x16xf32>
    %cst_32 = arith.constant 0.353553385 : f32
    %50 = vector.broadcast %cst_32 : f32 to vector<16x16xf32>
    %51 = arith.mulf %49, %50 : vector<16x16xf32>
    %52 = vector.broadcast %5 : vector<1x16xf32> to vector<16x16xf32>
    %53 = arith.addf %51, %52 : vector<16x16xf32>
    %cst_33 = arith.constant dense<0xFF800000> : vector<16xf32>
    %54 = vector.multi_reduction <maximumf>, %53, %cst_33 [1] : vector<16x16xf32> to vector<16xf32>
    %55 = vector.shape_cast %54 : vector<16xf32> to vector<16x1xf32>
    %56 = vector.broadcast %55 : vector<16x1xf32> to vector<16x16xf32>
    %57 = arith.subf %53, %56 : vector<16x16xf32>
    %58 = math.exp %57 : vector<16x16xf32>
    %cst_34 = arith.constant dense<0.000000e+00> : vector<16xf32>
    %59 = vector.multi_reduction <add>, %58, %cst_34 [1] : vector<16x16xf32> to vector<16xf32>
    %60 = vector.shape_cast %59 : vector<16xf32> to vector<16x1xf32>
    %61 = tpu.reciprocal %60 {approx = true} : vector<16x1xf32> -> vector<16x1xf32>
    %62 = vector.broadcast %61 : vector<16x1xf32> to vector<16x16xf32>
    %63 = arith.mulf %58, %62 : vector<16x16xf32>
    %cst_35 = arith.constant dense<0.000000e+00> : vector<16x8xf32>
    %64 = tpu.matmul %63, %48, %cst_35 {dimension_numbers = #tpu.dot_dimension_numbers<[1], [0], [0], [1], [0, 0, 1, 1], [], []>} : vector<16x16xf32>, vector<16x8xf32>, vector<16x8xf32> -> vector<16x8xf32>
    %65 = vector.extract_strided_slice %22 {offsets = [8, 0], sizes = [8, 32], strides = [1, 1]} : vector<32x32xf32> to vector<8x32xf32>
    %cst_36 = arith.constant dense<0.000000e+00> : vector<16x32xf32>
    %66 = tpu.matmul %64, %65, %cst_36 {dimension_numbers = #tpu.dot_dimension_numbers<[1], [0], [0], [1], [0, 0, 1, 1], [], []>} : vector<16x8xf32>, vector<8x32xf32>, vector<16x32xf32> -> vector<16x32xf32>
    %67 = arith.addf %45, %66 : vector<16x32xf32>
    %68 = vector.extract_strided_slice %11 {offsets = [0, 16], sizes = [16, 8], strides = [1, 1]} : vector<16x32xf32> to vector<16x8xf32>
    %69 = vector.extract_strided_slice %16 {offsets = [0, 16], sizes = [16, 8], strides = [1, 1]} : vector<16x32xf32> to vector<16x8xf32>
    %70 = vector.extract_strided_slice %21 {offsets = [0, 16], sizes = [16, 8], strides = [1, 1]} : vector<16x32xf32> to vector<16x8xf32>
    %cst_37 = arith.constant dense<0.000000e+00> : vector<16x16xf32>
    %71 = tpu.matmul %68, %69, %cst_37 {dimension_numbers = #tpu.dot_dimension_numbers<[1], [1], [0], [0], [0, 0, 1, 0], [], []>} : vector<16x8xf32>, vector<16x8xf32>, vector<16x16xf32> -> vector<16x16xf32>
    %cst_38 = arith.constant 0.353553385 : f32
    %72 = vector.broadcast %cst_38 : f32 to vector<16x16xf32>
    %73 = arith.mulf %71, %72 : vector<16x16xf32>
    %74 = vector.broadcast %5 : vector<1x16xf32> to vector<16x16xf32>
    %75 = arith.addf %73, %74 : vector<16x16xf32>
    %cst_39 = arith.constant dense<0xFF800000> : vector<16xf32>
    %76 = vector.multi_reduction <maximumf>, %75, %cst_39 [1] : vector<16x16xf32> to vector<16xf32>
    %77 = vector.shape_cast %76 : vector<16xf32> to vector<16x1xf32>
    %78 = vector.broadcast %77 : vector<16x1xf32> to vector<16x16xf32>
    %79 = arith.subf %75, %78 : vector<16x16xf32>
    %80 = math.exp %79 : vector<16x16xf32>
    %cst_40 = arith.constant dense<0.000000e+00> : vector<16xf32>
    %81 = vector.multi_reduction <add>, %80, %cst_40 [1] : vector<16x16xf32> to vector<16xf32>
    %82 = vector.shape_cast %81 : vector<16xf32> to vector<16x1xf32>
    %83 = tpu.reciprocal %82 {approx = true} : vector<16x1xf32> -> vector<16x1xf32>
    %84 = vector.broadcast %83 : vector<16x1xf32> to vector<16x16xf32>
    %85 = arith.mulf %80, %84 : vector<16x16xf32>
    %cst_41 = arith.constant dense<0.000000e+00> : vector<16x8xf32>
    %86 = tpu.matmul %85, %70, %cst_41 {dimension_numbers = #tpu.dot_dimension_numbers<[1], [0], [0], [1], [0, 0, 1, 1], [], []>} : vector<16x16xf32>, vector<16x8xf32>, vector<16x8xf32> -> vector<16x8xf32>
    %87 = vector.extract_strided_slice %22 {offsets = [16, 0], sizes = [8, 32], strides = [1, 1]} : vector<32x32xf32> to vector<8x32xf32>
    %cst_42 = arith.constant dense<0.000000e+00> : vector<16x32xf32>
    %88 = tpu.matmul %86, %87, %cst_42 {dimension_numbers = #tpu.dot_dimension_numbers<[1], [0], [0], [1], [0, 0, 1, 1], [], []>} : vector<16x8xf32>, vector<8x32xf32>, vector<16x32xf32> -> vector<16x32xf32>
    %89 = arith.addf %67, %88 : vector<16x32xf32>
    %90 = vector.extract_strided_slice %11 {offsets = [0, 24], sizes = [16, 8], strides = [1, 1]} : vector<16x32xf32> to vector<16x8xf32>
    %91 = vector.extract_strided_slice %16 {offsets = [0, 24], sizes = [16, 8], strides = [1, 1]} : vector<16x32xf32> to vector<16x8xf32>
    %92 = vector.extract_strided_slice %21 {offsets = [0, 24], sizes = [16, 8], strides = [1, 1]} : vector<16x32xf32> to vector<16x8xf32>
    %cst_43 = arith.constant dense<0.000000e+00> : vector<16x16xf32>
    %93 = tpu.matmul %90, %91, %cst_43 {dimension_numbers = #tpu.dot_dimension_numbers<[1], [1], [0], [0], [0, 0, 1, 0], [], []>} : vector<16x8xf32>, vector<16x8xf32>, vector<16x16xf32> -> vector<16x16xf32>
    %cst_44 = arith.constant 0.353553385 : f32
    %94 = vector.broadcast %cst_44 : f32 to vector<16x16xf32>
    %95 = arith.mulf %93, %94 : vector<16x16xf32>
    %96 = vector.broadcast %5 : vector<1x16xf32> to vector<16x16xf32>
    %97 = arith.addf %95, %96 : vector<16x16xf32>
    %cst_45 = arith.constant dense<0xFF800000> : vector<16xf32>
    %98 = vector.multi_reduction <maximumf>, %97, %cst_45 [1] : vector<16x16xf32> to vector<16xf32>
    %99 = vector.shape_cast %98 : vector<16xf32> to vector<16x1xf32>
    %100 = vector.broadcast %99 : vector<16x1xf32> to vector<16x16xf32>
    %101 = arith.subf %97, %100 : vector<16x16xf32>
    %102 = math.exp %101 : vector<16x16xf32>
    %cst_46 = arith.constant dense<0.000000e+00> : vector<16xf32>
    %103 = vector.multi_reduction <add>, %102, %cst_46 [1] : vector<16x16xf32> to vector<16xf32>
    %104 = vector.shape_cast %103 : vector<16xf32> to vector<16x1xf32>
    %105 = tpu.reciprocal %104 {approx = true} : vector<16x1xf32> -> vector<16x1xf32>
    %106 = vector.broadcast %105 : vector<16x1xf32> to vector<16x16xf32>
    %107 = arith.mulf %102, %106 : vector<16x16xf32>
    %cst_47 = arith.constant dense<0.000000e+00> : vector<16x8xf32>
    %108 = tpu.matmul %107, %92, %cst_47 {dimension_numbers = #tpu.dot_dimension_numbers<[1], [0], [0], [1], [0, 0, 1, 1], [], []>} : vector<16x16xf32>, vector<16x8xf32>, vector<16x8xf32> -> vector<16x8xf32>
    %109 = vector.extract_strided_slice %22 {offsets = [24, 0], sizes = [8, 32], strides = [1, 1]} : vector<32x32xf32> to vector<8x32xf32>
    %cst_48 = arith.constant dense<0.000000e+00> : vector<16x32xf32>
    %110 = tpu.matmul %108, %109, %cst_48 {dimension_numbers = #tpu.dot_dimension_numbers<[1], [0], [0], [1], [0, 0, 1, 1], [], []>} : vector<16x8xf32>, vector<8x32xf32>, vector<16x32xf32> -> vector<16x32xf32>
    %111 = arith.addf %89, %110 : vector<16x32xf32>
    %c0_49 = arith.constant 0 : index
    %c0_50 = arith.constant 0 : index
    %112 = vector.load %arg73[%c0_49, %c0_50] : memref<1x32xf32, #tpu.memory_space<vmem>>, vector<1x32xf32>
    %113 = vector.broadcast %112 : vector<1x32xf32> to vector<16x32xf32>
    %114 = arith.addf %111, %113 : vector<16x32xf32>
    %115 = arith.addf %6, %114 : vector<16x32xf32>
    %cst_51 = arith.constant dense<0.000000e+00> : vector<16xf32>
    %116 = vector.multi_reduction <add>, %115, %cst_51 [1] : vector<16x32xf32> to vector<16xf32>
    %117 = vector.shape_cast %116 : vector<16xf32> to vector<16x1xf32>
    %cst_52 = arith.constant 3.200000e+01 : f32
    %118 = vector.broadcast %cst_52 : f32 to vector<16x1xf32>
    %119 = arith.divf %117, %118 : vector<16x1xf32>
    %120 = vector.broadcast %119 : vector<16x1xf32> to vector<16x32xf32>
    %121 = arith.subf %115, %120 : vector<16x32xf32>
    %122 = arith.mulf %121, %121 : vector<16x32xf32>
    %cst_53 = arith.constant dense<0.000000e+00> : vector<16xf32>
    %123 = vector.multi_reduction <add>, %122, %cst_53 [1] : vector<16x32xf32> to vector<16xf32>
    %124 = vector.shape_cast %123 : vector<16xf32> to vector<16x1xf32>
    %cst_54 = arith.constant 3.200000e+01 : f32
    %125 = vector.broadcast %cst_54 : f32 to vector<16x1xf32>
    %126 = arith.divf %124, %125 : vector<16x1xf32>
    %127 = vector.broadcast %119 : vector<16x1xf32> to vector<16x32xf32>
    %128 = arith.subf %115, %127 : vector<16x32xf32>
    %cst_55 = arith.constant 9.99999974E-6 : f32
    %129 = vector.broadcast %cst_55 : f32 to vector<16x1xf32>
    %130 = arith.addf %126, %129 : vector<16x1xf32>
    %131 = math.rsqrt %130 : vector<16x1xf32>
    %132 = vector.broadcast %131 : vector<16x1xf32> to vector<16x32xf32>
    %133 = arith.mulf %128, %132 : vector<16x32xf32>
    %c0_56 = arith.constant 0 : index
    %c0_57 = arith.constant 0 : index
    %134 = vector.load %arg77[%c0_56, %c0_57] : memref<1x32xf32, #tpu.memory_space<vmem>>, vector<1x32xf32>
    %135 = vector.broadcast %134 : vector<1x32xf32> to vector<16x32xf32>
    %136 = arith.mulf %133, %135 : vector<16x32xf32>
    %c0_58 = arith.constant 0 : index
    %c0_59 = arith.constant 0 : index
    %137 = vector.load %arg76[%c0_58, %c0_59] : memref<1x32xf32, #tpu.memory_space<vmem>>, vector<1x32xf32>
    %138 = vector.broadcast %137 : vector<1x32xf32> to vector<16x32xf32>
    %139 = arith.addf %136, %138 : vector<16x32xf32>
    %c0_60 = arith.constant 0 : index
    %c0_61 = arith.constant 0 : index
    %140 = vector.load %arg86[%c0_60, %c0_61] : memref<32x64xf32, #tpu.memory_space<vmem>>, vector<32x64xf32>
    %cst_62 = arith.constant dense<0.000000e+00> : vector<16x64xf32>
    %141 = tpu.matmul %139, %140, %cst_62 {dimension_numbers = #tpu.dot_dimension_numbers<[1], [0], [0], [1], [0, 0, 1, 1], [], []>} : vector<16x32xf32>, vector<32x64xf32>, vector<16x64xf32> -> vector<16x64xf32>
    %c0_63 = arith.constant 0 : index
    %c0_64 = arith.constant 0 : index
    %142 = vector.load %arg82[%c0_63, %c0_64] : memref<1x64xf32, #tpu.memory_space<vmem>>, vector<1x64xf32>
    %143 = vector.broadcast %142 : vector<1x64xf32> to vector<16x64xf32>
    %144 = arith.addf %141, %143 : vector<16x64xf32>
    %cst_65 = arith.constant 0.000000e+00 : f32
    %145 = vector.broadcast %cst_65 : f32 to vector<16x64xf32>
    %146 = arith.maximumf %144, %145 : vector<16x64xf32>
    %c0_66 = arith.constant 0 : index
    %c0_67 = arith.constant 0 : index
    %147 = vector.load %arg87[%c0_66, %c0_67] : memref<64x32xf32, #tpu.memory_space<vmem>>, vector<64x32xf32>
    %cst_68 = arith.constant dense<0.000000e+00> : vector<16x32xf32>
    %148 = tpu.matmul %146, %147, %cst_68 {dimension_numbers = #tpu.dot_dimension_numbers<[1], [0], [0], [1], [0, 0, 1, 1], [], []>} : vector<16x64xf32>, vector<64x32xf32>, vector<16x32xf32> -> vector<16x32xf32>
    %c0_69 = arith.constant 0 : index
    %c0_70 = arith.constant 0 : index
    %149 = vector.load %arg83[%c0_69, %c0_70] : memref<1x32xf32, #tpu.memory_space<vmem>>, vector<1x32xf32>
    %150 = vector.broadcast %149 : vector<1x32xf32> to vector<16x32xf32>
    %151 = arith.addf %148, %150 : vector<16x32xf32>
    %152 = arith.addf %139, %151 : vector<16x32xf32>
    %cst_71 = arith.constant dense<0.000000e+00> : vector<16xf32>
    %153 = vector.multi_reduction <add>, %152, %cst_71 [1] : vector<16x32xf32> to vector<16xf32>
    %154 = vector.shape_cast %153 : vector<16xf32> to vector<16x1xf32>
    %cst_72 = arith.constant 3.200000e+01 : f32
    %155 = vector.broadcast %cst_72 : f32 to vector<16x1xf32>
    %156 = arith.divf %154, %155 : vector<16x1xf32>
    %157 = vector.broadcast %156 : vector<16x1xf32> to vector<16x32xf32>
    %158 = arith.subf %152, %157 : vector<16x32xf32>
    %159 = arith.mulf %158, %158 : vector<16x32xf32>
    %cst_73 = arith.constant dense<0.000000e+00> : vector<16xf32>
    %160 = vector.multi_reduction <add>, %159, %cst_73 [1] : vector<16x32xf32> to vector<16xf32>
    %161 = vector.shape_cast %160 : vector<16xf32> to vector<16x1xf32>
    %cst_74 = arith.constant 3.200000e+01 : f32
    %162 = vector.broadcast %cst_74 : f32 to vector<16x1xf32>
    %163 = arith.divf %161, %162 : vector<16x1xf32>
    %164 = vector.broadcast %156 : vector<16x1xf32> to vector<16x32xf32>
    %165 = arith.subf %152, %164 : vector<16x32xf32>
    %cst_75 = arith.constant 9.99999974E-6 : f32
    %166 = vector.broadcast %cst_75 : f32 to vector<16x1xf32>
    %167 = arith.addf %163, %166 : vector<16x1xf32>
    %168 = math.rsqrt %167 : vector<16x1xf32>
    %169 = vector.broadcast %168 : vector<16x1xf32> to vector<16x32xf32>
    %170 = arith.mulf %165, %169 : vector<16x32xf32>
    %c0_76 = arith.constant 0 : index
    %c0_77 = arith.constant 0 : index
    %171 = vector.load %arg85[%c0_76, %c0_77] : memref<1x32xf32, #tpu.memory_space<vmem>>, vector<1x32xf32>
    %172 = vector.broadcast %171 : vector<1x32xf32> to vector<16x32xf32>
    %173 = arith.mulf %170, %172 : vector<16x32xf32>
    %c0_78 = arith.constant 0 : index
    %c0_79 = arith.constant 0 : index
    %174 = vector.load %arg84[%c0_78, %c0_79] : memref<1x32xf32, #tpu.memory_space<vmem>>, vector<1x32xf32>
    %175 = vector.broadcast %174 : vector<1x32xf32> to vector<16x32xf32>
    %176 = arith.addf %173, %175 : vector<16x32xf32>
    %177 = arith.addf %176, %3 : vector<16x32xf32>
    %c0_80 = arith.constant 0 : index
    %c0_81 = arith.constant 0 : index
    %178 = vector.load %arg96[%c0_80, %c0_81] : memref<32x32xf32, #tpu.memory_space<vmem>>, vector<32x32xf32>
    %cst_82 = arith.constant dense<0.000000e+00> : vector<16x32xf32>
    %179 = tpu.matmul %177, %178, %cst_82 {dimension_numbers = #tpu.dot_dimension_numbers<[1], [0], [0], [1], [0, 0, 1, 1], [], []>} : vector<16x32xf32>, vector<32x32xf32>, vector<16x32xf32> -> vector<16x32xf32>
    %c0_83 = arith.constant 0 : index
    %c0_84 = arith.constant 0 : index
    %180 = vector.load %arg90[%c0_83, %c0_84] : memref<1x32xf32, #tpu.memory_space<vmem>>, vector<1x32xf32>
    %181 = vector.broadcast %180 : vector<1x32xf32> to vector<16x32xf32>
    %182 = arith.addf %179, %181 : vector<16x32xf32>
    %c0_85 = arith.constant 0 : index
    %c0_86 = arith.constant 0 : index
    %183 = vector.load %arg94[%c0_85, %c0_86] : memref<32x32xf32, #tpu.memory_space<vmem>>, vector<32x32xf32>
    %cst_87 = arith.constant dense<0.000000e+00> : vector<16x32xf32>
    %184 = tpu.matmul %177, %183, %cst_87 {dimension_numbers = #tpu.dot_dimension_numbers<[1], [0], [0], [1], [0, 0, 1, 1], [], []>} : vector<16x32xf32>, vector<32x32xf32>, vector<16x32xf32> -> vector<16x32xf32>
    %c0_88 = arith.constant 0 : index
    %c0_89 = arith.constant 0 : index
    %185 = vector.load %arg88[%c0_88, %c0_89] : memref<1x32xf32, #tpu.memory_space<vmem>>, vector<1x32xf32>
    %186 = vector.broadcast %185 : vector<1x32xf32> to vector<16x32xf32>
    %187 = arith.addf %184, %186 : vector<16x32xf32>
    %c0_90 = arith.constant 0 : index
    %c0_91 = arith.constant 0 : index
    %188 = vector.load %arg97[%c0_90, %c0_91] : memref<32x32xf32, #tpu.memory_space<vmem>>, vector<32x32xf32>
    %cst_92 = arith.constant dense<0.000000e+00> : vector<16x32xf32>
    %189 = tpu.matmul %176, %188, %cst_92 {dimension_numbers = #tpu.dot_dimension_numbers<[1], [0], [0], [1], [0, 0, 1, 1], [], []>} : vector<16x32xf32>, vector<32x32xf32>, vector<16x32xf32> -> vector<16x32xf32>
    %c0_93 = arith.constant 0 : index
    %c0_94 = arith.constant 0 : index
    %190 = vector.load %arg91[%c0_93, %c0_94] : memref<1x32xf32, #tpu.memory_space<vmem>>, vector<1x32xf32>
    %191 = vector.broadcast %190 : vector<1x32xf32> to vector<16x32xf32>
    %192 = arith.addf %189, %191 : vector<16x32xf32>
    %c0_95 = arith.constant 0 : index
    %c0_96 = arith.constant 0 : index
    %193 = vector.load %arg95[%c0_95, %c0_96] : memref<32x32xf32, #tpu.memory_space<vmem>>, vector<32x32xf32>
    %cst_97 = arith.constant 0.000000e+00 : f32
    %194 = vector.broadcast %cst_97 : f32 to vector<16x32xf32>
    %195 = vector.extract_strided_slice %182 {offsets = [0, 0], sizes = [16, 8], strides = [1, 1]} : vector<16x32xf32> to vector<16x8xf32>
    %196 = vector.extract_strided_slice %187 {offsets = [0, 0], sizes = [16, 8], strides = [1, 1]} : vector<16x32xf32> to vector<16x8xf32>
    %197 = vector.extract_strided_slice %192 {offsets = [0, 0], sizes = [16, 8], strides = [1, 1]} : vector<16x32xf32> to vector<16x8xf32>
    %cst_98 = arith.constant dense<0.000000e+00> : vector<16x16xf32>
    %198 = tpu.matmul %195, %196, %cst_98 {dimension_numbers = #tpu.dot_dimension_numbers<[1], [1], [0], [0], [0, 0, 1, 0], [], []>} : vector<16x8xf32>, vector<16x8xf32>, vector<16x16xf32> -> vector<16x16xf32>
    %cst_99 = arith.constant 0.353553385 : f32
    %199 = vector.broadcast %cst_99 : f32 to vector<16x16xf32>
    %200 = arith.mulf %198, %199 : vector<16x16xf32>
    %201 = vector.broadcast %5 : vector<1x16xf32> to vector<16x16xf32>
    %202 = arith.addf %200, %201 : vector<16x16xf32>
    %cst_100 = arith.constant dense<0xFF800000> : vector<16xf32>
    %203 = vector.multi_reduction <maximumf>, %202, %cst_100 [1] : vector<16x16xf32> to vector<16xf32>
    %204 = vector.shape_cast %203 : vector<16xf32> to vector<16x1xf32>
    %205 = vector.broadcast %204 : vector<16x1xf32> to vector<16x16xf32>
    %206 = arith.subf %202, %205 : vector<16x16xf32>
    %207 = math.exp %206 : vector<16x16xf32>
    %cst_101 = arith.constant dense<0.000000e+00> : vector<16xf32>
    %208 = vector.multi_reduction <add>, %207, %cst_101 [1] : vector<16x16xf32> to vector<16xf32>
    %209 = vector.shape_cast %208 : vector<16xf32> to vector<16x1xf32>
    %210 = tpu.reciprocal %209 {approx = true} : vector<16x1xf32> -> vector<16x1xf32>
    %211 = vector.broadcast %210 : vector<16x1xf32> to vector<16x16xf32>
    %212 = arith.mulf %207, %211 : vector<16x16xf32>
    %cst_102 = arith.constant dense<0.000000e+00> : vector<16x8xf32>
    %213 = tpu.matmul %212, %197, %cst_102 {dimension_numbers = #tpu.dot_dimension_numbers<[1], [0], [0], [1], [0, 0, 1, 1], [], []>} : vector<16x16xf32>, vector<16x8xf32>, vector<16x8xf32> -> vector<16x8xf32>
    %214 = vector.extract_strided_slice %193 {offsets = [0, 0], sizes = [8, 32], strides = [1, 1]} : vector<32x32xf32> to vector<8x32xf32>
    %cst_103 = arith.constant dense<0.000000e+00> : vector<16x32xf32>
    %215 = tpu.matmul %213, %214, %cst_103 {dimension_numbers = #tpu.dot_dimension_numbers<[1], [0], [0], [1], [0, 0, 1, 1], [], []>} : vector<16x8xf32>, vector<8x32xf32>, vector<16x32xf32> -> vector<16x32xf32>
    %216 = arith.addf %194, %215 : vector<16x32xf32>
    %217 = vector.extract_strided_slice %182 {offsets = [0, 8], sizes = [16, 8], strides = [1, 1]} : vector<16x32xf32> to vector<16x8xf32>
    %218 = vector.extract_strided_slice %187 {offsets = [0, 8], sizes = [16, 8], strides = [1, 1]} : vector<16x32xf32> to vector<16x8xf32>
    %219 = vector.extract_strided_slice %192 {offsets = [0, 8], sizes = [16, 8], strides = [1, 1]} : vector<16x32xf32> to vector<16x8xf32>
    %cst_104 = arith.constant dense<0.000000e+00> : vector<16x16xf32>
    %220 = tpu.matmul %217, %218, %cst_104 {dimension_numbers = #tpu.dot_dimension_numbers<[1], [1], [0], [0], [0, 0, 1, 0], [], []>} : vector<16x8xf32>, vector<16x8xf32>, vector<16x16xf32> -> vector<16x16xf32>
    %cst_105 = arith.constant 0.353553385 : f32
    %221 = vector.broadcast %cst_105 : f32 to vector<16x16xf32>
    %222 = arith.mulf %220, %221 : vector<16x16xf32>
    %223 = vector.broadcast %5 : vector<1x16xf32> to vector<16x16xf32>
    %224 = arith.addf %222, %223 : vector<16x16xf32>
    %cst_106 = arith.constant dense<0xFF800000> : vector<16xf32>
    %225 = vector.multi_reduction <maximumf>, %224, %cst_106 [1] : vector<16x16xf32> to vector<16xf32>
    %226 = vector.shape_cast %225 : vector<16xf32> to vector<16x1xf32>
    %227 = vector.broadcast %226 : vector<16x1xf32> to vector<16x16xf32>
    %228 = arith.subf %224, %227 : vector<16x16xf32>
    %229 = math.exp %228 : vector<16x16xf32>
    %cst_107 = arith.constant dense<0.000000e+00> : vector<16xf32>
    %230 = vector.multi_reduction <add>, %229, %cst_107 [1] : vector<16x16xf32> to vector<16xf32>
    %231 = vector.shape_cast %230 : vector<16xf32> to vector<16x1xf32>
    %232 = tpu.reciprocal %231 {approx = true} : vector<16x1xf32> -> vector<16x1xf32>
    %233 = vector.broadcast %232 : vector<16x1xf32> to vector<16x16xf32>
    %234 = arith.mulf %229, %233 : vector<16x16xf32>
    %cst_108 = arith.constant dense<0.000000e+00> : vector<16x8xf32>
    %235 = tpu.matmul %234, %219, %cst_108 {dimension_numbers = #tpu.dot_dimension_numbers<[1], [0], [0], [1], [0, 0, 1, 1], [], []>} : vector<16x16xf32>, vector<16x8xf32>, vector<16x8xf32> -> vector<16x8xf32>
    %236 = vector.extract_strided_slice %193 {offsets = [8, 0], sizes = [8, 32], strides = [1, 1]} : vector<32x32xf32> to vector<8x32xf32>
    %cst_109 = arith.constant dense<0.000000e+00> : vector<16x32xf32>
    %237 = tpu.matmul %235, %236, %cst_109 {dimension_numbers = #tpu.dot_dimension_numbers<[1], [0], [0], [1], [0, 0, 1, 1], [], []>} : vector<16x8xf32>, vector<8x32xf32>, vector<16x32xf32> -> vector<16x32xf32>
    %238 = arith.addf %216, %237 : vector<16x32xf32>
    %239 = vector.extract_strided_slice %182 {offsets = [0, 16], sizes = [16, 8], strides = [1, 1]} : vector<16x32xf32> to vector<16x8xf32>
    %240 = vector.extract_strided_slice %187 {offsets = [0, 16], sizes = [16, 8], strides = [1, 1]} : vector<16x32xf32> to vector<16x8xf32>
    %241 = vector.extract_strided_slice %192 {offsets = [0, 16], sizes = [16, 8], strides = [1, 1]} : vector<16x32xf32> to vector<16x8xf32>
    %cst_110 = arith.constant dense<0.000000e+00> : vector<16x16xf32>
    %242 = tpu.matmul %239, %240, %cst_110 {dimension_numbers = #tpu.dot_dimension_numbers<[1], [1], [0], [0], [0, 0, 1, 0], [], []>} : vector<16x8xf32>, vector<16x8xf32>, vector<16x16xf32> -> vector<16x16xf32>
    %cst_111 = arith.constant 0.353553385 : f32
    %243 = vector.broadcast %cst_111 : f32 to vector<16x16xf32>
    %244 = arith.mulf %242, %243 : vector<16x16xf32>
    %245 = vector.broadcast %5 : vector<1x16xf32> to vector<16x16xf32>
    %246 = arith.addf %244, %245 : vector<16x16xf32>
    %cst_112 = arith.constant dense<0xFF800000> : vector<16xf32>
    %247 = vector.multi_reduction <maximumf>, %246, %cst_112 [1] : vector<16x16xf32> to vector<16xf32>
    %248 = vector.shape_cast %247 : vector<16xf32> to vector<16x1xf32>
    %249 = vector.broadcast %248 : vector<16x1xf32> to vector<16x16xf32>
    %250 = arith.subf %246, %249 : vector<16x16xf32>
    %251 = math.exp %250 : vector<16x16xf32>
    %cst_113 = arith.constant dense<0.000000e+00> : vector<16xf32>
    %252 = vector.multi_reduction <add>, %251, %cst_113 [1] : vector<16x16xf32> to vector<16xf32>
    %253 = vector.shape_cast %252 : vector<16xf32> to vector<16x1xf32>
    %254 = tpu.reciprocal %253 {approx = true} : vector<16x1xf32> -> vector<16x1xf32>
    %255 = vector.broadcast %254 : vector<16x1xf32> to vector<16x16xf32>
    %256 = arith.mulf %251, %255 : vector<16x16xf32>
    %cst_114 = arith.constant dense<0.000000e+00> : vector<16x8xf32>
    %257 = tpu.matmul %256, %241, %cst_114 {dimension_numbers = #tpu.dot_dimension_numbers<[1], [0], [0], [1], [0, 0, 1, 1], [], []>} : vector<16x16xf32>, vector<16x8xf32>, vector<16x8xf32> -> vector<16x8xf32>
    %258 = vector.extract_strided_slice %193 {offsets = [16, 0], sizes = [8, 32], strides = [1, 1]} : vector<32x32xf32> to vector<8x32xf32>
    %cst_115 = arith.constant dense<0.000000e+00> : vector<16x32xf32>
    %259 = tpu.matmul %257, %258, %cst_115 {dimension_numbers = #tpu.dot_dimension_numbers<[1], [0], [0], [1], [0, 0, 1, 1], [], []>} : vector<16x8xf32>, vector<8x32xf32>, vector<16x32xf32> -> vector<16x32xf32>
    %260 = arith.addf %238, %259 : vector<16x32xf32>
    %261 = vector.extract_strided_slice %182 {offsets = [0, 24], sizes = [16, 8], strides = [1, 1]} : vector<16x32xf32> to vector<16x8xf32>
    %262 = vector.extract_strided_slice %187 {offsets = [0, 24], sizes = [16, 8], strides = [1, 1]} : vector<16x32xf32> to vector<16x8xf32>
    %263 = vector.extract_strided_slice %192 {offsets = [0, 24], sizes = [16, 8], strides = [1, 1]} : vector<16x32xf32> to vector<16x8xf32>
    %cst_116 = arith.constant dense<0.000000e+00> : vector<16x16xf32>
    %264 = tpu.matmul %261, %262, %cst_116 {dimension_numbers = #tpu.dot_dimension_numbers<[1], [1], [0], [0], [0, 0, 1, 0], [], []>} : vector<16x8xf32>, vector<16x8xf32>, vector<16x16xf32> -> vector<16x16xf32>
    %cst_117 = arith.constant 0.353553385 : f32
    %265 = vector.broadcast %cst_117 : f32 to vector<16x16xf32>
    %266 = arith.mulf %264, %265 : vector<16x16xf32>
    %267 = vector.broadcast %5 : vector<1x16xf32> to vector<16x16xf32>
    %268 = arith.addf %266, %267 : vector<16x16xf32>
    %cst_118 = arith.constant dense<0xFF800000> : vector<16xf32>
    %269 = vector.multi_reduction <maximumf>, %268, %cst_118 [1] : vector<16x16xf32> to vector<16xf32>
    %270 = vector.shape_cast %269 : vector<16xf32> to vector<16x1xf32>
    %271 = vector.broadcast %270 : vector<16x1xf32> to vector<16x16xf32>
    %272 = arith.subf %268, %271 : vector<16x16xf32>
    %273 = math.exp %272 : vector<16x16xf32>
    %cst_119 = arith.constant dense<0.000000e+00> : vector<16xf32>
    %274 = vector.multi_reduction <add>, %273, %cst_119 [1] : vector<16x16xf32> to vector<16xf32>
    %275 = vector.shape_cast %274 : vector<16xf32> to vector<16x1xf32>
    %276 = tpu.reciprocal %275 {approx = true} : vector<16x1xf32> -> vector<16x1xf32>
    %277 = vector.broadcast %276 : vector<16x1xf32> to vector<16x16xf32>
    %278 = arith.mulf %273, %277 : vector<16x16xf32>
    %cst_120 = arith.constant dense<0.000000e+00> : vector<16x8xf32>
    %279 = tpu.matmul %278, %263, %cst_120 {dimension_numbers = #tpu.dot_dimension_numbers<[1], [0], [0], [1], [0, 0, 1, 1], [], []>} : vector<16x16xf32>, vector<16x8xf32>, vector<16x8xf32> -> vector<16x8xf32>
    %280 = vector.extract_strided_slice %193 {offsets = [24, 0], sizes = [8, 32], strides = [1, 1]} : vector<32x32xf32> to vector<8x32xf32>
    %cst_121 = arith.constant dense<0.000000e+00> : vector<16x32xf32>
    %281 = tpu.matmul %279, %280, %cst_121 {dimension_numbers = #tpu.dot_dimension_numbers<[1], [0], [0], [1], [0, 0, 1, 1], [], []>} : vector<16x8xf32>, vector<8x32xf32>, vector<16x32xf32> -> vector<16x32xf32>
    %282 = arith.addf %260, %281 : vector<16x32xf32>
    %c0_122 = arith.constant 0 : index
    %c0_123 = arith.constant 0 : index
    %283 = vector.load %arg89[%c0_122, %c0_123] : memref<1x32xf32, #tpu.memory_space<vmem>>, vector<1x32xf32>
    %284 = vector.broadcast %283 : vector<1x32xf32> to vector<16x32xf32>
    %285 = arith.addf %282, %284 : vector<16x32xf32>
    %286 = arith.addf %177, %285 : vector<16x32xf32>
    %cst_124 = arith.constant dense<0.000000e+00> : vector<16xf32>
    %287 = vector.multi_reduction <add>, %286, %cst_124 [1] : vector<16x32xf32> to vector<16xf32>
    %288 = vector.shape_cast %287 : vector<16xf32> to vector<16x1xf32>
    %cst_125 = arith.constant 3.200000e+01 : f32
    %289 = vector.broadcast %cst_125 : f32 to vector<16x1xf32>
    %290 = arith.divf %288, %289 : vector<16x1xf32>
    %291 = vector.broadcast %290 : vector<16x1xf32> to vector<16x32xf32>
    %292 = arith.subf %286, %291 : vector<16x32xf32>
    %293 = arith.mulf %292, %292 : vector<16x32xf32>
    %cst_126 = arith.constant dense<0.000000e+00> : vector<16xf32>
    %294 = vector.multi_reduction <add>, %293, %cst_126 [1] : vector<16x32xf32> to vector<16xf32>
    %295 = vector.shape_cast %294 : vector<16xf32> to vector<16x1xf32>
    %cst_127 = arith.constant 3.200000e+01 : f32
    %296 = vector.broadcast %cst_127 : f32 to vector<16x1xf32>
    %297 = arith.divf %295, %296 : vector<16x1xf32>
    %298 = vector.broadcast %290 : vector<16x1xf32> to vector<16x32xf32>
    %299 = arith.subf %286, %298 : vector<16x32xf32>
    %cst_128 = arith.constant 9.99999974E-6 : f32
    %300 = vector.broadcast %cst_128 : f32 to vector<16x1xf32>
    %301 = arith.addf %297, %300 : vector<16x1xf32>
    %302 = math.rsqrt %301 : vector<16x1xf32>
    %303 = vector.broadcast %302 : vector<16x1xf32> to vector<16x32xf32>
    %304 = arith.mulf %299, %303 : vector<16x32xf32>
    %c0_129 = arith.constant 0 : index
    %c0_130 = arith.constant 0 : index
    %305 = vector.load %arg93[%c0_129, %c0_130] : memref<1x32xf32, #tpu.memory_space<vmem>>, vector<1x32xf32>
    %306 = vector.broadcast %305 : vector<1x32xf32> to vector<16x32xf32>
    %307 = arith.mulf %304, %306 : vector<16x32xf32>
    %c0_131 = arith.constant 0 : index
    %c0_132 = arith.constant 0 : index
    %308 = vector.load %arg92[%c0_131, %c0_132] : memref<1x32xf32, #tpu.memory_space<vmem>>, vector<1x32xf32>
    %309 = vector.broadcast %308 : vector<1x32xf32> to vector<16x32xf32>
    %310 = arith.addf %307, %309 : vector<16x32xf32>
    %c0_133 = arith.constant 0 : index
    %c0_134 = arith.constant 0 : index
    %311 = vector.load %arg102[%c0_133, %c0_134] : memref<32x64xf32, #tpu.memory_space<vmem>>, vector<32x64xf32>
    %cst_135 = arith.constant dense<0.000000e+00> : vector<16x64xf32>
    %312 = tpu.matmul %310, %311, %cst_135 {dimension_numbers = #tpu.dot_dimension_numbers<[1], [0], [0], [1], [0, 0, 1, 1], [], []>} : vector<16x32xf32>, vector<32x64xf32>, vector<16x64xf32> -> vector<16x64xf32>
    %c0_136 = arith.constant 0 : index
    %c0_137 = arith.constant 0 : index
    %313 = vector.load %arg98[%c0_136, %c0_137] : memref<1x64xf32, #tpu.memory_space<vmem>>, vector<1x64xf32>
    %314 = vector.broadcast %313 : vector<1x64xf32> to vector<16x64xf32>
    %315 = arith.addf %312, %314 : vector<16x64xf32>
    %cst_138 = arith.constant 0.000000e+00 : f32
    %316 = vector.broadcast %cst_138 : f32 to vector<16x64xf32>
    %317 = arith.maximumf %315, %316 : vector<16x64xf32>
    %c0_139 = arith.constant 0 : index
    %c0_140 = arith.constant 0 : index
    %318 = vector.load %arg103[%c0_139, %c0_140] : memref<64x32xf32, #tpu.memory_space<vmem>>, vector<64x32xf32>
    %cst_141 = arith.constant dense<0.000000e+00> : vector<16x32xf32>
    %319 = tpu.matmul %317, %318, %cst_141 {dimension_numbers = #tpu.dot_dimension_numbers<[1], [0], [0], [1], [0, 0, 1, 1], [], []>} : vector<16x64xf32>, vector<64x32xf32>, vector<16x32xf32> -> vector<16x32xf32>
    %c0_142 = arith.constant 0 : index
    %c0_143 = arith.constant 0 : index
    %320 = vector.load %arg99[%c0_142, %c0_143] : memref<1x32xf32, #tpu.memory_space<vmem>>, vector<1x32xf32>
    %321 = vector.broadcast %320 : vector<1x32xf32> to vector<16x32xf32>
    %322 = arith.addf %319, %321 : vector<16x32xf32>
    %323 = arith.addf %310, %322 : vector<16x32xf32>
    %cst_144 = arith.constant dense<0.000000e+00> : vector<16xf32>
    %324 = vector.multi_reduction <add>, %323, %cst_144 [1] : vector<16x32xf32> to vector<16xf32>
    %325 = vector.shape_cast %324 : vector<16xf32> to vector<16x1xf32>
    %cst_145 = arith.constant 3.200000e+01 : f32
    %326 = vector.broadcast %cst_145 : f32 to vector<16x1xf32>
    %327 = arith.divf %325, %326 : vector<16x1xf32>
    %328 = vector.broadcast %327 : vector<16x1xf32> to vector<16x32xf32>
    %329 = arith.subf %323, %328 : vector<16x32xf32>
    %330 = arith.mulf %329, %329 : vector<16x32xf32>
    %cst_146 = arith.constant dense<0.000000e+00> : vector<16xf32>
    %331 = vector.multi_reduction <add>, %330, %cst_146 [1] : vector<16x32xf32> to vector<16xf32>
    %332 = vector.shape_cast %331 : vector<16xf32> to vector<16x1xf32>
    %cst_147 = arith.constant 3.200000e+01 : f32
    %333 = vector.broadcast %cst_147 : f32 to vector<16x1xf32>
    %334 = arith.divf %332, %333 : vector<16x1xf32>
    %335 = vector.broadcast %327 : vector<16x1xf32> to vector<16x32xf32>
    %336 = arith.subf %323, %335 : vector<16x32xf32>
    %cst_148 = arith.constant 9.99999974E-6 : f32
    %337 = vector.broadcast %cst_148 : f32 to vector<16x1xf32>
    %338 = arith.addf %334, %337 : vector<16x1xf32>
    %339 = math.rsqrt %338 : vector<16x1xf32>
    %340 = vector.broadcast %339 : vector<16x1xf32> to vector<16x32xf32>
    %341 = arith.mulf %336, %340 : vector<16x32xf32>
    %c0_149 = arith.constant 0 : index
    %c0_150 = arith.constant 0 : index
    %342 = vector.load %arg101[%c0_149, %c0_150] : memref<1x32xf32, #tpu.memory_space<vmem>>, vector<1x32xf32>
    %343 = vector.broadcast %342 : vector<1x32xf32> to vector<16x32xf32>
    %344 = arith.mulf %341, %343 : vector<16x32xf32>
    %c0_151 = arith.constant 0 : index
    %c0_152 = arith.constant 0 : index
    %345 = vector.load %arg100[%c0_151, %c0_152] : memref<1x32xf32, #tpu.memory_space<vmem>>, vector<1x32xf32>
    %346 = vector.broadcast %345 : vector<1x32xf32> to vector<16x32xf32>
    %347 = arith.addf %344, %346 : vector<16x32xf32>
    %cst_153 = arith.constant dense<0.000000e+00> : vector<16xf32>
    %348 = vector.multi_reduction <add>, %347, %cst_153 [1] : vector<16x32xf32> to vector<16xf32>
    %349 = vector.shape_cast %348 : vector<16xf32> to vector<16x1xf32>
    %cst_154 = arith.constant 3.200000e+01 : f32
    %350 = vector.broadcast %cst_154 : f32 to vector<16x1xf32>
    %351 = arith.divf %349, %350 : vector<16x1xf32>
    %352 = vector.broadcast %351 : vector<16x1xf32> to vector<16x32xf32>
    %353 = arith.subf %347, %352 : vector<16x32xf32>
    %354 = arith.mulf %353, %353 : vector<16x32xf32>
    %cst_155 = arith.constant dense<0.000000e+00> : vector<16xf32>
    %355 = vector.multi_reduction <add>, %354, %cst_155 [1] : vector<16x32xf32> to vector<16xf32>
    %356 = vector.shape_cast %355 : vector<16xf32> to vector<16x1xf32>
    %cst_156 = arith.constant 3.200000e+01 : f32
    %357 = vector.broadcast %cst_156 : f32 to vector<16x1xf32>
    %358 = arith.divf %356, %357 : vector<16x1xf32>
    %359 = vector.broadcast %351 : vector<16x1xf32> to vector<16x32xf32>
    %360 = arith.subf %347, %359 : vector<16x32xf32>
    %cst_157 = arith.constant 9.99999974E-6 : f32
    %361 = vector.broadcast %cst_157 : f32 to vector<16x1xf32>
    %362 = arith.addf %358, %361 : vector<16x1xf32>
    %363 = math.rsqrt %362 : vector<16x1xf32>
    %364 = vector.broadcast %363 : vector<16x1xf32> to vector<16x32xf32>
    %365 = arith.mulf %360, %364 : vector<16x32xf32>
    %c0_158 = arith.constant 0 : index
    %c0_159 = arith.constant 0 : index
    %366 = vector.load %arg105[%c0_158, %c0_159] : memref<1x32xf32, #tpu.memory_space<vmem>>, vector<1x32xf32>
    %367 = vector.broadcast %366 : vector<1x32xf32> to vector<16x32xf32>
    %368 = arith.mulf %365, %367 : vector<16x32xf32>
    %c0_160 = arith.constant 0 : index
    %c0_161 = arith.constant 0 : index
    %369 = vector.load %arg104[%c0_160, %c0_161] : memref<1x32xf32, #tpu.memory_space<vmem>>, vector<1x32xf32>
    %370 = vector.broadcast %369 : vector<1x32xf32> to vector<16x32xf32>
    %371 = arith.addf %368, %370 : vector<16x32xf32>
    %c0_162 = arith.constant 0 : index
    %c0_163 = arith.constant 0 : index
    %372 = vector.load %arg106[%c0_162, %c0_163] : memref<8x32xf32, #tpu.memory_space<vmem>>, vector<8x32xf32>
    %cst_164 = arith.constant 0.000000e+00 : f32
    %373 = vector.broadcast %cst_164 : f32 to vector<8x32xf32>
    %374 = arith.addf %371, %3 : vector<16x32xf32>
    %375 = arith.addf %373, %372 : vector<8x32xf32>
    %c0_165 = arith.constant 0 : index
    %c0_166 = arith.constant 0 : index
    %376 = vector.load %arg40[%c0_165, %c0_166] : memref<32x32xf32, #tpu.memory_space<vmem>>, vector<32x32xf32>
    %cst_167 = arith.constant dense<0.000000e+00> : vector<8x32xf32>
    %377 = tpu.matmul %375, %376, %cst_167 {dimension_numbers = #tpu.dot_dimension_numbers<[1], [0], [0], [1], [0, 0, 1, 1], [], []>} : vector<8x32xf32>, vector<32x32xf32>, vector<8x32xf32> -> vector<8x32xf32>
    %c0_168 = arith.constant 0 : index
    %c0_169 = arith.constant 0 : index
    %378 = vector.load %arg34[%c0_168, %c0_169] : memref<1x32xf32, #tpu.memory_space<vmem>>, vector<1x32xf32>
    %379 = vector.broadcast %378 : vector<1x32xf32> to vector<8x32xf32>
    %380 = arith.addf %377, %379 : vector<8x32xf32>
    %c0_170 = arith.constant 0 : index
    %c0_171 = arith.constant 0 : index
    %381 = vector.load %arg38[%c0_170, %c0_171] : memref<32x32xf32, #tpu.memory_space<vmem>>, vector<32x32xf32>
    %cst_172 = arith.constant dense<0.000000e+00> : vector<8x32xf32>
    %382 = tpu.matmul %375, %381, %cst_172 {dimension_numbers = #tpu.dot_dimension_numbers<[1], [0], [0], [1], [0, 0, 1, 1], [], []>} : vector<8x32xf32>, vector<32x32xf32>, vector<8x32xf32> -> vector<8x32xf32>
    %c0_173 = arith.constant 0 : index
    %c0_174 = arith.constant 0 : index
    %383 = vector.load %arg32[%c0_173, %c0_174] : memref<1x32xf32, #tpu.memory_space<vmem>>, vector<1x32xf32>
    %384 = vector.broadcast %383 : vector<1x32xf32> to vector<8x32xf32>
    %385 = arith.addf %382, %384 : vector<8x32xf32>
    %c0_175 = arith.constant 0 : index
    %c0_176 = arith.constant 0 : index
    %386 = vector.load %arg41[%c0_175, %c0_176] : memref<32x32xf32, #tpu.memory_space<vmem>>, vector<32x32xf32>
    %cst_177 = arith.constant dense<0.000000e+00> : vector<8x32xf32>
    %387 = tpu.matmul %373, %386, %cst_177 {dimension_numbers = #tpu.dot_dimension_numbers<[1], [0], [0], [1], [0, 0, 1, 1], [], []>} : vector<8x32xf32>, vector<32x32xf32>, vector<8x32xf32> -> vector<8x32xf32>
    %c0_178 = arith.constant 0 : index
    %c0_179 = arith.constant 0 : index
    %388 = vector.load %arg35[%c0_178, %c0_179] : memref<1x32xf32, #tpu.memory_space<vmem>>, vector<1x32xf32>
    %389 = vector.broadcast %388 : vector<1x32xf32> to vector<8x32xf32>
    %390 = arith.addf %387, %389 : vector<8x32xf32>
    %c0_180 = arith.constant 0 : index
    %c0_181 = arith.constant 0 : index
    %391 = vector.load %arg39[%c0_180, %c0_181] : memref<32x32xf32, #tpu.memory_space<vmem>>, vector<32x32xf32>
    %cst_182 = arith.constant 0.000000e+00 : f32
    %392 = vector.broadcast %cst_182 : f32 to vector<8x32xf32>
    %393 = vector.extract_strided_slice %380 {offsets = [0, 0], sizes = [8, 8], strides = [1, 1]} : vector<8x32xf32> to vector<8x8xf32>
    %394 = vector.extract_strided_slice %385 {offsets = [0, 0], sizes = [8, 8], strides = [1, 1]} : vector<8x32xf32> to vector<8x8xf32>
    %395 = vector.extract_strided_slice %390 {offsets = [0, 0], sizes = [8, 8], strides = [1, 1]} : vector<8x32xf32> to vector<8x8xf32>
    %cst_183 = arith.constant dense<0.000000e+00> : vector<8x8xf32>
    %396 = tpu.matmul %393, %394, %cst_183 {dimension_numbers = #tpu.dot_dimension_numbers<[1], [1], [0], [0], [0, 0, 1, 0], [], []>} : vector<8x8xf32>, vector<8x8xf32>, vector<8x8xf32> -> vector<8x8xf32>
    %cst_184 = arith.constant 0.353553385 : f32
    %397 = vector.broadcast %cst_184 : f32 to vector<8x8xf32>
    %398 = arith.mulf %396, %397 : vector<8x8xf32>
    %cst_185 = arith.constant dense<0xFF800000> : vector<8xf32>
    %399 = vector.multi_reduction <maximumf>, %398, %cst_185 [1] : vector<8x8xf32> to vector<8xf32>
    %400 = vector.shape_cast %399 : vector<8xf32> to vector<8x1xf32>
    %401 = vector.broadcast %400 : vector<8x1xf32> to vector<8x8xf32>
    %402 = arith.subf %398, %401 : vector<8x8xf32>
    %403 = math.exp %402 : vector<8x8xf32>
    %cst_186 = arith.constant dense<0.000000e+00> : vector<8xf32>
    %404 = vector.multi_reduction <add>, %403, %cst_186 [1] : vector<8x8xf32> to vector<8xf32>
    %405 = vector.shape_cast %404 : vector<8xf32> to vector<8x1xf32>
    %406 = tpu.reciprocal %405 {approx = true} : vector<8x1xf32> -> vector<8x1xf32>
    %407 = vector.broadcast %406 : vector<8x1xf32> to vector<8x8xf32>
    %408 = arith.mulf %403, %407 : vector<8x8xf32>
    %cst_187 = arith.constant dense<0.000000e+00> : vector<8x8xf32>
    %409 = tpu.matmul %408, %395, %cst_187 {dimension_numbers = #tpu.dot_dimension_numbers<[1], [0], [0], [1], [0, 0, 1, 1], [], []>} : vector<8x8xf32>, vector<8x8xf32>, vector<8x8xf32> -> vector<8x8xf32>
    %410 = vector.extract_strided_slice %391 {offsets = [0, 0], sizes = [8, 32], strides = [1, 1]} : vector<32x32xf32> to vector<8x32xf32>
    %cst_188 = arith.constant dense<0.000000e+00> : vector<8x32xf32>
    %411 = tpu.matmul %409, %410, %cst_188 {dimension_numbers = #tpu.dot_dimension_numbers<[1], [0], [0], [1], [0, 0, 1, 1], [], []>} : vector<8x8xf32>, vector<8x32xf32>, vector<8x32xf32> -> vector<8x32xf32>
    %412 = arith.addf %392, %411 : vector<8x32xf32>
    %413 = vector.extract_strided_slice %380 {offsets = [0, 8], sizes = [8, 8], strides = [1, 1]} : vector<8x32xf32> to vector<8x8xf32>
    %414 = vector.extract_strided_slice %385 {offsets = [0, 8], sizes = [8, 8], strides = [1, 1]} : vector<8x32xf32> to vector<8x8xf32>
    %415 = vector.extract_strided_slice %390 {offsets = [0, 8], sizes = [8, 8], strides = [1, 1]} : vector<8x32xf32> to vector<8x8xf32>
    %cst_189 = arith.constant dense<0.000000e+00> : vector<8x8xf32>
    %416 = tpu.matmul %413, %414, %cst_189 {dimension_numbers = #tpu.dot_dimension_numbers<[1], [1], [0], [0], [0, 0, 1, 0], [], []>} : vector<8x8xf32>, vector<8x8xf32>, vector<8x8xf32> -> vector<8x8xf32>
    %cst_190 = arith.constant 0.353553385 : f32
    %417 = vector.broadcast %cst_190 : f32 to vector<8x8xf32>
    %418 = arith.mulf %416, %417 : vector<8x8xf32>
    %cst_191 = arith.constant dense<0xFF800000> : vector<8xf32>
    %419 = vector.multi_reduction <maximumf>, %418, %cst_191 [1] : vector<8x8xf32> to vector<8xf32>
    %420 = vector.shape_cast %419 : vector<8xf32> to vector<8x1xf32>
    %421 = vector.broadcast %420 : vector<8x1xf32> to vector<8x8xf32>
    %422 = arith.subf %418, %421 : vector<8x8xf32>
    %423 = math.exp %422 : vector<8x8xf32>
    %cst_192 = arith.constant dense<0.000000e+00> : vector<8xf32>
    %424 = vector.multi_reduction <add>, %423, %cst_192 [1] : vector<8x8xf32> to vector<8xf32>
    %425 = vector.shape_cast %424 : vector<8xf32> to vector<8x1xf32>
    %426 = tpu.reciprocal %425 {approx = true} : vector<8x1xf32> -> vector<8x1xf32>
    %427 = vector.broadcast %426 : vector<8x1xf32> to vector<8x8xf32>
    %428 = arith.mulf %423, %427 : vector<8x8xf32>
    %cst_193 = arith.constant dense<0.000000e+00> : vector<8x8xf32>
    %429 = tpu.matmul %428, %415, %cst_193 {dimension_numbers = #tpu.dot_dimension_numbers<[1], [0], [0], [1], [0, 0, 1, 1], [], []>} : vector<8x8xf32>, vector<8x8xf32>, vector<8x8xf32> -> vector<8x8xf32>
    %430 = vector.extract_strided_slice %391 {offsets = [8, 0], sizes = [8, 32], strides = [1, 1]} : vector<32x32xf32> to vector<8x32xf32>
    %cst_194 = arith.constant dense<0.000000e+00> : vector<8x32xf32>
    %431 = tpu.matmul %429, %430, %cst_194 {dimension_numbers = #tpu.dot_dimension_numbers<[1], [0], [0], [1], [0, 0, 1, 1], [], []>} : vector<8x8xf32>, vector<8x32xf32>, vector<8x32xf32> -> vector<8x32xf32>
    %432 = arith.addf %412, %431 : vector<8x32xf32>
    %433 = vector.extract_strided_slice %380 {offsets = [0, 16], sizes = [8, 8], strides = [1, 1]} : vector<8x32xf32> to vector<8x8xf32>
    %434 = vector.extract_strided_slice %385 {offsets = [0, 16], sizes = [8, 8], strides = [1, 1]} : vector<8x32xf32> to vector<8x8xf32>
    %435 = vector.extract_strided_slice %390 {offsets = [0, 16], sizes = [8, 8], strides = [1, 1]} : vector<8x32xf32> to vector<8x8xf32>
    %cst_195 = arith.constant dense<0.000000e+00> : vector<8x8xf32>
    %436 = tpu.matmul %433, %434, %cst_195 {dimension_numbers = #tpu.dot_dimension_numbers<[1], [1], [0], [0], [0, 0, 1, 0], [], []>} : vector<8x8xf32>, vector<8x8xf32>, vector<8x8xf32> -> vector<8x8xf32>
    %cst_196 = arith.constant 0.353553385 : f32
    %437 = vector.broadcast %cst_196 : f32 to vector<8x8xf32>
    %438 = arith.mulf %436, %437 : vector<8x8xf32>
    %cst_197 = arith.constant dense<0xFF800000> : vector<8xf32>
    %439 = vector.multi_reduction <maximumf>, %438, %cst_197 [1] : vector<8x8xf32> to vector<8xf32>
    %440 = vector.shape_cast %439 : vector<8xf32> to vector<8x1xf32>
    %441 = vector.broadcast %440 : vector<8x1xf32> to vector<8x8xf32>
    %442 = arith.subf %438, %441 : vector<8x8xf32>
    %443 = math.exp %442 : vector<8x8xf32>
    %cst_198 = arith.constant dense<0.000000e+00> : vector<8xf32>
    %444 = vector.multi_reduction <add>, %443, %cst_198 [1] : vector<8x8xf32> to vector<8xf32>
    %445 = vector.shape_cast %444 : vector<8xf32> to vector<8x1xf32>
    %446 = tpu.reciprocal %445 {approx = true} : vector<8x1xf32> -> vector<8x1xf32>
    %447 = vector.broadcast %446 : vector<8x1xf32> to vector<8x8xf32>
    %448 = arith.mulf %443, %447 : vector<8x8xf32>
    %cst_199 = arith.constant dense<0.000000e+00> : vector<8x8xf32>
    %449 = tpu.matmul %448, %435, %cst_199 {dimension_numbers = #tpu.dot_dimension_numbers<[1], [0], [0], [1], [0, 0, 1, 1], [], []>} : vector<8x8xf32>, vector<8x8xf32>, vector<8x8xf32> -> vector<8x8xf32>
    %450 = vector.extract_strided_slice %391 {offsets = [16, 0], sizes = [8, 32], strides = [1, 1]} : vector<32x32xf32> to vector<8x32xf32>
    %cst_200 = arith.constant dense<0.000000e+00> : vector<8x32xf32>
    %451 = tpu.matmul %449, %450, %cst_200 {dimension_numbers = #tpu.dot_dimension_numbers<[1], [0], [0], [1], [0, 0, 1, 1], [], []>} : vector<8x8xf32>, vector<8x32xf32>, vector<8x32xf32> -> vector<8x32xf32>
    %452 = arith.addf %432, %451 : vector<8x32xf32>
    %453 = vector.extract_strided_slice %380 {offsets = [0, 24], sizes = [8, 8], strides = [1, 1]} : vector<8x32xf32> to vector<8x8xf32>
    %454 = vector.extract_strided_slice %385 {offsets = [0, 24], sizes = [8, 8], strides = [1, 1]} : vector<8x32xf32> to vector<8x8xf32>
    %455 = vector.extract_strided_slice %390 {offsets = [0, 24], sizes = [8, 8], strides = [1, 1]} : vector<8x32xf32> to vector<8x8xf32>
    %cst_201 = arith.constant dense<0.000000e+00> : vector<8x8xf32>
    %456 = tpu.matmul %453, %454, %cst_201 {dimension_numbers = #tpu.dot_dimension_numbers<[1], [1], [0], [0], [0, 0, 1, 0], [], []>} : vector<8x8xf32>, vector<8x8xf32>, vector<8x8xf32> -> vector<8x8xf32>
    %cst_202 = arith.constant 0.353553385 : f32
    %457 = vector.broadcast %cst_202 : f32 to vector<8x8xf32>
    %458 = arith.mulf %456, %457 : vector<8x8xf32>
    %cst_203 = arith.constant dense<0xFF800000> : vector<8xf32>
    %459 = vector.multi_reduction <maximumf>, %458, %cst_203 [1] : vector<8x8xf32> to vector<8xf32>
    %460 = vector.shape_cast %459 : vector<8xf32> to vector<8x1xf32>
    %461 = vector.broadcast %460 : vector<8x1xf32> to vector<8x8xf32>
    %462 = arith.subf %458, %461 : vector<8x8xf32>
    %463 = math.exp %462 : vector<8x8xf32>
    %cst_204 = arith.constant dense<0.000000e+00> : vector<8xf32>
    %464 = vector.multi_reduction <add>, %463, %cst_204 [1] : vector<8x8xf32> to vector<8xf32>
    %465 = vector.shape_cast %464 : vector<8xf32> to vector<8x1xf32>
    %466 = tpu.reciprocal %465 {approx = true} : vector<8x1xf32> -> vector<8x1xf32>
    %467 = vector.broadcast %466 : vector<8x1xf32> to vector<8x8xf32>
    %468 = arith.mulf %463, %467 : vector<8x8xf32>
    %cst_205 = arith.constant dense<0.000000e+00> : vector<8x8xf32>
    %469 = tpu.matmul %468, %455, %cst_205 {dimension_numbers = #tpu.dot_dimension_numbers<[1], [0], [0], [1], [0, 0, 1, 1], [], []>} : vector<8x8xf32>, vector<8x8xf32>, vector<8x8xf32> -> vector<8x8xf32>
    %470 = vector.extract_strided_slice %391 {offsets = [24, 0], sizes = [8, 32], strides = [1, 1]} : vector<32x32xf32> to vector<8x32xf32>
    %cst_206 = arith.constant dense<0.000000e+00> : vector<8x32xf32>
    %471 = tpu.matmul %469, %470, %cst_206 {dimension_numbers = #tpu.dot_dimension_numbers<[1], [0], [0], [1], [0, 0, 1, 1], [], []>} : vector<8x8xf32>, vector<8x32xf32>, vector<8x32xf32> -> vector<8x32xf32>
    %472 = arith.addf %452, %471 : vector<8x32xf32>
    %c0_207 = arith.constant 0 : index
    %c0_208 = arith.constant 0 : index
    %473 = vector.load %arg33[%c0_207, %c0_208] : memref<1x32xf32, #tpu.memory_space<vmem>>, vector<1x32xf32>
    %474 = vector.broadcast %473 : vector<1x32xf32> to vector<8x32xf32>
    %475 = arith.addf %472, %474 : vector<8x32xf32>
    %476 = arith.addf %375, %475 : vector<8x32xf32>
    %cst_209 = arith.constant dense<0.000000e+00> : vector<8xf32>
    %477 = vector.multi_reduction <add>, %476, %cst_209 [1] : vector<8x32xf32> to vector<8xf32>
    %478 = vector.shape_cast %477 : vector<8xf32> to vector<8x1xf32>
    %cst_210 = arith.constant 3.200000e+01 : f32
    %479 = vector.broadcast %cst_210 : f32 to vector<8x1xf32>
    %480 = arith.divf %478, %479 : vector<8x1xf32>
    %481 = vector.broadcast %480 : vector<8x1xf32> to vector<8x32xf32>
    %482 = arith.subf %476, %481 : vector<8x32xf32>
    %483 = arith.mulf %482, %482 : vector<8x32xf32>
    %cst_211 = arith.constant dense<0.000000e+00> : vector<8xf32>
    %484 = vector.multi_reduction <add>, %483, %cst_211 [1] : vector<8x32xf32> to vector<8xf32>
    %485 = vector.shape_cast %484 : vector<8xf32> to vector<8x1xf32>
    %cst_212 = arith.constant 3.200000e+01 : f32
    %486 = vector.broadcast %cst_212 : f32 to vector<8x1xf32>
    %487 = arith.divf %485, %486 : vector<8x1xf32>
    %488 = vector.broadcast %480 : vector<8x1xf32> to vector<8x32xf32>
    %489 = arith.subf %476, %488 : vector<8x32xf32>
    %cst_213 = arith.constant 9.99999974E-6 : f32
    %490 = vector.broadcast %cst_213 : f32 to vector<8x1xf32>
    %491 = arith.addf %487, %490 : vector<8x1xf32>
    %492 = math.rsqrt %491 : vector<8x1xf32>
    %493 = vector.broadcast %492 : vector<8x1xf32> to vector<8x32xf32>
    %494 = arith.mulf %489, %493 : vector<8x32xf32>
    %c0_214 = arith.constant 0 : index
    %c0_215 = arith.constant 0 : index
    %495 = vector.load %arg37[%c0_214, %c0_215] : memref<1x32xf32, #tpu.memory_space<vmem>>, vector<1x32xf32>
    %496 = vector.broadcast %495 : vector<1x32xf32> to vector<8x32xf32>
    %497 = arith.mulf %494, %496 : vector<8x32xf32>
    %c0_216 = arith.constant 0 : index
    %c0_217 = arith.constant 0 : index
    %498 = vector.load %arg36[%c0_216, %c0_217] : memref<1x32xf32, #tpu.memory_space<vmem>>, vector<1x32xf32>
    %499 = vector.broadcast %498 : vector<1x32xf32> to vector<8x32xf32>
    %500 = arith.addf %497, %499 : vector<8x32xf32>
    %501 = arith.addf %373, %500 : vector<8x32xf32>
    %cst_218 = arith.constant dense<0.000000e+00> : vector<8xf32>
    %502 = vector.multi_reduction <add>, %501, %cst_218 [1] : vector<8x32xf32> to vector<8xf32>
    %503 = vector.shape_cast %502 : vector<8xf32> to vector<8x1xf32>
    %cst_219 = arith.constant 3.200000e+01 : f32
    %504 = vector.broadcast %cst_219 : f32 to vector<8x1xf32>
    %505 = arith.divf %503, %504 : vector<8x1xf32>
    %506 = vector.broadcast %505 : vector<8x1xf32> to vector<8x32xf32>
    %507 = arith.subf %501, %506 : vector<8x32xf32>
    %508 = arith.mulf %507, %507 : vector<8x32xf32>
    %cst_220 = arith.constant dense<0.000000e+00> : vector<8xf32>
    %509 = vector.multi_reduction <add>, %508, %cst_220 [1] : vector<8x32xf32> to vector<8xf32>
    %510 = vector.shape_cast %509 : vector<8xf32> to vector<8x1xf32>
    %cst_221 = arith.constant 3.200000e+01 : f32
    %511 = vector.broadcast %cst_221 : f32 to vector<8x1xf32>
    %512 = arith.divf %510, %511 : vector<8x1xf32>
    %513 = vector.broadcast %505 : vector<8x1xf32> to vector<8x32xf32>
    %514 = arith.subf %501, %513 : vector<8x32xf32>
    %cst_222 = arith.constant 9.99999974E-6 : f32
    %515 = vector.broadcast %cst_222 : f32 to vector<8x1xf32>
    %516 = arith.addf %512, %515 : vector<8x1xf32>
    %517 = math.rsqrt %516 : vector<8x1xf32>
    %518 = vector.broadcast %517 : vector<8x1xf32> to vector<8x32xf32>
    %519 = arith.mulf %514, %518 : vector<8x32xf32>
    %c0_223 = arith.constant 0 : index
    %c0_224 = arith.constant 0 : index
    %520 = vector.load %arg23[%c0_223, %c0_224] : memref<1x32xf32, #tpu.memory_space<vmem>>, vector<1x32xf32>
    %521 = vector.broadcast %520 : vector<1x32xf32> to vector<8x32xf32>
    %522 = arith.mulf %519, %521 : vector<8x32xf32>
    %c0_225 = arith.constant 0 : index
    %c0_226 = arith.constant 0 : index
    %523 = vector.load %arg22[%c0_225, %c0_226] : memref<1x32xf32, #tpu.memory_space<vmem>>, vector<1x32xf32>
    %524 = vector.broadcast %523 : vector<1x32xf32> to vector<8x32xf32>
    %525 = arith.addf %522, %524 : vector<8x32xf32>
    %526 = arith.addf %525, %372 : vector<8x32xf32>
    %c0_227 = arith.constant 0 : index
    %c0_228 = arith.constant 0 : index
    %527 = vector.load %arg20[%c0_227, %c0_228] : memref<32x32xf32, #tpu.memory_space<vmem>>, vector<32x32xf32>
    %cst_229 = arith.constant dense<0.000000e+00> : vector<8x32xf32>
    %528 = tpu.matmul %526, %527, %cst_229 {dimension_numbers = #tpu.dot_dimension_numbers<[1], [0], [0], [1], [0, 0, 1, 1], [], []>} : vector<8x32xf32>, vector<32x32xf32>, vector<8x32xf32> -> vector<8x32xf32>
    %c0_230 = arith.constant 0 : index
    %c0_231 = arith.constant 0 : index
    %529 = vector.load %arg14[%c0_230, %c0_231] : memref<1x32xf32, #tpu.memory_space<vmem>>, vector<1x32xf32>
    %530 = vector.broadcast %529 : vector<1x32xf32> to vector<8x32xf32>
    %531 = arith.addf %528, %530 : vector<8x32xf32>
    %c0_232 = arith.constant 0 : index
    %c0_233 = arith.constant 0 : index
    %532 = vector.load %arg18[%c0_232, %c0_233] : memref<32x32xf32, #tpu.memory_space<vmem>>, vector<32x32xf32>
    %cst_234 = arith.constant dense<0.000000e+00> : vector<16x32xf32>
    %533 = tpu.matmul %374, %532, %cst_234 {dimension_numbers = #tpu.dot_dimension_numbers<[1], [0], [0], [1], [0, 0, 1, 1], [], []>} : vector<16x32xf32>, vector<32x32xf32>, vector<16x32xf32> -> vector<16x32xf32>
    %c0_235 = arith.constant 0 : index
    %c0_236 = arith.constant 0 : index
    %534 = vector.load %arg12[%c0_235, %c0_236] : memref<1x32xf32, #tpu.memory_space<vmem>>, vector<1x32xf32>
    %535 = vector.broadcast %534 : vector<1x32xf32> to vector<16x32xf32>
    %536 = arith.addf %533, %535 : vector<16x32xf32>
    %c0_237 = arith.constant 0 : index
    %c0_238 = arith.constant 0 : index
    %537 = vector.load %arg21[%c0_237, %c0_238] : memref<32x32xf32, #tpu.memory_space<vmem>>, vector<32x32xf32>
    %cst_239 = arith.constant dense<0.000000e+00> : vector<16x32xf32>
    %538 = tpu.matmul %371, %537, %cst_239 {dimension_numbers = #tpu.dot_dimension_numbers<[1], [0], [0], [1], [0, 0, 1, 1], [], []>} : vector<16x32xf32>, vector<32x32xf32>, vector<16x32xf32> -> vector<16x32xf32>
    %c0_240 = arith.constant 0 : index
    %c0_241 = arith.constant 0 : index
    %539 = vector.load %arg15[%c0_240, %c0_241] : memref<1x32xf32, #tpu.memory_space<vmem>>, vector<1x32xf32>
    %540 = vector.broadcast %539 : vector<1x32xf32> to vector<16x32xf32>
    %541 = arith.addf %538, %540 : vector<16x32xf32>
    %c0_242 = arith.constant 0 : index
    %c0_243 = arith.constant 0 : index
    %542 = vector.load %arg19[%c0_242, %c0_243] : memref<32x32xf32, #tpu.memory_space<vmem>>, vector<32x32xf32>
    %cst_244 = arith.constant 0.000000e+00 : f32
    %543 = vector.broadcast %cst_244 : f32 to vector<8x32xf32>
    %544 = vector.extract_strided_slice %531 {offsets = [0, 0], sizes = [8, 8], strides = [1, 1]} : vector<8x32xf32> to vector<8x8xf32>
    %545 = vector.extract_strided_slice %536 {offsets = [0, 0], sizes = [16, 8], strides = [1, 1]} : vector<16x32xf32> to vector<16x8xf32>
    %546 = vector.extract_strided_slice %541 {offsets = [0, 0], sizes = [16, 8], strides = [1, 1]} : vector<16x32xf32> to vector<16x8xf32>
    %cst_245 = arith.constant dense<0.000000e+00> : vector<8x16xf32>
    %547 = tpu.matmul %544, %545, %cst_245 {dimension_numbers = #tpu.dot_dimension_numbers<[1], [1], [0], [0], [0, 0, 1, 0], [], []>} : vector<8x8xf32>, vector<16x8xf32>, vector<8x16xf32> -> vector<8x16xf32>
    %cst_246 = arith.constant 0.353553385 : f32
    %548 = vector.broadcast %cst_246 : f32 to vector<8x16xf32>
    %549 = arith.mulf %547, %548 : vector<8x16xf32>
    %550 = vector.broadcast %5 : vector<1x16xf32> to vector<8x16xf32>
    %551 = arith.addf %549, %550 : vector<8x16xf32>
    %cst_247 = arith.constant dense<0xFF800000> : vector<8xf32>
    %552 = vector.multi_reduction <maximumf>, %551, %cst_247 [1] : vector<8x16xf32> to vector<8xf32>
    %553 = vector.shape_cast %552 : vector<8xf32> to vector<8x1xf32>
    %554 = vector.broadcast %553 : vector<8x1xf32> to vector<8x16xf32>
    %555 = arith.subf %551, %554 : vector<8x16xf32>
    %556 = math.exp %555 : vector<8x16xf32>
    %cst_248 = arith.constant dense<0.000000e+00> : vector<8xf32>
    %557 = vector.multi_reduction <add>, %556, %cst_248 [1] : vector<8x16xf32> to vector<8xf32>
    %558 = vector.shape_cast %557 : vector<8xf32> to vector<8x1xf32>
    %559 = tpu.reciprocal %558 {approx = true} : vector<8x1xf32> -> vector<8x1xf32>
    %560 = vector.broadcast %559 : vector<8x1xf32> to vector<8x16xf32>
    %561 = arith.mulf %556, %560 : vector<8x16xf32>
    %cst_249 = arith.constant dense<0.000000e+00> : vector<8x8xf32>
    %562 = tpu.matmul %561, %546, %cst_249 {dimension_numbers = #tpu.dot_dimension_numbers<[1], [0], [0], [1], [0, 0, 1, 1], [], []>} : vector<8x16xf32>, vector<16x8xf32>, vector<8x8xf32> -> vector<8x8xf32>
    %563 = vector.extract_strided_slice %542 {offsets = [0, 0], sizes = [8, 32], strides = [1, 1]} : vector<32x32xf32> to vector<8x32xf32>
    %cst_250 = arith.constant dense<0.000000e+00> : vector<8x32xf32>
    %564 = tpu.matmul %562, %563, %cst_250 {dimension_numbers = #tpu.dot_dimension_numbers<[1], [0], [0], [1], [0, 0, 1, 1], [], []>} : vector<8x8xf32>, vector<8x32xf32>, vector<8x32xf32> -> vector<8x32xf32>
    %565 = arith.addf %543, %564 : vector<8x32xf32>
    %566 = vector.extract_strided_slice %531 {offsets = [0, 8], sizes = [8, 8], strides = [1, 1]} : vector<8x32xf32> to vector<8x8xf32>
    %567 = vector.extract_strided_slice %536 {offsets = [0, 8], sizes = [16, 8], strides = [1, 1]} : vector<16x32xf32> to vector<16x8xf32>
    %568 = vector.extract_strided_slice %541 {offsets = [0, 8], sizes = [16, 8], strides = [1, 1]} : vector<16x32xf32> to vector<16x8xf32>
    %cst_251 = arith.constant dense<0.000000e+00> : vector<8x16xf32>
    %569 = tpu.matmul %566, %567, %cst_251 {dimension_numbers = #tpu.dot_dimension_numbers<[1], [1], [0], [0], [0, 0, 1, 0], [], []>} : vector<8x8xf32>, vector<16x8xf32>, vector<8x16xf32> -> vector<8x16xf32>
    %cst_252 = arith.constant 0.353553385 : f32
    %570 = vector.broadcast %cst_252 : f32 to vector<8x16xf32>
    %571 = arith.mulf %569, %570 : vector<8x16xf32>
    %572 = vector.broadcast %5 : vector<1x16xf32> to vector<8x16xf32>
    %573 = arith.addf %571, %572 : vector<8x16xf32>
    %cst_253 = arith.constant dense<0xFF800000> : vector<8xf32>
    %574 = vector.multi_reduction <maximumf>, %573, %cst_253 [1] : vector<8x16xf32> to vector<8xf32>
    %575 = vector.shape_cast %574 : vector<8xf32> to vector<8x1xf32>
    %576 = vector.broadcast %575 : vector<8x1xf32> to vector<8x16xf32>
    %577 = arith.subf %573, %576 : vector<8x16xf32>
    %578 = math.exp %577 : vector<8x16xf32>
    %cst_254 = arith.constant dense<0.000000e+00> : vector<8xf32>
    %579 = vector.multi_reduction <add>, %578, %cst_254 [1] : vector<8x16xf32> to vector<8xf32>
    %580 = vector.shape_cast %579 : vector<8xf32> to vector<8x1xf32>
    %581 = tpu.reciprocal %580 {approx = true} : vector<8x1xf32> -> vector<8x1xf32>
    %582 = vector.broadcast %581 : vector<8x1xf32> to vector<8x16xf32>
    %583 = arith.mulf %578, %582 : vector<8x16xf32>
    %cst_255 = arith.constant dense<0.000000e+00> : vector<8x8xf32>
    %584 = tpu.matmul %583, %568, %cst_255 {dimension_numbers = #tpu.dot_dimension_numbers<[1], [0], [0], [1], [0, 0, 1, 1], [], []>} : vector<8x16xf32>, vector<16x8xf32>, vector<8x8xf32> -> vector<8x8xf32>
    %585 = vector.extract_strided_slice %542 {offsets = [8, 0], sizes = [8, 32], strides = [1, 1]} : vector<32x32xf32> to vector<8x32xf32>
    %cst_256 = arith.constant dense<0.000000e+00> : vector<8x32xf32>
    %586 = tpu.matmul %584, %585, %cst_256 {dimension_numbers = #tpu.dot_dimension_numbers<[1], [0], [0], [1], [0, 0, 1, 1], [], []>} : vector<8x8xf32>, vector<8x32xf32>, vector<8x32xf32> -> vector<8x32xf32>
    %587 = arith.addf %565, %586 : vector<8x32xf32>
    %588 = vector.extract_strided_slice %531 {offsets = [0, 16], sizes = [8, 8], strides = [1, 1]} : vector<8x32xf32> to vector<8x8xf32>
    %589 = vector.extract_strided_slice %536 {offsets = [0, 16], sizes = [16, 8], strides = [1, 1]} : vector<16x32xf32> to vector<16x8xf32>
    %590 = vector.extract_strided_slice %541 {offsets = [0, 16], sizes = [16, 8], strides = [1, 1]} : vector<16x32xf32> to vector<16x8xf32>
    %cst_257 = arith.constant dense<0.000000e+00> : vector<8x16xf32>
    %591 = tpu.matmul %588, %589, %cst_257 {dimension_numbers = #tpu.dot_dimension_numbers<[1], [1], [0], [0], [0, 0, 1, 0], [], []>} : vector<8x8xf32>, vector<16x8xf32>, vector<8x16xf32> -> vector<8x16xf32>
    %cst_258 = arith.constant 0.353553385 : f32
    %592 = vector.broadcast %cst_258 : f32 to vector<8x16xf32>
    %593 = arith.mulf %591, %592 : vector<8x16xf32>
    %594 = vector.broadcast %5 : vector<1x16xf32> to vector<8x16xf32>
    %595 = arith.addf %593, %594 : vector<8x16xf32>
    %cst_259 = arith.constant dense<0xFF800000> : vector<8xf32>
    %596 = vector.multi_reduction <maximumf>, %595, %cst_259 [1] : vector<8x16xf32> to vector<8xf32>
    %597 = vector.shape_cast %596 : vector<8xf32> to vector<8x1xf32>
    %598 = vector.broadcast %597 : vector<8x1xf32> to vector<8x16xf32>
    %599 = arith.subf %595, %598 : vector<8x16xf32>
    %600 = math.exp %599 : vector<8x16xf32>
    %cst_260 = arith.constant dense<0.000000e+00> : vector<8xf32>
    %601 = vector.multi_reduction <add>, %600, %cst_260 [1] : vector<8x16xf32> to vector<8xf32>
    %602 = vector.shape_cast %601 : vector<8xf32> to vector<8x1xf32>
    %603 = tpu.reciprocal %602 {approx = true} : vector<8x1xf32> -> vector<8x1xf32>
    %604 = vector.broadcast %603 : vector<8x1xf32> to vector<8x16xf32>
    %605 = arith.mulf %600, %604 : vector<8x16xf32>
    %cst_261 = arith.constant dense<0.000000e+00> : vector<8x8xf32>
    %606 = tpu.matmul %605, %590, %cst_261 {dimension_numbers = #tpu.dot_dimension_numbers<[1], [0], [0], [1], [0, 0, 1, 1], [], []>} : vector<8x16xf32>, vector<16x8xf32>, vector<8x8xf32> -> vector<8x8xf32>
    %607 = vector.extract_strided_slice %542 {offsets = [16, 0], sizes = [8, 32], strides = [1, 1]} : vector<32x32xf32> to vector<8x32xf32>
    %cst_262 = arith.constant dense<0.000000e+00> : vector<8x32xf32>
    %608 = tpu.matmul %606, %607, %cst_262 {dimension_numbers = #tpu.dot_dimension_numbers<[1], [0], [0], [1], [0, 0, 1, 1], [], []>} : vector<8x8xf32>, vector<8x32xf32>, vector<8x32xf32> -> vector<8x32xf32>
    %609 = arith.addf %587, %608 : vector<8x32xf32>
    %610 = vector.extract_strided_slice %531 {offsets = [0, 24], sizes = [8, 8], strides = [1, 1]} : vector<8x32xf32> to vector<8x8xf32>
    %611 = vector.extract_strided_slice %536 {offsets = [0, 24], sizes = [16, 8], strides = [1, 1]} : vector<16x32xf32> to vector<16x8xf32>
    %612 = vector.extract_strided_slice %541 {offsets = [0, 24], sizes = [16, 8], strides = [1, 1]} : vector<16x32xf32> to vector<16x8xf32>
    %cst_263 = arith.constant dense<0.000000e+00> : vector<8x16xf32>
    %613 = tpu.matmul %610, %611, %cst_263 {dimension_numbers = #tpu.dot_dimension_numbers<[1], [1], [0], [0], [0, 0, 1, 0], [], []>} : vector<8x8xf32>, vector<16x8xf32>, vector<8x16xf32> -> vector<8x16xf32>
    %cst_264 = arith.constant 0.353553385 : f32
    %614 = vector.broadcast %cst_264 : f32 to vector<8x16xf32>
    %615 = arith.mulf %613, %614 : vector<8x16xf32>
    %616 = vector.broadcast %5 : vector<1x16xf32> to vector<8x16xf32>
    %617 = arith.addf %615, %616 : vector<8x16xf32>
    %cst_265 = arith.constant dense<0xFF800000> : vector<8xf32>
    %618 = vector.multi_reduction <maximumf>, %617, %cst_265 [1] : vector<8x16xf32> to vector<8xf32>
    %619 = vector.shape_cast %618 : vector<8xf32> to vector<8x1xf32>
    %620 = vector.broadcast %619 : vector<8x1xf32> to vector<8x16xf32>
    %621 = arith.subf %617, %620 : vector<8x16xf32>
    %622 = math.exp %621 : vector<8x16xf32>
    %cst_266 = arith.constant dense<0.000000e+00> : vector<8xf32>
    %623 = vector.multi_reduction <add>, %622, %cst_266 [1] : vector<8x16xf32> to vector<8xf32>
    %624 = vector.shape_cast %623 : vector<8xf32> to vector<8x1xf32>
    %625 = tpu.reciprocal %624 {approx = true} : vector<8x1xf32> -> vector<8x1xf32>
    %626 = vector.broadcast %625 : vector<8x1xf32> to vector<8x16xf32>
    %627 = arith.mulf %622, %626 : vector<8x16xf32>
    %cst_267 = arith.constant dense<0.000000e+00> : vector<8x8xf32>
    %628 = tpu.matmul %627, %612, %cst_267 {dimension_numbers = #tpu.dot_dimension_numbers<[1], [0], [0], [1], [0, 0, 1, 1], [], []>} : vector<8x16xf32>, vector<16x8xf32>, vector<8x8xf32> -> vector<8x8xf32>
    %629 = vector.extract_strided_slice %542 {offsets = [24, 0], sizes = [8, 32], strides = [1, 1]} : vector<32x32xf32> to vector<8x32xf32>
    %cst_268 = arith.constant dense<0.000000e+00> : vector<8x32xf32>
    %630 = tpu.matmul %628, %629, %cst_268 {dimension_numbers = #tpu.dot_dimension_numbers<[1], [0], [0], [1], [0, 0, 1, 1], [], []>} : vector<8x8xf32>, vector<8x32xf32>, vector<8x32xf32> -> vector<8x32xf32>
    %631 = arith.addf %609, %630 : vector<8x32xf32>
    %c0_269 = arith.constant 0 : index
    %c0_270 = arith.constant 0 : index
    %632 = vector.load %arg13[%c0_269, %c0_270] : memref<1x32xf32, #tpu.memory_space<vmem>>, vector<1x32xf32>
    %633 = vector.broadcast %632 : vector<1x32xf32> to vector<8x32xf32>
    %634 = arith.addf %631, %633 : vector<8x32xf32>
    %635 = arith.addf %526, %634 : vector<8x32xf32>
    %cst_271 = arith.constant dense<0.000000e+00> : vector<8xf32>
    %636 = vector.multi_reduction <add>, %635, %cst_271 [1] : vector<8x32xf32> to vector<8xf32>
    %637 = vector.shape_cast %636 : vector<8xf32> to vector<8x1xf32>
    %cst_272 = arith.constant 3.200000e+01 : f32
    %638 = vector.broadcast %cst_272 : f32 to vector<8x1xf32>
    %639 = arith.divf %637, %638 : vector<8x1xf32>
    %640 = vector.broadcast %639 : vector<8x1xf32> to vector<8x32xf32>
    %641 = arith.subf %635, %640 : vector<8x32xf32>
    %642 = arith.mulf %641, %641 : vector<8x32xf32>
    %cst_273 = arith.constant dense<0.000000e+00> : vector<8xf32>
    %643 = vector.multi_reduction <add>, %642, %cst_273 [1] : vector<8x32xf32> to vector<8xf32>
    %644 = vector.shape_cast %643 : vector<8xf32> to vector<8x1xf32>
    %cst_274 = arith.constant 3.200000e+01 : f32
    %645 = vector.broadcast %cst_274 : f32 to vector<8x1xf32>
    %646 = arith.divf %644, %645 : vector<8x1xf32>
    %647 = vector.broadcast %639 : vector<8x1xf32> to vector<8x32xf32>
    %648 = arith.subf %635, %647 : vector<8x32xf32>
    %cst_275 = arith.constant 9.99999974E-6 : f32
    %649 = vector.broadcast %cst_275 : f32 to vector<8x1xf32>
    %650 = arith.addf %646, %649 : vector<8x1xf32>
    %651 = math.rsqrt %650 : vector<8x1xf32>
    %652 = vector.broadcast %651 : vector<8x1xf32> to vector<8x32xf32>
    %653 = arith.mulf %648, %652 : vector<8x32xf32>
    %c0_276 = arith.constant 0 : index
    %c0_277 = arith.constant 0 : index
    %654 = vector.load %arg17[%c0_276, %c0_277] : memref<1x32xf32, #tpu.memory_space<vmem>>, vector<1x32xf32>
    %655 = vector.broadcast %654 : vector<1x32xf32> to vector<8x32xf32>
    %656 = arith.mulf %653, %655 : vector<8x32xf32>
    %c0_278 = arith.constant 0 : index
    %c0_279 = arith.constant 0 : index
    %657 = vector.load %arg16[%c0_278, %c0_279] : memref<1x32xf32, #tpu.memory_space<vmem>>, vector<1x32xf32>
    %658 = vector.broadcast %657 : vector<1x32xf32> to vector<8x32xf32>
    %659 = arith.addf %656, %658 : vector<8x32xf32>
    %660 = arith.addf %526, %659 : vector<8x32xf32>
    %cst_280 = arith.constant dense<0.000000e+00> : vector<8xf32>
    %661 = vector.multi_reduction <add>, %660, %cst_280 [1] : vector<8x32xf32> to vector<8xf32>
    %662 = vector.shape_cast %661 : vector<8xf32> to vector<8x1xf32>
    %cst_281 = arith.constant 3.200000e+01 : f32
    %663 = vector.broadcast %cst_281 : f32 to vector<8x1xf32>
    %664 = arith.divf %662, %663 : vector<8x1xf32>
    %665 = vector.broadcast %664 : vector<8x1xf32> to vector<8x32xf32>
    %666 = arith.subf %660, %665 : vector<8x32xf32>
    %667 = arith.mulf %666, %666 : vector<8x32xf32>
    %cst_282 = arith.constant dense<0.000000e+00> : vector<8xf32>
    %668 = vector.multi_reduction <add>, %667, %cst_282 [1] : vector<8x32xf32> to vector<8xf32>
    %669 = vector.shape_cast %668 : vector<8xf32> to vector<8x1xf32>
    %cst_283 = arith.constant 3.200000e+01 : f32
    %670 = vector.broadcast %cst_283 : f32 to vector<8x1xf32>
    %671 = arith.divf %669, %670 : vector<8x1xf32>
    %672 = vector.broadcast %664 : vector<8x1xf32> to vector<8x32xf32>
    %673 = arith.subf %660, %672 : vector<8x32xf32>
    %cst_284 = arith.constant 9.99999974E-6 : f32
    %674 = vector.broadcast %cst_284 : f32 to vector<8x1xf32>
    %675 = arith.addf %671, %674 : vector<8x1xf32>
    %676 = math.rsqrt %675 : vector<8x1xf32>
    %677 = vector.broadcast %676 : vector<8x1xf32> to vector<8x32xf32>
    %678 = arith.mulf %673, %677 : vector<8x32xf32>
    %c0_285 = arith.constant 0 : index
    %c0_286 = arith.constant 0 : index
    %679 = vector.load %arg25[%c0_285, %c0_286] : memref<1x32xf32, #tpu.memory_space<vmem>>, vector<1x32xf32>
    %680 = vector.broadcast %679 : vector<1x32xf32> to vector<8x32xf32>
    %681 = arith.mulf %678, %680 : vector<8x32xf32>
    %c0_287 = arith.constant 0 : index
    %c0_288 = arith.constant 0 : index
    %682 = vector.load %arg24[%c0_287, %c0_288] : memref<1x32xf32, #tpu.memory_space<vmem>>, vector<1x32xf32>
    %683 = vector.broadcast %682 : vector<1x32xf32> to vector<8x32xf32>
    %684 = arith.addf %681, %683 : vector<8x32xf32>
    %c0_289 = arith.constant 0 : index
    %c0_290 = arith.constant 0 : index
    %685 = vector.load %arg30[%c0_289, %c0_290] : memref<32x64xf32, #tpu.memory_space<vmem>>, vector<32x64xf32>
    %cst_291 = arith.constant dense<0.000000e+00> : vector<8x64xf32>
    %686 = tpu.matmul %684, %685, %cst_291 {dimension_numbers = #tpu.dot_dimension_numbers<[1], [0], [0], [1], [0, 0, 1, 1], [], []>} : vector<8x32xf32>, vector<32x64xf32>, vector<8x64xf32> -> vector<8x64xf32>
    %c0_292 = arith.constant 0 : index
    %c0_293 = arith.constant 0 : index
    %687 = vector.load %arg26[%c0_292, %c0_293] : memref<1x64xf32, #tpu.memory_space<vmem>>, vector<1x64xf32>
    %688 = vector.broadcast %687 : vector<1x64xf32> to vector<8x64xf32>
    %689 = arith.addf %686, %688 : vector<8x64xf32>
    %cst_294 = arith.constant 0.000000e+00 : f32
    %690 = vector.broadcast %cst_294 : f32 to vector<8x64xf32>
    %691 = arith.maximumf %689, %690 : vector<8x64xf32>
    %c0_295 = arith.constant 0 : index
    %c0_296 = arith.constant 0 : index
    %692 = vector.load %arg31[%c0_295, %c0_296] : memref<64x32xf32, #tpu.memory_space<vmem>>, vector<64x32xf32>
    %cst_297 = arith.constant dense<0.000000e+00> : vector<8x32xf32>
    %693 = tpu.matmul %691, %692, %cst_297 {dimension_numbers = #tpu.dot_dimension_numbers<[1], [0], [0], [1], [0, 0, 1, 1], [], []>} : vector<8x64xf32>, vector<64x32xf32>, vector<8x32xf32> -> vector<8x32xf32>
    %c0_298 = arith.constant 0 : index
    %c0_299 = arith.constant 0 : index
    %694 = vector.load %arg27[%c0_298, %c0_299] : memref<1x32xf32, #tpu.memory_space<vmem>>, vector<1x32xf32>
    %695 = vector.broadcast %694 : vector<1x32xf32> to vector<8x32xf32>
    %696 = arith.addf %693, %695 : vector<8x32xf32>
    %697 = arith.addf %684, %696 : vector<8x32xf32>
    %cst_300 = arith.constant dense<0.000000e+00> : vector<8xf32>
    %698 = vector.multi_reduction <add>, %697, %cst_300 [1] : vector<8x32xf32> to vector<8xf32>
    %699 = vector.shape_cast %698 : vector<8xf32> to vector<8x1xf32>
    %cst_301 = arith.constant 3.200000e+01 : f32
    %700 = vector.broadcast %cst_301 : f32 to vector<8x1xf32>
    %701 = arith.divf %699, %700 : vector<8x1xf32>
    %702 = vector.broadcast %701 : vector<8x1xf32> to vector<8x32xf32>
    %703 = arith.subf %697, %702 : vector<8x32xf32>
    %704 = arith.mulf %703, %703 : vector<8x32xf32>
    %cst_302 = arith.constant dense<0.000000e+00> : vector<8xf32>
    %705 = vector.multi_reduction <add>, %704, %cst_302 [1] : vector<8x32xf32> to vector<8xf32>
    %706 = vector.shape_cast %705 : vector<8xf32> to vector<8x1xf32>
    %cst_303 = arith.constant 3.200000e+01 : f32
    %707 = vector.broadcast %cst_303 : f32 to vector<8x1xf32>
    %708 = arith.divf %706, %707 : vector<8x1xf32>
    %709 = vector.broadcast %701 : vector<8x1xf32> to vector<8x32xf32>
    %710 = arith.subf %697, %709 : vector<8x32xf32>
    %cst_304 = arith.constant 9.99999974E-6 : f32
    %711 = vector.broadcast %cst_304 : f32 to vector<8x1xf32>
    %712 = arith.addf %708, %711 : vector<8x1xf32>
    %713 = math.rsqrt %712 : vector<8x1xf32>
    %714 = vector.broadcast %713 : vector<8x1xf32> to vector<8x32xf32>
    %715 = arith.mulf %710, %714 : vector<8x32xf32>
    %c0_305 = arith.constant 0 : index
    %c0_306 = arith.constant 0 : index
    %716 = vector.load %arg29[%c0_305, %c0_306] : memref<1x32xf32, #tpu.memory_space<vmem>>, vector<1x32xf32>
    %717 = vector.broadcast %716 : vector<1x32xf32> to vector<8x32xf32>
    %718 = arith.mulf %715, %717 : vector<8x32xf32>
    %c0_307 = arith.constant 0 : index
    %c0_308 = arith.constant 0 : index
    %719 = vector.load %arg28[%c0_307, %c0_308] : memref<1x32xf32, #tpu.memory_space<vmem>>, vector<1x32xf32>
    %720 = vector.broadcast %719 : vector<1x32xf32> to vector<8x32xf32>
    %721 = arith.addf %718, %720 : vector<8x32xf32>
    %cst_309 = arith.constant dense<0.000000e+00> : vector<8xf32>
    %722 = vector.multi_reduction <add>, %721, %cst_309 [1] : vector<8x32xf32> to vector<8xf32>
    %723 = vector.shape_cast %722 : vector<8xf32> to vector<8x1xf32>
    %cst_310 = arith.constant 3.200000e+01 : f32
    %724 = vector.broadcast %cst_310 : f32 to vector<8x1xf32>
    %725 = arith.divf %723, %724 : vector<8x1xf32>
    %726 = vector.broadcast %725 : vector<8x1xf32> to vector<8x32xf32>
    %727 = arith.subf %721, %726 : vector<8x32xf32>
    %728 = arith.mulf %727, %727 : vector<8x32xf32>
    %cst_311 = arith.constant dense<0.000000e+00> : vector<8xf32>
    %729 = vector.multi_reduction <add>, %728, %cst_311 [1] : vector<8x32xf32> to vector<8xf32>
    %730 = vector.shape_cast %729 : vector<8xf32> to vector<8x1xf32>
    %cst_312 = arith.constant 3.200000e+01 : f32
    %731 = vector.broadcast %cst_312 : f32 to vector<8x1xf32>
    %732 = arith.divf %730, %731 : vector<8x1xf32>
    %733 = vector.broadcast %725 : vector<8x1xf32> to vector<8x32xf32>
    %734 = arith.subf %721, %733 : vector<8x32xf32>
    %cst_313 = arith.constant 9.99999974E-6 : f32
    %735 = vector.broadcast %cst_313 : f32 to vector<8x1xf32>
    %736 = arith.addf %732, %735 : vector<8x1xf32>
    %737 = math.rsqrt %736 : vector<8x1xf32>
    %738 = vector.broadcast %737 : vector<8x1xf32> to vector<8x32xf32>
    %739 = arith.mulf %734, %738 : vector<8x32xf32>
    %c0_314 = arith.constant 0 : index
    %c0_315 = arith.constant 0 : index
    %740 = vector.load %arg105[%c0_314, %c0_315] : memref<1x32xf32, #tpu.memory_space<vmem>>, vector<1x32xf32>
    %741 = vector.broadcast %740 : vector<1x32xf32> to vector<8x32xf32>
    %742 = arith.mulf %739, %741 : vector<8x32xf32>
    %c0_316 = arith.constant 0 : index
    %c0_317 = arith.constant 0 : index
    %743 = vector.load %arg104[%c0_316, %c0_317] : memref<1x32xf32, #tpu.memory_space<vmem>>, vector<1x32xf32>
    %744 = vector.broadcast %743 : vector<1x32xf32> to vector<8x32xf32>
    %745 = arith.addf %742, %744 : vector<8x32xf32>
    %746 = arith.addf %745, %372 : vector<8x32xf32>
    %c0_318 = arith.constant 0 : index
    %c0_319 = arith.constant 0 : index
    %747 = vector.load %arg70[%c0_318, %c0_319] : memref<32x32xf32, #tpu.memory_space<vmem>>, vector<32x32xf32>
    %cst_320 = arith.constant dense<0.000000e+00> : vector<8x32xf32>
    %748 = tpu.matmul %746, %747, %cst_320 {dimension_numbers = #tpu.dot_dimension_numbers<[1], [0], [0], [1], [0, 0, 1, 1], [], []>} : vector<8x32xf32>, vector<32x32xf32>, vector<8x32xf32> -> vector<8x32xf32>
    %c0_321 = arith.constant 0 : index
    %c0_322 = arith.constant 0 : index
    %749 = vector.load %arg64[%c0_321, %c0_322] : memref<1x32xf32, #tpu.memory_space<vmem>>, vector<1x32xf32>
    %750 = vector.broadcast %749 : vector<1x32xf32> to vector<8x32xf32>
    %751 = arith.addf %748, %750 : vector<8x32xf32>
    %c0_323 = arith.constant 0 : index
    %c0_324 = arith.constant 0 : index
    %752 = vector.load %arg68[%c0_323, %c0_324] : memref<32x32xf32, #tpu.memory_space<vmem>>, vector<32x32xf32>
    %cst_325 = arith.constant dense<0.000000e+00> : vector<8x32xf32>
    %753 = tpu.matmul %746, %752, %cst_325 {dimension_numbers = #tpu.dot_dimension_numbers<[1], [0], [0], [1], [0, 0, 1, 1], [], []>} : vector<8x32xf32>, vector<32x32xf32>, vector<8x32xf32> -> vector<8x32xf32>
    %c0_326 = arith.constant 0 : index
    %c0_327 = arith.constant 0 : index
    %754 = vector.load %arg62[%c0_326, %c0_327] : memref<1x32xf32, #tpu.memory_space<vmem>>, vector<1x32xf32>
    %755 = vector.broadcast %754 : vector<1x32xf32> to vector<8x32xf32>
    %756 = arith.addf %753, %755 : vector<8x32xf32>
    %c0_328 = arith.constant 0 : index
    %c0_329 = arith.constant 0 : index
    %757 = vector.load %arg71[%c0_328, %c0_329] : memref<32x32xf32, #tpu.memory_space<vmem>>, vector<32x32xf32>
    %cst_330 = arith.constant dense<0.000000e+00> : vector<8x32xf32>
    %758 = tpu.matmul %745, %757, %cst_330 {dimension_numbers = #tpu.dot_dimension_numbers<[1], [0], [0], [1], [0, 0, 1, 1], [], []>} : vector<8x32xf32>, vector<32x32xf32>, vector<8x32xf32> -> vector<8x32xf32>
    %c0_331 = arith.constant 0 : index
    %c0_332 = arith.constant 0 : index
    %759 = vector.load %arg65[%c0_331, %c0_332] : memref<1x32xf32, #tpu.memory_space<vmem>>, vector<1x32xf32>
    %760 = vector.broadcast %759 : vector<1x32xf32> to vector<8x32xf32>
    %761 = arith.addf %758, %760 : vector<8x32xf32>
    %c0_333 = arith.constant 0 : index
    %c0_334 = arith.constant 0 : index
    %762 = vector.load %arg69[%c0_333, %c0_334] : memref<32x32xf32, #tpu.memory_space<vmem>>, vector<32x32xf32>
    %cst_335 = arith.constant 0.000000e+00 : f32
    %763 = vector.broadcast %cst_335 : f32 to vector<8x32xf32>
    %764 = vector.extract_strided_slice %751 {offsets = [0, 0], sizes = [8, 8], strides = [1, 1]} : vector<8x32xf32> to vector<8x8xf32>
    %765 = vector.extract_strided_slice %756 {offsets = [0, 0], sizes = [8, 8], strides = [1, 1]} : vector<8x32xf32> to vector<8x8xf32>
    %766 = vector.extract_strided_slice %761 {offsets = [0, 0], sizes = [8, 8], strides = [1, 1]} : vector<8x32xf32> to vector<8x8xf32>
    %cst_336 = arith.constant dense<0.000000e+00> : vector<8x8xf32>
    %767 = tpu.matmul %764, %765, %cst_336 {dimension_numbers = #tpu.dot_dimension_numbers<[1], [1], [0], [0], [0, 0, 1, 0], [], []>} : vector<8x8xf32>, vector<8x8xf32>, vector<8x8xf32> -> vector<8x8xf32>
    %cst_337 = arith.constant 0.353553385 : f32
    %768 = vector.broadcast %cst_337 : f32 to vector<8x8xf32>
    %769 = arith.mulf %767, %768 : vector<8x8xf32>
    %cst_338 = arith.constant dense<0xFF800000> : vector<8xf32>
    %770 = vector.multi_reduction <maximumf>, %769, %cst_338 [1] : vector<8x8xf32> to vector<8xf32>
    %771 = vector.shape_cast %770 : vector<8xf32> to vector<8x1xf32>
    %772 = vector.broadcast %771 : vector<8x1xf32> to vector<8x8xf32>
    %773 = arith.subf %769, %772 : vector<8x8xf32>
    %774 = math.exp %773 : vector<8x8xf32>
    %cst_339 = arith.constant dense<0.000000e+00> : vector<8xf32>
    %775 = vector.multi_reduction <add>, %774, %cst_339 [1] : vector<8x8xf32> to vector<8xf32>
    %776 = vector.shape_cast %775 : vector<8xf32> to vector<8x1xf32>
    %777 = tpu.reciprocal %776 {approx = true} : vector<8x1xf32> -> vector<8x1xf32>
    %778 = vector.broadcast %777 : vector<8x1xf32> to vector<8x8xf32>
    %779 = arith.mulf %774, %778 : vector<8x8xf32>
    %cst_340 = arith.constant dense<0.000000e+00> : vector<8x8xf32>
    %780 = tpu.matmul %779, %766, %cst_340 {dimension_numbers = #tpu.dot_dimension_numbers<[1], [0], [0], [1], [0, 0, 1, 1], [], []>} : vector<8x8xf32>, vector<8x8xf32>, vector<8x8xf32> -> vector<8x8xf32>
    %781 = vector.extract_strided_slice %762 {offsets = [0, 0], sizes = [8, 32], strides = [1, 1]} : vector<32x32xf32> to vector<8x32xf32>
    %cst_341 = arith.constant dense<0.000000e+00> : vector<8x32xf32>
    %782 = tpu.matmul %780, %781, %cst_341 {dimension_numbers = #tpu.dot_dimension_numbers<[1], [0], [0], [1], [0, 0, 1, 1], [], []>} : vector<8x8xf32>, vector<8x32xf32>, vector<8x32xf32> -> vector<8x32xf32>
    %783 = arith.addf %763, %782 : vector<8x32xf32>
    %784 = vector.extract_strided_slice %751 {offsets = [0, 8], sizes = [8, 8], strides = [1, 1]} : vector<8x32xf32> to vector<8x8xf32>
    %785 = vector.extract_strided_slice %756 {offsets = [0, 8], sizes = [8, 8], strides = [1, 1]} : vector<8x32xf32> to vector<8x8xf32>
    %786 = vector.extract_strided_slice %761 {offsets = [0, 8], sizes = [8, 8], strides = [1, 1]} : vector<8x32xf32> to vector<8x8xf32>
    %cst_342 = arith.constant dense<0.000000e+00> : vector<8x8xf32>
    %787 = tpu.matmul %784, %785, %cst_342 {dimension_numbers = #tpu.dot_dimension_numbers<[1], [1], [0], [0], [0, 0, 1, 0], [], []>} : vector<8x8xf32>, vector<8x8xf32>, vector<8x8xf32> -> vector<8x8xf32>
    %cst_343 = arith.constant 0.353553385 : f32
    %788 = vector.broadcast %cst_343 : f32 to vector<8x8xf32>
    %789 = arith.mulf %787, %788 : vector<8x8xf32>
    %cst_344 = arith.constant dense<0xFF800000> : vector<8xf32>
    %790 = vector.multi_reduction <maximumf>, %789, %cst_344 [1] : vector<8x8xf32> to vector<8xf32>
    %791 = vector.shape_cast %790 : vector<8xf32> to vector<8x1xf32>
    %792 = vector.broadcast %791 : vector<8x1xf32> to vector<8x8xf32>
    %793 = arith.subf %789, %792 : vector<8x8xf32>
    %794 = math.exp %793 : vector<8x8xf32>
    %cst_345 = arith.constant dense<0.000000e+00> : vector<8xf32>
    %795 = vector.multi_reduction <add>, %794, %cst_345 [1] : vector<8x8xf32> to vector<8xf32>
    %796 = vector.shape_cast %795 : vector<8xf32> to vector<8x1xf32>
    %797 = tpu.reciprocal %796 {approx = true} : vector<8x1xf32> -> vector<8x1xf32>
    %798 = vector.broadcast %797 : vector<8x1xf32> to vector<8x8xf32>
    %799 = arith.mulf %794, %798 : vector<8x8xf32>
    %cst_346 = arith.constant dense<0.000000e+00> : vector<8x8xf32>
    %800 = tpu.matmul %799, %786, %cst_346 {dimension_numbers = #tpu.dot_dimension_numbers<[1], [0], [0], [1], [0, 0, 1, 1], [], []>} : vector<8x8xf32>, vector<8x8xf32>, vector<8x8xf32> -> vector<8x8xf32>
    %801 = vector.extract_strided_slice %762 {offsets = [8, 0], sizes = [8, 32], strides = [1, 1]} : vector<32x32xf32> to vector<8x32xf32>
    %cst_347 = arith.constant dense<0.000000e+00> : vector<8x32xf32>
    %802 = tpu.matmul %800, %801, %cst_347 {dimension_numbers = #tpu.dot_dimension_numbers<[1], [0], [0], [1], [0, 0, 1, 1], [], []>} : vector<8x8xf32>, vector<8x32xf32>, vector<8x32xf32> -> vector<8x32xf32>
    %803 = arith.addf %783, %802 : vector<8x32xf32>
    %804 = vector.extract_strided_slice %751 {offsets = [0, 16], sizes = [8, 8], strides = [1, 1]} : vector<8x32xf32> to vector<8x8xf32>
    %805 = vector.extract_strided_slice %756 {offsets = [0, 16], sizes = [8, 8], strides = [1, 1]} : vector<8x32xf32> to vector<8x8xf32>
    %806 = vector.extract_strided_slice %761 {offsets = [0, 16], sizes = [8, 8], strides = [1, 1]} : vector<8x32xf32> to vector<8x8xf32>
    %cst_348 = arith.constant dense<0.000000e+00> : vector<8x8xf32>
    %807 = tpu.matmul %804, %805, %cst_348 {dimension_numbers = #tpu.dot_dimension_numbers<[1], [1], [0], [0], [0, 0, 1, 0], [], []>} : vector<8x8xf32>, vector<8x8xf32>, vector<8x8xf32> -> vector<8x8xf32>
    %cst_349 = arith.constant 0.353553385 : f32
    %808 = vector.broadcast %cst_349 : f32 to vector<8x8xf32>
    %809 = arith.mulf %807, %808 : vector<8x8xf32>
    %cst_350 = arith.constant dense<0xFF800000> : vector<8xf32>
    %810 = vector.multi_reduction <maximumf>, %809, %cst_350 [1] : vector<8x8xf32> to vector<8xf32>
    %811 = vector.shape_cast %810 : vector<8xf32> to vector<8x1xf32>
    %812 = vector.broadcast %811 : vector<8x1xf32> to vector<8x8xf32>
    %813 = arith.subf %809, %812 : vector<8x8xf32>
    %814 = math.exp %813 : vector<8x8xf32>
    %cst_351 = arith.constant dense<0.000000e+00> : vector<8xf32>
    %815 = vector.multi_reduction <add>, %814, %cst_351 [1] : vector<8x8xf32> to vector<8xf32>
    %816 = vector.shape_cast %815 : vector<8xf32> to vector<8x1xf32>
    %817 = tpu.reciprocal %816 {approx = true} : vector<8x1xf32> -> vector<8x1xf32>
    %818 = vector.broadcast %817 : vector<8x1xf32> to vector<8x8xf32>
    %819 = arith.mulf %814, %818 : vector<8x8xf32>
    %cst_352 = arith.constant dense<0.000000e+00> : vector<8x8xf32>
    %820 = tpu.matmul %819, %806, %cst_352 {dimension_numbers = #tpu.dot_dimension_numbers<[1], [0], [0], [1], [0, 0, 1, 1], [], []>} : vector<8x8xf32>, vector<8x8xf32>, vector<8x8xf32> -> vector<8x8xf32>
    %821 = vector.extract_strided_slice %762 {offsets = [16, 0], sizes = [8, 32], strides = [1, 1]} : vector<32x32xf32> to vector<8x32xf32>
    %cst_353 = arith.constant dense<0.000000e+00> : vector<8x32xf32>
    %822 = tpu.matmul %820, %821, %cst_353 {dimension_numbers = #tpu.dot_dimension_numbers<[1], [0], [0], [1], [0, 0, 1, 1], [], []>} : vector<8x8xf32>, vector<8x32xf32>, vector<8x32xf32> -> vector<8x32xf32>
    %823 = arith.addf %803, %822 : vector<8x32xf32>
    %824 = vector.extract_strided_slice %751 {offsets = [0, 24], sizes = [8, 8], strides = [1, 1]} : vector<8x32xf32> to vector<8x8xf32>
    %825 = vector.extract_strided_slice %756 {offsets = [0, 24], sizes = [8, 8], strides = [1, 1]} : vector<8x32xf32> to vector<8x8xf32>
    %826 = vector.extract_strided_slice %761 {offsets = [0, 24], sizes = [8, 8], strides = [1, 1]} : vector<8x32xf32> to vector<8x8xf32>
    %cst_354 = arith.constant dense<0.000000e+00> : vector<8x8xf32>
    %827 = tpu.matmul %824, %825, %cst_354 {dimension_numbers = #tpu.dot_dimension_numbers<[1], [1], [0], [0], [0, 0, 1, 0], [], []>} : vector<8x8xf32>, vector<8x8xf32>, vector<8x8xf32> -> vector<8x8xf32>
    %cst_355 = arith.constant 0.353553385 : f32
    %828 = vector.broadcast %cst_355 : f32 to vector<8x8xf32>
    %829 = arith.mulf %827, %828 : vector<8x8xf32>
    %cst_356 = arith.constant dense<0xFF800000> : vector<8xf32>
    %830 = vector.multi_reduction <maximumf>, %829, %cst_356 [1] : vector<8x8xf32> to vector<8xf32>
    %831 = vector.shape_cast %830 : vector<8xf32> to vector<8x1xf32>
    %832 = vector.broadcast %831 : vector<8x1xf32> to vector<8x8xf32>
    %833 = arith.subf %829, %832 : vector<8x8xf32>
    %834 = math.exp %833 : vector<8x8xf32>
    %cst_357 = arith.constant dense<0.000000e+00> : vector<8xf32>
    %835 = vector.multi_reduction <add>, %834, %cst_357 [1] : vector<8x8xf32> to vector<8xf32>
    %836 = vector.shape_cast %835 : vector<8xf32> to vector<8x1xf32>
    %837 = tpu.reciprocal %836 {approx = true} : vector<8x1xf32> -> vector<8x1xf32>
    %838 = vector.broadcast %837 : vector<8x1xf32> to vector<8x8xf32>
    %839 = arith.mulf %834, %838 : vector<8x8xf32>
    %cst_358 = arith.constant dense<0.000000e+00> : vector<8x8xf32>
    %840 = tpu.matmul %839, %826, %cst_358 {dimension_numbers = #tpu.dot_dimension_numbers<[1], [0], [0], [1], [0, 0, 1, 1], [], []>} : vector<8x8xf32>, vector<8x8xf32>, vector<8x8xf32> -> vector<8x8xf32>
    %841 = vector.extract_strided_slice %762 {offsets = [24, 0], sizes = [8, 32], strides = [1, 1]} : vector<32x32xf32> to vector<8x32xf32>
    %cst_359 = arith.constant dense<0.000000e+00> : vector<8x32xf32>
    %842 = tpu.matmul %840, %841, %cst_359 {dimension_numbers = #tpu.dot_dimension_numbers<[1], [0], [0], [1], [0, 0, 1, 1], [], []>} : vector<8x8xf32>, vector<8x32xf32>, vector<8x32xf32> -> vector<8x32xf32>
    %843 = arith.addf %823, %842 : vector<8x32xf32>
    %c0_360 = arith.constant 0 : index
    %c0_361 = arith.constant 0 : index
    %844 = vector.load %arg63[%c0_360, %c0_361] : memref<1x32xf32, #tpu.memory_space<vmem>>, vector<1x32xf32>
    %845 = vector.broadcast %844 : vector<1x32xf32> to vector<8x32xf32>
    %846 = arith.addf %843, %845 : vector<8x32xf32>
    %847 = arith.addf %746, %846 : vector<8x32xf32>
    %cst_362 = arith.constant dense<0.000000e+00> : vector<8xf32>
    %848 = vector.multi_reduction <add>, %847, %cst_362 [1] : vector<8x32xf32> to vector<8xf32>
    %849 = vector.shape_cast %848 : vector<8xf32> to vector<8x1xf32>
    %cst_363 = arith.constant 3.200000e+01 : f32
    %850 = vector.broadcast %cst_363 : f32 to vector<8x1xf32>
    %851 = arith.divf %849, %850 : vector<8x1xf32>
    %852 = vector.broadcast %851 : vector<8x1xf32> to vector<8x32xf32>
    %853 = arith.subf %847, %852 : vector<8x32xf32>
    %854 = arith.mulf %853, %853 : vector<8x32xf32>
    %cst_364 = arith.constant dense<0.000000e+00> : vector<8xf32>
    %855 = vector.multi_reduction <add>, %854, %cst_364 [1] : vector<8x32xf32> to vector<8xf32>
    %856 = vector.shape_cast %855 : vector<8xf32> to vector<8x1xf32>
    %cst_365 = arith.constant 3.200000e+01 : f32
    %857 = vector.broadcast %cst_365 : f32 to vector<8x1xf32>
    %858 = arith.divf %856, %857 : vector<8x1xf32>
    %859 = vector.broadcast %851 : vector<8x1xf32> to vector<8x32xf32>
    %860 = arith.subf %847, %859 : vector<8x32xf32>
    %cst_366 = arith.constant 9.99999974E-6 : f32
    %861 = vector.broadcast %cst_366 : f32 to vector<8x1xf32>
    %862 = arith.addf %858, %861 : vector<8x1xf32>
    %863 = math.rsqrt %862 : vector<8x1xf32>
    %864 = vector.broadcast %863 : vector<8x1xf32> to vector<8x32xf32>
    %865 = arith.mulf %860, %864 : vector<8x32xf32>
    %c0_367 = arith.constant 0 : index
    %c0_368 = arith.constant 0 : index
    %866 = vector.load %arg67[%c0_367, %c0_368] : memref<1x32xf32, #tpu.memory_space<vmem>>, vector<1x32xf32>
    %867 = vector.broadcast %866 : vector<1x32xf32> to vector<8x32xf32>
    %868 = arith.mulf %865, %867 : vector<8x32xf32>
    %c0_369 = arith.constant 0 : index
    %c0_370 = arith.constant 0 : index
    %869 = vector.load %arg66[%c0_369, %c0_370] : memref<1x32xf32, #tpu.memory_space<vmem>>, vector<1x32xf32>
    %870 = vector.broadcast %869 : vector<1x32xf32> to vector<8x32xf32>
    %871 = arith.addf %868, %870 : vector<8x32xf32>
    %872 = arith.addf %745, %871 : vector<8x32xf32>
    %cst_371 = arith.constant dense<0.000000e+00> : vector<8xf32>
    %873 = vector.multi_reduction <add>, %872, %cst_371 [1] : vector<8x32xf32> to vector<8xf32>
    %874 = vector.shape_cast %873 : vector<8xf32> to vector<8x1xf32>
    %cst_372 = arith.constant 3.200000e+01 : f32
    %875 = vector.broadcast %cst_372 : f32 to vector<8x1xf32>
    %876 = arith.divf %874, %875 : vector<8x1xf32>
    %877 = vector.broadcast %876 : vector<8x1xf32> to vector<8x32xf32>
    %878 = arith.subf %872, %877 : vector<8x32xf32>
    %879 = arith.mulf %878, %878 : vector<8x32xf32>
    %cst_373 = arith.constant dense<0.000000e+00> : vector<8xf32>
    %880 = vector.multi_reduction <add>, %879, %cst_373 [1] : vector<8x32xf32> to vector<8xf32>
    %881 = vector.shape_cast %880 : vector<8xf32> to vector<8x1xf32>
    %cst_374 = arith.constant 3.200000e+01 : f32
    %882 = vector.broadcast %cst_374 : f32 to vector<8x1xf32>
    %883 = arith.divf %881, %882 : vector<8x1xf32>
    %884 = vector.broadcast %876 : vector<8x1xf32> to vector<8x32xf32>
    %885 = arith.subf %872, %884 : vector<8x32xf32>
    %cst_375 = arith.constant 9.99999974E-6 : f32
    %886 = vector.broadcast %cst_375 : f32 to vector<8x1xf32>
    %887 = arith.addf %883, %886 : vector<8x1xf32>
    %888 = math.rsqrt %887 : vector<8x1xf32>
    %889 = vector.broadcast %888 : vector<8x1xf32> to vector<8x32xf32>
    %890 = arith.mulf %885, %889 : vector<8x32xf32>
    %c0_376 = arith.constant 0 : index
    %c0_377 = arith.constant 0 : index
    %891 = vector.load %arg53[%c0_376, %c0_377] : memref<1x32xf32, #tpu.memory_space<vmem>>, vector<1x32xf32>
    %892 = vector.broadcast %891 : vector<1x32xf32> to vector<8x32xf32>
    %893 = arith.mulf %890, %892 : vector<8x32xf32>
    %c0_378 = arith.constant 0 : index
    %c0_379 = arith.constant 0 : index
    %894 = vector.load %arg52[%c0_378, %c0_379] : memref<1x32xf32, #tpu.memory_space<vmem>>, vector<1x32xf32>
    %895 = vector.broadcast %894 : vector<1x32xf32> to vector<8x32xf32>
    %896 = arith.addf %893, %895 : vector<8x32xf32>
    %897 = arith.addf %896, %372 : vector<8x32xf32>
    %c0_380 = arith.constant 0 : index
    %c0_381 = arith.constant 0 : index
    %898 = vector.load %arg50[%c0_380, %c0_381] : memref<32x32xf32, #tpu.memory_space<vmem>>, vector<32x32xf32>
    %cst_382 = arith.constant dense<0.000000e+00> : vector<8x32xf32>
    %899 = tpu.matmul %897, %898, %cst_382 {dimension_numbers = #tpu.dot_dimension_numbers<[1], [0], [0], [1], [0, 0, 1, 1], [], []>} : vector<8x32xf32>, vector<32x32xf32>, vector<8x32xf32> -> vector<8x32xf32>
    %c0_383 = arith.constant 0 : index
    %c0_384 = arith.constant 0 : index
    %900 = vector.load %arg44[%c0_383, %c0_384] : memref<1x32xf32, #tpu.memory_space<vmem>>, vector<1x32xf32>
    %901 = vector.broadcast %900 : vector<1x32xf32> to vector<8x32xf32>
    %902 = arith.addf %899, %901 : vector<8x32xf32>
    %c0_385 = arith.constant 0 : index
    %c0_386 = arith.constant 0 : index
    %903 = vector.load %arg48[%c0_385, %c0_386] : memref<32x32xf32, #tpu.memory_space<vmem>>, vector<32x32xf32>
    %cst_387 = arith.constant dense<0.000000e+00> : vector<16x32xf32>
    %904 = tpu.matmul %374, %903, %cst_387 {dimension_numbers = #tpu.dot_dimension_numbers<[1], [0], [0], [1], [0, 0, 1, 1], [], []>} : vector<16x32xf32>, vector<32x32xf32>, vector<16x32xf32> -> vector<16x32xf32>
    %c0_388 = arith.constant 0 : index
    %c0_389 = arith.constant 0 : index
    %905 = vector.load %arg42[%c0_388, %c0_389] : memref<1x32xf32, #tpu.memory_space<vmem>>, vector<1x32xf32>
    %906 = vector.broadcast %905 : vector<1x32xf32> to vector<16x32xf32>
    %907 = arith.addf %904, %906 : vector<16x32xf32>
    %c0_390 = arith.constant 0 : index
    %c0_391 = arith.constant 0 : index
    %908 = vector.load %arg51[%c0_390, %c0_391] : memref<32x32xf32, #tpu.memory_space<vmem>>, vector<32x32xf32>
    %cst_392 = arith.constant dense<0.000000e+00> : vector<16x32xf32>
    %909 = tpu.matmul %371, %908, %cst_392 {dimension_numbers = #tpu.dot_dimension_numbers<[1], [0], [0], [1], [0, 0, 1, 1], [], []>} : vector<16x32xf32>, vector<32x32xf32>, vector<16x32xf32> -> vector<16x32xf32>
    %c0_393 = arith.constant 0 : index
    %c0_394 = arith.constant 0 : index
    %910 = vector.load %arg45[%c0_393, %c0_394] : memref<1x32xf32, #tpu.memory_space<vmem>>, vector<1x32xf32>
    %911 = vector.broadcast %910 : vector<1x32xf32> to vector<16x32xf32>
    %912 = arith.addf %909, %911 : vector<16x32xf32>
    %c0_395 = arith.constant 0 : index
    %c0_396 = arith.constant 0 : index
    %913 = vector.load %arg49[%c0_395, %c0_396] : memref<32x32xf32, #tpu.memory_space<vmem>>, vector<32x32xf32>
    %cst_397 = arith.constant 0.000000e+00 : f32
    %914 = vector.broadcast %cst_397 : f32 to vector<8x32xf32>
    %915 = vector.extract_strided_slice %902 {offsets = [0, 0], sizes = [8, 8], strides = [1, 1]} : vector<8x32xf32> to vector<8x8xf32>
    %916 = vector.extract_strided_slice %907 {offsets = [0, 0], sizes = [16, 8], strides = [1, 1]} : vector<16x32xf32> to vector<16x8xf32>
    %917 = vector.extract_strided_slice %912 {offsets = [0, 0], sizes = [16, 8], strides = [1, 1]} : vector<16x32xf32> to vector<16x8xf32>
    %cst_398 = arith.constant dense<0.000000e+00> : vector<8x16xf32>
    %918 = tpu.matmul %915, %916, %cst_398 {dimension_numbers = #tpu.dot_dimension_numbers<[1], [1], [0], [0], [0, 0, 1, 0], [], []>} : vector<8x8xf32>, vector<16x8xf32>, vector<8x16xf32> -> vector<8x16xf32>
    %cst_399 = arith.constant 0.353553385 : f32
    %919 = vector.broadcast %cst_399 : f32 to vector<8x16xf32>
    %920 = arith.mulf %918, %919 : vector<8x16xf32>
    %921 = vector.broadcast %5 : vector<1x16xf32> to vector<8x16xf32>
    %922 = arith.addf %920, %921 : vector<8x16xf32>
    %cst_400 = arith.constant dense<0xFF800000> : vector<8xf32>
    %923 = vector.multi_reduction <maximumf>, %922, %cst_400 [1] : vector<8x16xf32> to vector<8xf32>
    %924 = vector.shape_cast %923 : vector<8xf32> to vector<8x1xf32>
    %925 = vector.broadcast %924 : vector<8x1xf32> to vector<8x16xf32>
    %926 = arith.subf %922, %925 : vector<8x16xf32>
    %927 = math.exp %926 : vector<8x16xf32>
    %cst_401 = arith.constant dense<0.000000e+00> : vector<8xf32>
    %928 = vector.multi_reduction <add>, %927, %cst_401 [1] : vector<8x16xf32> to vector<8xf32>
    %929 = vector.shape_cast %928 : vector<8xf32> to vector<8x1xf32>
    %930 = tpu.reciprocal %929 {approx = true} : vector<8x1xf32> -> vector<8x1xf32>
    %931 = vector.broadcast %930 : vector<8x1xf32> to vector<8x16xf32>
    %932 = arith.mulf %927, %931 : vector<8x16xf32>
    %cst_402 = arith.constant dense<0.000000e+00> : vector<8x8xf32>
    %933 = tpu.matmul %932, %917, %cst_402 {dimension_numbers = #tpu.dot_dimension_numbers<[1], [0], [0], [1], [0, 0, 1, 1], [], []>} : vector<8x16xf32>, vector<16x8xf32>, vector<8x8xf32> -> vector<8x8xf32>
    %934 = vector.extract_strided_slice %913 {offsets = [0, 0], sizes = [8, 32], strides = [1, 1]} : vector<32x32xf32> to vector<8x32xf32>
    %cst_403 = arith.constant dense<0.000000e+00> : vector<8x32xf32>
    %935 = tpu.matmul %933, %934, %cst_403 {dimension_numbers = #tpu.dot_dimension_numbers<[1], [0], [0], [1], [0, 0, 1, 1], [], []>} : vector<8x8xf32>, vector<8x32xf32>, vector<8x32xf32> -> vector<8x32xf32>
    %936 = arith.addf %914, %935 : vector<8x32xf32>
    %937 = vector.extract_strided_slice %902 {offsets = [0, 8], sizes = [8, 8], strides = [1, 1]} : vector<8x32xf32> to vector<8x8xf32>
    %938 = vector.extract_strided_slice %907 {offsets = [0, 8], sizes = [16, 8], strides = [1, 1]} : vector<16x32xf32> to vector<16x8xf32>
    %939 = vector.extract_strided_slice %912 {offsets = [0, 8], sizes = [16, 8], strides = [1, 1]} : vector<16x32xf32> to vector<16x8xf32>
    %cst_404 = arith.constant dense<0.000000e+00> : vector<8x16xf32>
    %940 = tpu.matmul %937, %938, %cst_404 {dimension_numbers = #tpu.dot_dimension_numbers<[1], [1], [0], [0], [0, 0, 1, 0], [], []>} : vector<8x8xf32>, vector<16x8xf32>, vector<8x16xf32> -> vector<8x16xf32>
    %cst_405 = arith.constant 0.353553385 : f32
    %941 = vector.broadcast %cst_405 : f32 to vector<8x16xf32>
    %942 = arith.mulf %940, %941 : vector<8x16xf32>
    %943 = vector.broadcast %5 : vector<1x16xf32> to vector<8x16xf32>
    %944 = arith.addf %942, %943 : vector<8x16xf32>
    %cst_406 = arith.constant dense<0xFF800000> : vector<8xf32>
    %945 = vector.multi_reduction <maximumf>, %944, %cst_406 [1] : vector<8x16xf32> to vector<8xf32>
    %946 = vector.shape_cast %945 : vector<8xf32> to vector<8x1xf32>
    %947 = vector.broadcast %946 : vector<8x1xf32> to vector<8x16xf32>
    %948 = arith.subf %944, %947 : vector<8x16xf32>
    %949 = math.exp %948 : vector<8x16xf32>
    %cst_407 = arith.constant dense<0.000000e+00> : vector<8xf32>
    %950 = vector.multi_reduction <add>, %949, %cst_407 [1] : vector<8x16xf32> to vector<8xf32>
    %951 = vector.shape_cast %950 : vector<8xf32> to vector<8x1xf32>
    %952 = tpu.reciprocal %951 {approx = true} : vector<8x1xf32> -> vector<8x1xf32>
    %953 = vector.broadcast %952 : vector<8x1xf32> to vector<8x16xf32>
    %954 = arith.mulf %949, %953 : vector<8x16xf32>
    %cst_408 = arith.constant dense<0.000000e+00> : vector<8x8xf32>
    %955 = tpu.matmul %954, %939, %cst_408 {dimension_numbers = #tpu.dot_dimension_numbers<[1], [0], [0], [1], [0, 0, 1, 1], [], []>} : vector<8x16xf32>, vector<16x8xf32>, vector<8x8xf32> -> vector<8x8xf32>
    %956 = vector.extract_strided_slice %913 {offsets = [8, 0], sizes = [8, 32], strides = [1, 1]} : vector<32x32xf32> to vector<8x32xf32>
    %cst_409 = arith.constant dense<0.000000e+00> : vector<8x32xf32>
    %957 = tpu.matmul %955, %956, %cst_409 {dimension_numbers = #tpu.dot_dimension_numbers<[1], [0], [0], [1], [0, 0, 1, 1], [], []>} : vector<8x8xf32>, vector<8x32xf32>, vector<8x32xf32> -> vector<8x32xf32>
    %958 = arith.addf %936, %957 : vector<8x32xf32>
    %959 = vector.extract_strided_slice %902 {offsets = [0, 16], sizes = [8, 8], strides = [1, 1]} : vector<8x32xf32> to vector<8x8xf32>
    %960 = vector.extract_strided_slice %907 {offsets = [0, 16], sizes = [16, 8], strides = [1, 1]} : vector<16x32xf32> to vector<16x8xf32>
    %961 = vector.extract_strided_slice %912 {offsets = [0, 16], sizes = [16, 8], strides = [1, 1]} : vector<16x32xf32> to vector<16x8xf32>
    %cst_410 = arith.constant dense<0.000000e+00> : vector<8x16xf32>
    %962 = tpu.matmul %959, %960, %cst_410 {dimension_numbers = #tpu.dot_dimension_numbers<[1], [1], [0], [0], [0, 0, 1, 0], [], []>} : vector<8x8xf32>, vector<16x8xf32>, vector<8x16xf32> -> vector<8x16xf32>
    %cst_411 = arith.constant 0.353553385 : f32
    %963 = vector.broadcast %cst_411 : f32 to vector<8x16xf32>
    %964 = arith.mulf %962, %963 : vector<8x16xf32>
    %965 = vector.broadcast %5 : vector<1x16xf32> to vector<8x16xf32>
    %966 = arith.addf %964, %965 : vector<8x16xf32>
    %cst_412 = arith.constant dense<0xFF800000> : vector<8xf32>
    %967 = vector.multi_reduction <maximumf>, %966, %cst_412 [1] : vector<8x16xf32> to vector<8xf32>
    %968 = vector.shape_cast %967 : vector<8xf32> to vector<8x1xf32>
    %969 = vector.broadcast %968 : vector<8x1xf32> to vector<8x16xf32>
    %970 = arith.subf %966, %969 : vector<8x16xf32>
    %971 = math.exp %970 : vector<8x16xf32>
    %cst_413 = arith.constant dense<0.000000e+00> : vector<8xf32>
    %972 = vector.multi_reduction <add>, %971, %cst_413 [1] : vector<8x16xf32> to vector<8xf32>
    %973 = vector.shape_cast %972 : vector<8xf32> to vector<8x1xf32>
    %974 = tpu.reciprocal %973 {approx = true} : vector<8x1xf32> -> vector<8x1xf32>
    %975 = vector.broadcast %974 : vector<8x1xf32> to vector<8x16xf32>
    %976 = arith.mulf %971, %975 : vector<8x16xf32>
    %cst_414 = arith.constant dense<0.000000e+00> : vector<8x8xf32>
    %977 = tpu.matmul %976, %961, %cst_414 {dimension_numbers = #tpu.dot_dimension_numbers<[1], [0], [0], [1], [0, 0, 1, 1], [], []>} : vector<8x16xf32>, vector<16x8xf32>, vector<8x8xf32> -> vector<8x8xf32>
    %978 = vector.extract_strided_slice %913 {offsets = [16, 0], sizes = [8, 32], strides = [1, 1]} : vector<32x32xf32> to vector<8x32xf32>
    %cst_415 = arith.constant dense<0.000000e+00> : vector<8x32xf32>
    %979 = tpu.matmul %977, %978, %cst_415 {dimension_numbers = #tpu.dot_dimension_numbers<[1], [0], [0], [1], [0, 0, 1, 1], [], []>} : vector<8x8xf32>, vector<8x32xf32>, vector<8x32xf32> -> vector<8x32xf32>
    %980 = arith.addf %958, %979 : vector<8x32xf32>
    %981 = vector.extract_strided_slice %902 {offsets = [0, 24], sizes = [8, 8], strides = [1, 1]} : vector<8x32xf32> to vector<8x8xf32>
    %982 = vector.extract_strided_slice %907 {offsets = [0, 24], sizes = [16, 8], strides = [1, 1]} : vector<16x32xf32> to vector<16x8xf32>
    %983 = vector.extract_strided_slice %912 {offsets = [0, 24], sizes = [16, 8], strides = [1, 1]} : vector<16x32xf32> to vector<16x8xf32>
    %cst_416 = arith.constant dense<0.000000e+00> : vector<8x16xf32>
    %984 = tpu.matmul %981, %982, %cst_416 {dimension_numbers = #tpu.dot_dimension_numbers<[1], [1], [0], [0], [0, 0, 1, 0], [], []>} : vector<8x8xf32>, vector<16x8xf32>, vector<8x16xf32> -> vector<8x16xf32>
    %cst_417 = arith.constant 0.353553385 : f32
    %985 = vector.broadcast %cst_417 : f32 to vector<8x16xf32>
    %986 = arith.mulf %984, %985 : vector<8x16xf32>
    %987 = vector.broadcast %5 : vector<1x16xf32> to vector<8x16xf32>
    %988 = arith.addf %986, %987 : vector<8x16xf32>
    %cst_418 = arith.constant dense<0xFF800000> : vector<8xf32>
    %989 = vector.multi_reduction <maximumf>, %988, %cst_418 [1] : vector<8x16xf32> to vector<8xf32>
    %990 = vector.shape_cast %989 : vector<8xf32> to vector<8x1xf32>
    %991 = vector.broadcast %990 : vector<8x1xf32> to vector<8x16xf32>
    %992 = arith.subf %988, %991 : vector<8x16xf32>
    %993 = math.exp %992 : vector<8x16xf32>
    %cst_419 = arith.constant dense<0.000000e+00> : vector<8xf32>
    %994 = vector.multi_reduction <add>, %993, %cst_419 [1] : vector<8x16xf32> to vector<8xf32>
    %995 = vector.shape_cast %994 : vector<8xf32> to vector<8x1xf32>
    %996 = tpu.reciprocal %995 {approx = true} : vector<8x1xf32> -> vector<8x1xf32>
    %997 = vector.broadcast %996 : vector<8x1xf32> to vector<8x16xf32>
    %998 = arith.mulf %993, %997 : vector<8x16xf32>
    %cst_420 = arith.constant dense<0.000000e+00> : vector<8x8xf32>
    %999 = tpu.matmul %998, %983, %cst_420 {dimension_numbers = #tpu.dot_dimension_numbers<[1], [0], [0], [1], [0, 0, 1, 1], [], []>} : vector<8x16xf32>, vector<16x8xf32>, vector<8x8xf32> -> vector<8x8xf32>
    %1000 = vector.extract_strided_slice %913 {offsets = [24, 0], sizes = [8, 32], strides = [1, 1]} : vector<32x32xf32> to vector<8x32xf32>
    %cst_421 = arith.constant dense<0.000000e+00> : vector<8x32xf32>
    %1001 = tpu.matmul %999, %1000, %cst_421 {dimension_numbers = #tpu.dot_dimension_numbers<[1], [0], [0], [1], [0, 0, 1, 1], [], []>} : vector<8x8xf32>, vector<8x32xf32>, vector<8x32xf32> -> vector<8x32xf32>
    %1002 = arith.addf %980, %1001 : vector<8x32xf32>
    %c0_422 = arith.constant 0 : index
    %c0_423 = arith.constant 0 : index
    %1003 = vector.load %arg43[%c0_422, %c0_423] : memref<1x32xf32, #tpu.memory_space<vmem>>, vector<1x32xf32>
    %1004 = vector.broadcast %1003 : vector<1x32xf32> to vector<8x32xf32>
    %1005 = arith.addf %1002, %1004 : vector<8x32xf32>
    %1006 = arith.addf %897, %1005 : vector<8x32xf32>
    %cst_424 = arith.constant dense<0.000000e+00> : vector<8xf32>
    %1007 = vector.multi_reduction <add>, %1006, %cst_424 [1] : vector<8x32xf32> to vector<8xf32>
    %1008 = vector.shape_cast %1007 : vector<8xf32> to vector<8x1xf32>
    %cst_425 = arith.constant 3.200000e+01 : f32
    %1009 = vector.broadcast %cst_425 : f32 to vector<8x1xf32>
    %1010 = arith.divf %1008, %1009 : vector<8x1xf32>
    %1011 = vector.broadcast %1010 : vector<8x1xf32> to vector<8x32xf32>
    %1012 = arith.subf %1006, %1011 : vector<8x32xf32>
    %1013 = arith.mulf %1012, %1012 : vector<8x32xf32>
    %cst_426 = arith.constant dense<0.000000e+00> : vector<8xf32>
    %1014 = vector.multi_reduction <add>, %1013, %cst_426 [1] : vector<8x32xf32> to vector<8xf32>
    %1015 = vector.shape_cast %1014 : vector<8xf32> to vector<8x1xf32>
    %cst_427 = arith.constant 3.200000e+01 : f32
    %1016 = vector.broadcast %cst_427 : f32 to vector<8x1xf32>
    %1017 = arith.divf %1015, %1016 : vector<8x1xf32>
    %1018 = vector.broadcast %1010 : vector<8x1xf32> to vector<8x32xf32>
    %1019 = arith.subf %1006, %1018 : vector<8x32xf32>
    %cst_428 = arith.constant 9.99999974E-6 : f32
    %1020 = vector.broadcast %cst_428 : f32 to vector<8x1xf32>
    %1021 = arith.addf %1017, %1020 : vector<8x1xf32>
    %1022 = math.rsqrt %1021 : vector<8x1xf32>
    %1023 = vector.broadcast %1022 : vector<8x1xf32> to vector<8x32xf32>
    %1024 = arith.mulf %1019, %1023 : vector<8x32xf32>
    %c0_429 = arith.constant 0 : index
    %c0_430 = arith.constant 0 : index
    %1025 = vector.load %arg47[%c0_429, %c0_430] : memref<1x32xf32, #tpu.memory_space<vmem>>, vector<1x32xf32>
    %1026 = vector.broadcast %1025 : vector<1x32xf32> to vector<8x32xf32>
    %1027 = arith.mulf %1024, %1026 : vector<8x32xf32>
    %c0_431 = arith.constant 0 : index
    %c0_432 = arith.constant 0 : index
    %1028 = vector.load %arg46[%c0_431, %c0_432] : memref<1x32xf32, #tpu.memory_space<vmem>>, vector<1x32xf32>
    %1029 = vector.broadcast %1028 : vector<1x32xf32> to vector<8x32xf32>
    %1030 = arith.addf %1027, %1029 : vector<8x32xf32>
    %1031 = arith.addf %897, %1030 : vector<8x32xf32>
    %cst_433 = arith.constant dense<0.000000e+00> : vector<8xf32>
    %1032 = vector.multi_reduction <add>, %1031, %cst_433 [1] : vector<8x32xf32> to vector<8xf32>
    %1033 = vector.shape_cast %1032 : vector<8xf32> to vector<8x1xf32>
    %cst_434 = arith.constant 3.200000e+01 : f32
    %1034 = vector.broadcast %cst_434 : f32 to vector<8x1xf32>
    %1035 = arith.divf %1033, %1034 : vector<8x1xf32>
    %1036 = vector.broadcast %1035 : vector<8x1xf32> to vector<8x32xf32>
    %1037 = arith.subf %1031, %1036 : vector<8x32xf32>
    %1038 = arith.mulf %1037, %1037 : vector<8x32xf32>
    %cst_435 = arith.constant dense<0.000000e+00> : vector<8xf32>
    %1039 = vector.multi_reduction <add>, %1038, %cst_435 [1] : vector<8x32xf32> to vector<8xf32>
    %1040 = vector.shape_cast %1039 : vector<8xf32> to vector<8x1xf32>
    %cst_436 = arith.constant 3.200000e+01 : f32
    %1041 = vector.broadcast %cst_436 : f32 to vector<8x1xf32>
    %1042 = arith.divf %1040, %1041 : vector<8x1xf32>
    %1043 = vector.broadcast %1035 : vector<8x1xf32> to vector<8x32xf32>
    %1044 = arith.subf %1031, %1043 : vector<8x32xf32>
    %cst_437 = arith.constant 9.99999974E-6 : f32
    %1045 = vector.broadcast %cst_437 : f32 to vector<8x1xf32>
    %1046 = arith.addf %1042, %1045 : vector<8x1xf32>
    %1047 = math.rsqrt %1046 : vector<8x1xf32>
    %1048 = vector.broadcast %1047 : vector<8x1xf32> to vector<8x32xf32>
    %1049 = arith.mulf %1044, %1048 : vector<8x32xf32>
    %c0_438 = arith.constant 0 : index
    %c0_439 = arith.constant 0 : index
    %1050 = vector.load %arg55[%c0_438, %c0_439] : memref<1x32xf32, #tpu.memory_space<vmem>>, vector<1x32xf32>
    %1051 = vector.broadcast %1050 : vector<1x32xf32> to vector<8x32xf32>
    %1052 = arith.mulf %1049, %1051 : vector<8x32xf32>
    %c0_440 = arith.constant 0 : index
    %c0_441 = arith.constant 0 : index
    %1053 = vector.load %arg54[%c0_440, %c0_441] : memref<1x32xf32, #tpu.memory_space<vmem>>, vector<1x32xf32>
    %1054 = vector.broadcast %1053 : vector<1x32xf32> to vector<8x32xf32>
    %1055 = arith.addf %1052, %1054 : vector<8x32xf32>
    %c0_442 = arith.constant 0 : index
    %c0_443 = arith.constant 0 : index
    %1056 = vector.load %arg60[%c0_442, %c0_443] : memref<32x64xf32, #tpu.memory_space<vmem>>, vector<32x64xf32>
    %cst_444 = arith.constant dense<0.000000e+00> : vector<8x64xf32>
    %1057 = tpu.matmul %1055, %1056, %cst_444 {dimension_numbers = #tpu.dot_dimension_numbers<[1], [0], [0], [1], [0, 0, 1, 1], [], []>} : vector<8x32xf32>, vector<32x64xf32>, vector<8x64xf32> -> vector<8x64xf32>
    %c0_445 = arith.constant 0 : index
    %c0_446 = arith.constant 0 : index
    %1058 = vector.load %arg56[%c0_445, %c0_446] : memref<1x64xf32, #tpu.memory_space<vmem>>, vector<1x64xf32>
    %1059 = vector.broadcast %1058 : vector<1x64xf32> to vector<8x64xf32>
    %1060 = arith.addf %1057, %1059 : vector<8x64xf32>
    %cst_447 = arith.constant 0.000000e+00 : f32
    %1061 = vector.broadcast %cst_447 : f32 to vector<8x64xf32>
    %1062 = arith.maximumf %1060, %1061 : vector<8x64xf32>
    %c0_448 = arith.constant 0 : index
    %c0_449 = arith.constant 0 : index
    %1063 = vector.load %arg61[%c0_448, %c0_449] : memref<64x32xf32, #tpu.memory_space<vmem>>, vector<64x32xf32>
    %cst_450 = arith.constant dense<0.000000e+00> : vector<8x32xf32>
    %1064 = tpu.matmul %1062, %1063, %cst_450 {dimension_numbers = #tpu.dot_dimension_numbers<[1], [0], [0], [1], [0, 0, 1, 1], [], []>} : vector<8x64xf32>, vector<64x32xf32>, vector<8x32xf32> -> vector<8x32xf32>
    %c0_451 = arith.constant 0 : index
    %c0_452 = arith.constant 0 : index
    %1065 = vector.load %arg57[%c0_451, %c0_452] : memref<1x32xf32, #tpu.memory_space<vmem>>, vector<1x32xf32>
    %1066 = vector.broadcast %1065 : vector<1x32xf32> to vector<8x32xf32>
    %1067 = arith.addf %1064, %1066 : vector<8x32xf32>
    %1068 = arith.addf %1055, %1067 : vector<8x32xf32>
    %cst_453 = arith.constant dense<0.000000e+00> : vector<8xf32>
    %1069 = vector.multi_reduction <add>, %1068, %cst_453 [1] : vector<8x32xf32> to vector<8xf32>
    %1070 = vector.shape_cast %1069 : vector<8xf32> to vector<8x1xf32>
    %cst_454 = arith.constant 3.200000e+01 : f32
    %1071 = vector.broadcast %cst_454 : f32 to vector<8x1xf32>
    %1072 = arith.divf %1070, %1071 : vector<8x1xf32>
    %1073 = vector.broadcast %1072 : vector<8x1xf32> to vector<8x32xf32>
    %1074 = arith.subf %1068, %1073 : vector<8x32xf32>
    %1075 = arith.mulf %1074, %1074 : vector<8x32xf32>
    %cst_455 = arith.constant dense<0.000000e+00> : vector<8xf32>
    %1076 = vector.multi_reduction <add>, %1075, %cst_455 [1] : vector<8x32xf32> to vector<8xf32>
    %1077 = vector.shape_cast %1076 : vector<8xf32> to vector<8x1xf32>
    %cst_456 = arith.constant 3.200000e+01 : f32
    %1078 = vector.broadcast %cst_456 : f32 to vector<8x1xf32>
    %1079 = arith.divf %1077, %1078 : vector<8x1xf32>
    %1080 = vector.broadcast %1072 : vector<8x1xf32> to vector<8x32xf32>
    %1081 = arith.subf %1068, %1080 : vector<8x32xf32>
    %cst_457 = arith.constant 9.99999974E-6 : f32
    %1082 = vector.broadcast %cst_457 : f32 to vector<8x1xf32>
    %1083 = arith.addf %1079, %1082 : vector<8x1xf32>
    %1084 = math.rsqrt %1083 : vector<8x1xf32>
    %1085 = vector.broadcast %1084 : vector<8x1xf32> to vector<8x32xf32>
    %1086 = arith.mulf %1081, %1085 : vector<8x32xf32>
    %c0_458 = arith.constant 0 : index
    %c0_459 = arith.constant 0 : index
    %1087 = vector.load %arg59[%c0_458, %c0_459] : memref<1x32xf32, #tpu.memory_space<vmem>>, vector<1x32xf32>
    %1088 = vector.broadcast %1087 : vector<1x32xf32> to vector<8x32xf32>
    %1089 = arith.mulf %1086, %1088 : vector<8x32xf32>
    %c0_460 = arith.constant 0 : index
    %c0_461 = arith.constant 0 : index
    %1090 = vector.load %arg58[%c0_460, %c0_461] : memref<1x32xf32, #tpu.memory_space<vmem>>, vector<1x32xf32>
    %1091 = vector.broadcast %1090 : vector<1x32xf32> to vector<8x32xf32>
    %1092 = arith.addf %1089, %1091 : vector<8x32xf32>
    %cst_462 = arith.constant dense<0.000000e+00> : vector<8xf32>
    %1093 = vector.multi_reduction <add>, %1092, %cst_462 [1] : vector<8x32xf32> to vector<8xf32>
    %1094 = vector.shape_cast %1093 : vector<8xf32> to vector<8x1xf32>
    %cst_463 = arith.constant 3.200000e+01 : f32
    %1095 = vector.broadcast %cst_463 : f32 to vector<8x1xf32>
    %1096 = arith.divf %1094, %1095 : vector<8x1xf32>
    %1097 = vector.broadcast %1096 : vector<8x1xf32> to vector<8x32xf32>
    %1098 = arith.subf %1092, %1097 : vector<8x32xf32>
    %1099 = arith.mulf %1098, %1098 : vector<8x32xf32>
    %cst_464 = arith.constant dense<0.000000e+00> : vector<8xf32>
    %1100 = vector.multi_reduction <add>, %1099, %cst_464 [1] : vector<8x32xf32> to vector<8xf32>
    %1101 = vector.shape_cast %1100 : vector<8xf32> to vector<8x1xf32>
    %cst_465 = arith.constant 3.200000e+01 : f32
    %1102 = vector.broadcast %cst_465 : f32 to vector<8x1xf32>
    %1103 = arith.divf %1101, %1102 : vector<8x1xf32>
    %1104 = vector.broadcast %1096 : vector<8x1xf32> to vector<8x32xf32>
    %1105 = arith.subf %1092, %1104 : vector<8x32xf32>
    %cst_466 = arith.constant 9.99999974E-6 : f32
    %1106 = vector.broadcast %cst_466 : f32 to vector<8x1xf32>
    %1107 = arith.addf %1103, %1106 : vector<8x1xf32>
    %1108 = math.rsqrt %1107 : vector<8x1xf32>
    %1109 = vector.broadcast %1108 : vector<8x1xf32> to vector<8x32xf32>
    %1110 = arith.mulf %1105, %1109 : vector<8x32xf32>
    %c0_467 = arith.constant 0 : index
    %c0_468 = arith.constant 0 : index
    %1111 = vector.load %arg105[%c0_467, %c0_468] : memref<1x32xf32, #tpu.memory_space<vmem>>, vector<1x32xf32>
    %1112 = vector.broadcast %1111 : vector<1x32xf32> to vector<8x32xf32>
    %1113 = arith.mulf %1110, %1112 : vector<8x32xf32>
    %c0_469 = arith.constant 0 : index
    %c0_470 = arith.constant 0 : index
    %1114 = vector.load %arg104[%c0_469, %c0_470] : memref<1x32xf32, #tpu.memory_space<vmem>>, vector<1x32xf32>
    %1115 = vector.broadcast %1114 : vector<1x32xf32> to vector<8x32xf32>
    %1116 = arith.addf %1113, %1115 : vector<8x32xf32>
    %c0_471 = arith.constant 0 : index
    %c0_472 = arith.constant 0 : index
    %1117 = vector.load %arg11[%c0_471, %c0_472] : memref<32x11xf32, #tpu.memory_space<vmem>>, vector<32x11xf32>
    %cst_473 = arith.constant dense<0.000000e+00> : vector<8x11xf32>
    %1118 = tpu.matmul %1116, %1117, %cst_473 {dimension_numbers = #tpu.dot_dimension_numbers<[1], [0], [0], [1], [0, 0, 1, 1], [], []>} : vector<8x32xf32>, vector<32x11xf32>, vector<8x11xf32> -> vector<8x11xf32>
    %c0_474 = arith.constant 0 : index
    %c0_475 = arith.constant 0 : index
    %1119 = vector.load %arg10[%c0_474, %c0_475] : memref<1x11xf32, #tpu.memory_space<vmem>>, vector<1x11xf32>
    %1120 = vector.broadcast %1119 : vector<1x11xf32> to vector<8x11xf32>
    %1121 = arith.addf %1118, %1120 : vector<8x11xf32>
    %c0_476 = arith.constant 0 : index
    %c0_477 = arith.constant 0 : index
    %1122 = vector.load %arg7[%c0_476, %c0_477] : memref<32x32xf32, #tpu.memory_space<vmem>>, vector<32x32xf32>
    %cst_478 = arith.constant dense<0.000000e+00> : vector<8x32xf32>
    %1123 = tpu.matmul %1116, %1122, %cst_478 {dimension_numbers = #tpu.dot_dimension_numbers<[1], [0], [0], [1], [0, 0, 1, 1], [], []>} : vector<8x32xf32>, vector<32x32xf32>, vector<8x32xf32> -> vector<8x32xf32>
    %c0_479 = arith.constant 0 : index
    %c0_480 = arith.constant 0 : index
    %1124 = vector.load %arg4[%c0_479, %c0_480] : memref<1x32xf32, #tpu.memory_space<vmem>>, vector<1x32xf32>
    %1125 = vector.broadcast %1124 : vector<1x32xf32> to vector<8x32xf32>
    %1126 = arith.addf %1123, %1125 : vector<8x32xf32>
    %cst_481 = arith.constant 0.000000e+00 : f32
    %1127 = vector.broadcast %cst_481 : f32 to vector<8x32xf32>
    %1128 = arith.maximumf %1126, %1127 : vector<8x32xf32>
    %c0_482 = arith.constant 0 : index
    %c0_483 = arith.constant 0 : index
    %1129 = vector.load %arg8[%c0_482, %c0_483] : memref<32x32xf32, #tpu.memory_space<vmem>>, vector<32x32xf32>
    %cst_484 = arith.constant dense<0.000000e+00> : vector<8x32xf32>
    %1130 = tpu.matmul %1128, %1129, %cst_484 {dimension_numbers = #tpu.dot_dimension_numbers<[1], [0], [0], [1], [0, 0, 1, 1], [], []>} : vector<8x32xf32>, vector<32x32xf32>, vector<8x32xf32> -> vector<8x32xf32>
    %c0_485 = arith.constant 0 : index
    %c0_486 = arith.constant 0 : index
    %1131 = vector.load %arg5[%c0_485, %c0_486] : memref<1x32xf32, #tpu.memory_space<vmem>>, vector<1x32xf32>
    %1132 = vector.broadcast %1131 : vector<1x32xf32> to vector<8x32xf32>
    %1133 = arith.addf %1130, %1132 : vector<8x32xf32>
    %cst_487 = arith.constant 0.000000e+00 : f32
    %1134 = vector.broadcast %cst_487 : f32 to vector<8x32xf32>
    %1135 = arith.maximumf %1133, %1134 : vector<8x32xf32>
    %c0_488 = arith.constant 0 : index
    %c0_489 = arith.constant 0 : index
    %1136 = vector.load %arg9[%c0_488, %c0_489] : memref<32x4xf32, #tpu.memory_space<vmem>>, vector<32x4xf32>
    %cst_490 = arith.constant dense<0.000000e+00> : vector<8x4xf32>
    %1137 = tpu.matmul %1135, %1136, %cst_490 {dimension_numbers = #tpu.dot_dimension_numbers<[1], [0], [0], [1], [0, 0, 1, 1], [], []>} : vector<8x32xf32>, vector<32x4xf32>, vector<8x4xf32> -> vector<8x4xf32>
    %c0_491 = arith.constant 0 : index
    %c0_492 = arith.constant 0 : index
    %1138 = vector.load %arg6[%c0_491, %c0_492] : memref<1x4xf32, #tpu.memory_space<vmem>>, vector<1x4xf32>
    %1139 = vector.broadcast %1138 : vector<1x4xf32> to vector<8x4xf32>
    %1140 = arith.addf %1137, %1139 : vector<8x4xf32>
    %1141 = arith.negf %1140 : vector<8x4xf32>
    %1142 = math.exp %1141 : vector<8x4xf32>
    %cst_493 = arith.constant 1.000000e+00 : f32
    %1143 = vector.broadcast %cst_493 : f32 to vector<8x4xf32>
    %1144 = arith.addf %1143, %1142 : vector<8x4xf32>
    %1145 = arith.divf %1143, %1144 : vector<8x4xf32>
    %c0_494 = arith.constant 0 : index
    %c0_495 = arith.constant 0 : index
    %c0_496 = arith.constant 0 : index
    %1146 = vector.load %arg107[%c0_494, %c0_495, %c0_496] : memref<1x8x11xf32, #tpu.memory_space<vmem>>, vector<1x8x11xf32>
    %1147 = vector.shape_cast %1146 : vector<1x8x11xf32> to vector<8x11xf32>
    %1148 = vector.shape_cast %1121 : vector<8x11xf32> to vector<1x8x11xf32>
    tpu.vector_store %arg107[%c0_494, %c0_495, %c0_496], %1148 {strides = array<i32>} : memref<1x8x11xf32, #tpu.memory_space<vmem>>, vector<1x8x11xf32>,
    %c0_497 = arith.constant 0 : index
    %c0_498 = arith.constant 0 : index
    %c0_499 = arith.constant 0 : index
    %1149 = vector.load %arg108[%c0_497, %c0_498, %c0_499] : memref<1x8x4xf32, #tpu.memory_space<vmem>>, vector<1x8x4xf32>
    %1150 = vector.shape_cast %1149 : vector<1x8x4xf32> to vector<8x4xf32>
    %1151 = vector.shape_cast %1145 : vector<8x4xf32> to vector<1x8x4xf32>
    tpu.vector_store %arg108[%c0_497, %c0_498, %c0_499], %1151 {strides = array<i32>} : memref<1x8x4xf32, #tpu.memory_space<vmem>>, vector<1x8x4xf32>,
    %c0_500 = arith.constant 0 : index
    %c0_501 = arith.constant 0 : index
    %c0_502 = arith.constant 0 : index
    %1152 = vector.load %arg109[%c0_500, %c0_501, %c0_502] : memref<1x8x32xf32, #tpu.memory_space<vmem>>, vector<1x8x32xf32>
    %1153 = vector.shape_cast %1152 : vector<1x8x32xf32> to vector<8x32xf32>
    %1154 = vector.shape_cast %1116 : vector<8x32xf32> to vector<1x8x32xf32>
    tpu.vector_store %arg109[%c0_500, %c0_501, %c0_502], %1154 {strides = array<i32>} : memref<1x8x32xf32, #tpu.memory_space<vmem>>, vector<1x8x32xf32>,
    %c0_503 = arith.constant 0 : index
    %c0_504 = arith.constant 0 : index
    %c0_505 = arith.constant 0 : index
    %1155 = vector.load %arg110[%c0_503, %c0_504, %c0_505] : memref<1x8x32xf32, #tpu.memory_space<vmem>>, vector<1x8x32xf32>
    %1156 = vector.shape_cast %1155 : vector<1x8x32xf32> to vector<8x32xf32>
    %1157 = vector.shape_cast %372 : vector<8x32xf32> to vector<1x8x32xf32>
    tpu.vector_store %arg110[%c0_503, %c0_504, %c0_505], %1157 {strides = array<i32>} : memref<1x8x32xf32, #tpu.memory_space<vmem>>, vector<1x8x32xf32>,
    return
  }
  func.func @transform_0(%arg0: i32) -> (i32, i32, i32) {
    %c0_i32 = arith.constant 0 : i32
    %c0_i32_0 = arith.constant 0 : i32
    %c0_i32_1 = arith.constant 0 : i32
    return %arg0, %c0_i32, %c0_i32_0 : i32, i32, i32
  }
  func.func @transform_1(%arg0: i32) -> (i32, i32, i32) {
    %c0_i32 = arith.constant 0 : i32
    %c0_i32_0 = arith.constant 0 : i32
    %c0_i32_1 = arith.constant 0 : i32
    return %arg0, %c0_i32, %c0_i32_0 : i32, i32, i32
  }
  func.func @transform_2(%arg0: i32) -> (i32, i32, i32) {
    %c0_i32 = arith.constant 0 : i32
    %c0_i32_0 = arith.constant 0 : i32
    %c0_i32_1 = arith.constant 0 : i32
    return %arg0, %c0_i32, %c0_i32_0 : i32, i32, i32
  }
  func.func @transform_3(%arg0: i32) -> (i32, i32) {
    %c0_i32 = arith.constant 0 : i32
    %c0_i32_0 = arith.constant 0 : i32
    %c0_i32_1 = arith.constant 0 : i32
    return %c0_i32, %c0_i32_0 : i32, i32
  }
  func.func @transform_4(%arg0: i32) -> (i32, i32) {
    %c0_i32 = arith.constant 0 : i32
    %c0_i32_0 = arith.constant 0 : i32
    %c0_i32_1 = arith.constant 0 : i32
    return %c0_i32, %c0_i32_0 : i32, i32
  }
  func.func @transform_5(%arg0: i32) -> (i32, i32) {
    %c0_i32 = arith.constant 0 : i32
    %c0_i32_0 = arith.constant 0 : i32
    %c0_i32_1 = arith.constant 0 : i32
    return %c0_i32, %c0_i32_0 : i32, i32
  }
  func.func @transform_6(%arg0: i32) -> (i32, i32) {
    %c0_i32 = arith.constant 0 : i32
    %c0_i32_0 = arith.constant 0 : i32
    %c0_i32_1 = arith.constant 0 : i32
    return %c0_i32, %c0_i32_0 : i32, i32
  }
  func.func @transform_7(%arg0: i32) -> (i32, i32) {
    %c0_i32 = arith.constant 0 : i32
    %c0_i32_0 = arith.constant 0 : i32
    %c0_i32_1 = arith.constant 0 : i32
    return %c0_i32, %c0_i32_0 : i32, i32
  }
  func.func @transform_8(%arg0: i32) -> (i32, i32) {
    %c0_i32 = arith.constant 0 : i32
    %c0_i32_0 = arith.constant 0 : i32
    %c0_i32_1 = arith.constant 0 : i32
    return %c0_i32, %c0_i32_0 : i32, i32
  }
  func.func @transform_9(%arg0: i32) -> (i32, i32) {
    %c0_i32 = arith.constant 0 : i32
    %c0_i32_0 = arith.constant 0 : i32
    %c0_i32_1 = arith.constant 0 : i32
    return %c0_i32, %c0_i32_0 : i32, i32
  }
  func.func @transform_10(%arg0: i32) -> (i32, i32) {
    %c0_i32 = arith.constant 0 : i32
    %c0_i32_0 = arith.constant 0 : i32
    %c0_i32_1 = arith.constant 0 : i32
    return %c0_i32, %c0_i32_0 : i32, i32
  }
  func.func @transform_11(%arg0: i32) -> (i32, i32) {
    %c0_i32 = arith.constant 0 : i32
    %c0_i32_0 = arith.constant 0 : i32
    %c0_i32_1 = arith.constant 0 : i32
    return %c0_i32, %c0_i32_0 : i32, i32
  }
  func.func @transform_12(%arg0: i32) -> (i32, i32) {
    %c0_i32 = arith.constant 0 : i32
    %c0_i32_0 = arith.constant 0 : i32
    %c0_i32_1 = arith.constant 0 : i32
    return %c0_i32, %c0_i32_0 : i32, i32
  }
  func.func @transform_13(%arg0: i32) -> (i32, i32) {
    %c0_i32 = arith.constant 0 : i32
    %c0_i32_0 = arith.constant 0 : i32
    %c0_i32_1 = arith.constant 0 : i32
    return %c0_i32, %c0_i32_0 : i32, i32
  }
  func.func @transform_14(%arg0: i32) -> (i32, i32) {
    %c0_i32 = arith.constant 0 : i32
    %c0_i32_0 = arith.constant 0 : i32
    %c0_i32_1 = arith.constant 0 : i32
    return %c0_i32, %c0_i32_0 : i32, i32
  }
  func.func @transform_15(%arg0: i32) -> (i32, i32) {
    %c0_i32 = arith.constant 0 : i32
    %c0_i32_0 = arith.constant 0 : i32
    %c0_i32_1 = arith.constant 0 : i32
    return %c0_i32, %c0_i32_0 : i32, i32
  }
  func.func @transform_16(%arg0: i32) -> (i32, i32) {
    %c0_i32 = arith.constant 0 : i32
    %c0_i32_0 = arith.constant 0 : i32
    %c0_i32_1 = arith.constant 0 : i32
    return %c0_i32, %c0_i32_0 : i32, i32
  }
  func.func @transform_17(%arg0: i32) -> (i32, i32) {
    %c0_i32 = arith.constant 0 : i32
    %c0_i32_0 = arith.constant 0 : i32
    %c0_i32_1 = arith.constant 0 : i32
    return %c0_i32, %c0_i32_0 : i32, i32
  }
  func.func @transform_18(%arg0: i32) -> (i32, i32) {
    %c0_i32 = arith.constant 0 : i32
    %c0_i32_0 = arith.constant 0 : i32
    %c0_i32_1 = arith.constant 0 : i32
    return %c0_i32, %c0_i32_0 : i32, i32
  }
  func.func @transform_19(%arg0: i32) -> (i32, i32) {
    %c0_i32 = arith.constant 0 : i32
    %c0_i32_0 = arith.constant 0 : i32
    %c0_i32_1 = arith.constant 0 : i32
    return %c0_i32, %c0_i32_0 : i32, i32
  }
  func.func @transform_20(%arg0: i32) -> (i32, i32) {
    %c0_i32 = arith.constant 0 : i32
    %c0_i32_0 = arith.constant 0 : i32
    %c0_i32_1 = arith.constant 0 : i32
    return %c0_i32, %c0_i32_0 : i32, i32
  }
  func.func @transform_21(%arg0: i32) -> (i32, i32) {
    %c0_i32 = arith.constant 0 : i32
    %c0_i32_0 = arith.constant 0 : i32
    %c0_i32_1 = arith.constant 0 : i32
    return %c0_i32, %c0_i32_0 : i32, i32
  }
  func.func @transform_22(%arg0: i32) -> (i32, i32) {
    %c0_i32 = arith.constant 0 : i32
    %c0_i32_0 = arith.constant 0 : i32
    %c0_i32_1 = arith.constant 0 : i32
    return %c0_i32, %c0_i32_0 : i32, i32
  }
  func.func @transform_23(%arg0: i32) -> (i32, i32) {
    %c0_i32 = arith.constant 0 : i32
    %c0_i32_0 = arith.constant 0 : i32
    %c0_i32_1 = arith.constant 0 : i32
    return %c0_i32, %c0_i32_0 : i32, i32
  }
  func.func @transform_24(%arg0: i32) -> (i32, i32) {
    %c0_i32 = arith.constant 0 : i32
    %c0_i32_0 = arith.constant 0 : i32
    %c0_i32_1 = arith.constant 0 : i32
    return %c0_i32, %c0_i32_0 : i32, i32
  }
  func.func @transform_25(%arg0: i32) -> (i32, i32) {
    %c0_i32 = arith.constant 0 : i32
    %c0_i32_0 = arith.constant 0 : i32
    %c0_i32_1 = arith.constant 0 : i32
    return %c0_i32, %c0_i32_0 : i32, i32
  }
  func.func @transform_26(%arg0: i32) -> (i32, i32) {
    %c0_i32 = arith.constant 0 : i32
    %c0_i32_0 = arith.constant 0 : i32
    %c0_i32_1 = arith.constant 0 : i32
    return %c0_i32, %c0_i32_0 : i32, i32
  }
  func.func @transform_27(%arg0: i32) -> (i32, i32) {
    %c0_i32 = arith.constant 0 : i32
    %c0_i32_0 = arith.constant 0 : i32
    %c0_i32_1 = arith.constant 0 : i32
    return %c0_i32, %c0_i32_0 : i32, i32
  }
  func.func @transform_28(%arg0: i32) -> (i32, i32) {
    %c0_i32 = arith.constant 0 : i32
    %c0_i32_0 = arith.constant 0 : i32
    %c0_i32_1 = arith.constant 0 : i32
    return %c0_i32, %c0_i32_0 : i32, i32
  }
  func.func @transform_29(%arg0: i32) -> (i32, i32) {
    %c0_i32 = arith.constant 0 : i32
    %c0_i32_0 = arith.constant 0 : i32
    %c0_i32_1 = arith.constant 0 : i32
    return %c0_i32, %c0_i32_0 : i32, i32
  }
  func.func @transform_30(%arg0: i32) -> (i32, i32) {
    %c0_i32 = arith.constant 0 : i32
    %c0_i32_0 = arith.constant 0 : i32
    %c0_i32_1 = arith.constant 0 : i32
    return %c0_i32, %c0_i32_0 : i32, i32
  }
  func.func @transform_31(%arg0: i32) -> (i32, i32) {
    %c0_i32 = arith.constant 0 : i32
    %c0_i32_0 = arith.constant 0 : i32
    %c0_i32_1 = arith.constant 0 : i32
    return %c0_i32, %c0_i32_0 : i32, i32
  }
  func.func @transform_32(%arg0: i32) -> (i32, i32) {
    %c0_i32 = arith.constant 0 : i32
    %c0_i32_0 = arith.constant 0 : i32
    %c0_i32_1 = arith.constant 0 : i32
    return %c0_i32, %c0_i32_0 : i32, i32
  }
  func.func @transform_33(%arg0: i32) -> (i32, i32) {
    %c0_i32 = arith.constant 0 : i32
    %c0_i32_0 = arith.constant 0 : i32
    %c0_i32_1 = arith.constant 0 : i32
    return %c0_i32, %c0_i32_0 : i32, i32
  }
  func.func @transform_34(%arg0: i32) -> (i32, i32) {
    %c0_i32 = arith.constant 0 : i32
    %c0_i32_0 = arith.constant 0 : i32
    %c0_i32_1 = arith.constant 0 : i32
    return %c0_i32, %c0_i32_0 : i32, i32
  }
  func.func @transform_35(%arg0: i32) -> (i32, i32) {
    %c0_i32 = arith.constant 0 : i32
    %c0_i32_0 = arith.constant 0 : i32
    %c0_i32_1 = arith.constant 0 : i32
    return %c0_i32, %c0_i32_0 : i32, i32
  }
  func.func @transform_36(%arg0: i32) -> (i32, i32) {
    %c0_i32 = arith.constant 0 : i32
    %c0_i32_0 = arith.constant 0 : i32
    %c0_i32_1 = arith.constant 0 : i32
    return %c0_i32, %c0_i32_0 : i32, i32
  }
  func.func @transform_37(%arg0: i32) -> (i32, i32) {
    %c0_i32 = arith.constant 0 : i32
    %c0_i32_0 = arith.constant 0 : i32
    %c0_i32_1 = arith.constant 0 : i32
    return %c0_i32, %c0_i32_0 : i32, i32
  }
  func.func @transform_38(%arg0: i32) -> (i32, i32) {
    %c0_i32 = arith.constant 0 : i32
    %c0_i32_0 = arith.constant 0 : i32
    %c0_i32_1 = arith.constant 0 : i32
    return %c0_i32, %c0_i32_0 : i32, i32
  }
  func.func @transform_39(%arg0: i32) -> (i32, i32) {
    %c0_i32 = arith.constant 0 : i32
    %c0_i32_0 = arith.constant 0 : i32
    %c0_i32_1 = arith.constant 0 : i32
    return %c0_i32, %c0_i32_0 : i32, i32
  }
  func.func @transform_40(%arg0: i32) -> (i32, i32) {
    %c0_i32 = arith.constant 0 : i32
    %c0_i32_0 = arith.constant 0 : i32
    %c0_i32_1 = arith.constant 0 : i32
    return %c0_i32, %c0_i32_0 : i32, i32
  }
  func.func @transform_41(%arg0: i32) -> (i32, i32) {
    %c0_i32 = arith.constant 0 : i32
    %c0_i32_0 = arith.constant 0 : i32
    %c0_i32_1 = arith.constant 0 : i32
    return %c0_i32, %c0_i32_0 : i32, i32
  }
  func.func @transform_42(%arg0: i32) -> (i32, i32) {
    %c0_i32 = arith.constant 0 : i32
    %c0_i32_0 = arith.constant 0 : i32
    %c0_i32_1 = arith.constant 0 : i32
    return %c0_i32, %c0_i32_0 : i32, i32
  }
  func.func @transform_43(%arg0: i32) -> (i32, i32) {
    %c0_i32 = arith.constant 0 : i32
    %c0_i32_0 = arith.constant 0 : i32
    %c0_i32_1 = arith.constant 0 : i32
    return %c0_i32, %c0_i32_0 : i32, i32
  }
  func.func @transform_44(%arg0: i32) -> (i32, i32) {
    %c0_i32 = arith.constant 0 : i32
    %c0_i32_0 = arith.constant 0 : i32
    %c0_i32_1 = arith.constant 0 : i32
    return %c0_i32, %c0_i32_0 : i32, i32
  }
  func.func @transform_45(%arg0: i32) -> (i32, i32) {
    %c0_i32 = arith.constant 0 : i32
    %c0_i32_0 = arith.constant 0 : i32
    %c0_i32_1 = arith.constant 0 : i32
    return %c0_i32, %c0_i32_0 : i32, i32
  }
  func.func @transform_46(%arg0: i32) -> (i32, i32) {
    %c0_i32 = arith.constant 0 : i32
    %c0_i32_0 = arith.constant 0 : i32
    %c0_i32_1 = arith.constant 0 : i32
    return %c0_i32, %c0_i32_0 : i32, i32
  }
  func.func @transform_47(%arg0: i32) -> (i32, i32) {
    %c0_i32 = arith.constant 0 : i32
    %c0_i32_0 = arith.constant 0 : i32
    %c0_i32_1 = arith.constant 0 : i32
    return %c0_i32, %c0_i32_0 : i32, i32
  }
  func.func @transform_48(%arg0: i32) -> (i32, i32) {
    %c0_i32 = arith.constant 0 : i32
    %c0_i32_0 = arith.constant 0 : i32
    %c0_i32_1 = arith.constant 0 : i32
    return %c0_i32, %c0_i32_0 : i32, i32
  }
  func.func @transform_49(%arg0: i32) -> (i32, i32) {
    %c0_i32 = arith.constant 0 : i32
    %c0_i32_0 = arith.constant 0 : i32
    %c0_i32_1 = arith.constant 0 : i32
    return %c0_i32, %c0_i32_0 : i32, i32
  }
  func.func @transform_50(%arg0: i32) -> (i32, i32) {
    %c0_i32 = arith.constant 0 : i32
    %c0_i32_0 = arith.constant 0 : i32
    %c0_i32_1 = arith.constant 0 : i32
    return %c0_i32, %c0_i32_0 : i32, i32
  }
  func.func @transform_51(%arg0: i32) -> (i32, i32) {
    %c0_i32 = arith.constant 0 : i32
    %c0_i32_0 = arith.constant 0 : i32
    %c0_i32_1 = arith.constant 0 : i32
    return %c0_i32, %c0_i32_0 : i32, i32
  }
  func.func @transform_52(%arg0: i32) -> (i32, i32) {
    %c0_i32 = arith.constant 0 : i32
    %c0_i32_0 = arith.constant 0 : i32
    %c0_i32_1 = arith.constant 0 : i32
    return %c0_i32, %c0_i32_0 : i32, i32
  }
  func.func @transform_53(%arg0: i32) -> (i32, i32) {
    %c0_i32 = arith.constant 0 : i32
    %c0_i32_0 = arith.constant 0 : i32
    %c0_i32_1 = arith.constant 0 : i32
    return %c0_i32, %c0_i32_0 : i32, i32
  }
  func.func @transform_54(%arg0: i32) -> (i32, i32) {
    %c0_i32 = arith.constant 0 : i32
    %c0_i32_0 = arith.constant 0 : i32
    %c0_i32_1 = arith.constant 0 : i32
    return %c0_i32, %c0_i32_0 : i32, i32
  }
  func.func @transform_55(%arg0: i32) -> (i32, i32) {
    %c0_i32 = arith.constant 0 : i32
    %c0_i32_0 = arith.constant 0 : i32
    %c0_i32_1 = arith.constant 0 : i32
    return %c0_i32, %c0_i32_0 : i32, i32
  }
  func.func @transform_56(%arg0: i32) -> (i32, i32) {
    %c0_i32 = arith.constant 0 : i32
    %c0_i32_0 = arith.constant 0 : i32
    %c0_i32_1 = arith.constant 0 : i32
    return %c0_i32, %c0_i32_0 : i32, i32
  }
  func.func @transform_57(%arg0: i32) -> (i32, i32) {
    %c0_i32 = arith.constant 0 : i32
    %c0_i32_0 = arith.constant 0 : i32
    %c0_i32_1 = arith.constant 0 : i32
    return %c0_i32, %c0_i32_0 : i32, i32
  }
  func.func @transform_58(%arg0: i32) -> (i32, i32) {
    %c0_i32 = arith.constant 0 : i32
    %c0_i32_0 = arith.constant 0 : i32
    %c0_i32_1 = arith.constant 0 : i32
    return %c0_i32, %c0_i32_0 : i32, i32
  }
  func.func @transform_59(%arg0: i32) -> (i32, i32) {
    %c0_i32 = arith.constant 0 : i32
    %c0_i32_0 = arith.constant 0 : i32
    %c0_i32_1 = arith.constant 0 : i32
    return %c0_i32, %c0_i32_0 : i32, i32
  }
  func.func @transform_60(%arg0: i32) -> (i32, i32) {
    %c0_i32 = arith.constant 0 : i32
    %c0_i32_0 = arith.constant 0 : i32
    %c0_i32_1 = arith.constant 0 : i32
    return %c0_i32, %c0_i32_0 : i32, i32
  }
  func.func @transform_61(%arg0: i32) -> (i32, i32) {
    %c0_i32 = arith.constant 0 : i32
    %c0_i32_0 = arith.constant 0 : i32
    %c0_i32_1 = arith.constant 0 : i32
    return %c0_i32, %c0_i32_0 : i32, i32
  }
  func.func @transform_62(%arg0: i32) -> (i32, i32) {
    %c0_i32 = arith.constant 0 : i32
    %c0_i32_0 = arith.constant 0 : i32
    %c0_i32_1 = arith.constant 0 : i32
    return %c0_i32, %c0_i32_0 : i32, i32
  }
  func.func @transform_63(%arg0: i32) -> (i32, i32) {
    %c0_i32 = arith.constant 0 : i32
    %c0_i32_0 = arith.constant 0 : i32
    %c0_i32_1 = arith.constant 0 : i32
    return %c0_i32, %c0_i32_0 : i32, i32
  }
  func.func @transform_64(%arg0: i32) -> (i32, i32) {
    %c0_i32 = arith.constant 0 : i32
    %c0_i32_0 = arith.constant 0 : i32
    %c0_i32_1 = arith.constant 0 : i32
    return %c0_i32, %c0_i32_0 : i32, i32
  }
  func.func @transform_65(%arg0: i32) -> (i32, i32) {
    %c0_i32 = arith.constant 0 : i32
    %c0_i32_0 = arith.constant 0 : i32
    %c0_i32_1 = arith.constant 0 : i32
    return %c0_i32, %c0_i32_0 : i32, i32
  }
  func.func @transform_66(%arg0: i32) -> (i32, i32) {
    %c0_i32 = arith.constant 0 : i32
    %c0_i32_0 = arith.constant 0 : i32
    %c0_i32_1 = arith.constant 0 : i32
    return %c0_i32, %c0_i32_0 : i32, i32
  }
  func.func @transform_67(%arg0: i32) -> (i32, i32) {
    %c0_i32 = arith.constant 0 : i32
    %c0_i32_0 = arith.constant 0 : i32
    %c0_i32_1 = arith.constant 0 : i32
    return %c0_i32, %c0_i32_0 : i32, i32
  }
  func.func @transform_68(%arg0: i32) -> (i32, i32) {
    %c0_i32 = arith.constant 0 : i32
    %c0_i32_0 = arith.constant 0 : i32
    %c0_i32_1 = arith.constant 0 : i32
    return %c0_i32, %c0_i32_0 : i32, i32
  }
  func.func @transform_69(%arg0: i32) -> (i32, i32) {
    %c0_i32 = arith.constant 0 : i32
    %c0_i32_0 = arith.constant 0 : i32
    %c0_i32_1 = arith.constant 0 : i32
    return %c0_i32, %c0_i32_0 : i32, i32
  }
  func.func @transform_70(%arg0: i32) -> (i32, i32) {
    %c0_i32 = arith.constant 0 : i32
    %c0_i32_0 = arith.constant 0 : i32
    %c0_i32_1 = arith.constant 0 : i32
    return %c0_i32, %c0_i32_0 : i32, i32
  }
  func.func @transform_71(%arg0: i32) -> (i32, i32) {
    %c0_i32 = arith.constant 0 : i32
    %c0_i32_0 = arith.constant 0 : i32
    %c0_i32_1 = arith.constant 0 : i32
    return %c0_i32, %c0_i32_0 : i32, i32
  }
  func.func @transform_72(%arg0: i32) -> (i32, i32) {
    %c0_i32 = arith.constant 0 : i32
    %c0_i32_0 = arith.constant 0 : i32
    %c0_i32_1 = arith.constant 0 : i32
    return %c0_i32, %c0_i32_0 : i32, i32
  }
  func.func @transform_73(%arg0: i32) -> (i32, i32) {
    %c0_i32 = arith.constant 0 : i32
    %c0_i32_0 = arith.constant 0 : i32
    %c0_i32_1 = arith.constant 0 : i32
    return %c0_i32, %c0_i32_0 : i32, i32
  }
  func.func @transform_74(%arg0: i32) -> (i32, i32) {
    %c0_i32 = arith.constant 0 : i32
    %c0_i32_0 = arith.constant 0 : i32
    %c0_i32_1 = arith.constant 0 : i32
    return %c0_i32, %c0_i32_0 : i32, i32
  }
  func.func @transform_75(%arg0: i32) -> (i32, i32) {
    %c0_i32 = arith.constant 0 : i32
    %c0_i32_0 = arith.constant 0 : i32
    %c0_i32_1 = arith.constant 0 : i32
    return %c0_i32, %c0_i32_0 : i32, i32
  }
  func.func @transform_76(%arg0: i32) -> (i32, i32) {
    %c0_i32 = arith.constant 0 : i32
    %c0_i32_0 = arith.constant 0 : i32
    %c0_i32_1 = arith.constant 0 : i32
    return %c0_i32, %c0_i32_0 : i32, i32
  }
  func.func @transform_77(%arg0: i32) -> (i32, i32) {
    %c0_i32 = arith.constant 0 : i32
    %c0_i32_0 = arith.constant 0 : i32
    %c0_i32_1 = arith.constant 0 : i32
    return %c0_i32, %c0_i32_0 : i32, i32
  }
  func.func @transform_78(%arg0: i32) -> (i32, i32) {
    %c0_i32 = arith.constant 0 : i32
    %c0_i32_0 = arith.constant 0 : i32
    %c0_i32_1 = arith.constant 0 : i32
    return %c0_i32, %c0_i32_0 : i32, i32
  }
  func.func @transform_79(%arg0: i32) -> (i32, i32) {
    %c0_i32 = arith.constant 0 : i32
    %c0_i32_0 = arith.constant 0 : i32
    %c0_i32_1 = arith.constant 0 : i32
    return %c0_i32, %c0_i32_0 : i32, i32
  }
  func.func @transform_80(%arg0: i32) -> (i32, i32) {
    %c0_i32 = arith.constant 0 : i32
    %c0_i32_0 = arith.constant 0 : i32
    %c0_i32_1 = arith.constant 0 : i32
    return %c0_i32, %c0_i32_0 : i32, i32
  }
  func.func @transform_81(%arg0: i32) -> (i32, i32) {
    %c0_i32 = arith.constant 0 : i32
    %c0_i32_0 = arith.constant 0 : i32
    %c0_i32_1 = arith.constant 0 : i32
    return %c0_i32, %c0_i32_0 : i32, i32
  }
  func.func @transform_82(%arg0: i32) -> (i32, i32) {
    %c0_i32 = arith.constant 0 : i32
    %c0_i32_0 = arith.constant 0 : i32
    %c0_i32_1 = arith.constant 0 : i32
    return %c0_i32, %c0_i32_0 : i32, i32
  }
  func.func @transform_83(%arg0: i32) -> (i32, i32) {
    %c0_i32 = arith.constant 0 : i32
    %c0_i32_0 = arith.constant 0 : i32
    %c0_i32_1 = arith.constant 0 : i32
    return %c0_i32, %c0_i32_0 : i32, i32
  }
  func.func @transform_84(%arg0: i32) -> (i32, i32) {
    %c0_i32 = arith.constant 0 : i32
    %c0_i32_0 = arith.constant 0 : i32
    %c0_i32_1 = arith.constant 0 : i32
    return %c0_i32, %c0_i32_0 : i32, i32
  }
  func.func @transform_85(%arg0: i32) -> (i32, i32) {
    %c0_i32 = arith.constant 0 : i32
    %c0_i32_0 = arith.constant 0 : i32
    %c0_i32_1 = arith.constant 0 : i32
    return %c0_i32, %c0_i32_0 : i32, i32
  }
  func.func @transform_86(%arg0: i32) -> (i32, i32) {
    %c0_i32 = arith.constant 0 : i32
    %c0_i32_0 = arith.constant 0 : i32
    %c0_i32_1 = arith.constant 0 : i32
    return %c0_i32, %c0_i32_0 : i32, i32
  }
  func.func @transform_87(%arg0: i32) -> (i32, i32) {
    %c0_i32 = arith.constant 0 : i32
    %c0_i32_0 = arith.constant 0 : i32
    %c0_i32_1 = arith.constant 0 : i32
    return %c0_i32, %c0_i32_0 : i32, i32
  }
  func.func @transform_88(%arg0: i32) -> (i32, i32) {
    %c0_i32 = arith.constant 0 : i32
    %c0_i32_0 = arith.constant 0 : i32
    %c0_i32_1 = arith.constant 0 : i32
    return %c0_i32, %c0_i32_0 : i32, i32
  }
  func.func @transform_89(%arg0: i32) -> (i32, i32) {
    %c0_i32 = arith.constant 0 : i32
    %c0_i32_0 = arith.constant 0 : i32
    %c0_i32_1 = arith.constant 0 : i32
    return %c0_i32, %c0_i32_0 : i32, i32
  }
  func.func @transform_90(%arg0: i32) -> (i32, i32) {
    %c0_i32 = arith.constant 0 : i32
    %c0_i32_0 = arith.constant 0 : i32
    %c0_i32_1 = arith.constant 0 : i32
    return %c0_i32, %c0_i32_0 : i32, i32
  }
  func.func @transform_91(%arg0: i32) -> (i32, i32) {
    %c0_i32 = arith.constant 0 : i32
    %c0_i32_0 = arith.constant 0 : i32
    %c0_i32_1 = arith.constant 0 : i32
    return %c0_i32, %c0_i32_0 : i32, i32
  }
  func.func @transform_92(%arg0: i32) -> (i32, i32) {
    %c0_i32 = arith.constant 0 : i32
    %c0_i32_0 = arith.constant 0 : i32
    %c0_i32_1 = arith.constant 0 : i32
    return %c0_i32, %c0_i32_0 : i32, i32
  }
  func.func @transform_93(%arg0: i32) -> (i32, i32) {
    %c0_i32 = arith.constant 0 : i32
    %c0_i32_0 = arith.constant 0 : i32
    %c0_i32_1 = arith.constant 0 : i32
    return %c0_i32, %c0_i32_0 : i32, i32
  }
  func.func @transform_94(%arg0: i32) -> (i32, i32) {
    %c0_i32 = arith.constant 0 : i32
    %c0_i32_0 = arith.constant 0 : i32
    %c0_i32_1 = arith.constant 0 : i32
    return %c0_i32, %c0_i32_0 : i32, i32
  }
  func.func @transform_95(%arg0: i32) -> (i32, i32) {
    %c0_i32 = arith.constant 0 : i32
    %c0_i32_0 = arith.constant 0 : i32
    %c0_i32_1 = arith.constant 0 : i32
    return %c0_i32, %c0_i32_0 : i32, i32
  }
  func.func @transform_96(%arg0: i32) -> (i32, i32) {
    %c0_i32 = arith.constant 0 : i32
    %c0_i32_0 = arith.constant 0 : i32
    %c0_i32_1 = arith.constant 0 : i32
    return %c0_i32, %c0_i32_0 : i32, i32
  }
  func.func @transform_97(%arg0: i32) -> (i32, i32) {
    %c0_i32 = arith.constant 0 : i32
    %c0_i32_0 = arith.constant 0 : i32
    %c0_i32_1 = arith.constant 0 : i32
    return %c0_i32, %c0_i32_0 : i32, i32
  }
  func.func @transform_98(%arg0: i32) -> (i32, i32) {
    %c0_i32 = arith.constant 0 : i32
    %c0_i32_0 = arith.constant 0 : i32
    %c0_i32_1 = arith.constant 0 : i32
    return %c0_i32, %c0_i32_0 : i32, i32
  }
  func.func @transform_99(%arg0: i32) -> (i32, i32) {
    %c0_i32 = arith.constant 0 : i32
    %c0_i32_0 = arith.constant 0 : i32
    %c0_i32_1 = arith.constant 0 : i32
    return %c0_i32, %c0_i32_0 : i32, i32
  }
  func.func @transform_100(%arg0: i32) -> (i32, i32) {
    %c0_i32 = arith.constant 0 : i32
    %c0_i32_0 = arith.constant 0 : i32
    %c0_i32_1 = arith.constant 0 : i32
    return %c0_i32, %c0_i32_0 : i32, i32
  }
  func.func @transform_101(%arg0: i32) -> (i32, i32) {
    %c0_i32 = arith.constant 0 : i32
    %c0_i32_0 = arith.constant 0 : i32
    %c0_i32_1 = arith.constant 0 : i32
    return %c0_i32, %c0_i32_0 : i32, i32
  }
  func.func @transform_102(%arg0: i32) -> (i32, i32) {
    %c0_i32 = arith.constant 0 : i32
    %c0_i32_0 = arith.constant 0 : i32
    %c0_i32_1 = arith.constant 0 : i32
    return %c0_i32, %c0_i32_0 : i32, i32
  }
  func.func @transform_103(%arg0: i32) -> (i32, i32) {
    %c0_i32 = arith.constant 0 : i32
    %c0_i32_0 = arith.constant 0 : i32
    %c0_i32_1 = arith.constant 0 : i32
    return %c0_i32, %c0_i32_0 : i32, i32
  }
  func.func @transform_104(%arg0: i32) -> (i32, i32) {
    %c0_i32 = arith.constant 0 : i32
    %c0_i32_0 = arith.constant 0 : i32
    %c0_i32_1 = arith.constant 0 : i32
    return %c0_i32, %c0_i32_0 : i32, i32
  }
  func.func @transform_105(%arg0: i32) -> (i32, i32) {
    %c0_i32 = arith.constant 0 : i32
    %c0_i32_0 = arith.constant 0 : i32
    %c0_i32_1 = arith.constant 0 : i32
    return %c0_i32, %c0_i32_0 : i32, i32
  }
  func.func @transform_106(%arg0: i32) -> (i32, i32, i32) {
    %c0_i32 = arith.constant 0 : i32
    %c0_i32_0 = arith.constant 0 : i32
    %c0_i32_1 = arith.constant 0 : i32
    return %arg0, %c0_i32, %c0_i32_0 : i32, i32, i32
  }
  func.func @transform_107(%arg0: i32) -> (i32, i32, i32) {
    %c0_i32 = arith.constant 0 : i32
    %c0_i32_0 = arith.constant 0 : i32
    %c0_i32_1 = arith.constant 0 : i32
    return %arg0, %c0_i32, %c0_i32_0 : i32, i32, i32
  }
  func.func @transform_108(%arg0: i32) -> (i32, i32, i32) {
    %c0_i32 = arith.constant 0 : i32
    %c0_i32_0 = arith.constant 0 : i32
    %c0_i32_1 = arith.constant 0 : i32
    return %arg0, %c0_i32, %c0_i32_0 : i32, i32, i32
  }
  func.func @transform_109(%arg0: i32) -> (i32, i32, i32) {
    %c0_i32 = arith.constant 0 : i32
    %c0_i32_0 = arith.constant 0 : i32
    %c0_i32_1 = arith.constant 0 : i32
    return %arg0, %c0_i32, %c0_i32_0 : i32, i32, i32
  }
}

</mosaic_0001>

<bundles_post_ra>
// kernel: detr_transformer_forward.1
= control target key start
LH: loop header
LB: loop body
LE: loop exit
PB: predicated region body
PF: predicated region fallthrough
CT: control target
= control target key end

     0   :  { %s19294_s6 = smov 1   ;;  %s19295_s10 = smov 2   ;;  %s21899_s0 = inlined_call_operand.smem [shape: u32[110], index: -1, kind: input, shape index: {}] }
   0x1   :  { %s19498_s5 = sld [smem:[%s21899_s0]]   ;;  %s19296_s14 = smov 3  }
   0x2   :  { %s19503_s9 = sld [smem:[%s21899_s0 + %s19294_s6]]   ;;  %s19297_s18 = smov 4  }
   0x3   :  { %s19508_s13 = sld [smem:[%s21899_s0 + %s19295_s10]]   ;;  %s19298_s22 = smov 5  }
   0x4   :  { %s19513_s17 = sld [smem:[%s21899_s0 + %s19296_s14]]   ;;  %s19299_s26 = smov 6  }
   0x5   :  { %s19518_s21 = sld [smem:[%s21899_s0 + %s19297_s18]]   ;;  %s19300_s30 = smov 7  }
   0x6   :  { %s19523_s25 = sld [smem:[%s21899_s0 + %s19298_s22]]   ;;  %s19301_s4 = smov 8  }
   0x7   :  { %21968 = sst [smem:[#allocation164_spill]] %s19498_s5  ;;  %s19302_s10 = smov 9  }
   0x8   :  { %21969 = sst [smem:[#allocation165_spill]] %s19503_s9  ;;  %s19303_s15 = smov 10  }
   0x9   :  { %21970 = sst [smem:[#allocation166_spill]] %s19508_s13  ;;  %s19304_s20 = smov 11  }
   0xa   :  { %21971 = sst [smem:[#allocation167_spill]] %s19513_s17  ;;  %s19306_s1 = smov 13  }
   0xb   :  { %21972 = sst [smem:[#allocation168_spill]] %s19518_s21  ;;  %s19307_s7 = smov 14  }
   0xc   :  { %21973 = sst [smem:[#allocation169_spill]] %s19523_s25  ;;  %s19309_s22 = smov 16  }
   0xd   :  { %s19528_s29 = sld [smem:[%s21899_s0 + %s19299_s26]]   ;;  %s19305_s26 = smov 12  }
   0xe   :  { %s19533_s3 = sld [smem:[%s21899_s0 + %s19300_s30]]   ;;  %s19310_s28 = smov 17  }
   0xf   :  { %s19538_s8 = sld [smem:[%s21899_s0 + %s19301_s4]]  }
  0x10   :  { %s19543_s14 = sld [smem:[%s21899_s0 + %s19302_s10]]  }
  0x11   :  { %s19548_s19 = sld [smem:[%s21899_s0 + %s19303_s15]]   ;;  %s19308_s15 = smov 15  }
  0x12   :  { %s19553_s24 = sld [smem:[%s21899_s0 + %s19304_s20]]  }
  0x13   :  { %21974 = sst [smem:[#allocation170_spill]] %s19528_s29 }
  0x14   :  { %21975 = sst [smem:[#allocation171_spill]] %s19533_s3 }
  0x15   :  { %21976 = sst [smem:[#allocation172_spill]] %s19538_s8 }
  0x16   :  { %21977 = sst [smem:[#allocation173_spill]] %s19543_s14 }
  0x17   :  { %21978 = sst [smem:[#allocation174_spill]] %s19548_s19 }
  0x18   :  { %21979 = sst [smem:[#allocation175_spill]] %s19553_s24 }
  0x19   :  { %s19558_s30 = sld [smem:[%s21899_s0 + %s19305_s26]]  }
  0x1a   :  { %s19563_s6 = sld [smem:[%s21899_s0 + %s19306_s1]]  }
  0x1b   :  { %s19568_s12 = sld [smem:[%s21899_s0 + %s19307_s7]]   ;;  %s19311_s7 = smov 18  }
  0x1c   :  { %s19573_s20 = sld [smem:[%s21899_s0 + %s19308_s15]]   ;;  %s19312_s15 = smov 19  }
  0x1d   :  { %s19578_s27 = sld [smem:[%s21899_s0 + %s19309_s22]]   ;;  %s19313_s22 = smov 20  }
  0x1e   :  { %s19583_s4 = sld [smem:[%s21899_s0 + %s19310_s28]]   ;;  %s19314_s28 = smov 21  }
  0x1f   :  { %s19588_s8 = sld [smem:[%s21899_s0 + %s19311_s7]]   ;;  %s19315_s7 = smov 22  }
  0x20   :  { %21980 = sst [smem:[#allocation176_spill]] %s19563_s6 }
  0x21   :  { %21981 = sst [smem:[#allocation177_spill]] %s19568_s12 }
  0x22   :  { %21982 = sst [smem:[#allocation178_spill]] %s19573_s20 }
  0x23   :  { %s19593_s3 = sld [smem:[%s21899_s0 + %s19312_s15]]   ;;  %s19316_s15 = smov 23  }
  0x24   :  { %21983 = sst [smem:[#allocation179_spill]] %s19583_s4 }
  0x25   :  { %21984 = sst [smem:[#allocation180_spill]] %s19588_s8 }
  0x26   :  { %s19598_s29 = sld [smem:[%s21899_s0 + %s19313_s22]]   ;;  %s19317_s22 = smov 24  }
  0x27   :  { %s19603_s19 = sld [smem:[%s21899_s0 + %s19314_s28]]   ;;  %s19318_s28 = smov 25  }
  0x28   :  { %s19608_s8 = sld [smem:[%s21899_s0 + %s19315_s7]]   ;;  %s19319_s7 = smov 26  }
  0x29   :  { %21985 = sst [smem:[#allocation181_spill]] %s19593_s3 }
  0x2a   :  { %s19613_s3 = sld [smem:[%s21899_s0 + %s19316_s15]]   ;;  %s19320_s15 = smov 27  }
  0x2b   :  { %s19623_s4 = sld [smem:[%s21899_s0 + %s19318_s28]]   ;;  %s19322_s28 = smov 29  }
  0x2c   :  { %21986 = sst [smem:[#allocation182_spill]] %s19598_s29 }
  0x2d   :  { %21987 = sst [smem:[#allocation183_spill]] %s19603_s19 }
  0x2e   :  { %21988 = sst [smem:[#allocation184_spill]] %s19608_s8 }
  0x2f   :  { %s19618_s29 = sld [smem:[%s21899_s0 + %s19317_s22]]   ;;  %s19321_s22 = smov 28  }
  0x30   :  { %21989 = sst [smem:[#allocation185_spill]] %s19613_s3 }
  0x31   :  { %21990 = sst [smem:[#allocation186_spill]] %s19623_s4 }
  0x32   :  { %s19628_s13 = sld [smem:[%s21899_s0 + %s19319_s7]]   ;;  %s19323_s7 = smov 30  }
  0x33   :  { %s19633_s9 = sld [smem:[%s21899_s0 + %s19320_s15]]   ;;  %s19324_s15 = smov 31  }
  0x34   :  { %s19638_s5 = sld [smem:[%s21899_s0 + %s19321_s22]]   ;;  %s19325_s22 = smov 32  }
  0x35   :  { %s19643_s4 = sld [smem:[%s21899_s0 + %s19322_s28]]   ;;  %s19326_s28 = smov 33  }
  0x36   :  { %s19648_s3 = sld [smem:[%s21899_s0 + %s19323_s7]]   ;;  %s19327_s7 = smov 34  }
  0x37   :  { %s19658_s19 = sld [smem:[%s21899_s0 + %s19325_s22]]   ;;  %s19329_s22 = smov 36  }
  0x38   :  { %21991 = sst [smem:[#allocation187_spill]] %s19628_s13 }
  0x39   :  { %21992 = sst [smem:[#allocation188_spill]] %s19633_s9 }
  0x3a   :  { %21993 = sst [smem:[#allocation189_spill]] %s19638_s5 }
  0x3b   :  { %21994 = sst [smem:[#allocation190_spill]] %s19643_s4 }
  0x3c   :  { %21995 = sst [smem:[#allocation191_spill]] %s19648_s3 }
  0x3d   :  { %s19653_s9 = sld [smem:[%s21899_s0 + %s19324_s15]]   ;;  %s19328_s15 = smov 35  }
  0x3e   :  { %s19663_s4 = sld [smem:[%s21899_s0 + %s19326_s28]]   ;;  %s19330_s28 = smov 37  }
  0x3f   :  { %s19668_s3 = sld [smem:[%s21899_s0 + %s19327_s7]]   ;;  %s19331_s7 = smov 38  }
  0x40   :  { %s19678_s20 = sld [smem:[%s21899_s0 + %s19329_s22]]   ;;  %s19333_s22 = smov 40  }
  0x41   :  { %s19688_s6 = sld [smem:[%s21899_s0 + %s19331_s7]]   ;;  %s19335_s7 = smov 42  }
  0x42   :  { %s19698_s24 = sld [smem:[%s21899_s0 + %s19333_s22]]   ;;  %s19337_s22 = smov 44  }
  0x43   :  { %21996 = sst [smem:[#allocation192_spill]] %s19653_s9 }
  0x44   :  { %21997 = sst [smem:[#allocation193_spill]] %s19663_s4 }
  0x45   :  { %21998 = sst [smem:[#allocation194_spill]] %s19668_s3 }
  0x46   :  { %s19673_s9 = sld [smem:[%s21899_s0 + %s19328_s15]]   ;;  %s19332_s15 = smov 39  }
  0x47   :  { %s19683_s4 = sld [smem:[%s21899_s0 + %s19330_s28]]   ;;  %s19334_s28 = smov 41  }
  0x48   :  { %22001 = sst [smem:[#allocation197_spill]] %s19688_s6 }
  0x49   :  { %22003 = sst [smem:[#allocation199_spill]] %s19698_s24 }
  0x4a   :  { %s19708_s6 = sld [smem:[%s21899_s0 + %s19335_s7]]   ;;  %s19339_s7 = smov 46  }
  0x4b   :  { %s19718_s24 = sld [smem:[%s21899_s0 + %s19337_s22]]   ;;  %s19341_s22 = smov 48  }
  0x4c   :  { %21999 = sst [smem:[#allocation195_spill]] %s19673_s9 }
  0x4d   :  { %22000 = sst [smem:[#allocation196_spill]] %s19683_s4 }
  0x4e   :  { %s19693_s9 = sld [smem:[%s21899_s0 + %s19332_s15]]   ;;  %s19336_s15 = smov 43  }
  0x4f   :  { %s19703_s4 = sld [smem:[%s21899_s0 + %s19334_s28]]   ;;  %s19338_s28 = smov 45  }
  0x50   :  { %22005 = sst [smem:[#allocation201_spill]] %s19708_s6 }
  0x51   :  { %s19728_s25 = sld [smem:[%s21899_s0 + %s19339_s7]]   ;;  %s19343_s7 = smov 50  }
  0x52   :  { %s19738_s17 = sld [smem:[%s21899_s0 + %s19341_s22]]   ;;  %s19345_s22 = smov 52  }
  0x54   :  { %22002 = sst [smem:[#allocation198_spill]] %s19693_s9 }
  0x55   :  { %22004 = sst [smem:[#allocation200_spill]] %s19703_s4 }
  0x56   :  { %s19713_s9 = sld [smem:[%s21899_s0 + %s19336_s15]]   ;;  %s19340_s15 = smov 47  }
  0x57   :  { %s19723_s4 = sld [smem:[%s21899_s0 + %s19338_s28]]   ;;  %s19342_s28 = smov 49  }
  0x58   :  { %22008 = sst [smem:[#allocation204_spill]] %s19728_s25 }
  0x59   :  { %22010 = sst [smem:[#allocation206_spill]] %s19738_s17 }
  0x5a   :  { %s19748_s25 = sld [smem:[%s21899_s0 + %s19343_s7]]   ;;  %s19347_s7 = smov 54  }
  0x5b   :  { %s19758_s17 = sld [smem:[%s21899_s0 + %s19345_s22]]   ;;  %s19349_s22 = smov 56  }
  0x5c   :  { %22006 = sst [smem:[#allocation202_spill]] %s19713_s9 }
  0x5d   :  { %22007 = sst [smem:[#allocation203_spill]] %s19723_s4 }
  0x5e   :  { %s19733_s9 = sld [smem:[%s21899_s0 + %s19340_s15]]   ;;  %s19344_s15 = smov 51  }
  0x5f   :  { %s19743_s4 = sld [smem:[%s21899_s0 + %s19342_s28]]   ;;  %s19346_s28 = smov 53  }
  0x60   :  { %22012 = sst [smem:[#allocation208_spill]] %s19748_s25 }
  0x61   :  { %22014 = sst [smem:[#allocation210_spill]] %s19758_s17 }
  0x62   :  { %s19768_s25 = sld [smem:[%s21899_s0 + %s19347_s7]]   ;;  %s19351_s7 = smov 58  }
  0x63   :  { %s19778_s17 = sld [smem:[%s21899_s0 + %s19349_s22]]   ;;  %s19353_s22 = smov 60  }
  0x64   :  { %22009 = sst [smem:[#allocation205_spill]] %s19733_s9 }
  0x65   :  { %22011 = sst [smem:[#allocation207_spill]] %s19743_s4 }
  0x66   :  { %s19753_s9 = sld [smem:[%s21899_s0 + %s19344_s15]]   ;;  %s19348_s15 = smov 55  }
  0x67   :  { %s19763_s4 = sld [smem:[%s21899_s0 + %s19346_s28]]   ;;  %s19350_s28 = smov 57  }
  0x68   :  { %22016 = sst [smem:[#allocation212_spill]] %s19768_s25 }
  0x69   :  { %22018 = sst [smem:[#allocation214_spill]] %s19778_s17 }
  0x6a   :  { %s19788_s25 = sld [smem:[%s21899_s0 + %s19351_s7]]   ;;  %s19355_s7 = smov 62  }
  0x6b   :  { %s19798_s17 = sld [smem:[%s21899_s0 + %s19353_s22]]   ;;  %s19357_s22 = smov 64  }
  0x6c   :  { %22013 = sst [smem:[#allocation209_spill]] %s19753_s9 }
  0x6d   :  { %22015 = sst [smem:[#allocation211_spill]] %s19763_s4 }
  0x6e   :  { %s19773_s9 = sld [smem:[%s21899_s0 + %s19348_s15]]   ;;  %s19352_s15 = smov 59  }
  0x6f   :  { %s19783_s4 = sld [smem:[%s21899_s0 + %s19350_s28]]   ;;  %s19354_s28 = smov 61  }
  0x70   :  { %22020 = sst [smem:[#allocation216_spill]] %s19788_s25 }
  0x71   :  { %22022 = sst [smem:[#allocation218_spill]] %s19798_s17 }
  0x72   :  { %s19808_s25 = sld [smem:[%s21899_s0 + %s19355_s7]]   ;;  %s19359_s7 = smov 66  }
  0x73   :  { %s19818_s17 = sld [smem:[%s21899_s0 + %s19357_s22]]   ;;  %s19361_s22 = smov 68  }
  0x74   :  { %22017 = sst [smem:[#allocation213_spill]] %s19773_s9 }
  0x75   :  { %22019 = sst [smem:[#allocation215_spill]] %s19783_s4 }
  0x76   :  { %s19793_s9 = sld [smem:[%s21899_s0 + %s19352_s15]]   ;;  %s19356_s15 = smov 63  }
  0x77   :  { %s19803_s4 = sld [smem:[%s21899_s0 + %s19354_s28]]   ;;  %s19358_s28 = smov 65  }
  0x78   :  { %22024 = sst [smem:[#allocation220_spill]] %s19808_s25 }
  0x79   :  { %22026 = sst [smem:[#allocation222_spill]] %s19818_s17 }
  0x7a   :  { %s19828_s25 = sld [smem:[%s21899_s0 + %s19359_s7]]   ;;  %s19363_s7 = smov 70  }
  0x7b   :  { %s19838_s17 = sld [smem:[%s21899_s0 + %s19361_s22]]   ;;  %s19365_s22 = smov 72  }
  0x7c   :  { %22021 = sst [smem:[#allocation217_spill]] %s19793_s9 }
  0x7d   :  { %22023 = sst [smem:[#allocation219_spill]] %s19803_s4 }
  0x7e   :  { %s19813_s9 = sld [smem:[%s21899_s0 + %s19356_s15]]   ;;  %s19360_s15 = smov 67  }
  0x7f   :  { %s19823_s4 = sld [smem:[%s21899_s0 + %s19358_s28]]   ;;  %s19362_s28 = smov 69  }
  0x80   :  { %22028 = sst [smem:[#allocation224_spill]] %s19828_s25 }
  0x81   :  { %22030 = sst [smem:[#allocation226_spill]] %s19838_s17 }
  0x82   :  { %s19848_s25 = sld [smem:[%s21899_s0 + %s19363_s7]]   ;;  %s19367_s7 = smov 74  }
  0x83   :  { %s19858_s17 = sld [smem:[%s21899_s0 + %s19365_s22]]   ;;  %s19369_s22 = smov 76  }
  0x84   :  { %22025 = sst [smem:[#allocation221_spill]] %s19813_s9 }
  0x85   :  { %22027 = sst [smem:[#allocation223_spill]] %s19823_s4 }
  0x86   :  { %s19833_s9 = sld [smem:[%s21899_s0 + %s19360_s15]]   ;;  %s19364_s15 = smov 71  }
  0x87   :  { %s19843_s4 = sld [smem:[%s21899_s0 + %s19362_s28]]   ;;  %s19366_s28 = smov 73  }
  0x88   :  { %22032 = sst [smem:[#allocation228_spill]] %s19848_s25 }
  0x89   :  { %22034 = sst [smem:[#allocation230_spill]] %s19858_s17 }
  0x8a   :  { %s19868_s25 = sld [smem:[%s21899_s0 + %s19367_s7]]   ;;  %s19371_s7 = smov 78  }
  0x8b   :  { %s19878_s17 = sld [smem:[%s21899_s0 + %s19369_s22]]   ;;  %s19373_s22 = smov 80  }
  0x8c   :  { %22029 = sst [smem:[#allocation225_spill]] %s19833_s9 }
  0x8d   :  { %22031 = sst [smem:[#allocation227_spill]] %s19843_s4 }
  0x8e   :  { %s19853_s9 = sld [smem:[%s21899_s0 + %s19364_s15]]   ;;  %s19368_s15 = smov 75  }
  0x8f   :  { %s19863_s4 = sld [smem:[%s21899_s0 + %s19366_s28]]   ;;  %s19370_s28 = smov 77  }
  0x90   :  { %22036 = sst [smem:[#allocation232_spill]] %s19868_s25 }
  0x91   :  { %22038 = sst [smem:[#allocation234_spill]] %s19878_s17 }
  0x92   :  { %s19888_s25 = sld [smem:[%s21899_s0 + %s19371_s7]]   ;;  %s19375_s7 = smov 82  }
  0x93   :  { %s19898_s17 = sld [smem:[%s21899_s0 + %s19373_s22]]   ;;  %s19377_s22 = smov 84  }
  0x94   :  { %22033 = sst [smem:[#allocation229_spill]] %s19853_s9 }
  0x95   :  { %22035 = sst [smem:[#allocation231_spill]] %s19863_s4 }
  0x96   :  { %s19873_s9 = sld [smem:[%s21899_s0 + %s19368_s15]]   ;;  %s19372_s15 = smov 79  }
  0x97   :  { %s19883_s4 = sld [smem:[%s21899_s0 + %s19370_s28]]   ;;  %s19374_s28 = smov 81  }
  0x98   :  { %22040 = sst [smem:[#allocation236_spill]] %s19888_s25 }
  0x99   :  { %22042 = sst [smem:[#allocation238_spill]] %s19898_s17 }
  0x9a   :  { %s19908_s25 = sld [smem:[%s21899_s0 + %s19375_s7]]   ;;  %s19379_s7 = smov 86  }
  0x9b   :  { %s19918_s17 = sld [smem:[%s21899_s0 + %s19377_s22]]   ;;  %s19381_s22 = smov 88  }
  0x9c   :  { %22037 = sst [smem:[#allocation233_spill]] %s19873_s9 }
  0x9d   :  { %22039 = sst [smem:[#allocation235_spill]] %s19883_s4 }
  0x9e   :  { %s19893_s9 = sld [smem:[%s21899_s0 + %s19372_s15]]   ;;  %s19376_s15 = smov 83  }
  0x9f   :  { %s19903_s4 = sld [smem:[%s21899_s0 + %s19374_s28]]   ;;  %s19378_s28 = smov 85  }
  0xa0   :  { %22044 = sst [smem:[#allocation240_spill]] %s19908_s25 }
  0xa1   :  { %22046 = sst [smem:[#allocation242_spill]] %s19918_s17 }
  0xa2   :  { %s19928_s25 = sld [smem:[%s21899_s0 + %s19379_s7]]   ;;  %s19383_s7 = smov 90  }
  0xa3   :  { %s19938_s17 = sld [smem:[%s21899_s0 + %s19381_s22]]   ;;  %s19385_s22 = smov 92  }
  0xa4   :  { %22041 = sst [smem:[#allocation237_spill]] %s19893_s9 }
  0xa5   :  { %22043 = sst [smem:[#allocation239_spill]] %s19903_s4 }
  0xa6   :  { %s19913_s9 = sld [smem:[%s21899_s0 + %s19376_s15]]   ;;  %s19380_s15 = smov 87  }
  0xa7   :  { %s19923_s4 = sld [smem:[%s21899_s0 + %s19378_s28]]   ;;  %s19382_s28 = smov 89  }
  0xa8   :  { %22048 = sst [smem:[#allocation244_spill]] %s19928_s25 }
  0xa9   :  { %22050 = sst [smem:[#allocation246_spill]] %s19938_s17 }
  0xaa   :  { %s19948_s25 = sld [smem:[%s21899_s0 + %s19383_s7]]   ;;  %s19387_s7 = smov 94  }
  0xab   :  { %s19958_s17 = sld [smem:[%s21899_s0 + %s19385_s22]]   ;;  %s19389_s22 = smov 96  }
  0xac   :  { %22045 = sst [smem:[#allocation241_spill]] %s19913_s9 }
  0xad   :  { %22047 = sst [smem:[#allocation243_spill]] %s19923_s4 }
  0xae   :  { %s19933_s9 = sld [smem:[%s21899_s0 + %s19380_s15]]   ;;  %s19384_s15 = smov 91  }
  0xaf   :  { %s19943_s4 = sld [smem:[%s21899_s0 + %s19382_s28]]   ;;  %s19386_s28 = smov 93  }
  0xb0   :  { %22052 = sst [smem:[#allocation248_spill]] %s19948_s25 }
  0xb1   :  { %22054 = sst [smem:[#allocation250_spill]] %s19958_s17 }
  0xb2   :  { %s19968_s25 = sld [smem:[%s21899_s0 + %s19387_s7]]   ;;  %s19391_s7 = smov 98  }
  0xb3   :  { %s19978_s17 = sld [smem:[%s21899_s0 + %s19389_s22]]   ;;  %s19393_s22 = smov 100  }
  0xb4   :  { %22049 = sst [smem:[#allocation245_spill]] %s19933_s9 }
  0xb5   :  { %22051 = sst [smem:[#allocation247_spill]] %s19943_s4 }
  0xb6   :  { %s19953_s9 = sld [smem:[%s21899_s0 + %s19384_s15]]   ;;  %s19388_s15 = smov 95  }
  0xb7   :  { %s19963_s4 = sld [smem:[%s21899_s0 + %s19386_s28]]   ;;  %s19390_s28 = smov 97  }
  0xb8   :  { %22056 = sst [smem:[#allocation252_spill]] %s19968_s25 }
  0xb9   :  { %22058 = sst [smem:[#allocation254_spill]] %s19978_s17 }
  0xba   :  { %s19988_s25 = sld [smem:[%s21899_s0 + %s19391_s7]]   ;;  %s19395_s7 = smov 102  }
  0xbb   :  { %s19998_s17 = sld [smem:[%s21899_s0 + %s19393_s22]]   ;;  %s19397_s22 = smov 104  }
  0xbc   :  { %22053 = sst [smem:[#allocation249_spill]] %s19953_s9 }
  0xbd   :  { %22055 = sst [smem:[#allocation251_spill]] %s19963_s4 }
  0xbe   :  { %s19973_s9 = sld [smem:[%s21899_s0 + %s19388_s15]]   ;;  %s19392_s15 = smov 99  }
  0xbf   :  { %s19983_s4 = sld [smem:[%s21899_s0 + %s19390_s28]]   ;;  %s19394_s28 = smov 101  }
  0xc0   :  { %22060 = sst [smem:[#allocation256_spill]] %s19988_s25 }
  0xc1   :  { %22062 = sst [smem:[#allocation258_spill]] %s19998_s17 }
  0xc2   :  { %s20008_s25 = sld [smem:[%s21899_s0 + %s19395_s7]]   ;;  %s19399_s7 = smov 106  }
  0xc3   :  { %s20018_s17 = sld [smem:[%s21899_s0 + %s19397_s22]]   ;;  %s19401_s22 = smov 108  }
  0xc4   :  { %22057 = sst [smem:[#allocation253_spill]] %s19973_s9 }
  0xc5   :  { %22059 = sst [smem:[#allocation255_spill]] %s19983_s4 }
  0xc6   :  { %s19993_s9 = sld [smem:[%s21899_s0 + %s19392_s15]]   ;;  %s19396_s15 = smov 103  }
  0xc7   :  { %s20003_s4 = sld [smem:[%s21899_s0 + %s19394_s28]]   ;;  %s19398_s28 = smov 105  }
  0xc8   :  { %22064 = sst [smem:[#allocation260_spill]] %s20008_s25 }
  0xc9   :  { %22066 = sst [smem:[#allocation262_spill]] %s20018_s17 }
  0xca   :  { %s20028_s25 = sld [smem:[%s21899_s0 + %s19399_s7]]  }
  0xcb   :  { %s20038_s17 = sld [smem:[%s21899_s0 + %s19401_s22]]  }
  0xcc   :  { %22061 = sst [smem:[#allocation257_spill]] %s19993_s9 }
  0xcd   :  { %22063 = sst [smem:[#allocation259_spill]] %s20003_s4 }
  0xce   :  { %s20013_s9 = sld [smem:[%s21899_s0 + %s19396_s15]]   ;;  %s19400_s15 = smov 107  }
  0xcf   :  { %s20023_s4 = sld [smem:[%s21899_s0 + %s19398_s28]]   ;;  %s19402_s28 = smov 109  }
  0xd1   :  { %22068 = sst [smem:[#allocation264_spill]] %s20038_s17 }
  0xd4   :  { %22065 = sst [smem:[#allocation261_spill]] %s20013_s9 }
  0xd5   :  { %22067 = sst [smem:[#allocation263_spill]] %s20023_s4 }
  0xd6   :  { %s20033_s9 = sld [smem:[%s21899_s0 + %s19400_s15]]  }
  0xd7   :  { %s20043_s4 = sld [smem:[%s21899_s0 + %s19402_s28]]  }
  0xd8   :  { %225 = vsyncpa [#allocation3], 0 }
  0xd9   :  { %226 = vsyncpa [#allocation6], 0 }
  0xda   :  { %227 = vsyncpa [#allocation9], 0 }
  0xdb   :  { %228 = vsyncpa [#allocation12], 0 }
  0xdc   :  { %229 = vsyncpa [#allocation15], 0 }
  0xdd   :  { %230 = vsyncpa [#allocation18], 0 }
  0xde   :  { %231 = vsyncpa [#allocation21], 0 }
  0xdf   :  { %232 = vsyncpa [#allocation24], 0 }
  0xe0   :  { %233 = vsyncpa [#allocation27], 0 }
  0xe1   :  { %234 = vsyncpa [#allocation30], 0 }
  0xe2   :  { %235 = vsyncpa [#allocation33], 0 }
  0xe3   :  { %236 = vsyncpa [#allocation36], 0 }
  0xe4   :  { %237 = vsyncpa [#allocation39], 0 }
  0xe5   :  { %238 = vsyncpa [#allocation42], 0 }
  0xe6   :  { %239 = vsyncpa [#allocation45], 0 }
  0xe7   :  { %240 = vsyncpa [#allocation48], 0 }
  0xe8   :  { %241 = vsyncpa [#allocation51], 0 }
  0xe9   :  { %242 = vsyncpa [#allocation54], 0 }
  0xea   :  { %243 = vsyncpa [#allocation57], 0 }
  0xeb   :  { %244 = vsyncpa [#allocation60], 0 }
  0xec   :  { %245 = vsyncpa [#allocation63], 0 }
  0xed   :  { %246 = vsyncpa [#allocation66], 0 }
  0xee   :  { %247 = vsyncpa [#allocation69], 0 }
  0xef   :  { %248 = vsyncpa [#allocation72], 0 }
  0xf0   :  { %249 = vsyncpa [#allocation75], 0 }
  0xf1   :  { %250 = vsyncpa [#allocation78], 0 }
  0xf2   :  { %251 = vsyncpa [#allocation81], 0 }
  0xf3   :  { %252 = vsyncpa [#allocation84], 0 }
  0xf4   :  { %253 = vsyncpa [#allocation87], 0 }
  0xf5   :  { %254 = vsyncpa [#allocation90], 0 }
  0xf6   :  { %255 = vsyncpa [#allocation93], 0 }
  0xf7   :  { %256 = vsyncpa [#allocation96], 0 }
  0xf8   :  { %257 = vsyncpa [#allocation99], 0 }
  0xf9   :  { %258 = vsyncpa [#allocation102], 0 }
  0xfa   :  { %259 = vsyncpa [#allocation105], 0 }
  0xfb   :  { %260 = vsyncpa [#allocation108], 0 }
  0xfc   :  { %261 = vsyncpa [#allocation111], 0 }
  0xfd   :  { %262 = vsyncpa [#allocation114], 0 }
  0xfe   :  { %263 = vsyncpa [#allocation117], 0 }
  0xff   :  { %264 = vsyncpa [#allocation4], 0 }
 0x100   :  { %266 = vsyncpa [#allocation4 + $0x1], 0 }
 0x101   :  { %267 = vsyncpa [#allocation121], 0 }
 0x102   :  { %269 = vsyncpa [#allocation121 + $0x1], 0  ;;  %s20045_s0 = smov 0   ;;  %s20047_s7 = smov 0  }
 0x103   :  { %22069 = sst [smem:[#allocation265_spill]] %s20045_s0  ;;  %s20049_s10 = smov 0  }
 0x104   :  { %s20051_s11 = smov 0  }
 0x105 LB: > { %s22071_s17 = sld [smem:[#allocation264_spill]]  ;;  %s20066_s15 = sadd.s32 4294967295, %s19292_s11   ;;  %s19292_s11 = sphi %s20051_s11, %s22202_s11   ;;  %s19288_s10 = sphi %s20049_s10, %s22204_s10   ;;  %s19284_s7 = sphi %s20047_s7, %s22206_s7  }
 0x106   : > { %s22072_s0 = sld [smem:[#allocation265_spill]]  ;;  %s21926_s16 = sadd.s32 4294967294, %s19292_s11  }
 0x107   : > { %22074 = sst [smem:[#allocation266_spill]] %s19288_s10  ;;  %s20070_s18 = sadd.s32 1, %s19292_s11  }
 0x108   : > { %22075 = sst [smem:[#allocation267_spill]] %s20070_s18  ;;  %s2523_s22 = sadd.s32 1, %s19288_s10 }
 0x109   : > { %s2520_s23 = ssub.s32 %s19292_s11, %s20070_s18  ;;  %p2533_p0 = scmp.ne.s32.totalorder %s19288_s10, %s19284_s7 }
 0x10a   : > { %p2521_p1 = scmp.eq.s32.totalorder %s2520_s23, 0  ;;  %p2534_p2 = scmp.eq.s32.totalorder %s20066_s15, 1 }
 0x10b   : > { %p2540_p4 = scmp.eq.s32.totalorder %s21926_s16, 1  ;;  %p14696_p7 = scmp.ge.s32.totalorder %s19292_s11, 1 }
 0x10c   : > { %22073 = sst [smem:[#allocation265_spill]] %s22072_s0  ;;  %p2539_p3 = scmp.ne.s32.totalorder %s19284_s7, %s22072_s0 }
 0x10d   : > { %s20083_s26 = scalar_select %p2521_p1, %s19288_s10, %s2523_s22  }
 0x10e   : > { %p20085_p5 = por %p2534_p2, %p2533_p0  ;;  %p20089_p6 = por %p2540_p4, %p2539_p3 }
 0x10f   : > { %22076 = sst [smem:[#allocation268_spill]] %s20083_s26  ;;  %p2625_p8 = scmp.lt.s32.totalorder %s19292_s11, 3 }
 0x110   : > { %s22077_s28 = scalar_select %p20085_p5, 1, 0 }
 0x111   : > { %s22078_s1 = scalar_select %p20089_p6, 1, 0 }
 0x112   : > { %p20095_p9 = pnand %p14696_p7, %p2625_p8 }
 0x113   : > { %22079 = sst [smem:[#allocation269_spill]] %s22078_s1  ;;  %p16608_p10 = scmp.eq.s32.totalorder (!%p20095_p9), %s20066_s15, 0 }
 0x114   : > { %2629 = sbr.rel (%p20095_p9) target bundleno = 1143 (0x477), region = 12  ;;  %s19403_s22 = smov (!%p20095_p9), [#allocation5]  }
 0x115   : > { %s2649_s23 = sshll.u32 (!%p20095_p9), %s19403_s22, 4  ;;  %s19404_s16 = smov (!%p20095_p9), [#allocation8]   ;;  %s2650_s23 = int_to_ptr.vmem [resolvable:$true] %s2649_s23 }
 0x116   : > { %s2680_s26 = sshll.u32 (!%p20095_p9), %s19404_s16, 4  ;;  %s17182_s10 = scalar_lea.vmem (!%p20095_p9), %s2650_s23, 16  ;;  %s2681_s26 = int_to_ptr.vmem [resolvable:$true] %s2680_s26 }
 0x117   : > { %p17183_p11 = scmp.ne.s32.totalorder (!%p20095_p9), %s2650_s23, %s17182_s10  ;;  %s17188_s18 = scalar_lea.vmem (!%p20095_p9), %s2650_s23, 32 }
 0x118   : > { %p17189_p0 = scmp.lt.s32.totalorder (!%p20095_p9), %s2650_s23, %s2650_s23  ;;  %p17190_p1 = scmp.lt.s32.totalorder (!%p20095_p9), %s17188_s18, %s17182_s10 }
 0x119   : > { %p17184_p12 = pnand %p17183_p11, %p16608_p10 }
 0x11a   : > { %p17191_p2 = por %p17190_p1, %p17189_p0 }
 0x11b   : > { %p17185_p13 = pneg %p17184_p12 }
 0x11d   : > { %p17192_p3 = pnand %p17191_p2, %p17185_p13 }
 0x11f   : > { %17195 = shalt.err (!%p17192_p3)
}
 0x120   : > { %s22081_s21 = sld [smem:[#allocation168_spill]]  ;;  %s17206_s22 = scalar_lea.vmem %s2681_s26, 16 }
 0x121   : > { %p17207_p4 = scmp.ne.s32.totalorder %s2681_s26, %s17206_s22  ;;  %s17212_s16 = scalar_lea.vmem %s2681_s26, 32 }
 0x122   : > { %p17213_p11 = scmp.lt.s32.totalorder %s2681_s26, %s2681_s26  ;;  %p17214_p12 = scmp.lt.s32.totalorder %s17212_s16, %s17206_s22 }
 0x123   : > { %p17208_p7 = pnand %p17207_p4, %p16608_p10 }
 0x124   : > { %p17215_p6 = por %p17214_p12, %p17213_p11 }
 0x125   : > { %p17209_p8 = pneg %p17208_p7 }
 0x126   : > { %16287 = dma.hbm_to_vmem [thread:$0]  (%p16608_p10), %s22081_s21, 16, %s2650_s23, [#allocation6]  }
 0x127   : > { %p17216_p5 = pnand %p17215_p6, %p17209_p8 }
 0x129   : > { %17219 = shalt.err (!%p17216_p5)
}
 0x12a   : > { %s22082_s14 = sld [smem:[#allocation173_spill]]  ;;  %s19405_s10 = smov [#allocation11]  }
 0x12b   : > { %s2705_s18 = sshll.u32 %s19405_s10, 4  ;;  %s19406_s23 = smov [#allocation14]   ;;  %s2706_s18 = int_to_ptr.vmem [resolvable:$true] %s2705_s18 }
 0x12c   : > { %s2727_s21 = sshll.u32 %s19406_s23, 4  ;;  %s17230_s1 = scalar_lea.vmem %s2706_s18, 16  ;;  %s2728_s21 = int_to_ptr.vmem [resolvable:$true] %s2727_s21 }
 0x12d   : > { %p17231_p13 = scmp.ne.s32.totalorder %s2706_s18, %s17230_s1  ;;  %s17236_s0 = scalar_lea.vmem %s2706_s18, 32 }
 0x12e   : > { %p17237_p2 = scmp.lt.s32.totalorder %s2706_s18, %s2706_s18  ;;  %p17238_p3 = scmp.lt.s32.totalorder %s17236_s0, %s17230_s1 }
 0x12f   : > { %p17232_p0 = pnand %p17231_p13, %p16608_p10 }
 0x130   : > { %16291 = dma.hbm_to_vmem [thread:$0]  (%p16608_p10), %s22082_s14, 16, %s2681_s26, [#allocation9]  }
 0x131   : > { %p17233_p1 = pneg %p17232_p0  ;;  %p17239_p6 = por %p17238_p3, %p17237_p2 }
 0x133   : > { %p17240_p5 = pnand %p17239_p6, %p17233_p1 }
 0x135   : > { %17243 = shalt.err (!%p17240_p5)
}
 0x136   : > { %16295 = dma.hbm_to_vmem [thread:$0]  (%p16608_p10), %s19558_s30, 16, %s2706_s18, [#allocation12]  }
 0x137   : > { %s17254_s26 = scalar_lea.vmem %s2728_s21, 16  ;;  %s17260_s22 = scalar_lea.vmem %s2728_s21, 32 }
 0x138   : > { %p17255_p4 = scmp.ne.s32.totalorder %s2728_s21, %s17254_s26  ;;  %p17261_p11 = scmp.lt.s32.totalorder %s2728_s21, %s2728_s21 }
 0x139   : > { %p17262_p12 = scmp.lt.s32.totalorder %s17260_s22, %s17254_s26 }
 0x13a   : > { %p17256_p7 = pnand %p17255_p4, %p16608_p10 }
 0x13b   : > { %p17263_p13 = por %p17262_p12, %p17261_p11 }
 0x13c   : > { %p17257_p8 = pneg %p17256_p7 }
 0x13e   : > { %p17264_p0 = pnand %p17263_p13, %p17257_p8 }
 0x140   : > { %17267 = shalt.err (!%p17264_p0)
}
 0x141   : > { %s22083_s12 = sld [smem:[#allocation177_spill]]  ;;  %s19407_s0 = smov [#allocation17]  }
 0x142   : > { %s2749_s1 = sshll.u32 %s19407_s0, 4  ;;  %s19408_s16 = smov [#allocation20]   ;;  %s2750_s1 = int_to_ptr.vmem [resolvable:$true] %s2749_s1 }
 0x143   : > { %s2783_s10 = sshll.u32 %s19408_s16, 4  ;;  %s17278_s18 = scalar_lea.vmem %s2750_s1, 16  ;;  %s2784_s10 = int_to_ptr.vmem [resolvable:$true] %s2783_s10 }
 0x144   : > { %p17279_p1 = scmp.ne.s32.totalorder %s2750_s1, %s17278_s18  ;;  %s17284_s23 = scalar_lea.vmem %s2750_s1, 32 }
 0x145   : > { %p17285_p6 = scmp.lt.s32.totalorder %s2750_s1, %s2750_s1  ;;  %p17286_p5 = scmp.lt.s32.totalorder %s17284_s23, %s17278_s18 }
 0x146   : > { %p17280_p2 = pnand %p17279_p1, %p16608_p10 }
 0x147   : > { %16299 = dma.hbm_to_vmem [thread:$0]  (%p16608_p10), %s22083_s12, 16, %s2728_s21, [#allocation15]  }
 0x148   : > { %p17281_p3 = pneg %p17280_p2  ;;  %p17287_p4 = por %p17286_p5, %p17285_p6 }
 0x14a   : > { %p17288_p7 = pnand %p17287_p4, %p17281_p3 }
 0x14c   : > { %17291 = shalt.err (!%p17288_p7)
}
 0x14d   : > { %16303 = dma.hbm_to_vmem [thread:$0]  (%p16608_p10), %s19578_s27, 16, %s2750_s1, [#allocation18]  }
 0x14e   : > { %s17302_s21 = scalar_lea.vmem %s2784_s10, 16  ;;  %s17308_s26 = scalar_lea.vmem %s2784_s10, 32 }
 0x14f   : > { %p17303_p8 = scmp.ne.s32.totalorder %s2784_s10, %s17302_s21  ;;  %p17309_p13 = scmp.lt.s32.totalorder %s2784_s10, %s2784_s10 }
 0x150   : > { %p17310_p0 = scmp.lt.s32.totalorder %s17308_s26, %s17302_s21 }
 0x151   : > { %p17304_p11 = pnand %p17303_p8, %p16608_p10 }
 0x152   : > { %p17311_p1 = por %p17310_p0, %p17309_p13 }
 0x153   : > { %p17305_p12 = pneg %p17304_p11 }
 0x155   : > { %p17312_p2 = pnand %p17311_p1, %p17305_p12 }
 0x157   : > { %17315 = shalt.err (!%p17312_p2)
}
 0x158   : > { %s22084_s8 = sld [smem:[#allocation184_spill]]  ;;  %s19409_s22 = smov [#allocation23]  }
 0x159   : > { %s2805_s0 = sshll.u32 %s19409_s22, 4  ;;  %s19410_s1 = smov [#allocation26]   ;;  %s2806_s0 = int_to_ptr.vmem [resolvable:$true] %s2805_s0 }
 0x15a   : > { %s2827_s16 = sshll.u32 %s19410_s1, 4  ;;  %s17326_s18 = scalar_lea.vmem %s2806_s0, 16  ;;  %s2828_s16 = int_to_ptr.vmem [resolvable:$true] %s2827_s16 }
 0x15b   : > { %p17327_p3 = scmp.ne.s32.totalorder %s2806_s0, %s17326_s18  ;;  %s17332_s23 = scalar_lea.vmem %s2806_s0, 32 }
 0x15c   : > { %p17333_p4 = scmp.lt.s32.totalorder %s2806_s0, %s2806_s0  ;;  %p17334_p7 = scmp.lt.s32.totalorder %s17332_s23, %s17326_s18 }
 0x15d   : > { %p17328_p6 = pnand %p17327_p3, %p16608_p10 }
 0x15e   : > { %16307 = dma.hbm_to_vmem [thread:$0]  (%p16608_p10), %s22084_s8, 16, %s2784_s10, [#allocation21]  }
 0x15f   : > { %p17329_p5 = pneg %p17328_p6  ;;  %p17335_p8 = por %p17334_p7, %p17333_p4 }
 0x161   : > { %p17336_p11 = pnand %p17335_p8, %p17329_p5 }
 0x163   : > { %17339 = shalt.err (!%p17336_p11)
}
 0x164   : > { %16311 = dma.hbm_to_vmem [thread:$0]  (%p16608_p10), %s19618_s29, 16, %s2806_s0, [#allocation24]  }
 0x165   : > { %s17350_s10 = scalar_lea.vmem %s2828_s16, 16  ;;  %s17356_s21 = scalar_lea.vmem %s2828_s16, 32 }
 0x166   : > { %p17351_p12 = scmp.ne.s32.totalorder %s2828_s16, %s17350_s10  ;;  %p17357_p1 = scmp.lt.s32.totalorder %s2828_s16, %s2828_s16 }
 0x167   : > { %p17358_p2 = scmp.lt.s32.totalorder %s17356_s21, %s17350_s10 }
 0x168   : > { %p17352_p13 = pnand %p17351_p12, %p16608_p10 }
 0x169   : > { %p17359_p3 = por %p17358_p2, %p17357_p1 }
 0x16a   : > { %p17353_p0 = pneg %p17352_p13 }
 0x16c   : > { %p17360_p6 = pnand %p17359_p3, %p17353_p0 }
 0x16e   : > { %17363 = shalt.err (!%p17360_p6)
}
 0x16f   : > { %s22085_s13 = sld [smem:[#allocation187_spill]]  ;;  %s19411_s26 = smov [#allocation29]  }
 0x170   : > { %s2849_s22 = sshll.u32 %s19411_s26, 4  ;;  %s19412_s0 = smov [#allocation32]   ;;  %s2850_s22 = int_to_ptr.vmem [resolvable:$true] %s2849_s22 }
 0x171   : > { %s2877_s1 = sshll.u32 %s19412_s0, 4  ;;  %s17374_s18 = scalar_lea.vmem %s2850_s22, 16  ;;  %s2878_s1 = int_to_ptr.vmem [resolvable:$true] %s2877_s1 }
 0x172   : > { %p17375_p5 = scmp.ne.s32.totalorder %s2850_s22, %s17374_s18  ;;  %s17380_s23 = scalar_lea.vmem %s2850_s22, 32 }
 0x173   : > { %p17381_p8 = scmp.lt.s32.totalorder %s2850_s22, %s2850_s22  ;;  %p17382_p11 = scmp.lt.s32.totalorder %s17380_s23, %s17374_s18 }
 0x174   : > { %p17376_p4 = pnand %p17375_p5, %p16608_p10 }
 0x175   : > { %16315 = dma.hbm_to_vmem [thread:$0]  (%p16608_p10), %s22085_s13, 16, %s2828_s16, [#allocation27]  }
 0x176   : > { %p17377_p7 = pneg %p17376_p4  ;;  %p17383_p12 = por %p17382_p11, %p17381_p8 }
 0x178   : > { %p17384_p13 = pnand %p17383_p12, %p17377_p7 }
 0x17a   : > { %17387 = shalt.err (!%p17384_p13)
}
 0x17b   : > { %s22086_s5 = sld [smem:[#allocation189_spill]]  ;;  %s17398_s16 = scalar_lea.vmem %s2878_s1, 16 }
 0x17c   : > { %p17399_p0 = scmp.ne.s32.totalorder %s2878_s1, %s17398_s16  ;;  %s17404_s10 = scalar_lea.vmem %s2878_s1, 32 }
 0x17d   : > { %p17405_p3 = scmp.lt.s32.totalorder %s2878_s1, %s2878_s1  ;;  %p17406_p6 = scmp.lt.s32.totalorder %s17404_s10, %s17398_s16 }
 0x17e   : > { %p17400_p1 = pnand %p17399_p0, %p16608_p10 }
 0x17f   : > { %p17407_p5 = por %p17406_p6, %p17405_p3 }
 0x180   : > { %p17401_p2 = pneg %p17400_p1 }
 0x181   : > { %16319 = dma.hbm_to_vmem [thread:$0]  (%p16608_p10), %s22086_s5, 16, %s2850_s22, [#allocation30]  }
 0x182   : > { %p17408_p4 = pnand %p17407_p5, %p17401_p2 }
 0x184   : > { %17411 = shalt.err (!%p17408_p4)
}
 0x185   : > { %16323 = dma.hbm_to_vmem [thread:$0]  (%p16608_p10), %s19658_s19, 16, %s2878_s1, [#allocation33]  }
 0x186   : > { %s19413_s21 = smov [#allocation35]   ;;  %s19414_s22 = smov [#allocation38]  }
 0x187   : > { %s2899_s26 = sshll.u32 %s19413_s21, 4  ;;  %s2921_s0 = sshll.u32 %s19414_s22, 4  ;;  %s2900_s26 = int_to_ptr.vmem [resolvable:$true] %s2899_s26  ;;  %s2922_s0 = int_to_ptr.vmem [resolvable:$true] %s2921_s0 }
 0x188   : > { %s17422_s18 = scalar_lea.vmem %s2900_s26, 16  ;;  %s17428_s23 = scalar_lea.vmem %s2900_s26, 32 }
 0x189   : > { %p17423_p7 = scmp.ne.s32.totalorder %s2900_s26, %s17422_s18  ;;  %p17429_p12 = scmp.lt.s32.totalorder %s2900_s26, %s2900_s26 }
 0x18a   : > { %p17430_p13 = scmp.lt.s32.totalorder %s17428_s23, %s17422_s18 }
 0x18b   : > { %p17424_p8 = pnand %p17423_p7, %p16608_p10 }
 0x18c   : > { %p17431_p0 = por %p17430_p13, %p17429_p12 }
 0x18d   : > { %p17425_p11 = pneg %p17424_p8 }
 0x18f   : > { %p17432_p1 = pnand %p17431_p0, %p17425_p11 }
 0x191   : > { %17435 = shalt.err (!%p17432_p1)
}
 0x192   : > { %s22087_s3 = sld [smem:[#allocation194_spill]]  ;;  %s17446_s1 = scalar_lea.vmem %s2922_s0, 16 }
 0x193   : > { %p17447_p2 = scmp.ne.s32.totalorder %s2922_s0, %s17446_s1  ;;  %s17452_s16 = scalar_lea.vmem %s2922_s0, 32 }
 0x194   : > { %p17453_p5 = scmp.lt.s32.totalorder %s2922_s0, %s2922_s0  ;;  %p17454_p4 = scmp.lt.s32.totalorder %s17452_s16, %s17446_s1 }
 0x195   : > { %p17448_p3 = pnand %p17447_p2, %p16608_p10 }
 0x196   : > { %p17455_p7 = por %p17454_p4, %p17453_p5 }
 0x197   : > { %p17449_p6 = pneg %p17448_p3 }
 0x198   : > { %16327 = dma.hbm_to_vmem [thread:$0]  (%p16608_p10), %s22087_s3, 16, %s2900_s26, [#allocation36]  }
 0x199   : > { %p17456_p8 = pnand %p17455_p7, %p17449_p6 }
 0x19b   : > { %17459 = shalt.err (!%p17456_p8)
}
 0x19c   : > { %16331 = dma.hbm_to_vmem [thread:$0]  (%p16608_p10), %s19678_s20, 16, %s2922_s0, [#allocation39]  }
 0x19d   : > { %s19415_s10 = smov [#allocation41]   ;;  %s19416_s26 = smov [#allocation44]  }
 0x19e   : > { %s2955_s21 = sshll.u32 %s19415_s10, 4  ;;  %s2977_s22 = sshll.u32 %s19416_s26, 4  ;;  %s2956_s21 = int_to_ptr.vmem [resolvable:$true] %s2955_s21  ;;  %s2978_s22 = int_to_ptr.vmem [resolvable:$true] %s2977_s22 }
 0x19f   : > { %s17470_s18 = scalar_lea.vmem %s2956_s21, 16  ;;  %s17476_s23 = scalar_lea.vmem %s2956_s21, 32 }
 0x1a0   : > { %p17471_p11 = scmp.ne.s32.totalorder %s2956_s21, %s17470_s18  ;;  %p17477_p0 = scmp.lt.s32.totalorder %s2956_s21, %s2956_s21 }
 0x1a1   : > { %p17478_p1 = scmp.lt.s32.totalorder %s17476_s23, %s17470_s18 }
 0x1a2   : > { %p17472_p12 = pnand %p17471_p11, %p16608_p10 }
 0x1a3   : > { %p17479_p2 = por %p17478_p1, %p17477_p0 }
 0x1a4   : > { %p17473_p13 = pneg %p17472_p12 }
 0x1a6   : > { %p17480_p3 = pnand %p17479_p2, %p17473_p13 }
 0x1a8   : > { %17483 = shalt.err (!%p17480_p3)
}
 0x1a9   : > { %s22088_s6 = sld [smem:[#allocation201_spill]]  ;;  %s17494_s0 = scalar_lea.vmem %s2978_s22, 16 }
 0x1aa   : > { %p17495_p6 = scmp.ne.s32.totalorder %s2978_s22, %s17494_s0  ;;  %s17500_s1 = scalar_lea.vmem %s2978_s22, 32 }
 0x1ab   : > { %p17501_p7 = scmp.lt.s32.totalorder %s2978_s22, %s2978_s22  ;;  %p17502_p8 = scmp.lt.s32.totalorder %s17500_s1, %s17494_s0 }
 0x1ac   : > { %p17496_p5 = pnand %p17495_p6, %p16608_p10 }
 0x1ad   : > { %p17503_p11 = por %p17502_p8, %p17501_p7 }
 0x1ae   : > { %p17497_p4 = pneg %p17496_p5 }
 0x1af   : > { %16335 = dma.hbm_to_vmem [thread:$0]  (%p16608_p10), %s22088_s6, 16, %s2956_s21, [#allocation42]  }
 0x1b0   : > { %p17504_p12 = pnand %p17503_p11, %p17497_p4 }
 0x1b2   : > { %17507 = shalt.err (!%p17504_p12)
}
 0x1b3   : > { %16339 = dma.hbm_to_vmem [thread:$0]  (%p16608_p10), %s19718_s24, 16, %s2978_s22, [#allocation45]  }
 0x1b4   : > { %s19417_s16 = smov [#allocation47]   ;;  %s19418_s21 = smov [#allocation50]  }
 0x1b5   : > { %s2999_s10 = sshll.u32 %s19417_s16, 4  ;;  %s3033_s26 = sshll.u32 %s19418_s21, 4  ;;  %s3000_s10 = int_to_ptr.vmem [resolvable:$true] %s2999_s10  ;;  %s3034_s26 = int_to_ptr.vmem [resolvable:$true] %s3033_s26 }
 0x1b6   : > { %s17518_s18 = scalar_lea.vmem %s3000_s10, 16  ;;  %s17524_s23 = scalar_lea.vmem %s3000_s10, 32 }
 0x1b7   : > { %p17519_p13 = scmp.ne.s32.totalorder %s3000_s10, %s17518_s18  ;;  %p17525_p2 = scmp.lt.s32.totalorder %s3000_s10, %s3000_s10 }
 0x1b8   : > { %p17526_p3 = scmp.lt.s32.totalorder %s17524_s23, %s17518_s18 }
 0x1b9   : > { %p17520_p0 = pnand %p17519_p13, %p16608_p10 }
 0x1ba   : > { %p17527_p6 = por %p17526_p3, %p17525_p2 }
 0x1bb   : > { %p17521_p1 = pneg %p17520_p0 }
 0x1bd   : > { %p17528_p5 = pnand %p17527_p6, %p17521_p1 }
 0x1bf   : > { %17531 = shalt.err (!%p17528_p5)
}
 0x1c0   : > { %s22089_s0 = sld [smem:[#allocation204_spill]]  ;;  %s17542_s22 = scalar_lea.vmem %s3034_s26, 16 }
 0x1c1   : > { %p17543_p4 = scmp.ne.s32.totalorder %s3034_s26, %s17542_s22  ;;  %s17548_s1 = scalar_lea.vmem %s3034_s26, 32 }
 0x1c2   : > { %p17549_p11 = scmp.lt.s32.totalorder %s3034_s26, %s3034_s26  ;;  %p17550_p12 = scmp.lt.s32.totalorder %s17548_s1, %s17542_s22 }
 0x1c3   : > { %p17544_p7 = pnand %p17543_p4, %p16608_p10 }
 0x1c4   : > { %p17551_p13 = por %p17550_p12, %p17549_p11 }
 0x1c5   : > { %p17545_p8 = pneg %p17544_p7 }
 0x1c6   : > { %16343 = dma.hbm_to_vmem [thread:$0]  (%p16608_p10), %s22089_s0, 16, %s3000_s10, [#allocation48]  }
 0x1c7   : > { %p17552_p0 = pnand %p17551_p13, %p17545_p8 }
 0x1c9   : > { %17555 = shalt.err (!%p17552_p0)
}
 0x1ca   : > { %s22090_s16 = sld [smem:[#allocation210_spill]]  ;;  %s19419_s21 = smov [#allocation53]  }
 0x1cb   : > { %s3055_s18 = sshll.u32 %s19419_s21, 4  ;;  %s19420_s10 = smov [#allocation56]   ;;  %s3056_s18 = int_to_ptr.vmem [resolvable:$true] %s3055_s18 }
 0x1cc   : > { %s3077_s23 = sshll.u32 %s19420_s10, 4  ;;  %s17566_s0 = scalar_lea.vmem %s3056_s18, 16  ;;  %s3078_s23 = int_to_ptr.vmem [resolvable:$true] %s3077_s23 }
 0x1cd   : > { %p17567_p1 = scmp.ne.s32.totalorder %s3056_s18, %s17566_s0  ;;  %s17572_s3 = scalar_lea.vmem %s3056_s18, 32 }
 0x1ce   : > { %p17573_p6 = scmp.lt.s32.totalorder %s3056_s18, %s3056_s18  ;;  %p17574_p5 = scmp.lt.s32.totalorder %s17572_s3, %s17566_s0 }
 0x1cf   : > { %p17568_p2 = pnand %p17567_p1, %p16608_p10 }
 0x1d0   : > { %16347 = dma.hbm_to_vmem [thread:$0]  (%p16608_p10), %s22090_s16, 16, %s3034_s26, [#allocation51]  }
 0x1d1   : > { %p17569_p3 = pneg %p17568_p2  ;;  %p17575_p4 = por %p17574_p5, %p17573_p6 }
 0x1d3   : > { %p17576_p7 = pnand %p17575_p4, %p17569_p3 }
 0x1d5   : > { %17579 = shalt.err (!%p17576_p7)
}
 0x1d6   : > { %s22091_s22 = sld [smem:[#allocation212_spill]]  ;;  %s17590_s26 = scalar_lea.vmem %s3078_s23, 16 }
 0x1d7   : > { %p17591_p8 = scmp.ne.s32.totalorder %s3078_s23, %s17590_s26  ;;  %s17596_s1 = scalar_lea.vmem %s3078_s23, 32 }
 0x1d8   : > { %p17597_p13 = scmp.lt.s32.totalorder %s3078_s23, %s3078_s23  ;;  %p17598_p0 = scmp.lt.s32.totalorder %s17596_s1, %s17590_s26 }
 0x1d9   : > { %p17592_p11 = pnand %p17591_p8, %p16608_p10 }
 0x1da   : > { %p17599_p1 = por %p17598_p0, %p17597_p13 }
 0x1db   : > { %p17593_p12 = pneg %p17592_p11 }
 0x1dc   : > { %16351 = dma.hbm_to_vmem [thread:$0]  (%p16608_p10), %s22091_s22, 16, %s3056_s18, [#allocation54]  }
 0x1dd   : > { %p17600_p2 = pnand %p17599_p1, %p17593_p12 }
 0x1df   : > { %17603 = shalt.err (!%p17600_p2)
}
 0x1e0   : > { %s22092_s3 = sld [smem:[#allocation214_spill]]  ;;  %s19421_s16 = smov [#allocation59]  }
 0x1e1   : > { %s3099_s21 = sshll.u32 %s19421_s16, 4  ;;  %s19422_s18 = smov [#allocation62]   ;;  %s3100_s21 = int_to_ptr.vmem [resolvable:$true] %s3099_s21 }
 0x1e2   : > { %s3126_s10 = sshll.u32 %s19422_s18, 4  ;;  %s17614_s0 = scalar_lea.vmem %s3100_s21, 16  ;;  %s3127_s10 = int_to_ptr.vmem [resolvable:$true] %s3126_s10 }
 0x1e3   : > { %p17615_p3 = scmp.ne.s32.totalorder %s3100_s21, %s17614_s0  ;;  %s17620_s22 = scalar_lea.vmem %s3100_s21, 32 }
 0x1e4   : > { %p17621_p4 = scmp.lt.s32.totalorder %s3100_s21, %s3100_s21  ;;  %p17622_p7 = scmp.lt.s32.totalorder %s17620_s22, %s17614_s0 }
 0x1e5   : > { %p17616_p6 = pnand %p17615_p3, %p16608_p10 }
 0x1e6   : > { %16355 = dma.hbm_to_vmem [thread:$0]  (%p16608_p10), %s22092_s3, 16, %s3078_s23, [#allocation57]  }
 0x1e7   : > { %p17617_p5 = pneg %p17616_p6  ;;  %p17623_p8 = por %p17622_p7, %p17621_p4 }
 0x1e9   : > { %p17624_p11 = pnand %p17623_p8, %p17617_p5 }
 0x1eb   : > { %17627 = shalt.err (!%p17624_p11)
}
 0x1ec   : > { %s22093_s26 = sld [smem:[#allocation216_spill]]  ;;  %s17638_s23 = scalar_lea.vmem %s3127_s10, 16 }
 0x1ed   : > { %p17639_p12 = scmp.ne.s32.totalorder %s3127_s10, %s17638_s23  ;;  %s17644_s1 = scalar_lea.vmem %s3127_s10, 32 }
 0x1ee   : > { %p17645_p1 = scmp.lt.s32.totalorder %s3127_s10, %s3127_s10  ;;  %p17646_p2 = scmp.lt.s32.totalorder %s17644_s1, %s17638_s23 }
 0x1ef   : > { %p17640_p13 = pnand %p17639_p12, %p16608_p10 }
 0x1f0   : > { %p17647_p3 = por %p17646_p2, %p17645_p1 }
 0x1f1   : > { %p17641_p0 = pneg %p17640_p13 }
 0x1f2   : > { %16359 = dma.hbm_to_vmem [thread:$0]  (%p16608_p10), %s22093_s26, 16, %s3100_s21, [#allocation60]  }
 0x1f3   : > { %p17648_p6 = pnand %p17647_p3, %p17641_p0 }
 0x1f5   : > { %17651 = shalt.err (!%p17648_p6)
}
 0x1f6   : > { %s22094_s3 = sld [smem:[#allocation219_spill]]  ;;  %s19423_s16 = smov [#allocation65]  }
 0x1f7   : > { %s3148_s18 = sshll.u32 %s19423_s16, 4  ;;  %s19424_s21 = smov [#allocation68]   ;;  %s3149_s18 = int_to_ptr.vmem [resolvable:$true] %s3148_s18 }
 0x1f8   : > { %s3170_s0 = sshll.u32 %s19424_s21, 4  ;;  %s17662_s22 = scalar_lea.vmem %s3149_s18, 16  ;;  %s3171_s0 = int_to_ptr.vmem [resolvable:$true] %s3170_s0 }
 0x1f9   : > { %p17663_p5 = scmp.ne.s32.totalorder %s3149_s18, %s17662_s22  ;;  %s17668_s26 = scalar_lea.vmem %s3149_s18, 32 }
 0x1fa   : > { %p17669_p8 = scmp.lt.s32.totalorder %s3149_s18, %s3149_s18  ;;  %p17670_p11 = scmp.lt.s32.totalorder %s17668_s26, %s17662_s22 }
 0x1fb   : > { %p17664_p4 = pnand %p17663_p5, %p16608_p10 }
 0x1fc   : > { %16363 = dma.hbm_to_vmem [thread:$0]  (%p16608_p10), %s22094_s3, 16, %s3127_s10, [#allocation63]  }
 0x1fd   : > { %p17665_p7 = pneg %p17664_p4  ;;  %p17671_p12 = por %p17670_p11, %p17669_p8 }
 0x1ff   : > { %p17672_p13 = pnand %p17671_p12, %p17665_p7 }
 0x201   : > { %17675 = shalt.err (!%p17672_p13)
}
 0x202   : > { %s22095_s23 = sld [smem:[#allocation221_spill]]  ;;  %s17686_s10 = scalar_lea.vmem %s3171_s0, 16 }
 0x203   : > { %p17687_p0 = scmp.ne.s32.totalorder %s3171_s0, %s17686_s10  ;;  %s17692_s1 = scalar_lea.vmem %s3171_s0, 32 }
 0x204   : > { %p17693_p3 = scmp.lt.s32.totalorder %s3171_s0, %s3171_s0  ;;  %p17694_p6 = scmp.lt.s32.totalorder %s17692_s1, %s17686_s10 }
 0x205   : > { %p17688_p1 = pnand %p17687_p0, %p16608_p10 }
 0x206   : > { %p17695_p5 = por %p17694_p6, %p17693_p3 }
 0x207   : > { %p17689_p2 = pneg %p17688_p1 }
 0x208   : > { %16367 = dma.hbm_to_vmem [thread:$0]  (%p16608_p10), %s22095_s23, 16, %s3149_s18, [#allocation66]  }
 0x209   : > { %p17696_p4 = pnand %p17695_p5, %p17689_p2 }
 0x20b   : > { %17699 = shalt.err (!%p17696_p4)
}
 0x20c   : > { %s22096_s3 = sld [smem:[#allocation223_spill]]  ;;  %s19425_s16 = smov [#allocation71]  }
 0x20d   : > { %s3194_s21 = sshll.u32 %s19425_s16, 4  ;;  %s19426_s18 = smov [#allocation74]   ;;  %s3195_s21 = int_to_ptr.vmem [resolvable:$true] %s3194_s21 }
 0x20e   : > { %s3220_s22 = sshll.u32 %s19426_s18, 4  ;;  %s17710_s26 = scalar_lea.vmem %s3195_s21, 512  ;;  %s3221_s22 = int_to_ptr.vmem [resolvable:$true] %s3220_s22 }
 0x20f   : > { %p17711_p7 = scmp.ne.s32.totalorder %s3195_s21, %s17710_s26  ;;  %p17717_p12 = scmp.lt.s32.totalorder %s3195_s21, %s3195_s21 }
 0x210   : > { %p17718_p13 = scmp.lt.s32.totalorder %s17710_s26, %s17710_s26 }
 0x211   : > { %p17712_p8 = pnand %p17711_p7, %p16608_p10 }
 0x212   : > { %16371 = dma.hbm_to_vmem [thread:$0]  (%p16608_p10), %s22096_s3, 16, %s3171_s0, [#allocation69]  }
 0x213   : > { %p17713_p11 = pneg %p17712_p8  ;;  %p17719_p0 = por %p17718_p13, %p17717_p12 }
 0x215   : > { %p17720_p1 = pnand %p17719_p0, %p17713_p11 }
 0x217   : > { %17723 = shalt.err (!%p17720_p1)
}
 0x218   : > { %s21933_s23 = smov 128   ;;  %s22097_s10 = sld [smem:[#allocation226_spill]] }
 0x219   : > { %s21935_s0 = smov 8   ;;  %s17734_s1 = scalar_lea.vmem %s3221_s22, 512 }
 0x21a   : > { %p17735_p2 = scmp.ne.s32.totalorder %s3221_s22, %s17734_s1  ;;  %p17741_p5 = scmp.lt.s32.totalorder %s3221_s22, %s3221_s22 }
 0x21b   : > { %p17742_p4 = scmp.lt.s32.totalorder %s17734_s1, %s17734_s1 }
 0x21c   : > { %p17736_p3 = pnand %p17735_p2, %p16608_p10 }
 0x21d   : > { %p17743_p7 = por %p17742_p4, %p17741_p5 }
 0x21e   : > { %16375 = dma.hbm_to_vmem [thread:$0]  (%p16608_p10), %s22097_s10, 512, %s3195_s21, [#allocation72], %s21933_s23, %s21933_s23, %s21935_s0  }
 0x21f   : > { %p17737_p6 = pneg %p17736_p3 }
 0x221   : > { %p17744_p8 = pnand %p17743_p7, %p17737_p6 }
 0x223   : > { %17747 = shalt.err (!%p17744_p8)
}
 0x224   : > { %s22098_s3 = sld [smem:[#allocation228_spill]]  ;;  %s19429_s16 = smov [#allocation77]  }
 0x225   : > { %s3245_s21 = sshll.u32 %s19429_s16, 4  ;;  %s19430_s18 = smov [#allocation80]   ;;  %s3246_s21 = int_to_ptr.vmem [resolvable:$true] %s3245_s21 }
 0x226   : > { %s3267_s26 = sshll.u32 %s19430_s18, 4  ;;  %s17758_s10 = scalar_lea.vmem %s3246_s21, 16  ;;  %s3268_s26 = int_to_ptr.vmem [resolvable:$true] %s3267_s26 }
 0x227   : > { %p17759_p11 = scmp.ne.s32.totalorder %s3246_s21, %s17758_s10  ;;  %s17764_s1 = scalar_lea.vmem %s3246_s21, 32 }
 0x228   : > { %p17765_p0 = scmp.lt.s32.totalorder %s3246_s21, %s3246_s21  ;;  %p17766_p1 = scmp.lt.s32.totalorder %s17764_s1, %s17758_s10 }
 0x229   : > { %p17760_p12 = pnand %p17759_p11, %p16608_p10 }
 0x22a   : > { %16379 = dma.hbm_to_vmem [thread:$0]  (%p16608_p10), %s22098_s3, 512, %s3221_s22, [#allocation75], %s21933_s23, %s21933_s23, %s21935_s0  }
 0x22b   : > { %p17761_p13 = pneg %p17760_p12  ;;  %p17767_p2 = por %p17766_p1, %p17765_p0 }
 0x22d   : > { %p17768_p3 = pnand %p17767_p2, %p17761_p13 }
 0x22f   : > { %17771 = shalt.err (!%p17768_p3)
}
 0x230   : > { %s22099_s5 = sld [smem:[#allocation230_spill]]  ;;  %s17782_s22 = scalar_lea.vmem %s3268_s26, 16 }
 0x231   : > { %p17783_p6 = scmp.ne.s32.totalorder %s3268_s26, %s17782_s22  ;;  %s17788_s3 = scalar_lea.vmem %s3268_s26, 32 }
 0x232   : > { %p17789_p7 = scmp.lt.s32.totalorder %s3268_s26, %s3268_s26  ;;  %p17790_p8 = scmp.lt.s32.totalorder %s17788_s3, %s17782_s22 }
 0x233   : > { %p17784_p5 = pnand %p17783_p6, %p16608_p10 }
 0x234   : > { %p17791_p11 = por %p17790_p8, %p17789_p7 }
 0x235   : > { %p17785_p4 = pneg %p17784_p5 }
 0x236   : > { %16383 = dma.hbm_to_vmem [thread:$0]  (%p16608_p10), %s22099_s5, 16, %s3246_s21, [#allocation78]  }
 0x237   : > { %p17792_p12 = pnand %p17791_p11, %p17785_p4 }
 0x239   : > { %17795 = shalt.err (!%p17792_p12)
}
 0x23a   : > { %s22100_s16 = sld [smem:[#allocation232_spill]]  ;;  %s19431_s18 = smov [#allocation83]  }
 0x23b   : > { %s3289_s10 = sshll.u32 %s19431_s18, 4  ;;  %s19432_s5 = smov [#allocation86]   ;;  %s3290_s10 = int_to_ptr.vmem [resolvable:$true] %s3289_s10 }
 0x23c   : > { %s3312_s21 = sshll.u32 %s19432_s5, 4  ;;  %s17806_s1 = scalar_lea.vmem %s3290_s10, 16  ;;  %s3313_s21 = int_to_ptr.vmem [resolvable:$true] %s3312_s21 }
 0x23d   : > { %p17807_p13 = scmp.ne.s32.totalorder %s3290_s10, %s17806_s1  ;;  %s17812_s23 = scalar_lea.vmem %s3290_s10, 32 }
 0x23e   : > { %p17813_p2 = scmp.lt.s32.totalorder %s3290_s10, %s3290_s10  ;;  %p17814_p3 = scmp.lt.s32.totalorder %s17812_s23, %s17806_s1 }
 0x23f   : > { %p17808_p0 = pnand %p17807_p13, %p16608_p10 }
 0x240   : > { %16387 = dma.hbm_to_vmem [thread:$0]  (%p16608_p10), %s22100_s16, 16, %s3268_s26, [#allocation81]  }
 0x241   : > { %p17809_p1 = pneg %p17808_p0  ;;  %p17815_p6 = por %p17814_p3, %p17813_p2 }
 0x243   : > { %p17816_p5 = pnand %p17815_p6, %p17809_p1 }
 0x245   : > { %17819 = shalt.err (!%p17816_p5)
}
 0x246   : > { %s22101_s22 = sld [smem:[#allocation234_spill]]  ;;  %s17830_s26 = scalar_lea.vmem %s3313_s21, 512 }
 0x247   : > { %p17831_p4 = scmp.ne.s32.totalorder %s3313_s21, %s17830_s26  ;;  %p17837_p11 = scmp.lt.s32.totalorder %s3313_s21, %s3313_s21 }
 0x248   : > { %p17838_p12 = scmp.lt.s32.totalorder %s17830_s26, %s17830_s26 }
 0x249   : > { %p17832_p7 = pnand %p17831_p4, %p16608_p10 }
 0x24a   : > { %p17839_p13 = por %p17838_p12, %p17837_p11 }
 0x24b   : > { %p17833_p8 = pneg %p17832_p7 }
 0x24c   : > { %16391 = dma.hbm_to_vmem [thread:$0]  (%p16608_p10), %s22101_s22, 16, %s3290_s10, [#allocation84]  }
 0x24d   : > { %p17840_p0 = pnand %p17839_p13, %p17833_p8 }
 0x24f   : > { %17843 = shalt.err (!%p17840_p0)
}
 0x250   : > { %s22102_s23 = smov 128   ;;  %s22103_s3 = sld [smem:[#allocation236_spill]] }
 0x251   : > { %s19433_s16 = smov [#allocation89]   ;;  %s19434_s10 = smov [#allocation92]  }
 0x252   : > { %s3338_s18 = sshll.u32 %s19433_s16, 4  ;;  %s3363_s5 = sshll.u32 %s19434_s10, 4  ;;  %s3339_s18 = int_to_ptr.vmem [resolvable:$true] %s3338_s18  ;;  %s3364_s5 = int_to_ptr.vmem [resolvable:$true] %s3363_s5 }
 0x253   : > { %s17854_s1 = scalar_lea.vmem %s3339_s18, 512  ;;  %p17861_p6 = scmp.lt.s32.totalorder %s3339_s18, %s3339_s18 }
 0x254   : > { %p17855_p1 = scmp.ne.s32.totalorder %s3339_s18, %s17854_s1  ;;  %p17862_p5 = scmp.lt.s32.totalorder %s17854_s1, %s17854_s1 }
 0x256   : > { %16395 = dma.hbm_to_vmem [thread:$0]  (%p16608_p10), %s22103_s3, 512, %s3313_s21, [#allocation87], %s22102_s23, %s22102_s23, %s21935_s0  }
 0x257   : > { %p17856_p2 = pnand %p17855_p1, %p16608_p10  ;;  %p17863_p4 = por %p17862_p5, %p17861_p6 }
 0x259   : > { %p17857_p3 = pneg %p17856_p2 }
 0x25b   : > { %p17864_p7 = pnand %p17863_p4, %p17857_p3 }
 0x25d   : > { %17867 = shalt.err (!%p17864_p7)
}
 0x25e   : > { %s22104_s21 = sld [smem:[#allocation238_spill]]  ;;  %s17878_s22 = scalar_lea.vmem %s3364_s5, 16 }
 0x25f   : > { %p17879_p8 = scmp.ne.s32.totalorder %s3364_s5, %s17878_s22  ;;  %s17884_s26 = scalar_lea.vmem %s3364_s5, 32 }
 0x260   : > { %p17885_p13 = scmp.lt.s32.totalorder %s3364_s5, %s3364_s5  ;;  %p17886_p0 = scmp.lt.s32.totalorder %s17884_s26, %s17878_s22 }
 0x261   : > { %p17880_p11 = pnand %p17879_p8, %p16608_p10 }
 0x262   : > { %p17887_p1 = por %p17886_p0, %p17885_p13 }
 0x263   : > { %p17881_p12 = pneg %p17880_p11 }
 0x264   : > { %16399 = dma.hbm_to_vmem [thread:$0]  (%p16608_p10), %s22104_s21, 512, %s3339_s18, [#allocation90], %s22102_s23, %s22102_s23, %s21935_s0  }
 0x265   : > { %p17888_p2 = pnand %p17887_p1, %p17881_p12 }
 0x267   : > { %17891 = shalt.err (!%p17888_p2)
}
 0x268   : > { %s22105_s3 = sld [smem:[#allocation240_spill]]  ;;  %s19435_s16 = smov [#allocation95]  }
 0x269   : > { %s3385_s10 = sshll.u32 %s19435_s16, 4  ;;  %s19436_s18 = smov [#allocation98]   ;;  %s3386_s10 = int_to_ptr.vmem [resolvable:$true] %s3385_s10 }
 0x26a   : > { %s3413_s1 = sshll.u32 %s19436_s18, 4  ;;  %s17902_s21 = scalar_lea.vmem %s3386_s10, 16  ;;  %s3414_s1 = int_to_ptr.vmem [resolvable:$true] %s3413_s1 }
 0x26b   : > { %p17903_p3 = scmp.ne.s32.totalorder %s3386_s10, %s17902_s21  ;;  %s17908_s0 = scalar_lea.vmem %s3386_s10, 32 }
 0x26c   : > { %p17909_p4 = scmp.lt.s32.totalorder %s3386_s10, %s3386_s10  ;;  %p17910_p7 = scmp.lt.s32.totalorder %s17908_s0, %s17902_s21 }
 0x26d   : > { %p17904_p6 = pnand %p17903_p3, %p16608_p10 }
 0x26e   : > { %16403 = dma.hbm_to_vmem [thread:$0]  (%p16608_p10), %s22105_s3, 16, %s3364_s5, [#allocation93]  }
 0x26f   : > { %p17905_p5 = pneg %p17904_p6  ;;  %p17911_p8 = por %p17910_p7, %p17909_p4 }
 0x271   : > { %p17912_p11 = pnand %p17911_p8, %p17905_p5 }
 0x273   : > { %17915 = shalt.err (!%p17912_p11)
}
 0x274   : > { %s22106_s22 = sld [smem:[#allocation242_spill]]  ;;  %s17926_s5 = scalar_lea.vmem %s3414_s1, 16 }
 0x275   : > { %p17927_p12 = scmp.ne.s32.totalorder %s3414_s1, %s17926_s5  ;;  %s17932_s26 = scalar_lea.vmem %s3414_s1, 32 }
 0x276   : > { %p17933_p1 = scmp.lt.s32.totalorder %s3414_s1, %s3414_s1  ;;  %p17934_p2 = scmp.lt.s32.totalorder %s17932_s26, %s17926_s5 }
 0x277   : > { %p17928_p13 = pnand %p17927_p12, %p16608_p10 }
 0x278   : > { %p17935_p3 = por %p17934_p2, %p17933_p1 }
 0x279   : > { %p17929_p0 = pneg %p17928_p13 }
 0x27a   : > { %16407 = dma.hbm_to_vmem [thread:$0]  (%p16608_p10), %s22106_s22, 16, %s3386_s10, [#allocation96]  }
 0x27b   : > { %p17936_p6 = pnand %p17935_p3, %p17929_p0 }
 0x27d   : > { %17939 = shalt.err (!%p17936_p6)
}
 0x27e   : > { %s22107_s0 = sld [smem:[#allocation246_spill]]  ;;  %s19437_s3 = smov [#allocation101]  }
 0x27f   : > { %s3435_s16 = sshll.u32 %s19437_s3, 4  ;;  %s19438_s10 = smov [#allocation104]   ;;  %s3436_s16 = int_to_ptr.vmem [resolvable:$true] %s3435_s16 }
 0x280   : > { %s3457_s18 = sshll.u32 %s19438_s10, 4  ;;  %s17950_s21 = scalar_lea.vmem %s3436_s16, 16  ;;  %s3458_s18 = int_to_ptr.vmem [resolvable:$true] %s3457_s18 }
 0x281   : > { %p17951_p5 = scmp.ne.s32.totalorder %s3436_s16, %s17950_s21  ;;  %s17956_s22 = scalar_lea.vmem %s3436_s16, 32 }
 0x282   : > { %p17957_p8 = scmp.lt.s32.totalorder %s3436_s16, %s3436_s16  ;;  %p17958_p11 = scmp.lt.s32.totalorder %s17956_s22, %s17950_s21 }
 0x283   : > { %p17952_p4 = pnand %p17951_p5, %p16608_p10 }
 0x284   : > { %16411 = dma.hbm_to_vmem [thread:$0]  (%p16608_p10), %s22107_s0, 16, %s3414_s1, [#allocation99]  }
 0x285   : > { %p17953_p7 = pneg %p17952_p4  ;;  %p17959_p12 = por %p17958_p11, %p17957_p8 }
 0x287   : > { %p17960_p13 = pnand %p17959_p12, %p17953_p7 }
 0x289   : > { %17963 = shalt.err (!%p17960_p13)
}
 0x28a   : > { %s22108_s5 = sld [smem:[#allocation248_spill]]  ;;  %s17974_s1 = scalar_lea.vmem %s3458_s18, 16 }
 0x28b   : > { %p17975_p0 = scmp.ne.s32.totalorder %s3458_s18, %s17974_s1  ;;  %s17980_s26 = scalar_lea.vmem %s3458_s18, 32 }
 0x28c   : > { %p17981_p3 = scmp.lt.s32.totalorder %s3458_s18, %s3458_s18  ;;  %p17982_p6 = scmp.lt.s32.totalorder %s17980_s26, %s17974_s1 }
 0x28d   : > { %p17976_p1 = pnand %p17975_p0, %p16608_p10 }
 0x28e   : > { %p17983_p5 = por %p17982_p6, %p17981_p3 }
 0x28f   : > { %p17977_p2 = pneg %p17976_p1 }
 0x290   : > { %16415 = dma.hbm_to_vmem [thread:$0]  (%p16608_p10), %s22108_s5, 16, %s3436_s16, [#allocation102]  }
 0x291   : > { %p17984_p4 = pnand %p17983_p5, %p17977_p2 }
 0x293   : > { %17987 = shalt.err (!%p17984_p4)
}
 0x294   : > { %s22109_s0 = sld [smem:[#allocation250_spill]]  ;;  %s19439_s3 = smov [#allocation107]  }
 0x295   : > { %s3480_s10 = sshll.u32 %s19439_s3, 4  ;;  %s19440_s16 = smov [#allocation110]   ;;  %s3481_s10 = int_to_ptr.vmem [resolvable:$true] %s3480_s10 }
 0x296   : > { %s3506_s21 = sshll.u32 %s19440_s16, 4  ;;  %s17998_s22 = scalar_lea.vmem %s3481_s10, 512  ;;  %s3507_s21 = int_to_ptr.vmem [resolvable:$true] %s3506_s21 }
 0x297   : > { %p17999_p7 = scmp.ne.s32.totalorder %s3481_s10, %s17998_s22  ;;  %p18005_p12 = scmp.lt.s32.totalorder %s3481_s10, %s3481_s10 }
 0x298   : > { %p18006_p13 = scmp.lt.s32.totalorder %s17998_s22, %s17998_s22 }
 0x299   : > { %p18000_p8 = pnand %p17999_p7, %p16608_p10 }
 0x29a   : > { %16419 = dma.hbm_to_vmem [thread:$0]  (%p16608_p10), %s22109_s0, 16, %s3458_s18, [#allocation105]  }
 0x29b   : > { %p18001_p11 = pneg %p18000_p8  ;;  %p18007_p0 = por %p18006_p13, %p18005_p12 }
 0x29d   : > { %p18008_p1 = pnand %p18007_p0, %p18001_p11 }
 0x29f   : > { %18011 = shalt.err (!%p18008_p1)
}
 0x2a0   : > { %s22110_s5 = smov 8   ;;  %s22111_s18 = sld [smem:[#allocation252_spill]] }
 0x2a1   : > { %s18022_s1 = scalar_lea.vmem %s3507_s21, 512  ;;  %p18029_p5 = scmp.lt.s32.totalorder %s3507_s21, %s3507_s21 }
 0x2a2   : > { %p18023_p2 = scmp.ne.s32.totalorder %s3507_s21, %s18022_s1  ;;  %p18030_p4 = scmp.lt.s32.totalorder %s18022_s1, %s18022_s1 }
 0x2a4   : > { %p18024_p3 = pnand %p18023_p2, %p16608_p10  ;;  %p18031_p7 = por %p18030_p4, %p18029_p5 }
 0x2a6   : > { %16423 = dma.hbm_to_vmem [thread:$0]  (%p16608_p10), %s22111_s18, 512, %s3481_s10, [#allocation108], %s22102_s23, %s22102_s23, %s22110_s5  }
 0x2a7   : > { %p18025_p6 = pneg %p18024_p3 }
 0x2a9   : > { %p18032_p8 = pnand %p18031_p7, %p18025_p6 }
 0x2ab   : > { %18035 = shalt.err (!%p18032_p8)
}
 0x2ac   : > { %s22112_s26 = sld [smem:[#allocation254_spill]]  ;;  %s19441_s0 = smov [#allocation113]  }
 0x2ad   : > { %s3531_s3 = sshll.u32 %s19441_s0, 4  ;;  %s19442_s10 = smov [#allocation116]   ;;  %s3532_s3 = int_to_ptr.vmem [resolvable:$true] %s3531_s3 }
 0x2ae   : > { %s3553_s16 = sshll.u32 %s19442_s10, 4  ;;  %s18046_s22 = scalar_lea.vmem %s3532_s3, 16  ;;  %s3554_s16 = int_to_ptr.vmem [resolvable:$true] %s3553_s16 }
 0x2af   : > { %p18047_p11 = scmp.ne.s32.totalorder %s3532_s3, %s18046_s22  ;;  %s18052_s18 = scalar_lea.vmem %s3532_s3, 32 }
 0x2b0   : > { %p18053_p0 = scmp.lt.s32.totalorder %s3532_s3, %s3532_s3  ;;  %p18054_p1 = scmp.lt.s32.totalorder %s18052_s18, %s18046_s22 }
 0x2b1   : > { %p18048_p12 = pnand %p18047_p11, %p16608_p10 }
 0x2b2   : > { %16427 = dma.hbm_to_vmem [thread:$0]  (%p16608_p10), %s22112_s26, 512, %s3507_s21, [#allocation111], %s22102_s23, %s22102_s23, %s22110_s5  }
 0x2b3   : > { %p18049_p13 = pneg %p18048_p12  ;;  %p18055_p2 = por %p18054_p1, %p18053_p0 }
 0x2b5   : > { %p18056_p3 = pnand %p18055_p2, %p18049_p13 }
 0x2b7   : > { %18059 = shalt.err (!%p18056_p3)
}
 0x2b8   : > { %s22113_s1 = sld [smem:[#allocation256_spill]]  ;;  %s18070_s21 = scalar_lea.vmem %s3554_s16, 16 }
 0x2b9   : > { %p18071_p6 = scmp.ne.s32.totalorder %s3554_s16, %s18070_s21  ;;  %s18076_s26 = scalar_lea.vmem %s3554_s16, 32 }
 0x2ba   : > { %p18077_p7 = scmp.lt.s32.totalorder %s3554_s16, %s3554_s16  ;;  %p18078_p8 = scmp.lt.s32.totalorder %s18076_s26, %s18070_s21 }
 0x2bb   : > { %p18072_p5 = pnand %p18071_p6, %p16608_p10 }
 0x2bc   : > { %p18079_p11 = por %p18078_p8, %p18077_p7 }
 0x2bd   : > { %p18073_p4 = pneg %p18072_p5 }
 0x2be   : > { %16431 = dma.hbm_to_vmem [thread:$0]  (%p16608_p10), %s22113_s1, 16, %s3532_s3, [#allocation114]  }
 0x2bf   : > { %p18080_p12 = pnand %p18079_p11, %p18073_p4 }
 0x2c1   : > { %18083 = shalt.err (!%p18080_p12)
}
 0x2c2   : > { %s22114_s0 = sld [smem:[#allocation258_spill]]  ;;  %s19443_s10 = smov [#allocation2]  }
 0x2c3   : > { %s2638_s22 = sshll.u32 %s19443_s10, 4  ;;  %s19444_s3 = smov [#allocation7]   ;;  %s2639_s22 = int_to_ptr.vmem [resolvable:$true] %s2638_s22 }
 0x2c4   : > { %s2660_s18 = sshll.u32 %s19444_s3, 4  ;;  %s18094_s1 = scalar_lea.vmem %s2639_s22, 16  ;;  %s2661_s18 = int_to_ptr.vmem [resolvable:$true] %s2660_s18 }
 0x2c5   : > { %p18095_p13 = scmp.ne.s32.totalorder %s2639_s22, %s18094_s1  ;;  %s18100_s21 = scalar_lea.vmem %s2639_s22, 32 }
 0x2c6   : > { %p18101_p2 = scmp.lt.s32.totalorder %s2639_s22, %s2639_s22  ;;  %p18102_p3 = scmp.lt.s32.totalorder %s18100_s21, %s18094_s1 }
 0x2c7   : > { %p18096_p0 = pnand %p18095_p13, %p16608_p10 }
 0x2c8   : > { %16435 = dma.hbm_to_vmem [thread:$0]  (%p16608_p10), %s22114_s0, 16, %s3554_s16, [#allocation117]  }
 0x2c9   : > { %p18097_p1 = pneg %p18096_p0  ;;  %p18103_p6 = por %p18102_p3, %p18101_p2 }
 0x2cb   : > { %p18104_p5 = pnand %p18103_p6, %p18097_p1 }
 0x2cd   : > { %18107 = shalt.err (!%p18104_p5)
}
 0x2ce   : > { %s22115_s16 = sld [smem:[#allocation167_spill]]  ;;  %s18118_s26 = scalar_lea.vmem %s2661_s18, 16 }
 0x2cf   : > { %p18119_p4 = scmp.ne.s32.totalorder %s2661_s18, %s18118_s26  ;;  %s18124_s0 = scalar_lea.vmem %s2661_s18, 32 }
 0x2d0   : > { %p18125_p11 = scmp.lt.s32.totalorder %s2661_s18, %s2661_s18  ;;  %p18126_p12 = scmp.lt.s32.totalorder %s18124_s0, %s18118_s26 }
 0x2d1   : > { %p18120_p7 = pnand %p18119_p4, %p16608_p10 }
 0x2d2   : > { %p18127_p13 = por %p18126_p12, %p18125_p11 }
 0x2d3   : > { %p18121_p8 = pneg %p18120_p7 }
 0x2d4   : > { %16285 = dma.hbm_to_vmem [thread:$0]  (%p16608_p10), %s22115_s16, 16, %s2639_s22, [#allocation3]  }
 0x2d5   : > { %p18128_p0 = pnand %p18127_p13, %p18121_p8 }
 0x2d7   : > { %18131 = shalt.err (!%p18128_p0)
}
 0x2d8   : > { %s22116_s10 = sld [smem:[#allocation169_spill]]  ;;  %s19445_s3 = smov [#allocation10]  }
 0x2d9   : > { %s2694_s1 = sshll.u32 %s19445_s3, 4  ;;  %s19446_s21 = smov [#allocation13]   ;;  %s2695_s1 = int_to_ptr.vmem [resolvable:$true] %s2694_s1 }
 0x2da   : > { %s2716_s22 = sshll.u32 %s19446_s21, 4  ;;  %s18142_s16 = scalar_lea.vmem %s2695_s1, 16  ;;  %s2717_s22 = int_to_ptr.vmem [resolvable:$true] %s2716_s22 }
 0x2db   : > { %p18143_p1 = scmp.ne.s32.totalorder %s2695_s1, %s18142_s16  ;;  %s18148_s26 = scalar_lea.vmem %s2695_s1, 32 }
 0x2dc   : > { %p18149_p6 = scmp.lt.s32.totalorder %s2695_s1, %s2695_s1  ;;  %p18150_p5 = scmp.lt.s32.totalorder %s18148_s26, %s18142_s16 }
 0x2dd   : > { %p18144_p2 = pnand %p18143_p1, %p16608_p10 }
 0x2de   : > { %16289 = dma.hbm_to_vmem [thread:$0]  (%p16608_p10), %s22116_s10, 16, %s2661_s18, [#allocation6]  }
 0x2df   : > { %p18145_p3 = pneg %p18144_p2  ;;  %p18151_p4 = por %p18150_p5, %p18149_p6 }
 0x2e1   : > { %p18152_p7 = pnand %p18151_p4, %p18145_p3 }
 0x2e3   : > { %18155 = shalt.err (!%p18152_p7)
}
 0x2e4   : > { %s22117_s18 = sld [smem:[#allocation175_spill]]  ;;  %s18166_s0 = scalar_lea.vmem %s2717_s22, 16 }
 0x2e5   : > { %p18167_p8 = scmp.ne.s32.totalorder %s2717_s22, %s18166_s0  ;;  %s18172_s10 = scalar_lea.vmem %s2717_s22, 32 }
 0x2e6   : > { %p18173_p13 = scmp.lt.s32.totalorder %s2717_s22, %s2717_s22  ;;  %p18174_p0 = scmp.lt.s32.totalorder %s18172_s10, %s18166_s0 }
 0x2e7   : > { %p18168_p11 = pnand %p18167_p8, %p16608_p10 }
 0x2e8   : > { %p18175_p1 = por %p18174_p0, %p18173_p13 }
 0x2e9   : > { %p18169_p12 = pneg %p18168_p11 }
 0x2ea   : > { %16293 = dma.hbm_to_vmem [thread:$0]  (%p16608_p10), %s22117_s18, 16, %s2695_s1, [#allocation9]  }
 0x2eb   : > { %p18176_p2 = pnand %p18175_p1, %p18169_p12 }
 0x2ed   : > { %18179 = shalt.err (!%p18176_p2)
}
 0x2ee   : > { %s22118_s3 = sld [smem:[#allocation176_spill]]  ;;  %s19447_s21 = smov [#allocation16]  }
 0x2ef   : > { %s2738_s16 = sshll.u32 %s19447_s21, 4  ;;  %s19448_s26 = smov [#allocation19]   ;;  %s2739_s16 = int_to_ptr.vmem [resolvable:$true] %s2738_s16 }
 0x2f0   : > { %s2772_s1 = sshll.u32 %s19448_s26, 4  ;;  %s18190_s18 = scalar_lea.vmem %s2739_s16, 16  ;;  %s2773_s1 = int_to_ptr.vmem [resolvable:$true] %s2772_s1 }
 0x2f1   : > { %p18191_p3 = scmp.ne.s32.totalorder %s2739_s16, %s18190_s18  ;;  %s18196_s0 = scalar_lea.vmem %s2739_s16, 32 }
 0x2f2   : > { %p18197_p4 = scmp.lt.s32.totalorder %s2739_s16, %s2739_s16  ;;  %p18198_p7 = scmp.lt.s32.totalorder %s18196_s0, %s18190_s18 }
 0x2f3   : > { %p18192_p6 = pnand %p18191_p3, %p16608_p10 }
 0x2f4   : > { %16297 = dma.hbm_to_vmem [thread:$0]  (%p16608_p10), %s22118_s3, 16, %s2717_s22, [#allocation12]  }
 0x2f5   : > { %p18193_p5 = pneg %p18192_p6  ;;  %p18199_p8 = por %p18198_p7, %p18197_p4 }
 0x2f7   : > { %p18200_p11 = pnand %p18199_p8, %p18193_p5 }
 0x2f9   : > { %18203 = shalt.err (!%p18200_p11)
}
 0x2fa   : > { %s22119_s22 = sld [smem:[#allocation178_spill]]  ;;  %s18214_s10 = scalar_lea.vmem %s2773_s1, 16 }
 0x2fb   : > { %p18215_p12 = scmp.ne.s32.totalorder %s2773_s1, %s18214_s10  ;;  %s18220_s3 = scalar_lea.vmem %s2773_s1, 32 }
 0x2fc   : > { %p18221_p1 = scmp.lt.s32.totalorder %s2773_s1, %s2773_s1  ;;  %p18222_p2 = scmp.lt.s32.totalorder %s18220_s3, %s18214_s10 }
 0x2fd   : > { %p18216_p13 = pnand %p18215_p12, %p16608_p10 }
 0x2fe   : > { %p18223_p3 = por %p18222_p2, %p18221_p1 }
 0x2ff   : > { %p18217_p0 = pneg %p18216_p13 }
 0x300   : > { %16301 = dma.hbm_to_vmem [thread:$0]  (%p16608_p10), %s22119_s22, 16, %s2739_s16, [#allocation15]  }
 0x301   : > { %p18224_p6 = pnand %p18223_p3, %p18217_p0 }
 0x303   : > { %18227 = shalt.err (!%p18224_p6)
}
 0x304   : > { %s22120_s21 = sld [smem:[#allocation183_spill]]  ;;  %s19449_s26 = smov [#allocation22]  }
 0x305   : > { %s2794_s18 = sshll.u32 %s19449_s26, 4  ;;  %s19450_s0 = smov [#allocation25]   ;;  %s2795_s18 = int_to_ptr.vmem [resolvable:$true] %s2794_s18 }
 0x306   : > { %s2816_s16 = sshll.u32 %s19450_s0, 4  ;;  %s18238_s22 = scalar_lea.vmem %s2795_s18, 16  ;;  %s2817_s16 = int_to_ptr.vmem [resolvable:$true] %s2816_s16 }
 0x307   : > { %p18239_p5 = scmp.ne.s32.totalorder %s2795_s18, %s18238_s22  ;;  %s18244_s10 = scalar_lea.vmem %s2795_s18, 32 }
 0x308   : > { %p18245_p8 = scmp.lt.s32.totalorder %s2795_s18, %s2795_s18  ;;  %p18246_p11 = scmp.lt.s32.totalorder %s18244_s10, %s18238_s22 }
 0x309   : > { %p18240_p4 = pnand %p18239_p5, %p16608_p10 }
 0x30a   : > { %16305 = dma.hbm_to_vmem [thread:$0]  (%p16608_p10), %s22120_s21, 16, %s2773_s1, [#allocation18]  }
 0x30b   : > { %p18241_p7 = pneg %p18240_p4  ;;  %p18247_p12 = por %p18246_p11, %p18245_p8 }
 0x30d   : > { %p18248_p13 = pnand %p18247_p12, %p18241_p7 }
 0x30f   : > { %18251 = shalt.err (!%p18248_p13)
}
 0x310   : > { %s22121_s1 = sld [smem:[#allocation185_spill]]  ;;  %s18262_s3 = scalar_lea.vmem %s2817_s16, 16 }
 0x311   : > { %p18263_p0 = scmp.ne.s32.totalorder %s2817_s16, %s18262_s3  ;;  %s18268_s21 = scalar_lea.vmem %s2817_s16, 32 }
 0x312   : > { %p18269_p3 = scmp.lt.s32.totalorder %s2817_s16, %s2817_s16  ;;  %p18270_p6 = scmp.lt.s32.totalorder %s18268_s21, %s18262_s3 }
 0x313   : > { %p18264_p1 = pnand %p18263_p0, %p16608_p10 }
 0x314   : > { %p18271_p5 = por %p18270_p6, %p18269_p3 }
 0x315   : > { %p18265_p2 = pneg %p18264_p1 }
 0x316   : > { %16309 = dma.hbm_to_vmem [thread:$0]  (%p16608_p10), %s22121_s1, 16, %s2795_s18, [#allocation21]  }
 0x317   : > { %p18272_p4 = pnand %p18271_p5, %p18265_p2 }
 0x319   : > { %18275 = shalt.err (!%p18272_p4)
}
 0x31a   : > { %s22122_s26 = sld [smem:[#allocation186_spill]]  ;;  %s19451_s0 = smov [#allocation28]  }
 0x31b   : > { %s2838_s22 = sshll.u32 %s19451_s0, 4  ;;  %s19452_s10 = smov [#allocation31]   ;;  %s2839_s22 = int_to_ptr.vmem [resolvable:$true] %s2838_s22 }
 0x31c   : > { %s2866_s18 = sshll.u32 %s19452_s10, 4  ;;  %s18286_s1 = scalar_lea.vmem %s2839_s22, 16  ;;  %s2867_s18 = int_to_ptr.vmem [resolvable:$true] %s2866_s18 }
 0x31d   : > { %p18287_p7 = scmp.ne.s32.totalorder %s2839_s22, %s18286_s1  ;;  %s18292_s3 = scalar_lea.vmem %s2839_s22, 32 }
 0x31e   : > { %p18293_p12 = scmp.lt.s32.totalorder %s2839_s22, %s2839_s22  ;;  %p18294_p13 = scmp.lt.s32.totalorder %s18292_s3, %s18286_s1 }
 0x31f   : > { %p18288_p8 = pnand %p18287_p7, %p16608_p10 }
 0x320   : > { %16313 = dma.hbm_to_vmem [thread:$0]  (%p16608_p10), %s22122_s26, 16, %s2817_s16, [#allocation24]  }
 0x321   : > { %p18289_p11 = pneg %p18288_p8  ;;  %p18295_p0 = por %p18294_p13, %p18293_p12 }
 0x323   : > { %p18296_p1 = pnand %p18295_p0, %p18289_p11 }
 0x325   : > { %18299 = shalt.err (!%p18296_p1)
}
 0x326   : > { %s22123_s16 = sld [smem:[#allocation188_spill]]  ;;  %s18310_s21 = scalar_lea.vmem %s2867_s18, 16 }
 0x327   : > { %p18311_p2 = scmp.ne.s32.totalorder %s2867_s18, %s18310_s21  ;;  %s18316_s26 = scalar_lea.vmem %s2867_s18, 32 }
 0x328   : > { %p18317_p5 = scmp.lt.s32.totalorder %s2867_s18, %s2867_s18  ;;  %p18318_p4 = scmp.lt.s32.totalorder %s18316_s26, %s18310_s21 }
 0x329   : > { %p18312_p3 = pnand %p18311_p2, %p16608_p10 }
 0x32a   : > { %p18319_p7 = por %p18318_p4, %p18317_p5 }
 0x32b   : > { %p18313_p6 = pneg %p18312_p3 }
 0x32c   : > { %16317 = dma.hbm_to_vmem [thread:$0]  (%p16608_p10), %s22123_s16, 16, %s2839_s22, [#allocation27]  }
 0x32d   : > { %p18320_p8 = pnand %p18319_p7, %p18313_p6 }
 0x32f   : > { %18323 = shalt.err (!%p18320_p8)
}
 0x330   : > { %s22124_s0 = sld [smem:[#allocation192_spill]]  ;;  %s19453_s10 = smov [#allocation34]  }
 0x331   : > { %s2888_s1 = sshll.u32 %s19453_s10, 4  ;;  %s19454_s3 = smov [#allocation37]   ;;  %s2889_s1 = int_to_ptr.vmem [resolvable:$true] %s2888_s1 }
 0x332   : > { %s2910_s22 = sshll.u32 %s19454_s3, 4  ;;  %s18334_s16 = scalar_lea.vmem %s2889_s1, 16  ;;  %s2911_s22 = int_to_ptr.vmem [resolvable:$true] %s2910_s22 }
 0x333   : > { %p18335_p11 = scmp.ne.s32.totalorder %s2889_s1, %s18334_s16  ;;  %s18340_s21 = scalar_lea.vmem %s2889_s1, 32 }
 0x334   : > { %p18341_p0 = scmp.lt.s32.totalorder %s2889_s1, %s2889_s1  ;;  %p18342_p1 = scmp.lt.s32.totalorder %s18340_s21, %s18334_s16 }
 0x335   : > { %p18336_p12 = pnand %p18335_p11, %p16608_p10 }
 0x336   : > { %16321 = dma.hbm_to_vmem [thread:$0]  (%p16608_p10), %s22124_s0, 16, %s2867_s18, [#allocation30]  }
 0x337   : > { %p18337_p13 = pneg %p18336_p12  ;;  %p18343_p2 = por %p18342_p1, %p18341_p0 }
 0x339   : > { %p18344_p3 = pnand %p18343_p2, %p18337_p13 }
 0x33b   : > { %18347 = shalt.err (!%p18344_p3)
}
 0x33c   : > { %s22125_s18 = sld [smem:[#allocation193_spill]]  ;;  %s18358_s26 = scalar_lea.vmem %s2911_s22, 16 }
 0x33d   : > { %p18359_p6 = scmp.ne.s32.totalorder %s2911_s22, %s18358_s26  ;;  %s18364_s0 = scalar_lea.vmem %s2911_s22, 32 }
 0x33e   : > { %p18365_p7 = scmp.lt.s32.totalorder %s2911_s22, %s2911_s22  ;;  %p18366_p8 = scmp.lt.s32.totalorder %s18364_s0, %s18358_s26 }
 0x33f   : > { %p18360_p5 = pnand %p18359_p6, %p16608_p10 }
 0x340   : > { %p18367_p11 = por %p18366_p8, %p18365_p7 }
 0x341   : > { %p18361_p4 = pneg %p18360_p5 }
 0x342   : > { %16325 = dma.hbm_to_vmem [thread:$0]  (%p16608_p10), %s22125_s18, 16, %s2889_s1, [#allocation33]  }
 0x343   : > { %p18368_p12 = pnand %p18367_p11, %p18361_p4 }
 0x345   : > { %18371 = shalt.err (!%p18368_p12)
}
 0x346   : > { %s22126_s10 = sld [smem:[#allocation195_spill]]  ;;  %s19455_s3 = smov [#allocation40]  }
 0x347   : > { %s2944_s16 = sshll.u32 %s19455_s3, 4  ;;  %s19456_s21 = smov [#allocation43]   ;;  %s2945_s16 = int_to_ptr.vmem [resolvable:$true] %s2944_s16 }
 0x348   : > { %s2966_s1 = sshll.u32 %s19456_s21, 4  ;;  %s18382_s18 = scalar_lea.vmem %s2945_s16, 16  ;;  %s2967_s1 = int_to_ptr.vmem [resolvable:$true] %s2966_s1 }
 0x349   : > { %p18383_p13 = scmp.ne.s32.totalorder %s2945_s16, %s18382_s18  ;;  %s18388_s26 = scalar_lea.vmem %s2945_s16, 32 }
 0x34a   : > { %p18389_p2 = scmp.lt.s32.totalorder %s2945_s16, %s2945_s16  ;;  %p18390_p3 = scmp.lt.s32.totalorder %s18388_s26, %s18382_s18 }
 0x34b   : > { %p18384_p0 = pnand %p18383_p13, %p16608_p10 }
 0x34c   : > { %16329 = dma.hbm_to_vmem [thread:$0]  (%p16608_p10), %s22126_s10, 16, %s2911_s22, [#allocation36]  }
 0x34d   : > { %p18385_p1 = pneg %p18384_p0  ;;  %p18391_p6 = por %p18390_p3, %p18389_p2 }
 0x34f   : > { %p18392_p5 = pnand %p18391_p6, %p18385_p1 }
 0x351   : > { %18395 = shalt.err (!%p18392_p5)
}
 0x352   : > { %s22127_s22 = sld [smem:[#allocation200_spill]]  ;;  %s18406_s0 = scalar_lea.vmem %s2967_s1, 16 }
 0x353   : > { %p18407_p4 = scmp.ne.s32.totalorder %s2967_s1, %s18406_s0  ;;  %s18412_s10 = scalar_lea.vmem %s2967_s1, 32 }
 0x354   : > { %p18413_p11 = scmp.lt.s32.totalorder %s2967_s1, %s2967_s1  ;;  %p18414_p12 = scmp.lt.s32.totalorder %s18412_s10, %s18406_s0 }
 0x355   : > { %p18408_p7 = pnand %p18407_p4, %p16608_p10 }
 0x356   : > { %p18415_p13 = por %p18414_p12, %p18413_p11 }
 0x357   : > { %p18409_p8 = pneg %p18408_p7 }
 0x358   : > { %16333 = dma.hbm_to_vmem [thread:$0]  (%p16608_p10), %s22127_s22, 16, %s2945_s16, [#allocation39]  }
 0x359   : > { %p18416_p0 = pnand %p18415_p13, %p18409_p8 }
 0x35b   : > { %18419 = shalt.err (!%p18416_p0)
}
 0x35c   : > { %s22128_s3 = sld [smem:[#allocation202_spill]]  ;;  %s19457_s21 = smov [#allocation46]  }
 0x35d   : > { %s2988_s18 = sshll.u32 %s19457_s21, 4  ;;  %s19458_s26 = smov [#allocation49]   ;;  %s2989_s18 = int_to_ptr.vmem [resolvable:$true] %s2988_s18 }
 0x35e   : > { %s3022_s16 = sshll.u32 %s19458_s26, 4  ;;  %s18430_s22 = scalar_lea.vmem %s2989_s18, 16  ;;  %s3023_s16 = int_to_ptr.vmem [resolvable:$true] %s3022_s16 }
 0x35f   : > { %p18431_p1 = scmp.ne.s32.totalorder %s2989_s18, %s18430_s22  ;;  %s18436_s0 = scalar_lea.vmem %s2989_s18, 32 }
 0x360   : > { %p18437_p6 = scmp.lt.s32.totalorder %s2989_s18, %s2989_s18  ;;  %p18438_p5 = scmp.lt.s32.totalorder %s18436_s0, %s18430_s22 }
 0x361   : > { %p18432_p2 = pnand %p18431_p1, %p16608_p10 }
 0x362   : > { %16337 = dma.hbm_to_vmem [thread:$0]  (%p16608_p10), %s22128_s3, 16, %s2967_s1, [#allocation42]  }
 0x363   : > { %p18433_p3 = pneg %p18432_p2  ;;  %p18439_p4 = por %p18438_p5, %p18437_p6 }
 0x365   : > { %p18440_p7 = pnand %p18439_p4, %p18433_p3 }
 0x367   : > { %18443 = shalt.err (!%p18440_p7)
}
 0x368   : > { %s22129_s1 = sld [smem:[#allocation203_spill]]  ;;  %s18454_s10 = scalar_lea.vmem %s3023_s16, 16 }
 0x369   : > { %p18455_p8 = scmp.ne.s32.totalorder %s3023_s16, %s18454_s10  ;;  %s18460_s3 = scalar_lea.vmem %s3023_s16, 32 }
 0x36a   : > { %p18461_p13 = scmp.lt.s32.totalorder %s3023_s16, %s3023_s16  ;;  %p18462_p0 = scmp.lt.s32.totalorder %s18460_s3, %s18454_s10 }
 0x36b   : > { %p18456_p11 = pnand %p18455_p8, %p16608_p10 }
 0x36c   : > { %p18463_p1 = por %p18462_p0, %p18461_p13 }
 0x36d   : > { %p18457_p12 = pneg %p18456_p11 }
 0x36e   : > { %16341 = dma.hbm_to_vmem [thread:$0]  (%p16608_p10), %s22129_s1, 16, %s2989_s18, [#allocation45]  }
 0x36f   : > { %p18464_p2 = pnand %p18463_p1, %p18457_p12 }
 0x371   : > { %18467 = shalt.err (!%p18464_p2)
}
 0x372   : > { %s22130_s21 = sld [smem:[#allocation209_spill]]  ;;  %s19459_s26 = smov [#allocation52]  }
 0x373   : > { %s3044_s22 = sshll.u32 %s19459_s26, 4  ;;  %s19460_s0 = smov [#allocation55]   ;;  %s3045_s22 = int_to_ptr.vmem [resolvable:$true] %s3044_s22 }
 0x374   : > { %s3066_s18 = sshll.u32 %s19460_s0, 4  ;;  %s18478_s1 = scalar_lea.vmem %s3045_s22, 16  ;;  %s3067_s18 = int_to_ptr.vmem [resolvable:$true] %s3066_s18 }
 0x375   : > { %p18479_p3 = scmp.ne.s32.totalorder %s3045_s22, %s18478_s1  ;;  %s18484_s10 = scalar_lea.vmem %s3045_s22, 32 }
 0x376   : > { %p18485_p4 = scmp.lt.s32.totalorder %s3045_s22, %s3045_s22  ;;  %p18486_p7 = scmp.lt.s32.totalorder %s18484_s10, %s18478_s1 }
 0x377   : > { %p18480_p6 = pnand %p18479_p3, %p16608_p10 }
 0x378   : > { %16345 = dma.hbm_to_vmem [thread:$0]  (%p16608_p10), %s22130_s21, 16, %s3023_s16, [#allocation48]  }
 0x379   : > { %p18481_p5 = pneg %p18480_p6  ;;  %p18487_p8 = por %p18486_p7, %p18485_p4 }
 0x37b   : > { %p18488_p11 = pnand %p18487_p8, %p18481_p5 }
 0x37d   : > { %18491 = shalt.err (!%p18488_p11)
}
 0x37e   : > { %s22131_s16 = sld [smem:[#allocation211_spill]]  ;;  %s18502_s3 = scalar_lea.vmem %s3067_s18, 16 }
 0x37f   : > { %p18503_p12 = scmp.ne.s32.totalorder %s3067_s18, %s18502_s3  ;;  %s18508_s21 = scalar_lea.vmem %s3067_s18, 32 }
 0x380   : > { %p18509_p1 = scmp.lt.s32.totalorder %s3067_s18, %s3067_s18  ;;  %p18510_p2 = scmp.lt.s32.totalorder %s18508_s21, %s18502_s3 }
 0x381   : > { %p18504_p13 = pnand %p18503_p12, %p16608_p10 }
 0x382   : > { %p18511_p3 = por %p18510_p2, %p18509_p1 }
 0x383   : > { %p18505_p0 = pneg %p18504_p13 }
 0x384   : > { %16349 = dma.hbm_to_vmem [thread:$0]  (%p16608_p10), %s22131_s16, 16, %s3045_s22, [#allocation51]  }
 0x385   : > { %p18512_p6 = pnand %p18511_p3, %p18505_p0 }
 0x387   : > { %18515 = shalt.err (!%p18512_p6)
}
 0x388   : > { %s22132_s26 = sld [smem:[#allocation213_spill]]  ;;  %s19461_s0 = smov [#allocation58]  }
 0x389   : > { %s3088_s1 = sshll.u32 %s19461_s0, 4  ;;  %s19462_s10 = smov [#allocation61]   ;;  %s3089_s1 = int_to_ptr.vmem [resolvable:$true] %s3088_s1 }
 0x38a   : > { %s3109_s22 = sshll.u32 %s19462_s10, 4  ;;  %s18526_s16 = scalar_lea.vmem %s3089_s1, 16  ;;  %s3110_s22 = int_to_ptr.vmem [resolvable:$true] %s3109_s22 }
 0x38b   : > { %p18527_p5 = scmp.ne.s32.totalorder %s3089_s1, %s18526_s16  ;;  %s18532_s3 = scalar_lea.vmem %s3089_s1, 32 }
 0x38c   : > { %p18533_p8 = scmp.lt.s32.totalorder %s3089_s1, %s3089_s1  ;;  %p18534_p11 = scmp.lt.s32.totalorder %s18532_s3, %s18526_s16 }
 0x38d   : > { %p18528_p4 = pnand %p18527_p5, %p16608_p10 }
 0x38e   : > { %16353 = dma.hbm_to_vmem [thread:$0]  (%p16608_p10), %s22132_s26, 16, %s3067_s18, [#allocation54]  }
 0x38f   : > { %p18529_p7 = pneg %p18528_p4  ;;  %p18535_p12 = por %p18534_p11, %p18533_p8 }
 0x391   : > { %p18536_p13 = pnand %p18535_p12, %p18529_p7 }
 0x393   : > { %18539 = shalt.err (!%p18536_p13)
}
 0x394   : > { %s22133_s18 = sld [smem:[#allocation215_spill]]  ;;  %s18550_s21 = scalar_lea.vmem %s3110_s22, 512 }
 0x395   : > { %p18551_p0 = scmp.ne.s32.totalorder %s3110_s22, %s18550_s21  ;;  %p18557_p3 = scmp.lt.s32.totalorder %s3110_s22, %s3110_s22 }
 0x396   : > { %p18558_p6 = scmp.lt.s32.totalorder %s18550_s21, %s18550_s21 }
 0x397   : > { %p18552_p1 = pnand %p18551_p0, %p16608_p10 }
 0x398   : > { %p18559_p5 = por %p18558_p6, %p18557_p3 }
 0x399   : > { %p18553_p2 = pneg %p18552_p1 }
 0x39a   : > { %16357 = dma.hbm_to_vmem [thread:$0]  (%p16608_p10), %s22133_s18, 16, %s3089_s1, [#allocation57]  }
 0x39b   : > { %p18560_p4 = pnand %p18559_p5, %p18553_p2 }
 0x39d   : > { %18563 = shalt.err (!%p18560_p4)
}
 0x39e   : > { %s22134_s26 = sld [smem:[#allocation217_spill]]  ;;  %s19463_s0 = smov [#allocation64]  }
 0x39f   : > { %s3137_s1 = sshll.u32 %s19463_s0, 4  ;;  %s19464_s10 = smov [#allocation67]   ;;  %s3138_s1 = int_to_ptr.vmem [resolvable:$true] %s3137_s1 }
 0x3a0   : > { %s3159_s16 = sshll.u32 %s19464_s10, 4  ;;  %s18574_s3 = scalar_lea.vmem %s3138_s1, 16  ;;  %s3160_s16 = int_to_ptr.vmem [resolvable:$true] %s3159_s16 }
 0x3a1   : > { %p18575_p7 = scmp.ne.s32.totalorder %s3138_s1, %s18574_s3  ;;  %s18580_s18 = scalar_lea.vmem %s3138_s1, 32 }
 0x3a2   : > { %p18581_p12 = scmp.lt.s32.totalorder %s3138_s1, %s3138_s1  ;;  %p18582_p13 = scmp.lt.s32.totalorder %s18580_s18, %s18574_s3 }
 0x3a3   : > { %p18576_p8 = pnand %p18575_p7, %p16608_p10 }
 0x3a4   : > { %16361 = dma.hbm_to_vmem [thread:$0]  (%p16608_p10), %s22134_s26, 512, %s3110_s22, [#allocation60], %s22102_s23, %s22102_s23, %s22110_s5  }
 0x3a5   : > { %p18577_p11 = pneg %p18576_p8  ;;  %p18583_p0 = por %p18582_p13, %p18581_p12 }
 0x3a7   : > { %p18584_p1 = pnand %p18583_p0, %p18577_p11 }
 0x3a9   : > { %18587 = shalt.err (!%p18584_p1)
}
 0x3aa   : > { %s22135_s22 = sld [smem:[#allocation220_spill]]  ;;  %s18598_s21 = scalar_lea.vmem %s3160_s16, 16 }
 0x3ab   : > { %p18599_p2 = scmp.ne.s32.totalorder %s3160_s16, %s18598_s21  ;;  %s18604_s26 = scalar_lea.vmem %s3160_s16, 32 }
 0x3ac   : > { %p18605_p5 = scmp.lt.s32.totalorder %s3160_s16, %s3160_s16  ;;  %p18606_p4 = scmp.lt.s32.totalorder %s18604_s26, %s18598_s21 }
 0x3ad   : > { %p18600_p3 = pnand %p18599_p2, %p16608_p10 }
 0x3ae   : > { %p18607_p7 = por %p18606_p4, %p18605_p5 }
 0x3af   : > { %p18601_p6 = pneg %p18600_p3 }
 0x3b0   : > { %16365 = dma.hbm_to_vmem [thread:$0]  (%p16608_p10), %s22135_s22, 16, %s3138_s1, [#allocation63]  }
 0x3b1   : > { %p18608_p8 = pnand %p18607_p7, %p18601_p6 }
 0x3b3   : > { %18611 = shalt.err (!%p18608_p8)
}
 0x3b4   : > { %s22136_s0 = sld [smem:[#allocation222_spill]]  ;;  %s19465_s10 = smov [#allocation70]  }
 0x3b5   : > { %s3181_s3 = sshll.u32 %s19465_s10, 4  ;;  %s19466_s18 = smov [#allocation73]   ;;  %s3182_s3 = int_to_ptr.vmem [resolvable:$true] %s3181_s3 }
 0x3b6   : > { %s3207_s1 = sshll.u32 %s19466_s18, 4  ;;  %s18622_s22 = scalar_lea.vmem %s3182_s3, 16  ;;  %s3208_s1 = int_to_ptr.vmem [resolvable:$true] %s3207_s1 }
 0x3b7   : > { %p18623_p11 = scmp.ne.s32.totalorder %s3182_s3, %s18622_s22  ;;  %s18628_s21 = scalar_lea.vmem %s3182_s3, 32 }
 0x3b8   : > { %p18629_p0 = scmp.lt.s32.totalorder %s3182_s3, %s3182_s3  ;;  %p18630_p1 = scmp.lt.s32.totalorder %s18628_s21, %s18622_s22 }
 0x3b9   : > { %p18624_p12 = pnand %p18623_p11, %p16608_p10 }
 0x3ba   : > { %16369 = dma.hbm_to_vmem [thread:$0]  (%p16608_p10), %s22136_s0, 16, %s3160_s16, [#allocation66]  }
 0x3bb   : > { %p18625_p13 = pneg %p18624_p12  ;;  %p18631_p2 = por %p18630_p1, %p18629_p0 }
 0x3bd   : > { %p18632_p3 = pnand %p18631_p2, %p18625_p13 }
 0x3bf   : > { %18635 = shalt.err (!%p18632_p3)
}
 0x3c0   : > { %s22137_s16 = sld [smem:[#allocation224_spill]]  ;;  %s18646_s26 = scalar_lea.vmem %s3208_s1, 512 }
 0x3c1   : > { %p18647_p6 = scmp.ne.s32.totalorder %s3208_s1, %s18646_s26  ;;  %p18653_p7 = scmp.lt.s32.totalorder %s3208_s1, %s3208_s1 }
 0x3c2   : > { %p18654_p8 = scmp.lt.s32.totalorder %s18646_s26, %s18646_s26 }
 0x3c3   : > { %p18648_p5 = pnand %p18647_p6, %p16608_p10 }
 0x3c4   : > { %p18655_p11 = por %p18654_p8, %p18653_p7 }
 0x3c5   : > { %p18649_p4 = pneg %p18648_p5 }
 0x3c6   : > { %16373 = dma.hbm_to_vmem [thread:$0]  (%p16608_p10), %s22137_s16, 16, %s3182_s3, [#allocation69]  }
 0x3c7   : > { %p18656_p12 = pnand %p18655_p11, %p18649_p4 }
 0x3c9   : > { %18659 = shalt.err (!%p18656_p12)
}
 0x3ca   : > { %s22138_s0 = sld [smem:[#allocation227_spill]]  ;;  %s19467_s10 = smov [#allocation76]  }
 0x3cb   : > { %s3234_s3 = sshll.u32 %s19467_s10, 4  ;;  %s19468_s18 = smov [#allocation79]   ;;  %s3235_s3 = int_to_ptr.vmem [resolvable:$true] %s3234_s3 }
 0x3cc   : > { %s3256_s22 = sshll.u32 %s19468_s18, 4  ;;  %s18670_s21 = scalar_lea.vmem %s3235_s3, 16  ;;  %s3257_s22 = int_to_ptr.vmem [resolvable:$true] %s3256_s22 }
 0x3cd   : > { %p18671_p13 = scmp.ne.s32.totalorder %s3235_s3, %s18670_s21  ;;  %s18676_s16 = scalar_lea.vmem %s3235_s3, 32 }
 0x3ce   : > { %p18677_p2 = scmp.lt.s32.totalorder %s3235_s3, %s3235_s3  ;;  %p18678_p3 = scmp.lt.s32.totalorder %s18676_s16, %s18670_s21 }
 0x3cf   : > { %p18672_p0 = pnand %p18671_p13, %p16608_p10 }
 0x3d0   : > { %16377 = dma.hbm_to_vmem [thread:$0]  (%p16608_p10), %s22138_s0, 512, %s3208_s1, [#allocation72], %s22102_s23, %s22102_s23, %s22110_s5  }
 0x3d1   : > { %p18673_p1 = pneg %p18672_p0  ;;  %p18679_p6 = por %p18678_p3, %p18677_p2 }
 0x3d3   : > { %p18680_p5 = pnand %p18679_p6, %p18673_p1 }
 0x3d5   : > { %18683 = shalt.err (!%p18680_p5)
}
 0x3d6   : > { %s22139_s1 = sld [smem:[#allocation229_spill]]  ;;  %s18694_s26 = scalar_lea.vmem %s3257_s22, 16 }
 0x3d7   : > { %p18695_p4 = scmp.ne.s32.totalorder %s3257_s22, %s18694_s26  ;;  %s18700_s0 = scalar_lea.vmem %s3257_s22, 32 }
 0x3d8   : > { %p18701_p11 = scmp.lt.s32.totalorder %s3257_s22, %s3257_s22  ;;  %p18702_p12 = scmp.lt.s32.totalorder %s18700_s0, %s18694_s26 }
 0x3d9   : > { %p18696_p7 = pnand %p18695_p4, %p16608_p10 }
 0x3da   : > { %p18703_p13 = por %p18702_p12, %p18701_p11 }
 0x3db   : > { %p18697_p8 = pneg %p18696_p7 }
 0x3dc   : > { %16381 = dma.hbm_to_vmem [thread:$0]  (%p16608_p10), %s22139_s1, 16, %s3235_s3, [#allocation75]  }
 0x3dd   : > { %p18704_p0 = pnand %p18703_p13, %p18697_p8 }
 0x3df   : > { %18707 = shalt.err (!%p18704_p0)
}
 0x3e0   : > { %s22140_s10 = sld [smem:[#allocation231_spill]]  ;;  %s19469_s18 = smov [#allocation82]  }
 0x3e1   : > { %s3278_s21 = sshll.u32 %s19469_s18, 4  ;;  %s19470_s16 = smov [#allocation85]   ;;  %s3279_s21 = int_to_ptr.vmem [resolvable:$true] %s3278_s21 }
 0x3e2   : > { %s3299_s3 = sshll.u32 %s19470_s16, 4  ;;  %s18718_s1 = scalar_lea.vmem %s3279_s21, 16  ;;  %s3300_s3 = int_to_ptr.vmem [resolvable:$true] %s3299_s3 }
 0x3e3   : > { %p18719_p1 = scmp.ne.s32.totalorder %s3279_s21, %s18718_s1  ;;  %s18724_s26 = scalar_lea.vmem %s3279_s21, 32 }
 0x3e4   : > { %p18725_p6 = scmp.lt.s32.totalorder %s3279_s21, %s3279_s21  ;;  %p18726_p5 = scmp.lt.s32.totalorder %s18724_s26, %s18718_s1 }
 0x3e5   : > { %p18720_p2 = pnand %p18719_p1, %p16608_p10 }
 0x3e6   : > { %16385 = dma.hbm_to_vmem [thread:$0]  (%p16608_p10), %s22140_s10, 16, %s3257_s22, [#allocation78]  }
 0x3e7   : > { %p18721_p3 = pneg %p18720_p2  ;;  %p18727_p4 = por %p18726_p5, %p18725_p6 }
 0x3e9   : > { %p18728_p7 = pnand %p18727_p4, %p18721_p3 }
 0x3eb   : > { %18731 = shalt.err (!%p18728_p7)
}
 0x3ec   : > { %s22141_s22 = sld [smem:[#allocation233_spill]]  ;;  %s18742_s0 = scalar_lea.vmem %s3300_s3, 512 }
 0x3ed   : > { %p18743_p8 = scmp.ne.s32.totalorder %s3300_s3, %s18742_s0  ;;  %p18749_p13 = scmp.lt.s32.totalorder %s3300_s3, %s3300_s3 }
 0x3ee   : > { %p18750_p0 = scmp.lt.s32.totalorder %s18742_s0, %s18742_s0 }
 0x3ef   : > { %p18744_p11 = pnand %p18743_p8, %p16608_p10 }
 0x3f0   : > { %p18751_p1 = por %p18750_p0, %p18749_p13 }
 0x3f1   : > { %p18745_p12 = pneg %p18744_p11 }
 0x3f2   : > { %16389 = dma.hbm_to_vmem [thread:$0]  (%p16608_p10), %s22141_s22, 16, %s3279_s21, [#allocation81]  }
 0x3f3   : > { %p18752_p2 = pnand %p18751_p1, %p18745_p12 }
 0x3f5   : > { %18755 = shalt.err (!%p18752_p2)
}
 0x3f6   : > { %s22142_s10 = sld [smem:[#allocation235_spill]]  ;;  %s19471_s18 = smov [#allocation88]  }
 0x3f7   : > { %s3325_s21 = sshll.u32 %s19471_s18, 4  ;;  %s19472_s16 = smov [#allocation91]   ;;  %s3326_s21 = int_to_ptr.vmem [resolvable:$true] %s3325_s21 }
 0x3f8   : > { %s3352_s1 = sshll.u32 %s19472_s16, 4  ;;  %s18766_s26 = scalar_lea.vmem %s3326_s21, 512  ;;  %s3353_s1 = int_to_ptr.vmem [resolvable:$true] %s3352_s1 }
 0x3f9   : > { %p18767_p3 = scmp.ne.s32.totalorder %s3326_s21, %s18766_s26  ;;  %p18773_p4 = scmp.lt.s32.totalorder %s3326_s21, %s3326_s21 }
 0x3fa   : > { %p18774_p7 = scmp.lt.s32.totalorder %s18766_s26, %s18766_s26 }
 0x3fb   : > { %p18768_p6 = pnand %p18767_p3, %p16608_p10 }
 0x3fc   : > { %16393 = dma.hbm_to_vmem [thread:$0]  (%p16608_p10), %s22142_s10, 512, %s3300_s3, [#allocation84], %s22102_s23, %s22102_s23, %s22110_s5  }
 0x3fd   : > { %p18769_p5 = pneg %p18768_p6  ;;  %p18775_p8 = por %p18774_p7, %p18773_p4 }
 0x3ff   : > { %p18776_p11 = pnand %p18775_p8, %p18769_p5 }
 0x401   : > { %18779 = shalt.err (!%p18776_p11)
}
 0x402   : > { %s22143_s3 = sld [smem:[#allocation237_spill]]  ;;  %s18790_s22 = scalar_lea.vmem %s3353_s1, 16 }
 0x403   : > { %p18791_p12 = scmp.ne.s32.totalorder %s3353_s1, %s18790_s22  ;;  %s18796_s0 = scalar_lea.vmem %s3353_s1, 32 }
 0x404   : > { %p18797_p1 = scmp.lt.s32.totalorder %s3353_s1, %s3353_s1  ;;  %p18798_p2 = scmp.lt.s32.totalorder %s18796_s0, %s18790_s22 }
 0x405   : > { %p18792_p13 = pnand %p18791_p12, %p16608_p10 }
 0x406   : > { %p18799_p3 = por %p18798_p2, %p18797_p1 }
 0x407   : > { %p18793_p0 = pneg %p18792_p13 }
 0x408   : > { %16397 = dma.hbm_to_vmem [thread:$0]  (%p16608_p10), %s22143_s3, 512, %s3326_s21, [#allocation87], %s22102_s23, %s22102_s23, %s22110_s5  }
 0x409   : > { %p18800_p6 = pnand %p18799_p3, %p18793_p0 }
 0x40b   : > { %18803 = shalt.err (!%p18800_p6)
}
 0x40c   : > { %s22144_s10 = sld [smem:[#allocation239_spill]]  ;;  %s19473_s18 = smov [#allocation94]  }
 0x40d   : > { %s3374_s16 = sshll.u32 %s19473_s18, 4  ;;  %s19474_s26 = smov [#allocation97]   ;;  %s3375_s16 = int_to_ptr.vmem [resolvable:$true] %s3374_s16 }
 0x40e   : > { %s3402_s21 = sshll.u32 %s19474_s26, 4  ;;  %s18814_s3 = scalar_lea.vmem %s3375_s16, 16  ;;  %s3403_s21 = int_to_ptr.vmem [resolvable:$true] %s3402_s21 }
 0x40f   : > { %p18815_p5 = scmp.ne.s32.totalorder %s3375_s16, %s18814_s3  ;;  %s18820_s22 = scalar_lea.vmem %s3375_s16, 32 }
 0x410   : > { %p18821_p8 = scmp.lt.s32.totalorder %s3375_s16, %s3375_s16  ;;  %p18822_p11 = scmp.lt.s32.totalorder %s18820_s22, %s18814_s3 }
 0x411   : > { %p18816_p4 = pnand %p18815_p5, %p16608_p10 }
 0x412   : > { %16401 = dma.hbm_to_vmem [thread:$0]  (%p16608_p10), %s22144_s10, 16, %s3353_s1, [#allocation90]  }
 0x413   : > { %p18817_p7 = pneg %p18816_p4  ;;  %p18823_p12 = por %p18822_p11, %p18821_p8 }
 0x415   : > { %p18824_p13 = pnand %p18823_p12, %p18817_p7 }
 0x417   : > { %18827 = shalt.err (!%p18824_p13)
}
 0x418   : > { %s22145_s1 = sld [smem:[#allocation241_spill]]  ;;  %s18838_s0 = scalar_lea.vmem %s3403_s21, 16 }
 0x419   : > { %p18839_p0 = scmp.ne.s32.totalorder %s3403_s21, %s18838_s0  ;;  %s18844_s10 = scalar_lea.vmem %s3403_s21, 32 }
 0x41a   : > { %p18845_p3 = scmp.lt.s32.totalorder %s3403_s21, %s3403_s21  ;;  %p18846_p6 = scmp.lt.s32.totalorder %s18844_s10, %s18838_s0 }
 0x41b   : > { %p18840_p1 = pnand %p18839_p0, %p16608_p10 }
 0x41c   : > { %p18847_p5 = por %p18846_p6, %p18845_p3 }
 0x41d   : > { %p18841_p2 = pneg %p18840_p1 }
 0x41e   : > { %16405 = dma.hbm_to_vmem [thread:$0]  (%p16608_p10), %s22145_s1, 16, %s3375_s16, [#allocation93]  }
 0x41f   : > { %p18848_p4 = pnand %p18847_p5, %p18841_p2 }
 0x421   : > { %18851 = shalt.err (!%p18848_p4)
}
 0x422   : > { %s22146_s18 = sld [smem:[#allocation245_spill]]  ;;  %s19475_s26 = smov [#allocation100]  }
 0x423   : > { %s3424_s3 = sshll.u32 %s19475_s26, 4  ;;  %s19476_s22 = smov [#allocation103]   ;;  %s3425_s3 = int_to_ptr.vmem [resolvable:$true] %s3424_s3 }
 0x424   : > { %s3446_s16 = sshll.u32 %s19476_s22, 4  ;;  %s18862_s1 = scalar_lea.vmem %s3425_s3, 16  ;;  %s3447_s16 = int_to_ptr.vmem [resolvable:$true] %s3446_s16 }
 0x425   : > { %p18863_p7 = scmp.ne.s32.totalorder %s3425_s3, %s18862_s1  ;;  %s18868_s0 = scalar_lea.vmem %s3425_s3, 32 }
 0x426   : > { %p18869_p12 = scmp.lt.s32.totalorder %s3425_s3, %s3425_s3  ;;  %p18870_p13 = scmp.lt.s32.totalorder %s18868_s0, %s18862_s1 }
 0x427   : > { %p18864_p8 = pnand %p18863_p7, %p16608_p10 }
 0x428   : > { %16409 = dma.hbm_to_vmem [thread:$0]  (%p16608_p10), %s22146_s18, 16, %s3403_s21, [#allocation96]  }
 0x429   : > { %p18865_p11 = pneg %p18864_p8  ;;  %p18871_p0 = por %p18870_p13, %p18869_p12 }
 0x42b   : > { %p18872_p1 = pnand %p18871_p0, %p18865_p11 }
 0x42d   : > { %18875 = shalt.err (!%p18872_p1)
}
 0x42e   : > { %s22147_s21 = sld [smem:[#allocation247_spill]]  ;;  %s18886_s10 = scalar_lea.vmem %s3447_s16, 16 }
 0x42f   : > { %p18887_p2 = scmp.ne.s32.totalorder %s3447_s16, %s18886_s10  ;;  %s18892_s18 = scalar_lea.vmem %s3447_s16, 32 }
 0x430   : > { %p18893_p5 = scmp.lt.s32.totalorder %s3447_s16, %s3447_s16  ;;  %p18894_p4 = scmp.lt.s32.totalorder %s18892_s18, %s18886_s10 }
 0x431   : > { %p18888_p3 = pnand %p18887_p2, %p16608_p10 }
 0x432   : > { %p18895_p7 = por %p18894_p4, %p18893_p5 }
 0x433   : > { %p18889_p6 = pneg %p18888_p3 }
 0x434   : > { %16413 = dma.hbm_to_vmem [thread:$0]  (%p16608_p10), %s22147_s21, 16, %s3425_s3, [#allocation99]  }
 0x435   : > { %p18896_p8 = pnand %p18895_p7, %p18889_p6 }
 0x437   : > { %18899 = shalt.err (!%p18896_p8)
}
 0x438   : > { %s22148_s26 = sld [smem:[#allocation249_spill]]  ;;  %s19477_s22 = smov [#allocation106]  }
 0x439   : > { %s3467_s1 = sshll.u32 %s19477_s22, 4  ;;  %s19478_s0 = smov [#allocation109]   ;;  %s3468_s1 = int_to_ptr.vmem [resolvable:$true] %s3467_s1 }
 0x43a   : > { %s3493_s3 = sshll.u32 %s19478_s0, 4  ;;  %s18910_s21 = scalar_lea.vmem %s3468_s1, 512  ;;  %s3494_s3 = int_to_ptr.vmem [resolvable:$true] %s3493_s3 }
 0x43b   : > { %p18911_p11 = scmp.ne.s32.totalorder %s3468_s1, %s18910_s21  ;;  %p18917_p0 = scmp.lt.s32.totalorder %s3468_s1, %s3468_s1 }
 0x43c   : > { %p18918_p1 = scmp.lt.s32.totalorder %s18910_s21, %s18910_s21 }
 0x43d   : > { %p18912_p12 = pnand %p18911_p11, %p16608_p10 }
 0x43e   : > { %16417 = dma.hbm_to_vmem [thread:$0]  (%p16608_p10), %s22148_s26, 16, %s3447_s16, [#allocation102]  }
 0x43f   : > { %p18913_p13 = pneg %p18912_p12  ;;  %p18919_p2 = por %p18918_p1, %p18917_p0 }
 0x441   : > { %p18920_p3 = pnand %p18919_p2, %p18913_p13 }
 0x443   : > { %18923 = shalt.err (!%p18920_p3)
}
 0x444   : > { %s22149_s16 = sld [smem:[#allocation251_spill]]  ;;  %s18934_s10 = scalar_lea.vmem %s3494_s3, 512 }
 0x445   : > { %p18935_p6 = scmp.ne.s32.totalorder %s3494_s3, %s18934_s10  ;;  %p18941_p7 = scmp.lt.s32.totalorder %s3494_s3, %s3494_s3 }
 0x446   : > { %p18942_p8 = scmp.lt.s32.totalorder %s18934_s10, %s18934_s10 }
 0x447   : > { %p18936_p5 = pnand %p18935_p6, %p16608_p10 }
 0x448   : > { %p18943_p11 = por %p18942_p8, %p18941_p7 }
 0x449   : > { %p18937_p4 = pneg %p18936_p5 }
 0x44a   : > { %16421 = dma.hbm_to_vmem [thread:$0]  (%p16608_p10), %s22149_s16, 512, %s3468_s1, [#allocation105], %s22102_s23, %s22102_s23, %s22110_s5  }
 0x44b   : > { %p18944_p12 = pnand %p18943_p11, %p18937_p4 }
 0x44d   : > { %18947 = shalt.err (!%p18944_p12)
}
 0x44e   : > { %s22150_s18 = sld [smem:[#allocation253_spill]]  ;;  %s19479_s26 = smov [#allocation112]  }
 0x44f   : > { %s3520_s22 = sshll.u32 %s19479_s26, 4  ;;  %s19480_s1 = smov [#allocation115]   ;;  %s3521_s22 = int_to_ptr.vmem [resolvable:$true] %s3520_s22 }
 0x450   : > { %s3542_s0 = sshll.u32 %s19480_s1, 4  ;;  %s18958_s21 = scalar_lea.vmem %s3521_s22, 16  ;;  %s3543_s0 = int_to_ptr.vmem [resolvable:$true] %s3542_s0 }
 0x451   : > { %p18959_p13 = scmp.ne.s32.totalorder %s3521_s22, %s18958_s21  ;;  %s18964_s16 = scalar_lea.vmem %s3521_s22, 32 }
 0x452   : > { %p18965_p2 = scmp.lt.s32.totalorder %s3521_s22, %s3521_s22  ;;  %p18966_p3 = scmp.lt.s32.totalorder %s18964_s16, %s18958_s21 }
 0x453   : > { %p18960_p0 = pnand %p18959_p13, %p16608_p10 }
 0x454   : > { %16425 = dma.hbm_to_vmem [thread:$0]  (%p16608_p10), %s22150_s18, 512, %s3494_s3, [#allocation108], %s22102_s23, %s22102_s23, %s22110_s5  }
 0x455   : > { %p18961_p1 = pneg %p18960_p0  ;;  %p18967_p6 = por %p18966_p3, %p18965_p2 }
 0x457   : > { %p18968_p5 = pnand %p18967_p6, %p18961_p1 }
 0x459   : > { %18971 = shalt.err (!%p18968_p5)
}
 0x45a   : > { %s22151_s23 = sld [smem:[#allocation255_spill]]  ;;  %s18982_s5 = scalar_lea.vmem %s3543_s0, 16 }
 0x45b   : > { %p18983_p4 = scmp.ne.s32.totalorder %s3543_s0, %s18982_s5  ;;  %s18988_s3 = scalar_lea.vmem %s3543_s0, 32 }
 0x45c   : > { %p18989_p11 = scmp.lt.s32.totalorder %s3543_s0, %s3543_s0  ;;  %p18990_p12 = scmp.lt.s32.totalorder %s18988_s3, %s18982_s5 }
 0x45d   : > { %p18984_p7 = pnand %p18983_p4, %p16608_p10 }
 0x45e   : > { %p18991_p13 = por %p18990_p12, %p18989_p11 }
 0x45f   : > { %p18985_p8 = pneg %p18984_p7 }
 0x460   : > { %16429 = dma.hbm_to_vmem [thread:$0]  (%p16608_p10), %s22151_s23, 16, %s3521_s22, [#allocation111]  }
 0x461   : > { %p18992_p0 = pnand %p18991_p13, %p18985_p8 }
 0x463   : > { %18995 = shalt.err (!%p18992_p0)
}
 0x464   : > { %s22152_s10 = sld [smem:[#allocation257_spill]]  ;;  %s19481_s18 = smov [#allocation118]  }
 0x465   : > { %s3570_s26 = sshll.u32 %s19481_s18, 4  ;;  %s3571_s26 = int_to_ptr.vmem [resolvable:$true] %s3570_s26 }
 0x466   : > { %s19006_s22 = scalar_lea.vmem %s3571_s26, 16  ;;  %s19012_s1 = scalar_lea.vmem %s3571_s26, 32 }
 0x467   : > { %p19007_p1 = scmp.ne.s32.totalorder %s3571_s26, %s19006_s22  ;;  %p19013_p6 = scmp.lt.s32.totalorder %s3571_s26, %s3571_s26 }
 0x468   : > { %p19014_p5 = scmp.lt.s32.totalorder %s19012_s1, %s19006_s22 }
 0x469   : > { %p19008_p2 = pnand %p19007_p1, %p16608_p10 }
 0x46a   : > { %16433 = dma.hbm_to_vmem [thread:$0]  (%p16608_p10), %s22152_s10, 16, %s3543_s0, [#allocation114]  }
 0x46b   : > { %p19009_p3 = pneg %p19008_p2  ;;  %p19015_p4 = por %p19014_p5, %p19013_p6 }
 0x46d   : > { %p19016_p7 = pnand %p19015_p4, %p19009_p3 }
 0x46f   : > { %19019 = shalt.err (!%p19016_p7)
}
 0x470   : > { %s22153_s21 = sld [smem:[#allocation261_spill]] }
 0x476   : > { %16437 = dma.hbm_to_vmem [thread:$0]  (%p16608_p10), %s22153_s21, 16, %s3571_s26, [#allocation117]  }
 0x477 PF: > { %3611 = sbr.rel (%p20095_p9) target bundleno = 21943 (0x55b7), region = 444  ;;  %p16685_p8 = scmp.eq.s32.totalorder (!%p20095_p9), %s20066_s15, 0 }
 0x47c   : > { %19115 = dma.done.wait (%p16685_p8), [#allocation3], 16  }
 0x47d   : > { %19117 = vsyncadd (%p16685_p8), [#allocation3], 4294967280 }
 0x47e   : > { %19119 = dma.done.wait (%p16685_p8), [#allocation6], 32  }
 0x47f   : > { %19121 = vsyncadd (%p16685_p8), [#allocation6], 4294967264 }
 0x480   : > { %19123 = dma.done.wait (%p16685_p8), [#allocation9], 32  }
 0x481   : > { %19125 = vsyncadd (%p16685_p8), [#allocation9], 4294967264 }
 0x482   : > { %19127 = dma.done.wait (%p16685_p8), [#allocation12], 32  }
 0x483   : > { %19129 = vsyncadd (%p16685_p8), [#allocation12], 4294967264 }
 0x484   : > { %19131 = dma.done.wait (%p16685_p8), [#allocation15], 32  }
 0x485   : > { %19133 = vsyncadd (%p16685_p8), [#allocation15], 4294967264 }
 0x486   : > { %19135 = dma.done.wait (%p16685_p8), [#allocation18], 32  }
 0x487   : > { %19137 = vsyncadd (%p16685_p8), [#allocation18], 4294967264 }
 0x488   : > { %19139 = dma.done.wait (%p16685_p8), [#allocation21], 32  }
 0x489   : > { %19141 = vsyncadd (%p16685_p8), [#allocation21], 4294967264 }
 0x48a   : > { %19143 = dma.done.wait (%p16685_p8), [#allocation24], 32  }
 0x48b   : > { %19145 = vsyncadd (%p16685_p8), [#allocation24], 4294967264 }
 0x48c   : > { %19147 = dma.done.wait (%p16685_p8), [#allocation27], 32  }
 0x48d   : > { %19149 = vsyncadd (%p16685_p8), [#allocation27], 4294967264 }
 0x48e   : > { %19151 = dma.done.wait (%p16685_p8), [#allocation30], 32  }
 0x48f   : > { %19153 = vsyncadd (%p16685_p8), [#allocation30], 4294967264 }
 0x490   : > { %19155 = dma.done.wait (%p16685_p8), [#allocation33], 32  }
 0x491   : > { %19157 = vsyncadd (%p16685_p8), [#allocation33], 4294967264 }
 0x492   : > { %19159 = dma.done.wait (%p16685_p8), [#allocation36], 32  }
 0x493   : > { %19161 = vsyncadd (%p16685_p8), [#allocation36], 4294967264 }
 0x494   : > { %19163 = dma.done.wait (%p16685_p8), [#allocation39], 32  }
 0x495   : > { %19165 = vsyncadd (%p16685_p8), [#allocation39], 4294967264 }
 0x496   : > { %19167 = dma.done.wait (%p16685_p8), [#allocation42], 32  }
 0x497   : > { %19169 = vsyncadd (%p16685_p8), [#allocation42], 4294967264 }
 0x498   : > { %19171 = dma.done.wait (%p16685_p8), [#allocation45], 32  }
 0x499   : > { %19173 = vsyncadd (%p16685_p8), [#allocation45], 4294967264 }
 0x49a   : > { %19175 = dma.done.wait (%p16685_p8), [#allocation48], 32  }
 0x49b   : > { %19177 = vsyncadd (%p16685_p8), [#allocation48], 4294967264 }
 0x49c   : > { %19179 = dma.done.wait (%p16685_p8), [#allocation51], 32  }
 0x49d   : > { %19181 = vsyncadd (%p16685_p8), [#allocation51], 4294967264 }
 0x49e   : > { %19183 = dma.done.wait (%p16685_p8), [#allocation54], 32  }
 0x49f   : > { %19185 = vsyncadd (%p16685_p8), [#allocation54], 4294967264 }
 0x4a0   : > { %19187 = dma.done.wait (%p16685_p8), [#allocation57], 32  }
 0x4a1   : > { %19189 = vsyncadd (%p16685_p8), [#allocation57], 4294967264 }
 0x4a2   : > { %19191 = dma.done.wait (%p16685_p8), [#allocation60], 528  }
 0x4a3   : > { %19193 = vsyncadd (%p16685_p8), [#allocation60], 4294966768 }
 0x4a4   : > { %19195 = dma.done.wait (%p16685_p8), [#allocation63], 32  }
 0x4a5   : > { %19197 = vsyncadd (%p16685_p8), [#allocation63], 4294967264 }
 0x4a6   : > { %19199 = dma.done.wait (%p16685_p8), [#allocation66], 32  }
 0x4a7   : > { %19201 = vsyncadd (%p16685_p8), [#allocation66], 4294967264 }
 0x4a8   : > { %19203 = dma.done.wait (%p16685_p8), [#allocation69], 32  }
 0x4a9   : > { %19205 = vsyncadd (%p16685_p8), [#allocation69], 4294967264 }
 0x4aa   : > { %19207 = dma.done.wait (%p16685_p8), [#allocation72], 1024  }
 0x4ab   : > { %19209 = vsyncadd (%p16685_p8), [#allocation72], 4294966272 }
 0x4ac   : > { %19211 = dma.done.wait (%p16685_p8), [#allocation75], 528  }
 0x4ad   : > { %19213 = vsyncadd (%p16685_p8), [#allocation75], 4294966768 }
 0x4ae   : > { %19215 = dma.done.wait (%p16685_p8), [#allocation78], 32  }
 0x4af   : > { %19217 = vsyncadd (%p16685_p8), [#allocation78], 4294967264 }
 0x4b0   : > { %19219 = dma.done.wait (%p16685_p8), [#allocation81], 32  }
 0x4b1   : > { %19221 = vsyncadd (%p16685_p8), [#allocation81], 4294967264 }
 0x4b2   : > { %19223 = dma.done.wait (%p16685_p8), [#allocation84], 528  }
 0x4b3   : > { %19225 = vsyncadd (%p16685_p8), [#allocation84], 4294966768 }
 0x4b4   : > { %19227 = dma.done.wait (%p16685_p8), [#allocation87], 1024  }
 0x4b5   : > { %19229 = vsyncadd (%p16685_p8), [#allocation87], 4294966272 }
 0x4b6   : > { %19231 = dma.done.wait (%p16685_p8), [#allocation90], 528  }
 0x4b7   : > { %19233 = vsyncadd (%p16685_p8), [#allocation90], 4294966768 }
 0x4b8   : > { %19235 = dma.done.wait (%p16685_p8), [#allocation93], 32  }
 0x4b9   : > { %19237 = vsyncadd (%p16685_p8), [#allocation93], 4294967264 }
 0x4ba   : > { %19239 = dma.done.wait (%p16685_p8), [#allocation96], 32  }
 0x4bb   : > { %19241 = vsyncadd (%p16685_p8), [#allocation96], 4294967264 }
 0x4bc   : > { %19243 = dma.done.wait (%p16685_p8), [#allocation99], 32  }
 0x4bd   : > { %19245 = vsyncadd (%p16685_p8), [#allocation99], 4294967264 }
 0x4be   : > { %19247 = dma.done.wait (%p16685_p8), [#allocation102], 32  }
 0x4bf   : > { %19249 = vsyncadd (%p16685_p8), [#allocation102], 4294967264 }
 0x4c0   : > { %19251 = dma.done.wait (%p16685_p8), [#allocation105], 528  }
 0x4c1   : > { %19253 = vsyncadd (%p16685_p8), [#allocation105], 4294966768 }
 0x4c2   : > { %19255 = dma.done.wait (%p16685_p8), [#allocation108], 1024  }
 0x4c3   : > { %19257 = vsyncadd (%p16685_p8), [#allocation108], 4294966272 }
 0x4c4   : > { %19259 = dma.done.wait (%p16685_p8), [#allocation111], 528  }
 0x4c5   : > { %19261 = vsyncadd (%p16685_p8), [#allocation111], 4294966768 }
 0x4c6   : > { %19263 = dma.done.wait (%p16685_p8), [#allocation114], 32  }
 0x4c7   : > { %19265 = vsyncadd (%p16685_p8), [#allocation114], 4294967264 }
 0x4c8   : > { %19267 = dma.done.wait (%p16685_p8), [#allocation117], 32  }
 0x4c9   : > { %19269 = vsyncadd (%p16685_p8), [#allocation117], 4294967264  ;;  %s22154_s2 = sld [smem:[#allocation164_spill]]  ;;  %p4173_p9 = scmp.lt.s32.totalorder %s20066_s15, 1  ;;  %v4293_v0 = vld [vmem:[#allocation85 + $0x18] sm:$0xff]  ;;  %v4292_v1 = vld [vmem:[#allocation85 + $0x10] sm:$0xff] }
 0x4ca   : > { %s22155_s0 = sld [smem:[#allocation165_spill]]  ;;  %v4200_v2 = vld [vmem:[#allocation88 + $0x18] sm:$0xff]  ;;  %15509 = vmatprep.subr.mxu1 %v4293_v0  ;;  %v4291_v3 = vld [vmem:[#allocation85 + $0x8] sm:$0xff]  ;;  %v4199_v4 = vld [vmem:[#allocation88 + $0x10] sm:$0xff]  ;;  %vm4208_vm0 = vcmask 261120   ;;  %vm4472_vm1 = vcmask 64512  }
 0x4cb   : > { %s20684_s16 = scalar_select %p4173_p9, %s20066_s15, 1  ;;  %15498 = vmatprep.subr.mxu0 %v4200_v2  ;;  %15510 = vmatpush3.msra.mxu1 %v4293_v0  ;;  %v4198_v5 = vld [vmem:[#allocation88 + $0x8] sm:$0xff]  ;;  %v4290_v10 = vld [vmem:[#allocation85] sm:$0xff]  ;;  %v4379_v14 = vld [vmem:[#allocation89 + $0x18] sm:$0xff]  ;;  %vm4570_vm2 = vcmask 130048   ;;  %vm5781_vm3 = vcmask 523264  }
 0x4cc   : > { %15499 = vmatpush3.msra.mxu0 %v4200_v2  ;;  %15511 = vmatprep.subr.mxu1 %v4292_v1  ;;  %v4197_v13 = vld [vmem:[#allocation88] sm:$0xff]  ;;  %v4378_v15 = vld [vmem:[#allocation89 + $0x10] sm:$0xff]  ;;  %v4377_v16 = vld [vmem:[#allocation89 + $0x8] sm:$0xff]  ;;  %s22156_s10 = sld [smem:[#allocation166_spill]]  ;;  %s21941_s18 = smov 120   ;;  %vm19486_vm4 = vmmov 0  }
 0x4cd   : > { %s15116_s23 = sshll.u32 %s20684_s16, 4  ;;  %15500 = vmatprep.subr.mxu0 %v4199_v4  ;;  %15512 = vmatpush3.msra.mxu1 %v4292_v1  ;;  %v14864_v17 = vld [vmem:[#allocation76] ss:$0 sm:$0xff]  ;;  %v4376_v18 = vld [vmem:[#allocation89] sm:$0xff]  ;;  %v14861_v23 = vld [vmem:[#allocation79] ss:$0 sm:$0xff] }
 0x4ce   : > { %15501 = vmatpush3.msra.mxu0 %v4199_v4  ;;  %15513 = vmatprep.subr.mxu1 %v4291_v3  ;;  %v14867_v38 = vld [vmem:[#allocation80] ss:$0 sm:$0xff]  ;;  %v4468_v62 = vld [vmem:[#allocation86] sm:$0xff]  ;;  %s21939_s22 = smov 112   ;;  %s21937_s1 = smov 104   ;;  %vm13624_vm5 = vcmask 89088  }
 0x4cf   : > { %s4177_s5 = scalar_lea.vmem %s22154_s2, %s15116_s23  ;;  %15502 = vmatprep.subr.mxu0 %v4198_v5  ;;  %15514 = vmatpush3.msra.mxu1 %v4291_v3  ;;  %s22157_s21 = sld [smem:[#allocation243_spill]] }
 0x4d0   : > { %s20689_s3 = scalar_lea.vmem %s22155_s0, %s15116_s23  ;;  %v4190_v6 = vld [vmem:[%s4177_s5] sm:$0xff]  ;;  %v4191_v7 = vld [vmem:[%s4177_s5 + $0x8] sm:$0xff]  ;;  %15515 = vmatprep.subr.mxu1 %v4290_v10  ;;  %15503 = vmatpush3.msra.mxu0 %v4198_v5  ;;  %s22158_s2 = sld [smem:[#allocation244_spill]] }
 0x4d1   : > { %v20692_v8 = vld [vmem:[%s20689_s3] sm:$0xff]  ;;  %v20695_v9 = vld [vmem:[%s20689_s3 + $0x8] sm:$0xff]  ;;  %15516 = vmatpush3.msra.mxu1 %v4290_v10  ;;  %15504 = vmatprep.subr.mxu0 %v4197_v13  ;;  %s22159_s0 = sld [smem:[#allocation259_spill]]  ;;  %p22195_p11 = scmp.ne.s32.totalorder %s22077_s28, 0 }
 0x4d2   : > { %v20698_v11 = vadd.f32 %v20692_v8, %v4190_v6  ;;  %v20701_v12 = vadd.f32 %v20695_v9, %v4191_v7  ;;  %15505 = vmatpush3.msra.mxu0 %v4197_v13  ;;  %s20739_s26 = scalar_lea.vmem %s22156_s10, %s20684_s16  ;;  %s22161_s5 = sld [smem:[#allocation260_spill]] }
 0x4d3   : > { %15520 = vmatprep.subr.mxu0 %v4379_v14  ;;  %v20742_v32 = vld [vmem:[%s20739_s26] ss:$0 sm:$0xff]  ;;  %s22162_s10 = sld [smem:[#allocation198_spill]]  ;;  %s19487_s13 = smov [#allocation120]  }
 0x4d4   : > { %15517 = vmatprep.mubr.msk.f32.mxu1 %vm4208_vm0, %v20698_v11  ;;  %15506 = vmatprep.mubr.msk.f32.mxu0 %vm4208_vm0, %v20698_v11  ;;  %s22177_s6 = sld [smem:[#allocation182_spill]]  ;;  %s19024_s14 = sshll.u32 %s19487_s13, 4  ;;  %s19025_s14 = int_to_ptr.vmem [resolvable:$false] %s19024_s14 }
 0x4d5   : > { %15518 = vmatmul.mubr.msk.f32.vlgmr.msra.gmra.mxu1 %vm4208_vm0, %v20701_v12  ;;  %15507 = vmatmul.mubr.msk.f32.vlgmr.msra.gmra.mxu0 %vm4208_vm0, %v20701_v12 }
 0x4d6   : > { %15528 = vmatprep.mubr.msk.f32.mxu0 %vm4208_vm0, %v4190_v6  ;;  %15521 = vmatpush3.msra.mxu0 %v4379_v14 }
 0x4d7   : > { %15522 = vmatprep.subr.mxu0 %v4378_v15  ;;  %s22160_s23 = smov %s22159_s0 }
 0x4d8   : > { %15523 = vmatpush3.msra.mxu0 %v4378_v15 }
 0x4d9   : > { %15524 = vmatprep.subr.mxu0 %v4377_v16 }
 0x4da   : > { %15525 = vmatpush3.msra.mxu0 %v4377_v16 }
 0x4db   : > { %15526 = vmatprep.subr.mxu0 %v4376_v18 }
 0x4dc   : > { %15527 = vmatpush3.msra.mxu0 %v4376_v18 }
 0x4dd   : > { %15529 = vmatmul.mubr.msk.f32.vlgmr.msra.gmra.mxu0 %vm4208_vm0, %v4191_v7 }
 0x595   : > { %v15519_v19 = vpop.f32.mrf.mxu1  ;;  %v15508_v22 = vpop.f32.mrf.mxu0 }
 0x596   : > { %v20712_v20 = vadd.f32 %v15519_v19, %v14864_v17  ;;  %v20731_v27 = vadd.f32 %v15508_v22, %v14861_v23 }
 0x597   : > { %v4367_v21 = vpop.f32.mrf.mxu1  ;;  %v4281_v25 = vpop.f32.mrf.mxu0 }
 0x598   : > { %v20714_v24 = vadd.f32 %v14864_v17, %v4367_v21  ;;  %15531 = vmatprep.subr.msk.mxu1 %vm4472_vm1, %v20712_v20  ;;  %v20723_v26 = vadd.f32 %v14861_v23, %v4281_v25 }
 0x599   : > { %15532 = vmatpush3.xpose.msk.msra.mxu1 %vm4472_vm1, %v20712_v20 }
 0x59a   : > { %4678 = vrot.lane.b32.xlu1 %v20714_v24, %s21941_s18  ;;  %15533 = vmatprep.subr.msk.mxu1 %vm4472_vm1, %v20714_v24 }
 0x59b   : > { %15535 = vmatprep.mubr.msk.f32.mxu1 %vm4472_vm1, %v20723_v26 }
 0x59d   : > { %15534 = vmatpush3.xpose.msk.msra.mxu1 %vm4472_vm1, %v20714_v24  ;;  %v15530_v37 = vpop.f32.mrf.mxu0 }
 0x59e   : > { %4674 = vrot.lane.b32.xlu1 %v20723_v26, %s21941_s18  ;;  %v20748_v39 = vadd.f32 %v15530_v37, %v14867_v38 }
 0x59f   : > { %v4459_v40 = vpop.f32.mrf.mxu0 }
 0x5a0   : > { %15536 = vmatmul.mubr.msk.f32.vlgmr.msra.gmra.mxu1 %vm4472_vm1, %v20731_v27  ;;  %v20750_v41 = vadd.f32 %v14867_v38, %v4459_v40  ;;  %15538 = vmatprep.subr.mxu1 %v20748_v39 }
 0x5a1   : > { %15539 = vmatpush3.msra.mxu1 %v20748_v39 }
 0x5a2   : > { %15540 = vmatprep.subr.mxu1 %v20750_v41 }
 0x5a3   : > { %15541 = vmatpush3.msra.mxu1 %v20750_v41 }
 0x60c   : > { %v4679_v53 = vpop.permute.xlu1 %4678 }
 0x610   : > { %v4675_v54 = vpop.permute.xlu1 %4674 }
 0x660   : > { %v15537_v28 = vpop.f32.mrf.mxu1 }
 0x661   : > { %v4561_v30 = vmul.f32 0.35355338, %v15537_v28 }
 0x662   : > { %v4551_v29 = vpop.f32.mrf.mxu1 }
 0x663   : > { %v4560_v31 = vmul.f32 0.35355338, %v4551_v29  ;;  %v4569_v35 = vadd.f32 %v20742_v32, %v4561_v30  ;;  %v4469_v29 = vld [vmem:[#allocation86 + $0x8] sm:$0xff] }
 0x665   : > { %v4568_v33 = vadd.f32 %v20742_v32, %v4560_v31  ;;  %v4574_v36 = vsel %vm4570_vm2, %v4569_v35, -inf }
 0x667   : > { %v4571_v34 = vsel %vm4570_vm2, %v4568_v33, -inf }
 0x668   : > { %4572 = vmax.xlane.f32.xlu0 %v4571_v34 }
 0x66c   : > { %4575 = vmax.xlane.f32.xlu0 %v4574_v36 }
 0x682   : > { %4680 = vrot.lane.b32.xlu0 %v20712_v20, %s21941_s18 }
 0x6f1   : > { %v4573_v42 = vpop.xlane.xlu0 %4572 }
 0x6f2   : > { %v4577_v43 = vsub.f32 %v4568_v33, %v4573_v42 }
 0x6f4   : > { %v4579_v46 = vmul.f32 1.442695, %v4577_v43 }
 0x6f5   : > { %v4576_v44 = vpop.xlane.xlu0 %4575 }
 0x6f6   : > { %v4578_v45 = vsub.f32 %v4569_v35, %v4576_v44 }
 0x6f8   : > { %v4581_v47 = vmul.f32 1.442695, %v4578_v45 }
 0x6f9   : > { %v4681_v48 = vpop.permute.xlu0 %4680 }
 0x6fa   : > { %16988 = vpow2.f32 %v4581_v47  ;;  %15545 = vmatprep.subr.msk.mxu1 %vm4472_vm1, %v4681_v48 }
 0x6fb   : > { %16990 = vpow2.f32 %v4579_v46 }
 0x707   : > { %v16989_v49 = vpop.eup %16988 }
 0x708   : > { %v4586_v50 = vsel %vm4570_vm2, %v16989_v49, 0.0  ;;  %v16991_v51 = vpop.eup %16990 }
 0x709   : > { %4587 = vadd.xlane.f32.xlu1 %v4586_v50  ;;  %v4583_v52 = vsel %vm4570_vm2, %v16991_v51, 0.0 }
 0x70d   : > { %4584 = vadd.xlane.f32.xlu1 %v4583_v52 }
 0x71e   : > { %4676 = vrot.lane.b32.xlu1 %v20731_v27, %s21941_s18 }
 0x792   : > { %v4588_v55 = vpop.xlane.xlu1 %4587 }
 0x793   : > { %16992 = vrcp.f32 %v4588_v55 }
 0x796   : > { %v4585_v56 = vpop.xlane.xlu1 %4584 }
 0x797   : > { %16994 = vrcp.f32 %v4585_v56 }
 0x79a   : > { %v4677_v61 = vpop.permute.xlu1 %4676 }
 0x7a0   : > { %v16993_v57 = vpop.eup %16992 }
 0x7a1   : > { %v4592_v60 = vmul.f32 %v16993_v57, %v16989_v49 }
 0x7a4   : > { %v16995_v58 = vpop.eup %16994 }
 0x7a5   : > { %v4591_v59 = vmul.f32 %v16995_v58, %v16991_v51 }
 0x7a7   : > { %15542 = vmatprep.mubr.msk.f32.mxu1 %vm4570_vm2, %v4591_v59 }
 0x7a8   : > { %15543 = vmatmul.mubr.msk.f32.vlgmr.msra.gmra.mxu1 %vm4570_vm2, %v4592_v60 }
 0x7a9   : > { %15546 = vmatpush3.xpose.msk.msra.mxu1 %vm4472_vm1, %v4681_v48  ;;  %15549 = vmatprep.mubr.msk.f32.mxu1 %vm4472_vm1, %v4675_v54 }
 0x7aa   : > { %15547 = vmatprep.subr.msk.mxu1 %vm4472_vm1, %v4679_v53 }
 0x7ad   : > { %15548 = vmatpush3.xpose.msk.msra.mxu1 %vm4472_vm1, %v4679_v53 }
 0x7ae   : > { %15564 = vmatprep.subr.mxu1 %v4468_v62 }
 0x7b0   : > { %15550 = vmatmul.mubr.msk.f32.vlgmr.msra.gmra.mxu1 %vm4472_vm1, %v4677_v61 }
 0x7b1   : > { %15565 = vmatpush3.msra.mxu1 %v4468_v62 }
 0x868   : > { %v15544_v63 = vpop.f32.mrf.mxu1 }
 0x86a   : > { %v4665_v0 = vpop.f32.mrf.mxu1 }
 0x86b   : > { %15566 = vmatprep.mubr.msk.f32.mxu1 %vm4472_vm1, %v4665_v0 }
 0x86c   : > { %15567 = vmatmul.mubr.msk.f32.vlgmr.msra.gmra.mxu1 %vm4472_vm1, %v15544_v63 }
 0x870   : > { %v15551_v1 = vpop.f32.mrf.mxu1 }
 0x871   : > { %v4766_v2 = vmul.f32 0.35355338, %v15551_v1 }
 0x872   : > { %v4756_v3 = vpop.f32.mrf.mxu1 }
 0x873   : > { %v4765_v4 = vmul.f32 0.35355338, %v4756_v3  ;;  %v4768_v5 = vadd.f32 %v20742_v32, %v4766_v2 }
 0x875   : > { %v4772_v6 = vsel %vm4570_vm2, %v4768_v5, -inf  ;;  %v4767_v7 = vadd.f32 %v20742_v32, %v4765_v4 }
 0x876   : > { %4773 = vmax.xlane.f32.xlu1 %v4772_v6 }
 0x877   : > { %v4769_v10 = vsel %vm4570_vm2, %v4767_v7, -inf }
 0x878   : > { %4770 = vmax.xlane.f32.xlu0 %v4769_v10 }
 0x887   : > { %4793 = vrot.lane.b32.xlu1 %v20750_v41, %s21941_s18 }
 0x88b   : > { %5048 = vrot.lane.b32.xlu1 %v20712_v20, %s21939_s22 }
 0x88f   : > { %5046 = vrot.lane.b32.xlu1 %v20714_v24, %s21939_s22 }
 0x893   : > { %5044 = vrot.lane.b32.xlu1 %v20731_v27, %s21939_s22 }
 0x897   : > { %5333 = vrot.lane.b32.xlu1 %v20714_v24, %s21937_s1 }
 0x89b   : > { %5331 = vrot.lane.b32.xlu1 %v20731_v27, %s21937_s1 }
 0x8ff   : > { %v4774_v13 = vpop.xlane.xlu1 %4773 }
 0x900   : > { %v4776_v14 = vsub.f32 %v4768_v5, %v4774_v13 }
 0x901   : > { %v4771_v15 = vpop.xlane.xlu0 %4770 }
 0x902   : > { %v4779_v16 = vmul.f32 1.442695, %v4776_v14  ;;  %v4775_v17 = vsub.f32 %v4767_v7, %v4771_v15 }
 0x903   : > { %v4794_v28 = vpop.permute.xlu1 %4793 }
 0x904   : > { %16996 = vpow2.f32 %v4779_v16  ;;  %v4777_v18 = vmul.f32 1.442695, %v4775_v17 }
 0x906   : > { %16998 = vpow2.f32 %v4777_v18 }
 0x911   : > { %v16997_v19 = vpop.eup %16996 }
 0x912   : > { %v4784_v21 = vsel %vm4570_vm2, %v16997_v19, 0.0 }
 0x913   : > { %v16999_v22 = vpop.eup %16998  ;;  %4785 = vadd.xlane.f32.xlu0 %v4784_v21 }
 0x914   : > { %v4781_v23 = vsel %vm4570_vm2, %v16999_v22, 0.0 }
 0x917   : > { %4782 = vadd.xlane.f32.xlu0 %v4781_v23  ;;  %v4470_v23 = vld [vmem:[#allocation86 + $0x10] sm:$0xff] }
 0x92d   : > { %4795 = vrot.lane.b32.xlu0 %v20748_v39, %s21941_s18 }
 0x931   : > { %5042 = vrot.lane.b32.xlu0 %v20723_v26, %s21939_s22 }
 0x935   : > { %5335 = vrot.lane.b32.xlu0 %v20712_v20, %s21937_s1  ;;  %v5049_v20 = vpop.permute.xlu1 %5048 }
 0x939   : > { %5329 = vrot.lane.b32.xlu0 %v20723_v26, %s21937_s1  ;;  %v5047_v36 = vpop.permute.xlu1 %5046 }
 0x93d   : > { %v5045_v40 = vpop.permute.xlu1 %5044 }
 0x941   : > { %v5334_v43 = vpop.permute.xlu1 %5333 }
 0x945   : > { %v5332_v44 = vpop.permute.xlu1 %5331 }
 0x99c   : > { %v4786_v24 = vpop.xlane.xlu0 %4785 }
 0x99d   : > { %17000 = vrcp.f32 %v4786_v24 }
 0x9a0   : > { %v4783_v25 = vpop.xlane.xlu0 %4782 }
 0x9a1   : > { %17002 = vrcp.f32 %v4783_v25 }
 0x9a4   : > { %v4796_v27 = vpop.permute.xlu0 %4795 }
 0x9a5   : > { %15552 = vmatprep.subr.mxu0 %v4796_v27 }
 0x9a6   : > { %15553 = vmatpush3.msra.mxu0 %v4796_v27 }
 0x9a7   : > { %15554 = vmatprep.subr.mxu0 %v4794_v28 }
 0x9a8   : > { %15555 = vmatpush3.msra.mxu0 %v4794_v28  ;;  %v5043_v26 = vpop.permute.xlu0 %5042 }
 0x9a9   : > { %15559 = vmatprep.subr.mxu0 %v4469_v29 }
 0x9aa   : > { %v17001_v30 = vpop.eup %17000 }
 0x9ab   : > { %v4790_v34 = vmul.f32 %v17001_v30, %v16997_v19 }
 0x9ac   : > { %v5336_v38 = vpop.permute.xlu0 %5335 }
 0x9ae   : > { %v17003_v31 = vpop.eup %17002 }
 0x9af   : > { %v4789_v33 = vmul.f32 %v17003_v31, %v16999_v22 }
 0x9b0   : > { %v5330_v42 = vpop.permute.xlu0 %5329 }
 0x9b1   : > { %15556 = vmatprep.mubr.msk.f32.mxu0 %vm4570_vm2, %v4789_v33 }
 0x9b2   : > { %15557 = vmatmul.mubr.msk.f32.vlgmr.msra.gmra.mxu0 %vm4570_vm2, %v4790_v34 }
 0x9b3   : > { %15560 = vmatpush3.msra.mxu0 %v4469_v29 }
 0x9b4   : > { %15569 = vmatprep.subr.msk.mxu0 %vm4472_vm1, %v5049_v20 }
 0xa72   : > { %v15558_v35 = vpop.f32.mrf.mxu0 }
 0xa74   : > { %v4871_v37 = vpop.f32.mrf.mxu0 }
 0xa75   : > { %15561 = vmatprep.mubr.msk.f32.mxu0 %vm4472_vm1, %v4871_v37 }
 0xa76   : > { %15562 = vmatmul.mubr.msk.f32.vlgmr.msra.gmra.mxu0 %vm4472_vm1, %v15558_v35 }
 0xa77   : > { %15570 = vmatpush3.xpose.msk.msra.mxu0 %vm4472_vm1, %v5049_v20  ;;  %15573 = vmatprep.mubr.msk.f32.mxu0 %vm4472_vm1, %v5043_v26  ;;  %v15568_v26 = vpop.f32.mrf.mxu1 }
 0xa78   : > { %15571 = vmatprep.subr.msk.mxu0 %vm4472_vm1, %v5047_v36 }
 0xa79   : > { %v5033_v35 = vpop.f32.mrf.mxu1 }
 0xa7b   : > { %15572 = vmatpush3.xpose.msk.msra.mxu0 %vm4472_vm1, %v5047_v36 }
 0xa7c   : > { %15588 = vmatprep.subr.msk.mxu0 %vm4472_vm1, %v5336_v38 }
 0xa7e   : > { %15574 = vmatmul.mubr.msk.f32.vlgmr.msra.gmra.mxu0 %vm4472_vm1, %v5045_v40 }
 0xa7f   : > { %15589 = vmatpush3.xpose.msk.msra.mxu0 %vm4472_vm1, %v5336_v38  ;;  %15592 = vmatprep.mubr.msk.f32.mxu0 %vm4472_vm1, %v5330_v42 }
 0xa80   : > { %15590 = vmatprep.subr.msk.mxu0 %vm4472_vm1, %v5334_v43 }
 0xa83   : > { %15591 = vmatpush3.xpose.msk.msra.mxu0 %vm4472_vm1, %v5334_v43 }
 0xa86   : > { %15593 = vmatmul.mubr.msk.f32.vlgmr.msra.gmra.mxu0 %vm4472_vm1, %v5332_v44 }
 0xb36   : > { %v20814_v45 = vpop.f32.mrf.mxu0 }
 0xb38   : > { %v20816_v46 = vpop.f32.mrf.mxu0 }
 0xb3e   : > { %v15575_v47 = vpop.f32.mrf.mxu0 }
 0xb3f   : > { %v5134_v48 = vmul.f32 0.35355338, %v15575_v47  ;;  %v4471_v47 = vld [vmem:[#allocation86 + $0x18] sm:$0xff] }
 0xb40   : > { %v5124_v49 = vpop.f32.mrf.mxu0 }
 0xb41   : > { %v5133_v50 = vmul.f32 0.35355338, %v5124_v49  ;;  %v5136_v51 = vadd.f32 %v20742_v32, %v5134_v48  ;;  %v5039_v48 = vadd.f32 %v15568_v26, %v20814_v45  ;;  %v14905_v26 = vld [vmem:[#allocation82] ss:$0 sm:$0xff] }
 0xb43   : > { %v5140_v52 = vsel %vm4570_vm2, %v5136_v51, -inf  ;;  %v5135_v53 = vadd.f32 %v20742_v32, %v5133_v50  ;;  %v5034_v50 = vadd.f32 %v5033_v35, %v20816_v46 }
 0xb44   : > { %5141 = vmax.xlane.f32.xlu1 %v5140_v52 }
 0xb45   : > { %v5137_v54 = vsel %vm4570_vm2, %v5135_v53, -inf }
 0xb46   : > { %5138 = vmax.xlane.f32.xlu0 %v5137_v54  ;;  %v15594_v55 = vpop.f32.mrf.mxu0 }
 0xb47   : > { %v5421_v14 = vmul.f32 0.35355338, %v15594_v55 }
 0xb48   : > { %v5411_v56 = vpop.f32.mrf.mxu0 }
 0xb49   : > { %v5420_v57 = vmul.f32 0.35355338, %v5411_v56  ;;  %v5423_v15 = vadd.f32 %v20742_v32, %v5421_v14  ;;  %v5674_v14 = vld [vmem:[%s22157_s21 + $0x10] sm:$0xff] }
 0xb4b   : > { %v5422_v58 = vadd.f32 %v20742_v32, %v5420_v57  ;;  %v5427_v16 = vsel %vm4570_vm2, %v5423_v15, -inf  ;;  %v14903_v57 = vld [vmem:[#allocation77] ss:$0 sm:$0xff] }
 0xb4d   : > { %v5424_v59 = vsel %vm4570_vm2, %v5422_v58, -inf }
 0xb55   : > { %5159 = vrot.lane.b32.xlu1 %v20750_v41, %s21939_s22 }
 0xb79   : > { %5425 = vmax.xlane.f32.xlu1 %v5424_v59 }
 0xbcd   : > { %v5142_v60 = vpop.xlane.xlu1 %5141 }
 0xbce   : > { %v5144_v61 = vsub.f32 %v5136_v51, %v5142_v60 }
 0xbcf   : > { %v5139_v62 = vpop.xlane.xlu0 %5138 }
 0xbd0   : > { %v5147_v63 = vmul.f32 1.442695, %v5144_v61  ;;  %v5143_v0 = vsub.f32 %v5135_v53, %v5139_v62 }
 0xbd1   : > { %v5160_v6 = vpop.permute.xlu1 %5159 }
 0xbd2   : > { %17004 = vpow2.f32 %v5147_v63  ;;  %v5145_v1 = vmul.f32 1.442695, %v5143_v0 }
 0xbd4   : > { %17006 = vpow2.f32 %v5145_v1 }
 0xbdf   : > { %v17005_v2 = vpop.eup %17004 }
 0xbe0   : > { %v5152_v3 = vsel %vm4570_vm2, %v17005_v2, 0.0 }
 0xbe1   : > { %v17007_v4 = vpop.eup %17006  ;;  %5153 = vadd.xlane.f32.xlu0 %v5152_v3 }
 0xbe2   : > { %v5149_v5 = vsel %vm4570_vm2, %v17007_v4, 0.0 }
 0xbe5   : > { %5150 = vadd.xlane.f32.xlu0 %v5149_v5 }
 0xbfb   : > { %5161 = vrot.lane.b32.xlu0 %v20748_v39, %s21939_s22 }
 0xc02   : > { %v5426_v7 = vpop.xlane.xlu1 %5425 }
 0xc03   : > { %v5430_v10 = vsub.f32 %v5422_v58, %v5426_v7 }
 0xc05   : > { %v5432_v13 = vmul.f32 1.442695, %v5430_v10 }
 0xc07   : > { %17008 = vpow2.f32 %v5432_v13  ;;  %v5675_v13 = vld [vmem:[%s22157_s21 + $0x18] sm:$0xff] }
 0xc08   : > { %15607 = vmatprep.subr.mxu0 %v5675_v13 }
 0xc09   : > { %15608 = vmatpush3.msra.mxu0 %v5675_v13  ;;  %v5911_v13 = vld [vmem:[#allocation109] sm:$0xff] }
 0xc0a   : > { %15609 = vmatprep.subr.mxu0 %v5674_v14 }
 0xc0b   : > { %15610 = vmatpush3.msra.mxu0 %v5674_v14  ;;  %v6006_v14 = vld [vmem:[#allocation106 + $0x18] sm:$0xff] }
 0xc14   : > { %v17009_v17 = vpop.eup %17008 }
 0xc15   : > { %v5436_v18 = vsel %vm4570_vm2, %v17009_v17, 0.0 }
 0xc1a   : > { %5428 = vmax.xlane.f32.xlu0 %v5427_v16  ;;  %v5672_v16 = vld [vmem:[%s22157_s21] sm:$0xff] }
 0xc1e   : > { %5437 = vadd.xlane.f32.xlu0 %v5436_v18  ;;  %v5772_v18 = vld [vmem:[%s22158_s2 + $0x30] sm:$0xff] }
 0xc34   : > { %5448 = vrot.lane.b32.xlu0 %v20748_v39, %s21937_s1 }
 0xc6a   : > { %v5154_v19 = vpop.xlane.xlu0 %5153 }
 0xc6b   : > { %17010 = vrcp.f32 %v5154_v19  ;;  %v5771_v19 = vld [vmem:[%s22158_s2 + $0x28] sm:$0xff] }
 0xc6e   : > { %v5151_v21 = vpop.xlane.xlu0 %5150 }
 0xc6f   : > { %17012 = vrcp.f32 %v5151_v21  ;;  %v5770_v21 = vld [vmem:[%s22158_s2 + $0x20] sm:$0xff] }
 0xc72   : > { %v5162_v22 = vpop.permute.xlu0 %5161 }
 0xc73   : > { %15576 = vmatprep.subr.mxu1 %v5162_v22 }
 0xc74   : > { %15577 = vmatpush3.msra.mxu1 %v5162_v22 }
 0xc75   : > { %15578 = vmatprep.subr.mxu1 %v5160_v6 }
 0xc76   : > { %15579 = vmatpush3.msra.mxu1 %v5160_v6 }
 0xc77   : > { %15583 = vmatprep.subr.mxu1 %v4470_v23 }
 0xc78   : > { %v17011_v24 = vpop.eup %17010 }
 0xc79   : > { %v5158_v28 = vmul.f32 %v17011_v24, %v17005_v2 }
 0xc7c   : > { %v17013_v25 = vpop.eup %17012 }
 0xc7d   : > { %v5157_v27 = vmul.f32 %v17013_v25, %v17007_v4 }
 0xc7f   : > { %15580 = vmatprep.mubr.msk.f32.mxu1 %vm4570_vm2, %v5157_v27 }
 0xc80   : > { %15581 = vmatmul.mubr.msk.f32.vlgmr.msra.gmra.mxu1 %vm4570_vm2, %v5158_v28 }
 0xc81   : > { %15584 = vmatpush3.msra.mxu1 %v4470_v23 }
 0xca3   : > { %v5429_v39 = vpop.xlane.xlu0 %5428 }
 0xca4   : > { %v5431_v29 = vsub.f32 %v5423_v15, %v5429_v39  ;;  %v5673_v15 = vld [vmem:[%s22157_s21 + $0x8] sm:$0xff] }
 0xca5   : > { %15611 = vmatprep.subr.mxu0 %v5673_v15 }
 0xca6   : > { %v5434_v30 = vmul.f32 1.442695, %v5431_v29  ;;  %15612 = vmatpush3.msra.mxu0 %v5673_v15 }
 0xca7   : > { %v5438_v31 = vpop.xlane.xlu0 %5437  ;;  %15613 = vmatprep.subr.mxu0 %v5672_v16 }
 0xca8   : > { %17014 = vpow2.f32 %v5434_v30  ;;  %15614 = vmatpush3.msra.mxu0 %v5672_v16  ;;  %v14904_v30 = vld [vmem:[#allocation83] ss:$0 sm:$0xff] }
 0xca9   : > { %17016 = vrcp.f32 %v5438_v31 }
 0xcab   : > { %v5449_v33 = vpop.permute.xlu0 %5448 }
 0xcac   : > { %15595 = vmatprep.subr.mxu1 %v5449_v33 }
 0xcb5   : > { %v17015_v34 = vpop.eup %17014 }
 0xcb6   : > { %v5439_v20 = vsel %vm4570_vm2, %v17015_v34, 0.0  ;;  %v17017_v36 = vpop.eup %17016 }
 0xcb7   : > { %5440 = vadd.xlane.f32.xlu1 %v5439_v20  ;;  %v5444_v42 = vmul.f32 %v17017_v36, %v17009_v17  ;;  %v5773_v17 = vld [vmem:[%s22158_s2 + $0x38] sm:$0xff] }
 0xcc8   : > { %5446 = vrot.lane.b32.xlu1 %v20750_v41, %s21937_s1 }
 0xd40   : > { %v15582_v37 = vpop.f32.mrf.mxu1  ;;  %v5441_v38 = vpop.xlane.xlu1 %5440 }
 0xd41   : > { %17018 = vrcp.f32 %v5441_v38  ;;  %v5768_v38 = vld [vmem:[%s22158_s2 + $0x10] sm:$0xff] }
 0xd42   : > { %v5237_v40 = vpop.f32.mrf.mxu1 }
 0xd43   : > { %15585 = vmatprep.mubr.msk.f32.mxu1 %vm4472_vm1, %v5237_v40  ;;  %v5767_v40 = vld [vmem:[%s22158_s2 + $0x8] sm:$0xff] }
 0xd44   : > { %15586 = vmatmul.mubr.msk.f32.vlgmr.msra.gmra.mxu1 %vm4472_vm1, %v15582_v37  ;;  %v5447_v43 = vpop.permute.xlu1 %5446  ;;  %v5769_v37 = vld [vmem:[%s22158_s2 + $0x18] sm:$0xff] }
 0xd45   : > { %15596 = vmatpush3.msra.mxu1 %v5449_v33  ;;  %15599 = vmatprep.mubr.msk.f32.mxu1 %vm4570_vm2, %v5444_v42  ;;  %v5766_v42 = vld [vmem:[%s22158_s2] sm:$0xff]  ;;  %s22172_s2 = smov 112  }
 0xd46   : > { %15597 = vmatprep.subr.mxu1 %v5447_v43 }
 0xd47   : > { %15598 = vmatpush3.msra.mxu1 %v5447_v43  ;;  %v14906_v43 = vld [vmem:[#allocation91] ss:$0 sm:$0xff] }
 0xd48   : > { %15602 = vmatprep.subr.mxu1 %v4471_v47 }
 0xd4e   : > { %v17019_v41 = vpop.eup %17018 }
 0xd4f   : > { %v5445_v44 = vmul.f32 %v17019_v41, %v17015_v34 }
 0xd51   : > { %15600 = vmatmul.mubr.msk.f32.vlgmr.msra.gmra.mxu1 %vm4570_vm2, %v5445_v44 }
 0xd52   : > { %15603 = vmatpush3.msra.mxu1 %v4471_v47 }
 0xd53   : > { %15618 = vmatprep.subr.mxu1 %v5773_v17 }
 0xe04   : > { %v15587_v49 = vpop.f32.mrf.mxu1 }
 0xe05   : > { %v5328_v51 = vadd.f32 %v15587_v49, %v5039_v48 }
 0xe06   : > { %v5318_v52 = vpop.f32.mrf.mxu1 }
 0xe07   : > { %v5327_v53 = vadd.f32 %v5318_v52, %v5034_v50 }
 0xe11   : > { %v15601_v54 = vpop.f32.mrf.mxu1 }
 0xe13   : > { %v5524_v55 = vpop.f32.mrf.mxu1 }
 0xe14   : > { %15604 = vmatprep.mubr.msk.f32.mxu1 %vm4472_vm1, %v5524_v55 }
 0xe15   : > { %15605 = vmatmul.mubr.msk.f32.vlgmr.msra.gmra.mxu1 %vm4472_vm1, %v15601_v54 }
 0xe16   : > { %15619 = vmatpush3.msra.mxu1 %v5773_v17 }
 0xe17   : > { %15620 = vmatprep.subr.mxu1 %v5772_v18 }
 0xe18   : > { %15621 = vmatpush3.msra.mxu1 %v5772_v18 }
 0xe19   : > { %15622 = vmatprep.subr.mxu1 %v5771_v19 }
 0xe1a   : > { %15623 = vmatpush3.msra.mxu1 %v5771_v19 }
 0xe1b   : > { %15624 = vmatprep.subr.mxu1 %v5770_v21 }
 0xe1c   : > { %15625 = vmatpush3.msra.mxu1 %v5770_v21 }
 0xe1d   : > { %15626 = vmatprep.subr.mxu1 %v5769_v37 }
 0xe1e   : > { %15627 = vmatpush3.msra.mxu1 %v5769_v37 }
 0xe1f   : > { %15628 = vmatprep.subr.mxu1 %v5768_v38 }
 0xe20   : > { %15629 = vmatpush3.msra.mxu1 %v5768_v38 }
 0xe21   : > { %15630 = vmatprep.subr.mxu1 %v5767_v40 }
 0xe22   : > { %15631 = vmatpush3.msra.mxu1 %v5767_v40 }
 0xe23   : > { %15632 = vmatprep.subr.mxu1 %v5766_v42 }
 0xe24   : > { %15633 = vmatpush3.msra.mxu1 %v5766_v42  ;;  %v14914_v42 = vld [vmem:[#allocation100] ss:$0 sm:$0xff] }
 0xed5   : > { %v15606_v56 = vpop.f32.mrf.mxu1 }
 0xed6   : > { %v5615_v58 = vadd.f32 %v15606_v56, %v5328_v51  ;;  %v14909_v51 = vld [vmem:[#allocation92] ss:$0 sm:$0xff] }
 0xed7   : > { %v5605_v59 = vpop.f32.mrf.mxu1 }
 0xed8   : > { %v5624_v60 = vadd.f32 %v14903_v57, %v5615_v58  ;;  %v5614_v61 = vadd.f32 %v5605_v59, %v5327_v53 }
 0xeda   : > { %v5623_v62 = vadd.f32 %v14903_v57, %v5614_v61  ;;  %v5626_v45 = vadd.f32 %v5624_v60, %v20701_v12 }
 0xedc   : > { %v5630_v46 = vsel %vm4208_vm0, %v5626_v45, 0.0  ;;  %v5625_v63 = vadd.f32 %v5623_v62, %v20698_v11 }
 0xedd   : > { %5631 = vadd.xlane.f32.xlu0 %v5630_v46 }
 0xede   : > { %v5627_v0 = vsel %vm4208_vm0, %v5625_v63, 0.0 }
 0xedf   : > { %5628 = vadd.xlane.f32.xlu1 %v5627_v0 }
 0xf66   : > { %v5632_v1 = vpop.xlane.xlu0 %5631 }
 0xf67   : > { %v5635_v2 = vmul.f32 0.03125, %v5632_v1 }
 0xf68   : > { %v5629_v3 = vpop.xlane.xlu1 %5628 }
 0xf69   : > { %v5637_v4 = vsub.f32 %v5626_v45, %v5635_v2  ;;  %v5634_v5 = vmul.f32 0.03125, %v5629_v3 }
 0xf6b   : > { %v5636_v6 = vsub.f32 %v5625_v63, %v5634_v5  ;;  %v5639_v7 = vmul.f32 %v5637_v4, %v5637_v4  ;;  %v5914_v5 = vld [vmem:[#allocation109 + $0x18] sm:$0xff] }
 0xf6c   : > { %15637 = vmatprep.subr.mxu0 %v5914_v5 }
 0xf6d   : > { %v5643_v12 = vsel %vm4208_vm0, %v5639_v7, 0.0  ;;  %v5638_v10 = vmul.f32 %v5636_v6, %v5636_v6  ;;  %v5913_v7 = vld [vmem:[#allocation109 + $0x10] sm:$0xff] }
 0xf6e   : > { %5644 = vadd.xlane.f32.xlu1 %v5643_v12  ;;  %v6090_v12 = vld [vmem:[#allocation110 + $0x8] sm:$0xff] }
 0xf6f   : > { %v5640_v11 = vsel %vm4208_vm0, %v5638_v10, 0.0  ;;  %v5912_v10 = vld [vmem:[#allocation109 + $0x8] sm:$0xff] }
 0xf70   : > { %5641 = vadd.xlane.f32.xlu0 %v5640_v11  ;;  %v6089_v11 = vld [vmem:[#allocation110] sm:$0xff] }
 0xff7   : > { %v5645_v22 = vpop.xlane.xlu1 %5644 }
 0xff8   : > { %v5647_v23 = vmul.f32 0.03125, %v5645_v22 }
 0xff9   : > { %v5642_v24 = vpop.xlane.xlu0 %5641 }
 0xffa   : > { %v5649_v25 = vadd.f32 1e-05, %v5647_v23  ;;  %v5646_v27 = vmul.f32 0.03125, %v5642_v24  ;;  %v14912_v23 = vld [vmem:[#allocation95] ss:$0 sm:$0xff] }
 0xffc   : > { %17020 = vrsqrt.f32 %v5649_v25  ;;  %v5648_v28 = vadd.f32 1e-05, %v5646_v27 }
 0xffe   : > { %17022 = vrsqrt.f32 %v5648_v28 }
0x1009   : > { %v17021_v39 = vpop.eup %17020 }
0x100a   : > { %v5653_v29 = vmul.f32 %v17021_v39, %v5637_v4  ;;  %v6092_v4 = vld [vmem:[#allocation110 + $0x18] sm:$0xff]  ;;  %v14913_v39 = vld [vmem:[#allocation94] ss:$0 sm:$0xff] }
0x100b   : > { %v17023_v31 = vpop.eup %17022  ;;  %15659 = vmatprep.subr.mxu1 %v6092_v4 }
0x100c   : > { %v5652_v33 = vmul.f32 %v17023_v31, %v5636_v6  ;;  %v5662_v34 = vmul.f32 %v14904_v30, %v5653_v29  ;;  %v6091_v6 = vld [vmem:[#allocation110 + $0x10] sm:$0xff] }
0x100e   : > { %v5661_v20 = vmul.f32 %v14904_v30, %v5652_v33  ;;  %v5671_v36 = vadd.f32 %v14905_v26, %v5662_v34 }
0x1010   : > { %v5670_v35 = vadd.f32 %v14905_v26, %v5661_v20  ;;  %v6005_v20 = vld [vmem:[#allocation106 + $0x10] sm:$0xff]  ;;  %v6004_v26 = vld [vmem:[#allocation106 + $0x8] sm:$0xff] }
0x1012   : > { %15615 = vmatprep.mubr.msk.f32.mxu0 %vm4208_vm0, %v5670_v35 }
0x1013   : > { %15616 = vmatmul.mubr.msk.f32.vlgmr.msra.gmra.mxu0 %vm4208_vm0, %v5671_v36 }
0x1014   : > { %15638 = vmatpush3.msra.mxu0 %v5914_v5 }
0x1015   : > { %15639 = vmatprep.subr.mxu0 %v5913_v7 }
0x1016   : > { %15640 = vmatpush3.msra.mxu0 %v5913_v7 }
0x1017   : > { %15641 = vmatprep.subr.mxu0 %v5912_v10 }
0x1018   : > { %15642 = vmatpush3.msra.mxu0 %v5912_v10 }
0x1019   : > { %15643 = vmatprep.subr.mxu0 %v5911_v13 }
0x101a   : > { %15644 = vmatpush3.msra.mxu0 %v5911_v13 }
0x101b   : > { %15648 = vmatprep.subr.mxu0 %v6006_v14 }
0x10d3   : > { %v15617_v41 = vpop.f32.mrf.mxu0 }
0x10d4   : > { %v5761_v44 = vadd.f32 %v15617_v41, %v14906_v43 }
0x10d5   : > { %v5755_v47 = vpop.f32.mrf.mxu0 }
0x10d6   : > { %v5756_v48 = vadd.f32 %v14906_v43, %v5755_v47  ;;  %v5765_v50 = vmax.f32 %v5761_v44, 0.0  ;;  %v14917_v44 = vld [vmem:[#allocation97] ss:$0 sm:$0xff] }
0x10d8   : > { %v5764_v49 = vmax.f32 %v5756_v48, 0.0 }
0x10da   : > { %15634 = vmatprep.mubr.msk.f32.mxu1 %vm5781_vm3, %v5764_v49 }
0x10db   : > { %15635 = vmatmul.mubr.msk.f32.vlgmr.msra.gmra.mxu1 %vm5781_vm3, %v5765_v50 }
0x10dc   : > { %15660 = vmatpush3.msra.mxu1 %v6092_v4 }
0x10dd   : > { %15661 = vmatprep.subr.mxu1 %v6091_v6 }
0x10de   : > { %15662 = vmatpush3.msra.mxu1 %v6091_v6 }
0x10df   : > { %15663 = vmatprep.subr.mxu1 %v6090_v12 }
0x10e0   : > { %15664 = vmatpush3.msra.mxu1 %v6090_v12 }
0x10e1   : > { %15665 = vmatprep.subr.mxu1 %v6089_v11 }
0x10e2   : > { %15666 = vmatpush3.msra.mxu1 %v6089_v11 }
0x119b   : > { %v15636_v52 = vpop.f32.mrf.mxu1 }
0x119c   : > { %v5860_v53 = vadd.f32 %v15636_v52, %v14909_v51 }
0x119d   : > { %v5854_v54 = vpop.f32.mrf.mxu1 }
0x119e   : > { %v5855_v55 = vadd.f32 %v14909_v51, %v5854_v54  ;;  %v5864_v56 = vadd.f32 %v5860_v53, %v5671_v36 }
0x11a0   : > { %v5868_v57 = vsel %vm4208_vm0, %v5864_v56, 0.0  ;;  %v5863_v58 = vadd.f32 %v5855_v55, %v5670_v35 }
0x11a1   : > { %5869 = vadd.xlane.f32.xlu1 %v5868_v57 }
0x11a2   : > { %v5865_v59 = vsel %vm4208_vm0, %v5863_v58, 0.0 }
0x11a3   : > { %5866 = vadd.xlane.f32.xlu0 %v5865_v59 }
0x122a   : > { %v5870_v60 = vpop.xlane.xlu1 %5869 }
0x122b   : > { %v5872_v61 = vmul.f32 0.03125, %v5870_v60 }
0x122c   : > { %v5867_v62 = vpop.xlane.xlu0 %5866 }
0x122d   : > { %v5874_v45 = vsub.f32 %v5864_v56, %v5872_v61  ;;  %v5871_v46 = vmul.f32 0.03125, %v5867_v62 }
0x122f   : > { %v5873_v63 = vsub.f32 %v5863_v58, %v5871_v46  ;;  %v5876_v0 = vmul.f32 %v5874_v45, %v5874_v45 }
0x1231   : > { %v5880_v1 = vsel %vm4208_vm0, %v5876_v0, 0.0  ;;  %v5875_v2 = vmul.f32 %v5873_v63, %v5873_v63 }
0x1232   : > { %5881 = vadd.xlane.f32.xlu1 %v5880_v1 }
0x1233   : > { %v5877_v3 = vsel %vm4208_vm0, %v5875_v2, 0.0 }
0x1234   : > { %5878 = vadd.xlane.f32.xlu0 %v5877_v3 }
0x12bb   : > { %v5882_v15 = vpop.xlane.xlu1 %5881 }
0x12bc   : > { %v5884_v16 = vmul.f32 0.03125, %v5882_v15 }
0x12bd   : > { %v5879_v17 = vpop.xlane.xlu0 %5878 }
0x12be   : > { %v5886_v18 = vadd.f32 1e-05, %v5884_v16  ;;  %v5883_v19 = vmul.f32 0.03125, %v5879_v17  ;;  %v6181_v16 = vld [vmem:[#allocation107] sm:$0xff] }
0x12c0   : > { %17024 = vrsqrt.f32 %v5886_v18  ;;  %v5885_v21 = vadd.f32 1e-05, %v5883_v19 }
0x12c2   : > { %17026 = vrsqrt.f32 %v5885_v21 }
0x12cd   : > { %v17025_v22 = vpop.eup %17024 }
0x12ce   : > { %v5890_v24 = vmul.f32 %v17025_v22, %v5874_v45 }
0x12cf   : > { %v17027_v25 = vpop.eup %17026 }
0x12d0   : > { %v5889_v27 = vmul.f32 %v17027_v25, %v5873_v63  ;;  %v5899_v28 = vmul.f32 %v14912_v23, %v5890_v24 }
0x12d2   : > { %v5898_v29 = vmul.f32 %v14912_v23, %v5889_v27  ;;  %v5908_v30 = vadd.f32 %v14913_v39, %v5899_v28 }
0x12d4   : > { %v5907_v31 = vadd.f32 %v14913_v39, %v5898_v29  ;;  %v20879_v34 = vadd.f32 %v5908_v30, %v20695_v9  ;;  %v14920_v9 = vld [vmem:[#allocation101] ss:$0 sm:$0xff] }
0x12d6   : > { %15667 = vmatprep.mubr.msk.f32.mxu1 %vm4208_vm0, %v5907_v31  ;;  %v20876_v33 = vadd.f32 %v5907_v31, %v20692_v8  ;;  %v6003_v8 = vld [vmem:[#allocation106] sm:$0xff] }
0x12d7   : > { %15668 = vmatmul.mubr.msk.f32.vlgmr.msra.gmra.mxu1 %vm4208_vm0, %v5908_v30 }
0x12d8   : > { %15645 = vmatprep.mubr.msk.f32.mxu0 %vm4208_vm0, %v20876_v33 }
0x12d9   : > { %15646 = vmatmul.mubr.msk.f32.vlgmr.msra.gmra.mxu0 %vm4208_vm0, %v20879_v34 }
0x12da   : > { %15649 = vmatpush3.msra.mxu0 %v6006_v14  ;;  %15656 = vmatprep.mubr.msk.f32.mxu0 %vm4208_vm0, %v20876_v33 }
0x12db   : > { %15650 = vmatprep.subr.mxu0 %v6005_v20 }
0x12dc   : > { %15651 = vmatpush3.msra.mxu0 %v6005_v20 }
0x12dd   : > { %15652 = vmatprep.subr.mxu0 %v6004_v26 }
0x12de   : > { %15653 = vmatpush3.msra.mxu0 %v6004_v26 }
0x12df   : > { %15654 = vmatprep.subr.mxu0 %v6003_v8 }
0x12e0   : > { %15655 = vmatpush3.msra.mxu0 %v6003_v8 }
0x12e1   : > { %15657 = vmatmul.mubr.msk.f32.vlgmr.msra.gmra.mxu0 %vm4208_vm0, %v20879_v34 }
0x1397   : > { %v15669_v35 = vpop.f32.mrf.mxu1 }
0x1398   : > { %v20890_v36 = vadd.f32 %v15669_v35, %v14920_v9 }
0x1399   : > { %v15647_v37 = vpop.f32.mrf.mxu0  ;;  %v6172_v38 = vpop.f32.mrf.mxu1 }
0x139a   : > { %v20892_v40 = vadd.f32 %v14920_v9, %v6172_v38  ;;  %15677 = vmatprep.subr.mxu1 %v20890_v36  ;;  %v20914_v51 = vadd.f32 %v15647_v37, %v14914_v42 }
0x139b   : > { %v5994_v43 = vpop.f32.mrf.mxu0  ;;  %15678 = vmatpush3.msra.mxu1 %v20890_v36 }
0x139c   : > { %v20896_v41 = vadd.f32 %v14914_v42, %v5994_v43  ;;  %15679 = vmatprep.subr.mxu1 %v20892_v40 }
0x139d   : > { %15680 = vmatpush3.msra.mxu1 %v20892_v40 }
0x139e   : > { %15674 = vmatprep.mubr.msk.f32.mxu0 %vm4472_vm1, %v20896_v41 }
0x13a1   : > { %v15658_v47 = vpop.f32.mrf.mxu0 }
0x13a2   : > { %v20902_v48 = vadd.f32 %v15658_v47, %v14917_v44 }
0x13a3   : > { %v6080_v49 = vpop.f32.mrf.mxu0 }
0x13a4   : > { %v20904_v50 = vadd.f32 %v14917_v44, %v6080_v49  ;;  %15670 = vmatprep.subr.msk.mxu0 %vm4472_vm1, %v20902_v48  ;;  %v6182_v44 = vld [vmem:[#allocation107 + $0x8] sm:$0xff] }
0x13a5   : > { %15671 = vmatpush3.xpose.msk.msra.mxu0 %vm4472_vm1, %v20902_v48 }
0x13a6   : > { %15672 = vmatprep.subr.msk.mxu0 %vm4472_vm1, %v20904_v50 }
0x13a9   : > { %15673 = vmatpush3.xpose.msk.msra.mxu0 %vm4472_vm1, %v20904_v50 }
0x13ac   : > { %15675 = vmatmul.mubr.msk.f32.vlgmr.msra.gmra.mxu0 %vm4472_vm1, %v20914_v51 }
0x146c   : > { %v15676_v52 = vpop.f32.mrf.mxu0 }
0x146d   : > { %v6273_v53 = vmul.f32 0.35355338, %v15676_v52 }
0x146e   : > { %v6263_v54 = vpop.f32.mrf.mxu0 }
0x146f   : > { %v6272_v55 = vmul.f32 0.35355338, %v6263_v54  ;;  %v6275_v56 = vadd.f32 %v20742_v32, %v6273_v53 }
0x1471   : > { %v6279_v57 = vsel %vm4570_vm2, %v6275_v56, -inf  ;;  %v6274_v58 = vadd.f32 %v20742_v32, %v6272_v55 }
0x1472   : > { %6280 = vmax.xlane.f32.xlu1 %v6279_v57 }
0x1473   : > { %v6276_v59 = vsel %vm4570_vm2, %v6274_v58, -inf }
0x1474   : > { %6277 = vmax.xlane.f32.xlu0 %v6276_v59 }
0x14fb   : > { %v6281_v60 = vpop.xlane.xlu1 %6280 }
0x14fc   : > { %v6283_v61 = vsub.f32 %v6275_v56, %v6281_v60 }
0x14fd   : > { %v6278_v62 = vpop.xlane.xlu0 %6277 }
0x14fe   : > { %v6286_v45 = vmul.f32 1.442695, %v6283_v61  ;;  %v6282_v46 = vsub.f32 %v6274_v58, %v6278_v62 }
0x1500   : > { %17028 = vpow2.f32 %v6286_v45  ;;  %v6284_v63 = vmul.f32 1.442695, %v6282_v46 }
0x1502   : > { %17030 = vpow2.f32 %v6284_v63 }
0x150d   : > { %v17029_v0 = vpop.eup %17028 }
0x150e   : > { %v6291_v1 = vsel %vm4570_vm2, %v17029_v0, 0.0 }
0x150f   : > { %v17031_v2 = vpop.eup %17030  ;;  %6292 = vadd.xlane.f32.xlu1 %v6291_v1 }
0x1510   : > { %v6288_v3 = vsel %vm4570_vm2, %v17031_v2, 0.0 }
0x1511   : > { %6289 = vadd.xlane.f32.xlu0 %v6288_v3 }
0x1520   : > { %6383 = vrot.lane.b32.xlu1 %v20904_v50, %s21941_s18 }
0x1524   : > { %6379 = vrot.lane.b32.xlu1 %v20896_v41, %s21941_s18 }
0x1527   : > { %6385 = vrot.lane.b32.xlu0 %v20902_v48, %s21941_s18 }
0x1528   : > { %6381 = vrot.lane.b32.xlu1 %v20914_v51, %s21941_s18 }
0x1598   : > { %v6293_v4 = vpop.xlane.xlu1 %6292 }
0x1599   : > { %17032 = vrcp.f32 %v6293_v4 }
0x159a   : > { %v6290_v5 = vpop.xlane.xlu0 %6289 }
0x159b   : > { %17034 = vrcp.f32 %v6290_v5 }
0x159c   : > { %v6384_v7 = vpop.permute.xlu1 %6383 }
0x159e   : > { %v6386_v6 = vpop.permute.xlu0 %6385 }
0x159f   : > { %15684 = vmatprep.subr.msk.mxu1 %vm4472_vm1, %v6386_v6 }
0x15a0   : > { %v6380_v14 = vpop.permute.xlu1 %6379 }
0x15a4   : > { %v6382_v15 = vpop.permute.xlu1 %6381 }
0x15a6   : > { %v17033_v12 = vpop.eup %17032 }
0x15a7   : > { %v6297_v13 = vmul.f32 %v17033_v12, %v17029_v0  ;;  %v17164_v0 = vld [vmem:[%s20739_s26] ss:$0 sm:$0xff] }
0x15a8   : > { %v17035_v10 = vpop.eup %17034 }
0x15a9   : > { %v6296_v11 = vmul.f32 %v17035_v10, %v17031_v2 }
0x15ab   : > { %15681 = vmatprep.mubr.msk.f32.mxu1 %vm4570_vm2, %v6296_v11 }
0x15ac   : > { %15682 = vmatmul.mubr.msk.f32.vlgmr.msra.gmra.mxu1 %vm4570_vm2, %v6297_v13 }
0x15ad   : > { %15685 = vmatpush3.xpose.msk.msra.mxu1 %vm4472_vm1, %v6386_v6  ;;  %15688 = vmatprep.mubr.msk.f32.mxu1 %vm4472_vm1, %v6380_v14 }
0x15ae   : > { %15686 = vmatprep.subr.msk.mxu1 %vm4472_vm1, %v6384_v7 }
0x15b1   : > { %15687 = vmatpush3.xpose.msk.msra.mxu1 %vm4472_vm1, %v6384_v7 }
0x15b2   : > { %15703 = vmatprep.subr.mxu1 %v6181_v16 }
0x15b4   : > { %15689 = vmatmul.mubr.msk.f32.vlgmr.msra.gmra.mxu1 %vm4472_vm1, %v6382_v15 }
0x15b5   : > { %15704 = vmatpush3.msra.mxu1 %v6181_v16 }
0x166c   : > { %v15683_v17 = vpop.f32.mrf.mxu1 }
0x166e   : > { %v6370_v18 = vpop.f32.mrf.mxu1 }
0x166f   : > { %15705 = vmatprep.mubr.msk.f32.mxu1 %vm4472_vm1, %v6370_v18 }
0x1670   : > { %15706 = vmatmul.mubr.msk.f32.vlgmr.msra.gmra.mxu1 %vm4472_vm1, %v15683_v17 }
0x1674   : > { %v15690_v19 = vpop.f32.mrf.mxu1 }
0x1675   : > { %v6471_v21 = vmul.f32 0.35355338, %v15690_v19 }
0x1676   : > { %v6461_v22 = vpop.f32.mrf.mxu1 }
0x1677   : > { %v6470_v23 = vmul.f32 0.35355338, %v6461_v22  ;;  %v6473_v24 = vadd.f32 %v20742_v32, %v6471_v21 }
0x1679   : > { %v6477_v25 = vsel %vm4570_vm2, %v6473_v24, -inf  ;;  %v6472_v27 = vadd.f32 %v20742_v32, %v6470_v23 }
0x167a   : > { %6478 = vmax.xlane.f32.xlu1 %v6477_v25 }
0x167b   : > { %v6474_v28 = vsel %vm4570_vm2, %v6472_v27, -inf }
0x167c   : > { %6475 = vmax.xlane.f32.xlu0 %v6474_v28 }
0x168b   : > { %6498 = vrot.lane.b32.xlu1 %v20892_v40, %s21941_s18 }
0x168f   : > { %6753 = vrot.lane.b32.xlu1 %v20902_v48, %s21939_s22 }
0x1693   : > { %6751 = vrot.lane.b32.xlu1 %v20904_v50, %s21939_s22 }
0x1697   : > { %6749 = vrot.lane.b32.xlu1 %v20914_v51, %s21939_s22 }
0x169b   : > { %7038 = vrot.lane.b32.xlu1 %v20904_v50, %s21937_s1 }
0x169f   : > { %7036 = vrot.lane.b32.xlu1 %v20914_v51, %s21937_s1 }
0x1703   : > { %v6479_v32 = vpop.xlane.xlu1 %6478 }
0x1704   : > { %v6481_v39 = vsub.f32 %v6473_v24, %v6479_v32 }
0x1705   : > { %v6476_v29 = vpop.xlane.xlu0 %6475 }
0x1706   : > { %v6484_v30 = vmul.f32 1.442695, %v6481_v39  ;;  %v6480_v31 = vsub.f32 %v6472_v27, %v6476_v29 }
0x1707   : > { %v6499_v43 = vpop.permute.xlu1 %6498 }
0x1708   : > { %17036 = vpow2.f32 %v6484_v30  ;;  %v6482_v20 = vmul.f32 1.442695, %v6480_v31 }
0x170a   : > { %17038 = vpow2.f32 %v6482_v20 }
0x1715   : > { %v17037_v26 = vpop.eup %17036 }
0x1716   : > { %v6489_v8 = vsel %vm4570_vm2, %v17037_v26, 0.0 }
0x1717   : > { %v17039_v9 = vpop.eup %17038  ;;  %6490 = vadd.xlane.f32.xlu0 %v6489_v8  ;;  %v6183_v8 = vld [vmem:[#allocation107 + $0x10] sm:$0xff] }
0x1718   : > { %v6486_v35 = vsel %vm4570_vm2, %v17039_v9, 0.0 }
0x171b   : > { %6487 = vadd.xlane.f32.xlu0 %v6486_v35 }
0x1731   : > { %6500 = vrot.lane.b32.xlu0 %v20890_v36, %s21941_s18  ;;  %s22166_s18 = sld [smem:[#allocation196_spill]] }
0x1735   : > { %6747 = vrot.lane.b32.xlu0 %v20896_v41, %s21939_s22 }
0x1739   : > { %7040 = vrot.lane.b32.xlu0 %v20902_v48, %s21937_s1 }
0x173d   : > { %7034 = vrot.lane.b32.xlu0 %v20896_v41, %s21937_s1  ;;  %v6754_v41 = vpop.permute.xlu1 %6753 }
0x1741   : > { %v6752_v53 = vpop.permute.xlu1 %6751 }
0x1745   : > { %v6750_v56 = vpop.permute.xlu1 %6749 }
0x1749   : > { %v7039_v58 = vpop.permute.xlu1 %7038 }
0x174d   : > { %v7037_v59 = vpop.permute.xlu1 %7036 }
0x17a0   : > { %v6491_v37 = vpop.xlane.xlu0 %6490 }
0x17a1   : > { %17040 = vrcp.f32 %v6491_v37 }
0x17a4   : > { %v6488_v38 = vpop.xlane.xlu0 %6487 }
0x17a5   : > { %17042 = vrcp.f32 %v6488_v38 }
0x17a8   : > { %v6501_v42 = vpop.permute.xlu0 %6500 }
0x17a9   : > { %15691 = vmatprep.subr.mxu0 %v6501_v42 }
0x17aa   : > { %15692 = vmatpush3.msra.mxu0 %v6501_v42 }
0x17ab   : > { %15693 = vmatprep.subr.mxu0 %v6499_v43 }
0x17ac   : > { %15694 = vmatpush3.msra.mxu0 %v6499_v43  ;;  %v6748_v48 = vpop.permute.xlu0 %6747 }
0x17ad   : > { %15698 = vmatprep.subr.mxu0 %v6182_v44 }
0x17ae   : > { %v17041_v47 = vpop.eup %17040 }
0x17af   : > { %v6495_v51 = vmul.f32 %v17041_v47, %v17037_v26 }
0x17b0   : > { %v7041_v55 = vpop.permute.xlu0 %7040 }
0x17b2   : > { %v17043_v49 = vpop.eup %17042 }
0x17b3   : > { %v6494_v50 = vmul.f32 %v17043_v49, %v17039_v9 }
0x17b4   : > { %v7035_v57 = vpop.permute.xlu0 %7034 }
0x17b5   : > { %15695 = vmatprep.mubr.msk.f32.mxu0 %vm4570_vm2, %v6494_v50 }
0x17b6   : > { %15696 = vmatmul.mubr.msk.f32.vlgmr.msra.gmra.mxu0 %vm4570_vm2, %v6495_v51  ;;  %v15707_v51 = vpop.f32.mrf.mxu1 }
0x17b7   : > { %15699 = vmatpush3.msra.mxu0 %v6182_v44 }
0x17b8   : > { %15708 = vmatprep.subr.msk.mxu0 %vm4472_vm1, %v6754_v41 }
0x1876   : > { %v15697_v52 = vpop.f32.mrf.mxu0 }
0x1878   : > { %v6576_v54 = vpop.f32.mrf.mxu0 }
0x1879   : > { %15700 = vmatprep.mubr.msk.f32.mxu0 %vm4472_vm1, %v6576_v54 }
0x187a   : > { %15701 = vmatmul.mubr.msk.f32.vlgmr.msra.gmra.mxu0 %vm4472_vm1, %v15697_v52 }
0x187b   : > { %15709 = vmatpush3.xpose.msk.msra.mxu0 %vm4472_vm1, %v6754_v41  ;;  %15712 = vmatprep.mubr.msk.f32.mxu0 %vm4472_vm1, %v6748_v48  ;;  %v6738_v41 = vpop.f32.mrf.mxu1 }
0x187c   : > { %15710 = vmatprep.subr.msk.mxu0 %vm4472_vm1, %v6752_v53 }
0x187f   : > { %15711 = vmatpush3.xpose.msk.msra.mxu0 %vm4472_vm1, %v6752_v53 }
0x1880   : > { %15727 = vmatprep.subr.msk.mxu0 %vm4472_vm1, %v7041_v55 }
0x1882   : > { %15713 = vmatmul.mubr.msk.f32.vlgmr.msra.gmra.mxu0 %vm4472_vm1, %v6750_v56 }
0x1883   : > { %15728 = vmatpush3.xpose.msk.msra.mxu0 %vm4472_vm1, %v7041_v55  ;;  %15731 = vmatprep.mubr.msk.f32.mxu0 %vm4472_vm1, %v7035_v57 }
0x1884   : > { %15729 = vmatprep.subr.msk.mxu0 %vm4472_vm1, %v7039_v58 }
0x1887   : > { %15730 = vmatpush3.xpose.msk.msra.mxu0 %vm4472_vm1, %v7039_v58  ;;  %v6184_v58 = vld [vmem:[#allocation107 + $0x18] sm:$0xff] }
0x188a   : > { %15732 = vmatmul.mubr.msk.f32.vlgmr.msra.gmra.mxu0 %vm4472_vm1, %v7037_v59 }
0x193a   : > { %v20984_v60 = vpop.f32.mrf.mxu0 }
0x193b   : > { %v6744_v59 = vadd.f32 %v15707_v51, %v20984_v60 }
0x193c   : > { %v20986_v61 = vpop.f32.mrf.mxu0 }
0x1942   : > { %v15714_v62 = vpop.f32.mrf.mxu0 }
0x1943   : > { %v6839_v45 = vmul.f32 0.35355338, %v15714_v62 }
0x1944   : > { %v6829_v46 = vpop.f32.mrf.mxu0 }
0x1945   : > { %v6838_v63 = vmul.f32 0.35355338, %v6829_v46  ;;  %v6841_v1 = vadd.f32 %v17164_v0, %v6839_v45  ;;  %v6739_v45 = vadd.f32 %v6738_v41, %v20986_v61  ;;  %v7663_v41 = vld [vmem:[%s22162_s10 + $0x18] sm:$0xff] }
0x1947   : > { %v6845_v2 = vsel %vm4570_vm2, %v6841_v1, -inf  ;;  %v6840_v3 = vadd.f32 %v17164_v0, %v6838_v63 }
0x1948   : > { %6846 = vmax.xlane.f32.xlu1 %v6845_v2 }
0x1949   : > { %v6842_v4 = vsel %vm4570_vm2, %v6840_v3, -inf }
0x194a   : > { %6843 = vmax.xlane.f32.xlu0 %v6842_v4  ;;  %v15733_v5 = vpop.f32.mrf.mxu0  ;;  %v14955_v4 = vld [vmem:[#allocation98] ss:$0 sm:$0xff] }
0x194b   : > { %v7126_v28 = vmul.f32 0.35355338, %v15733_v5 }
0x194c   : > { %v7116_v6 = vpop.f32.mrf.mxu0 }
0x194d   : > { %v7125_v7 = vmul.f32 0.35355338, %v7116_v6  ;;  %v7128_v32 = vadd.f32 %v17164_v0, %v7126_v28  ;;  %v19485_v28 = vmov 0.0  }
0x194f   : > { %v7127_v12 = vadd.f32 %v17164_v0, %v7125_v7  ;;  %v7132_v39 = vsel %vm4570_vm2, %v7128_v32, -inf }
0x1951   : > { %v7129_v10 = vsel %vm4570_vm2, %v7127_v12, -inf }
0x1959   : > { %6864 = vrot.lane.b32.xlu1 %v20892_v40, %s21939_s22 }
0x197d   : > { %7130 = vmax.xlane.f32.xlu1 %v7129_v10 }
0x19d1   : > { %v6847_v11 = vpop.xlane.xlu1 %6846 }
0x19d2   : > { %v6849_v13 = vsub.f32 %v6841_v1, %v6847_v11 }
0x19d3   : > { %v6844_v14 = vpop.xlane.xlu0 %6843 }
0x19d4   : > { %v6852_v15 = vmul.f32 1.442695, %v6849_v13  ;;  %v6848_v16 = vsub.f32 %v6840_v3, %v6844_v14 }
0x19d5   : > { %v6865_v23 = vpop.permute.xlu1 %6864 }
0x19d6   : > { %17044 = vpow2.f32 %v6852_v15  ;;  %v6850_v17 = vmul.f32 1.442695, %v6848_v16 }
0x19d8   : > { %17046 = vpow2.f32 %v6850_v17 }
0x19e3   : > { %v17045_v18 = vpop.eup %17044 }
0x19e4   : > { %v6857_v19 = vsel %vm4570_vm2, %v17045_v18, 0.0 }
0x19e5   : > { %v17047_v21 = vpop.eup %17046  ;;  %6858 = vadd.xlane.f32.xlu0 %v6857_v19 }
0x19e6   : > { %v6854_v22 = vsel %vm4570_vm2, %v17047_v21, 0.0 }
0x19e9   : > { %6855 = vadd.xlane.f32.xlu0 %v6854_v22 }
0x19ff   : > { %6866 = vrot.lane.b32.xlu0 %v20890_v36, %s21939_s22 }
0x1a06   : > { %v7131_v24 = vpop.xlane.xlu1 %7130 }
0x1a07   : > { %v7135_v25 = vsub.f32 %v7127_v12, %v7131_v24  ;;  %v7378_v24 = vld [vmem:[%s22160_s23 + $0x10] sm:$0xff] }
0x1a09   : > { %v7137_v27 = vmul.f32 1.442695, %v7135_v25  ;;  %v7377_v25 = vld [vmem:[%s22160_s23 + $0x8] sm:$0xff] }
0x1a0b   : > { %17048 = vpow2.f32 %v7137_v27  ;;  %v7376_v27 = vld [vmem:[%s22160_s23] sm:$0xff] }
0x1a18   : > { %v17049_v29 = vpop.eup %17048 }
0x1a19   : > { %v7141_v30 = vsel %vm4570_vm2, %v17049_v29, 0.0 }
0x1a1e   : > { %7133 = vmax.xlane.f32.xlu0 %v7132_v39  ;;  %v7476_v39 = vld [vmem:[%s22161_s5 + $0x30] sm:$0xff] }
0x1a22   : > { %7142 = vadd.xlane.f32.xlu0 %v7141_v30  ;;  %v7474_v30 = vld [vmem:[%s22161_s5 + $0x20] sm:$0xff] }
0x1a38   : > { %7153 = vrot.lane.b32.xlu0 %v20890_v36, %s21937_s1 }
0x1a6e   : > { %v6859_v31 = vpop.xlane.xlu0 %6858 }
0x1a6f   : > { %17050 = vrcp.f32 %v6859_v31 }
0x1a72   : > { %v6856_v20 = vpop.xlane.xlu0 %6855 }
0x1a73   : > { %17052 = vrcp.f32 %v6856_v20 }
0x1a76   : > { %v6867_v26 = vpop.permute.xlu0 %6866 }
0x1a77   : > { %15715 = vmatprep.subr.mxu1 %v6867_v26 }
0x1a78   : > { %15716 = vmatpush3.msra.mxu1 %v6867_v26 }
0x1a79   : > { %15717 = vmatprep.subr.mxu1 %v6865_v23 }
0x1a7a   : > { %15718 = vmatpush3.msra.mxu1 %v6865_v23  ;;  %v7379_v23 = vld [vmem:[%s22159_s0 + $0x18] sm:$0xff]  ;;  %s22164_s0 = sld [smem:[#allocation263_spill]] }
0x1a7b   : > { %15722 = vmatprep.subr.mxu1 %v6183_v8  ;;  %15746 = vmatprep.subr.mxu0 %v7379_v23 }
0x1a7c   : > { %v17051_v9 = vpop.eup %17050  ;;  %15747 = vmatpush3.msra.mxu0 %v7379_v23 }
0x1a7d   : > { %v6863_v38 = vmul.f32 %v17051_v9, %v17045_v18  ;;  %15748 = vmatprep.subr.mxu0 %v7378_v24 }
0x1a7e   : > { %15749 = vmatpush3.msra.mxu0 %v7378_v24 }
0x1a7f   : > { %15750 = vmatprep.subr.mxu0 %v7377_v25 }
0x1a80   : > { %v17053_v35 = vpop.eup %17052  ;;  %15751 = vmatpush3.msra.mxu0 %v7377_v25  ;;  %s22165_s22 = smov %s22164_s0 }
0x1a81   : > { %v6862_v37 = vmul.f32 %v17053_v35, %v17047_v21  ;;  %15752 = vmatprep.subr.mxu0 %v7376_v27 }
0x1a82   : > { %15753 = vmatpush3.msra.mxu0 %v7376_v27 }
0x1a83   : > { %15719 = vmatprep.mubr.msk.f32.mxu1 %vm4570_vm2, %v6862_v37  ;;  %15776 = vmatprep.subr.mxu0 %v19485_v28 }
0x1a84   : > { %15720 = vmatmul.mubr.msk.f32.vlgmr.msra.gmra.mxu1 %vm4570_vm2, %v6863_v38 }
0x1a85   : > { %15723 = vmatpush3.msra.mxu1 %v6183_v8 }
0x1aa7   : > { %v7134_v36 = vpop.xlane.xlu0 %7133 }
0x1aa8   : > { %v7136_v42 = vsub.f32 %v7128_v32, %v7134_v36  ;;  %v7477_v32 = vld [vmem:[%s22161_s5 + $0x38] sm:$0xff]  ;;  %v14956_v36 = vld [vmem:[#allocation104] ss:$0 sm:$0xff] }
0x1aaa   : > { %v7139_v43 = vmul.f32 1.442695, %v7136_v42 }
0x1aab   : > { %v7143_v44 = vpop.xlane.xlu0 %7142 }
0x1aac   : > { %17054 = vpow2.f32 %v7139_v43 }
0x1aad   : > { %17056 = vrcp.f32 %v7143_v44 }
0x1aaf   : > { %v7154_v47 = vpop.permute.xlu0 %7153 }
0x1ab0   : > { %15734 = vmatprep.subr.mxu1 %v7154_v47 }
0x1ab9   : > { %v17055_v49 = vpop.eup %17054 }
0x1aba   : > { %v7144_v50 = vsel %vm4570_vm2, %v17055_v49, 0.0  ;;  %v17057_v48 = vpop.eup %17056 }
0x1abb   : > { %7145 = vadd.xlane.f32.xlu1 %v7144_v50  ;;  %v7149_v55 = vmul.f32 %v17057_v48, %v17049_v29  ;;  %v7475_v29 = vld [vmem:[%s22161_s5 + $0x28] sm:$0xff] }
0x1acc   : > { %7151 = vrot.lane.b32.xlu1 %v20892_v40, %s21937_s1  ;;  %s22163_s1 = smov %s22162_s10  ;;  %s22167_s10 = sld [smem:[#allocation199_spill]] }
0x1acd   : > { %v7662_v48 = vld [vmem:[%s22163_s1 + $0x10] sm:$0xff] }
0x1b44   : > { %v15721_v52 = vpop.f32.mrf.mxu1  ;;  %v7146_v53 = vpop.xlane.xlu1 %7145 }
0x1b45   : > { %17058 = vrcp.f32 %v7146_v53  ;;  %v7660_v53 = vld [vmem:[%s22163_s1] sm:$0xff] }
0x1b46   : > { %v6942_v54 = vpop.f32.mrf.mxu1 }
0x1b47   : > { %15724 = vmatprep.mubr.msk.f32.mxu1 %vm4472_vm1, %v6942_v54  ;;  %v21047_v54 = vld [vmem:[%s22164_s0] sm:$0xff]  ;;  %s22169_s0 = smov 120  }
0x1b48   : > { %15725 = vmatmul.mubr.msk.f32.vlgmr.msra.gmra.mxu1 %vm4472_vm1, %v15721_v52  ;;  %v7152_v56 = vpop.permute.xlu1 %7151  ;;  %v7661_v52 = vld [vmem:[%s22163_s1 + $0x8] sm:$0xff]  ;;  %s22168_s1 = smov %s22167_s10 }
0x1b49   : > { %15735 = vmatpush3.msra.mxu1 %v7154_v47  ;;  %15738 = vmatprep.mubr.msk.f32.mxu1 %vm4570_vm2, %v7149_v55  ;;  %v7747_v55 = vld [vmem:[%s22166_s18 + $0x18] sm:$0xff] }
0x1b4a   : > { %15736 = vmatprep.subr.mxu1 %v7152_v56 }
0x1b4b   : > { %15737 = vmatpush3.msra.mxu1 %v7152_v56  ;;  %v7746_v56 = vld [vmem:[%s22166_s18 + $0x10] sm:$0xff] }
0x1b4c   : > { %15741 = vmatprep.subr.mxu1 %v6184_v58 }
0x1b52   : > { %v17059_v40 = vpop.eup %17058 }
0x1b53   : > { %v7150_v57 = vmul.f32 %v17059_v40, %v17055_v49  ;;  %v14957_v49 = vld [vmem:[#allocation103] ss:$0 sm:$0xff]  ;;  %v7745_v40 = vld [vmem:[%s22166_s18 + $0x8] sm:$0xff] }
0x1b55   : > { %15739 = vmatmul.mubr.msk.f32.vlgmr.msra.gmra.mxu1 %vm4570_vm2, %v7150_v57  ;;  %v7744_v57 = vld [vmem:[%s22166_s18] sm:$0xff] }
0x1b56   : > { %15742 = vmatpush3.msra.mxu1 %v6184_v58  ;;  %v7473_v58 = vld [vmem:[%s22161_s5 + $0x18] sm:$0xff] }
0x1b57   : > { %15757 = vmatprep.subr.mxu1 %v7477_v32 }
0x1c08   : > { %v15726_v62 = vpop.f32.mrf.mxu1 }
0x1c09   : > { %v7033_v46 = vadd.f32 %v15726_v62, %v6744_v59  ;;  %v7472_v59 = vld [vmem:[%s22161_s5 + $0x10] sm:$0xff]  ;;  %v7471_v62 = vld [vmem:[%s22161_s5 + $0x8] sm:$0xff] }
0x1c0a   : > { %v7023_v63 = vpop.f32.mrf.mxu1 }
0x1c0b   : > { %v7032_v0 = vadd.f32 %v7023_v63, %v6739_v45  ;;  %v7470_v45 = vld [vmem:[%s22161_s5] sm:$0xff]  ;;  %s22175_s5 = sld [smem:[#allocation262_spill]] }
0x1c15   : > { %v15740_v1 = vpop.f32.mrf.mxu1 }
0x1c17   : > { %v7229_v2 = vpop.f32.mrf.mxu1 }
0x1c18   : > { %15743 = vmatprep.mubr.msk.f32.mxu1 %vm4472_vm1, %v7229_v2 }
0x1c19   : > { %15744 = vmatmul.mubr.msk.f32.vlgmr.msra.gmra.mxu1 %vm4472_vm1, %v15740_v1 }
0x1c1a   : > { %15758 = vmatpush3.msra.mxu1 %v7477_v32 }
0x1c1b   : > { %15759 = vmatprep.subr.mxu1 %v7476_v39 }
0x1c1c   : > { %15760 = vmatpush3.msra.mxu1 %v7476_v39 }
0x1c1d   : > { %15761 = vmatprep.subr.mxu1 %v7475_v29 }
0x1c1e   : > { %15762 = vmatpush3.msra.mxu1 %v7475_v29 }
0x1c1f   : > { %15763 = vmatprep.subr.mxu1 %v7474_v30 }
0x1c20   : > { %15764 = vmatpush3.msra.mxu1 %v7474_v30 }
0x1c21   : > { %15765 = vmatprep.subr.mxu1 %v7473_v58 }
0x1c22   : > { %15766 = vmatpush3.msra.mxu1 %v7473_v58 }
0x1c23   : > { %15767 = vmatprep.subr.mxu1 %v7472_v59 }
0x1c24   : > { %15768 = vmatpush3.msra.mxu1 %v7472_v59 }
0x1c25   : > { %15769 = vmatprep.subr.mxu1 %v7471_v62 }
0x1c26   : > { %15770 = vmatpush3.msra.mxu1 %v7471_v62 }
0x1c27   : > { %15771 = vmatprep.subr.mxu1 %v7470_v45 }
0x1c28   : > { %15772 = vmatpush3.msra.mxu1 %v7470_v45 }
0x1c29   : > { %15798 = vmatprep.subr.mxu1 %v19485_v28 }
0x1cd9   : > { %v15745_v3 = vpop.f32.mrf.mxu1 }
0x1cda   : > { %v7320_v5 = vadd.f32 %v15745_v3, %v7033_v46  ;;  %v14958_v46 = vld [vmem:[#allocation112] ss:$0 sm:$0xff] }
0x1cdb   : > { %v7310_v6 = vpop.f32.mrf.mxu1 }
0x1cdc   : > { %v7329_v7 = vadd.f32 %v14955_v4, %v7320_v5  ;;  %v7319_v12 = vadd.f32 %v7310_v6, %v7032_v0  ;;  %v14968_v5 = vld [vmem:[#allocation34] ss:$0 sm:$0xff] }
0x1cde   : > { %v7328_v10 = vadd.f32 %v14955_v4, %v7319_v12  ;;  %v7331_v60 = vadd.f32 %v7329_v7, %v20879_v34 }
0x1ce0   : > { %v7335_v61 = vsel %vm4208_vm0, %v7331_v60, 0.0  ;;  %v7330_v11 = vadd.f32 %v7328_v10, %v20876_v33  ;;  %v14970_v10 = vld [vmem:[#allocation31] ss:$0 sm:$0xff] }
0x1ce1   : > { %7336 = vadd.xlane.f32.xlu0 %v7335_v61 }
0x1ce2   : > { %v7332_v13 = vsel %vm4208_vm0, %v7330_v11, 0.0 }
0x1ce3   : > { %7333 = vadd.xlane.f32.xlu1 %v7332_v13  ;;  %v7828_v13 = vld [vmem:[%s22167_s10 + $0x18] sm:$0xff]  ;;  %s22170_s10 = sld [smem:[#allocation197_spill]] }
0x1d6a   : > { %v7337_v14 = vpop.xlane.xlu0 %7336 }
0x1d6b   : > { %v7339_v15 = vmul.f32 0.03125, %v7337_v14  ;;  %v7827_v14 = vld [vmem:[%s22168_s1 + $0x10] sm:$0xff] }
0x1d6c   : > { %v7334_v16 = vpop.xlane.xlu1 %7333 }
0x1d6d   : > { %v7341_v17 = vsub.f32 %v7331_v60, %v7339_v15  ;;  %v7338_v18 = vmul.f32 0.03125, %v7334_v16  ;;  %v7826_v15 = vld [vmem:[%s22168_s1 + $0x8] sm:$0xff]  ;;  %v7825_v16 = vld [vmem:[%s22168_s1] sm:$0xff]  ;;  %s22171_s1 = smov %s22170_s10 }
0x1d6f   : > { %v7340_v19 = vsub.f32 %v7330_v11, %v7338_v18  ;;  %v7343_v21 = vmul.f32 %v7341_v17, %v7341_v17 }
0x1d71   : > { %v7347_v34 = vsel %vm4208_vm0, %v7343_v21, 0.0  ;;  %v7342_v22 = vmul.f32 %v7340_v19, %v7340_v19 }
0x1d72   : > { %7348 = vadd.xlane.f32.xlu1 %v7347_v34 }
0x1d73   : > { %v7344_v33 = vsel %vm4208_vm0, %v7342_v22, 0.0 }
0x1d74   : > { %7345 = vadd.xlane.f32.xlu0 %v7344_v33 }
0x1dfb   : > { %v7349_v31 = vpop.xlane.xlu1 %7348 }
0x1dfc   : > { %v7351_v20 = vmul.f32 0.03125, %v7349_v31 }
0x1dfd   : > { %v7346_v26 = vpop.xlane.xlu0 %7345 }
0x1dfe   : > { %v7353_v8 = vadd.f32 1e-05, %v7351_v20  ;;  %v7350_v9 = vmul.f32 0.03125, %v7346_v26  ;;  %v14972_v26 = vld [vmem:[#allocation35] ss:$0 sm:$0xff] }
0x1e00   : > { %17060 = vrsqrt.f32 %v7353_v8  ;;  %v7352_v35 = vadd.f32 1e-05, %v7350_v9 }
0x1e02   : > { %17062 = vrsqrt.f32 %v7352_v35 }
0x1e0d   : > { %v17061_v37 = vpop.eup %17060 }
0x1e0e   : > { %v7357_v38 = vmul.f32 %v17061_v37, %v7341_v17 }
0x1e0f   : > { %v17063_v42 = vpop.eup %17062 }
0x1e10   : > { %v7356_v43 = vmul.f32 %v17063_v42, %v7340_v19  ;;  %v7366_v44 = vmul.f32 %v14956_v36, %v7357_v38 }
0x1e12   : > { %v7365_v47 = vmul.f32 %v14956_v36, %v7356_v43  ;;  %v21032_v51 = vadd.f32 %v14957_v49, %v7366_v44 }
0x1e14   : > { %v21030_v50 = vadd.f32 %v14957_v49, %v7365_v47 }
0x1e16   : > { %15754 = vmatprep.mubr.msk.f32.mxu0 %vm4208_vm0, %v21030_v50 }
0x1e17   : > { %15755 = vmatmul.mubr.msk.f32.vlgmr.msra.gmra.mxu0 %vm4208_vm0, %v21032_v51 }
0x1e18   : > { %15777 = vmatpush3.msra.mxu0 %v7663_v41  ;;  %15784 = vmatprep.mubr.msk.f32.mxu0 %vm19486_vm4, %v19485_v28 }
0x1e19   : > { %15778 = vmatprep.subr.mxu0 %v19485_v28 }
0x1e1a   : > { %15779 = vmatpush3.msra.mxu0 %v7662_v48  ;;  %v7910_v48 = vld [vmem:[%s22170_s10 + $0x8] sm:$0xff]  ;;  %s22173_s10 = smov 104  }
0x1e1b   : > { %15780 = vmatprep.subr.mxu0 %v19485_v28 }
0x1e1c   : > { %15781 = vmatpush3.msra.mxu0 %v7661_v52 }
0x1e1d   : > { %15782 = vmatprep.subr.mxu0 %v19485_v28 }
0x1e1e   : > { %15783 = vmatpush3.msra.mxu0 %v7660_v53 }
0x1e1f   : > { %15785 = vmatmul.mubr.msk.f32.vlgmr.msra.gmra.mxu0 %vm4208_vm0, %v21047_v54  ;;  %15787 = vmatprep.subr.mxu0 %v19485_v28 }
0x1e20   : > { %15788 = vmatpush3.msra.mxu0 %v7747_v55  ;;  %15795 = vmatprep.mubr.msk.f32.mxu0 %vm19486_vm4, %v19485_v28 }
0x1e21   : > { %15789 = vmatprep.subr.mxu0 %v19485_v28 }
0x1e22   : > { %15790 = vmatpush3.msra.mxu0 %v7746_v56  ;;  %v7909_v56 = vld [vmem:[%s22171_s1] sm:$0xff] }
0x1e23   : > { %15791 = vmatprep.subr.mxu0 %v19485_v28 }
0x1e24   : > { %15792 = vmatpush3.msra.mxu0 %v7745_v40 }
0x1e25   : > { %15793 = vmatprep.subr.mxu0 %v19485_v28 }
0x1e26   : > { %15794 = vmatpush3.msra.mxu0 %v7744_v57 }
0x1e27   : > { %15796 = vmatmul.mubr.msk.f32.vlgmr.msra.gmra.mxu0 %vm4208_vm0, %v21047_v54  ;;  %15809 = vmatprep.subr.mxu0 %v19485_v28 }
0x1e28   : > { %15811 = vmatprep.mubr.msk.f32.mxu0 %vm19486_vm4, %v19485_v28 }
0x1ed7   : > { %v15756_v63 = vpop.f32.mrf.mxu0 }
0x1ed8   : > { %v7465_v0 = vadd.f32 %v15756_v63, %v14958_v46 }
0x1ed9   : > { %v7459_v1 = vpop.f32.mrf.mxu0 }
0x1eda   : > { %v7460_v2 = vadd.f32 %v14958_v46, %v7459_v1  ;;  %v7469_v4 = vmax.f32 %v7465_v0, 0.0 }
0x1edc   : > { %v7468_v3 = vmax.f32 %v7460_v2, 0.0 }
0x1ede   : > { %15773 = vmatprep.mubr.msk.f32.mxu1 %vm5781_vm3, %v7468_v3 }
0x1edf   : > { %v7740_v6 = vpop.f32.mrf.mxu0  ;;  %15774 = vmatmul.mubr.msk.f32.vlgmr.msra.gmra.mxu1 %vm5781_vm3, %v7469_v4 }
0x1ee0   : > { %v21074_v7 = vadd.f32 %v14968_v5, %v7740_v6  ;;  %15806 = vmatprep.mubr.msk.f32.mxu1 %vm19486_vm4, %v19485_v28  ;;  %15799 = vmatpush3.msra.mxu1 %v7828_v13 }
0x1ee1   : > { %v15786_v12 = vpop.f32.mrf.mxu0  ;;  %15800 = vmatprep.subr.mxu1 %v19485_v28 }
0x1ee2   : > { %8074 = vrot.lane.b32.xlu1 %v21074_v7, %s22169_s0  ;;  %15801 = vmatpush3.msra.mxu1 %v7827_v14 }
0x1ee3   : > { %15802 = vmatprep.subr.mxu1 %v19485_v28 }
0x1ee4   : > { %15803 = vmatpush3.msra.mxu1 %v7826_v15 }
0x1ee5   : > { %15804 = vmatprep.subr.mxu1 %v19485_v28 }
0x1ee6   : > { %15805 = vmatpush3.msra.mxu1 %v7825_v16 }
0x1ee7   : > { %v7821_v60 = vpop.f32.mrf.mxu0  ;;  %15807 = vmatmul.mubr.f32.vlgmr.msra.gmra.mxu1 %v19485_v28  ;;  %15814 = vmatprep.subr.mxu1 %v19485_v28 }
0x1ee8   : > { %v21080_v61 = vadd.f32 %v14970_v10, %v7821_v60  ;;  %15816 = vmatprep.mubr.msk.f32.mxu1 %vm19486_vm4, %v19485_v28 }
0x1ee9   : > { %v15797_v11 = vpop.f32.mrf.mxu0 }
0x1eea   : > { %8076 = vrot.lane.b32.xlu0 %v21080_v61, %s22169_s0  ;;  %15810 = vmatpush3.xpose.msk.msra.mxu0 %vm4472_vm1, %v21080_v61 }
0x1eeb   : > { %15819 = vmatprep.subr.mxu0 %v19485_v28 }
0x1eed   : > { %15812 = vmatmul.mubr.msk.f32.vlgmr.msra.gmra.mxu0 %vm4472_vm1, %v21074_v7 }
0x1eee   : > { %15821 = vmatprep.mubr.msk.f32.mxu0 %vm19486_vm4, %v19485_v28 }
0x1f54   : > { %v8075_v18 = vpop.permute.xlu1 %8074 }
0x1f5c   : > { %v8077_v17 = vpop.permute.xlu0 %8076 }
0x1f5d   : > { %15820 = vmatpush3.xpose.msk.msra.mxu0 %vm4472_vm1, %v8077_v17  ;;  %v7911_v17 = vld [vmem:[%s22171_s1 + $0x10] sm:$0xff] }
0x1f5e   : > { %15829 = vmatprep.subr.mxu0 %v19485_v28 }
0x1f60   : > { %15822 = vmatmul.mubr.msk.f32.vlgmr.msra.gmra.mxu0 %vm4472_vm1, %v8075_v18 }
0x1f61   : > { %15831 = vmatprep.mubr.msk.f32.mxu0 %vm19486_vm4, %v19485_v28  ;;  %15830 = vmatpush3.msra.mxu0 %v7910_v48 }
0x1f62   : > { %15839 = vmatprep.subr.mxu0 %v19485_v28 }
0x1f9f   : > { %v21110_v31 = vpop.f32.mrf.mxu1 }
0x1fa1   : > { %v21112_v20 = vpop.f32.mrf.mxu1 }
0x1fa7   : > { %v7905_v8 = vpop.f32.mrf.mxu1 }
0x1fa8   : > { %v21114_v9 = vadd.f32 %v14972_v26, %v7905_v8 }
0x1fa9   : > { %v15808_v35 = vpop.f32.mrf.mxu1 }
0x1faa   : > { %15815 = vmatpush3.msra.mxu1 %v21114_v9 }
0x1fab   : > { %15824 = vmatprep.subr.mxu1 %v19485_v28 }
0x1fad   : > { %v7985_v19 = vpop.f32.mrf.mxu0 }
0x1fae   : > { %v7989_v21 = vmul.f32 0.35355338, %v7985_v19 }
0x1faf   : > { %v15813_v34 = vpop.f32.mrf.mxu0 }
0x1fb0   : > { %v7990_v22 = vsel %vm4472_vm1, %v7989_v21, -inf }
0x1fb1   : > { %7991 = vmax.xlane.f32.xlu1 %v7990_v22 }
0x2020   : > { %v8148_v33 = vpop.f32.mrf.mxu0 }
0x2021   : > { %v8152_v23 = vmul.f32 0.35355338, %v8148_v33 }
0x2022   : > { %v15823_v24 = vpop.f32.mrf.mxu0 }
0x2023   : > { %v8153_v25 = vsel %vm4472_vm1, %v8152_v23, -inf }
0x2024   : > { %8154 = vmax.xlane.f32.xlu0 %v8153_v25 }
0x203a   : > { %v7992_v27 = vpop.xlane.xlu1 %7991 }
0x203b   : > { %v7993_v32 = vsub.f32 %v7989_v21, %v7992_v27 }
0x203d   : > { %v7994_v39 = vmul.f32 1.442695, %v7993_v32  ;;  %v14961_v32 = vld [vmem:[#allocation113] ss:$0 sm:$0xff] }
0x203f   : > { %17064 = vpow2.f32 %v7994_v39  ;;  %v7558_v39 = vadd.f32 %v14961_v32, %v21112_v20 }
0x2041   : > { %v7566_v26 = vadd.f32 %v7558_v39, %v21030_v50  ;;  %v14990_v39 = vld [vmem:[#allocation38] ss:$0 sm:$0xff] }
0x2043   : > { %v7568_v35 = vsel %vm4208_vm0, %v7566_v26, 0.0 }
0x204c   : > { %v17065_v29 = vpop.eup %17064 }
0x204d   : > { %v7996_v30 = vsel %vm4472_vm1, %v17065_v29, 0.0 }
0x204e   : > { %7997 = vadd.xlane.f32.xlu0 %v7996_v30  ;;  %v7563_v30 = vadd.f32 %v21110_v31, %v14961_v32 }
0x2064   : > { %8165 = vrot.lane.b32.xlu0 %v21114_v9, %s22169_s0 }
0x20ad   : > { %v8155_v37 = vpop.xlane.xlu0 %8154 }
0x20ae   : > { %v8156_v38 = vsub.f32 %v8152_v23, %v8155_v37 }
0x20b0   : > { %v8157_v36 = vmul.f32 1.442695, %v8156_v38 }
0x20b2   : > { %17066 = vpow2.f32 %v8157_v36 }
0x20bf   : > { %v17067_v42 = vpop.eup %17066 }
0x20c0   : > { %v8159_v43 = vsel %vm4472_vm1, %v17067_v42, 0.0 }
0x20c1   : > { %8160 = vadd.xlane.f32.xlu1 %v8159_v43 }
0x20d2   : > { %8389 = vrot.lane.b32.xlu1 %v21080_v61, %s22172_s2 }
0x20d6   : > { %8387 = vrot.lane.b32.xlu1 %v21074_v7, %s22172_s2 }
0x20d7   : > { %v7998_v44 = vpop.xlane.xlu0 %7997 }
0x20d8   : > { %17068 = vrcp.f32 %v7998_v44 }
0x20db   : > { %v8166_v41 = vpop.permute.xlu0 %8165 }
0x20e5   : > { %v17069_v47 = vpop.eup %17068 }
0x20e6   : > { %v8000_v49 = vmul.f32 %v17069_v47, %v17065_v29 }
0x20e8   : > { %15817 = vmatmul.mubr.msk.f32.vlgmr.msra.gmra.mxu1 %vm4472_vm1, %v8000_v49 }
0x20e9   : > { %15825 = vmatpush3.msra.mxu1 %v8166_v41  ;;  %15826 = vmatprep.mubr.msk.f32.mxu1 %vm19486_vm4, %v19485_v28 }
0x20ea   : > { %15834 = vmatprep.subr.mxu1 %v19485_v28 }
0x214a   : > { %v8161_v52 = vpop.xlane.xlu1 %8160 }
0x214b   : > { %17070 = vrcp.f32 %v8161_v52  ;;  %v7912_v52 = vld [vmem:[%s22171_s1 + $0x18] sm:$0xff]  ;;  %s22174_s1 = sld [smem:[#allocation179_spill]] }
0x214e   : > { %v8390_v58 = vpop.permute.xlu1 %8389 }
0x2152   : > { %v8388_v45 = vpop.permute.xlu1 %8387 }
0x2158   : > { %v17071_v53 = vpop.eup %17070 }
0x2159   : > { %v8163_v55 = vmul.f32 %v17071_v53, %v17067_v42 }
0x215b   : > { %15827 = vmatmul.mubr.msk.f32.vlgmr.msra.gmra.mxu1 %vm4472_vm1, %v8163_v55 }
0x215c   : > { %15835 = vmatpush3.msra.mxu1 %v7909_v56  ;;  %15836 = vmatprep.mubr.msk.f32.mxu1 %vm19486_vm4, %v19485_v28 }
0x215d   : > { %15844 = vmatprep.subr.mxu1 %v19485_v28 }
0x21a8   : > { %v8070_v40 = vpop.f32.mrf.mxu1 }
0x21a9   : > { %15837 = vmatmul.mubr.msk.f32.vlgmr.msra.gmra.mxu1 %vm4472_vm1, %v8070_v40 }
0x21aa   : > { %v15818_v57 = vpop.f32.mrf.mxu1  ;;  %15846 = vmatprep.mubr.msk.f32.mxu1 %vm19486_vm4, %v19485_v28 }
0x21ab   : > { %v14989_v57 = vld [vmem:[#allocation32] ss:$0 sm:$0xff] }
0x221b   : > { %v8237_v59 = vpop.f32.mrf.mxu1 }
0x221c   : > { %15832 = vmatmul.mubr.msk.f32.vlgmr.msra.gmra.mxu0 %vm4472_vm1, %v8237_v59 }
0x221d   : > { %15840 = vmatpush3.xpose.msk.msra.mxu0 %vm4472_vm1, %v8390_v58  ;;  %v15828_v62 = vpop.f32.mrf.mxu1  ;;  %15841 = vmatprep.mubr.msk.f32.mxu0 %vm19486_vm4, %v19485_v28 }
0x221e   : > { %15849 = vmatprep.subr.mxu0 %v19485_v28 }
0x2220   : > { %15842 = vmatmul.mubr.msk.f32.vlgmr.msra.gmra.mxu0 %vm4472_vm1, %v8388_v45 }
0x2221   : > { %15851 = vmatprep.mubr.msk.f32.mxu0 %vm19486_vm4, %v19485_v28  ;;  %15850 = vmatpush3.msra.mxu0 %v7911_v17 }
0x2222   : > { %15859 = vmatprep.subr.mxu0 %v19485_v28 }
0x2269   : > { %v21147_v46 = vpop.f32.mrf.mxu1 }
0x226b   : > { %v15838_v63 = vpop.f32.mrf.mxu1 }
0x22dc   : > { %v21149_v0 = vpop.f32.mrf.mxu0 }
0x22dd   : > { %v8384_v38 = vadd.f32 %v21147_v46, %v21149_v0 }
0x22de   : > { %v15833_v1 = vpop.f32.mrf.mxu0 }
0x22e0   : > { %v8461_v2 = vpop.f32.mrf.mxu0 }
0x22e1   : > { %v8465_v3 = vmul.f32 0.35355338, %v8461_v2 }
0x22e2   : > { %v15843_v4 = vpop.f32.mrf.mxu0 }
0x22e3   : > { %v8466_v5 = vsel %vm4472_vm1, %v8465_v3, -inf }
0x22e4   : > { %8467 = vmax.xlane.f32.xlu1 %v8466_v5 }
0x22f5   : > { %8629 = vrot.lane.b32.xlu1 %v21080_v61, %s22173_s10 }
0x22f9   : > { %8627 = vrot.lane.b32.xlu1 %v21074_v7, %s22173_s10 }
0x236d   : > { %v8468_v6 = vpop.xlane.xlu1 %8467 }
0x236e   : > { %v8469_v12 = vsub.f32 %v8465_v3, %v8468_v6 }
0x2370   : > { %v8470_v10 = vmul.f32 1.442695, %v8469_v12 }
0x2371   : > { %v8630_v7 = vpop.permute.xlu1 %8629 }
0x2372   : > { %17072 = vpow2.f32 %v8470_v10 }
0x2375   : > { %v8628_v16 = vpop.permute.xlu1 %8627 }
0x237f   : > { %v17073_v60 = vpop.eup %17072 }
0x2380   : > { %v8472_v11 = vsel %vm4472_vm1, %v17073_v60, 0.0 }
0x2381   : > { %8473 = vadd.xlane.f32.xlu0 %v8472_v11 }
0x2397   : > { %8477 = vrot.lane.b32.xlu0 %v21114_v9, %s22172_s2 }
0x240a   : > { %v8474_v13 = vpop.xlane.xlu0 %8473 }
0x240b   : > { %17074 = vrcp.f32 %v8474_v13 }
0x240e   : > { %v8478_v14 = vpop.permute.xlu0 %8477 }
0x240f   : > { %15845 = vmatpush3.msra.mxu1 %v8478_v14 }
0x2410   : > { %15854 = vmatprep.subr.mxu1 %v19485_v28 }
0x2418   : > { %v17075_v61 = vpop.eup %17074 }
0x2419   : > { %v8476_v15 = vmul.f32 %v17075_v61, %v17073_v60 }
0x241b   : > { %15847 = vmatmul.mubr.msk.f32.vlgmr.msra.gmra.mxu1 %vm4472_vm1, %v8476_v15 }
0x241c   : > { %15855 = vmatpush3.xpose.msk.msra.mxu1 %vm4472_vm1, %v8630_v7  ;;  %15856 = vmatprep.mubr.msk.f32.mxu1 %vm19486_vm4, %v19485_v28 }
0x241d   : > { %15864 = vmatprep.subr.mxu1 %v19485_v28 }
0x241f   : > { %15857 = vmatmul.mubr.msk.f32.vlgmr.msra.gmra.mxu1 %vm4472_vm1, %v8628_v16  ;;  %v14964_v16 = vld [vmem:[#allocation116] ss:$0 sm:$0xff] }
0x2420   : > { %15866 = vmatprep.mubr.msk.f32.mxu1 %vm19486_vm4, %v19485_v28  ;;  %15865 = vmatpush3.msra.mxu1 %v7912_v52 }
0x24db   : > { %v8549_v18 = vpop.f32.mrf.mxu1 }
0x24dc   : > { %15852 = vmatmul.mubr.msk.f32.vlgmr.msra.gmra.mxu0 %vm4472_vm1, %v8549_v18 }
0x24dd   : > { %v15848_v19 = vpop.f32.mrf.mxu1  ;;  %15861 = vmatprep.mubr.msk.f32.mxu0 %vm19486_vm4, %v19485_v28 }
0x24df   : > { %v8701_v21 = vpop.f32.mrf.mxu1 }
0x24e0   : > { %v8705_v34 = vmul.f32 0.35355338, %v8701_v21  ;;  %v14965_v21 = vld [vmem:[#allocation115] ss:$0 sm:$0xff] }
0x24e1   : > { %v15858_v22 = vpop.f32.mrf.mxu1 }
0x24e2   : > { %v8706_v33 = vsel %vm4472_vm1, %v8705_v34, -inf }
0x24e3   : > { %8707 = vmax.xlane.f32.xlu0 %v8706_v33 }
0x24f9   : > { %8717 = vrot.lane.b32.xlu0 %v21114_v9, %s22173_s10  ;;  %v7567_v9 = vadd.f32 %v7563_v30, %v21032_v51  ;;  %v14991_v30 = vld [vmem:[#allocation37] ss:$0 sm:$0xff] }
0x24fb   : > { %v7571_v37 = vsel %vm4208_vm0, %v7567_v9, 0.0 }
0x256c   : > { %v8708_v23 = vpop.xlane.xlu0 %8707 }
0x256d   : > { %v8709_v24 = vsub.f32 %v8705_v34, %v8708_v23 }
0x256f   : > { %v8710_v25 = vmul.f32 1.442695, %v8709_v24 }
0x2570   : > { %v8718_v27 = vpop.permute.xlu0 %8717 }
0x2571   : > { %17076 = vpow2.f32 %v8710_v25  ;;  %15860 = vmatpush3.msra.mxu0 %v8718_v27 }
0x2572   : > { %15869 = vmatprep.subr.mxu0 %v19485_v28 }
0x257e   : > { %v17077_v29 = vpop.eup %17076 }
0x257f   : > { %v8712_v8 = vsel %vm4472_vm1, %v17077_v29, 0.0 }
0x2580   : > { %8713 = vadd.xlane.f32.xlu1 %v8712_v8 }
0x2584   : > { %7569 = vadd.xlane.f32.xlu1 %v7568_v35 }
0x2588   : > { %7572 = vadd.xlane.f32.xlu1 %v7571_v37 }
0x259c   : > { %v8622_v20 = vpop.f32.mrf.mxu0 }
0x259d   : > { %v8626_v36 = vadd.f32 %v8622_v20, %v8384_v38 }
0x259e   : > { %v15853_v31 = vpop.f32.mrf.mxu0 }
0x2609   : > { %v8714_v42 = vpop.xlane.xlu1 %8713 }
0x260a   : > { %17078 = vrcp.f32 %v8714_v42 }
0x260d   : > { %v7570_v50 = vpop.xlane.xlu1 %7569 }
0x260e   : > { %v7574_v56 = vmul.f32 0.03125, %v7570_v50 }
0x2610   : > { %v7576_v62 = vsub.f32 %v7566_v26, %v7574_v56 }
0x2611   : > { %v7573_v43 = vpop.xlane.xlu1 %7572 }
0x2612   : > { %v7575_v44 = vmul.f32 0.03125, %v7573_v43  ;;  %v7578_v0 = vmul.f32 %v7576_v62, %v7576_v62 }
0x2614   : > { %v7577_v47 = vsub.f32 %v7567_v9, %v7575_v44  ;;  %v7580_v1 = vsel %vm4208_vm0, %v7578_v0, 0.0 }
0x2616   : > { %v7579_v51 = vmul.f32 %v7577_v47, %v7577_v47 }
0x2617   : > { %v17079_v49 = vpop.eup %17078 }
0x2618   : > { %v7583_v41 = vsel %vm4208_vm0, %v7579_v51, 0.0  ;;  %v8716_v48 = vmul.f32 %v17079_v49, %v17077_v29  ;;  %v9022_v51 = vld [vmem:[%s22174_s1 + $0x10] sm:$0xff]  ;;  %v9021_v49 = vld [vmem:[%s22174_s1 + $0x8] sm:$0xff] }
0x2619   : > { %7584 = vadd.xlane.f32.xlu0 %v7583_v41  ;;  %v9020_v41 = vld [vmem:[%s22174_s1] sm:$0xff] }
0x261a   : > { %15862 = vmatmul.mubr.msk.f32.vlgmr.msra.gmra.mxu0 %vm4472_vm1, %v8716_v48 }
0x261b   : > { %15877 = vmatprep.mubr.msk.f32.mxu0 %vm19486_vm4, %v19485_v28 }
0x26a2   : > { %v7585_v2 = vpop.xlane.xlu0 %7584 }
0x26a3   : > { %v7587_v3 = vmul.f32 0.03125, %v7585_v2 }
0x26a5   : > { %v7589_v5 = vadd.f32 1e-05, %v7587_v3 }
0x26a7   : > { %17080 = vrsqrt.f32 %v7589_v5 }
0x26b4   : > { %v17081_v61 = vpop.eup %17080 }
0x26b5   : > { %v7593_v7 = vmul.f32 %v17081_v61, %v7577_v47  ;;  %v9023_v47 = vld [vmem:[%s22174_s1 + $0x18] sm:$0xff]  ;;  %s22176_s1 = sld [smem:[#allocation181_spill]] }
0x26b6   : > { %15880 = vmatprep.subr.mxu1 %v9023_v47 }
0x26b7   : > { %v7602_v19 = vmul.f32 %v14964_v16, %v7593_v7 }
0x26b9   : > { %v7611_v33 = vadd.f32 %v14965_v21, %v7602_v19 }
0x26bb   : > { %v7615_v23 = vsel %vm4208_vm0, %v7611_v33, 0.0  ;;  %v8938_v61 = vld [vmem:[%s22176_s1 + $0x10] sm:$0xff]  ;;  %v8937_v7 = vld [vmem:[%s22176_s1 + $0x8] sm:$0xff] }
0x26da   : > { %v8789_v53 = vpop.f32.mrf.mxu0 }
0x26db   : > { %15867 = vmatmul.mubr.msk.f32.vlgmr.msra.gmra.mxu1 %vm4472_vm1, %v8789_v53 }
0x26dc   : > { %v15863_v55 = vpop.f32.mrf.mxu0  ;;  %15881 = vmatpush3.msra.mxu1 %v9023_v47 }
0x26dd   : > { %15882 = vmatprep.subr.mxu1 %v9022_v51 }
0x26de   : > { %15883 = vmatpush3.msra.mxu1 %v9022_v51 }
0x26df   : > { %15884 = vmatprep.subr.mxu1 %v9021_v49 }
0x26e0   : > { %15885 = vmatpush3.msra.mxu1 %v9021_v49 }
0x26e1   : > { %15886 = vmatprep.subr.mxu1 %v9020_v41 }
0x26e2   : > { %15887 = vmatpush3.msra.mxu1 %v9020_v41 }
0x26e3   : > { %15902 = vmatprep.subr.mxu1 %v19485_v28 }
0x279b   : > { %v8862_v40 = vpop.f32.mrf.mxu1 }
0x279c   : > { %v8866_v58 = vadd.f32 %v8862_v40, %v8626_v36 }
0x279d   : > { %v15868_v59 = vpop.f32.mrf.mxu1 }
0x279e   : > { %v8874_v45 = vadd.f32 %v14989_v57, %v8866_v58 }
0x27a0   : > { %v8875_v46 = vadd.f32 %v8874_v45, %v21047_v54 }
0x27a2   : > { %v8876_v63 = vsel %vm4208_vm0, %v8875_v46, 0.0 }
0x27a3   : > { %8877 = vadd.xlane.f32.xlu1 %v8876_v63  ;;  %v21208_v63 = vld [vmem:[%s22175_s5] ss:$0 sm:$0xff] }
0x27a7   : > { %7581 = vadd.xlane.f32.xlu1 %v7580_v1  ;;  %v21210_v1 = vld [vmem:[#allocation118] ss:$0 sm:$0xff] }
0x282c   : > { %v8878_v4 = vpop.xlane.xlu1 %8877 }
0x282d   : > { %v8879_v6 = vmul.f32 0.03125, %v8878_v4 }
0x282f   : > { %v8880_v12 = vsub.f32 %v8875_v46, %v8879_v6 }
0x2830   : > { %v7582_v10 = vpop.xlane.xlu1 %7581 }
0x2831   : > { %v7586_v60 = vmul.f32 0.03125, %v7582_v10  ;;  %v8881_v11 = vmul.f32 %v8880_v12, %v8880_v12 }
0x2833   : > { %v7588_v13 = vadd.f32 1e-05, %v7586_v60  ;;  %v8882_v14 = vsel %vm4208_vm0, %v8881_v11, 0.0  ;;  %v17166_v11 = vld [vmem:[%s20689_s3 + $0x8] sm:$0xff] }
0x2834   : > { %8883 = vadd.xlane.f32.xlu1 %v8882_v14  ;;  %v8939_v14 = vld [vmem:[%s22176_s1 + $0x18] sm:$0xff] }
0x2835   : > { %17082 = vrsqrt.f32 %v7588_v13  ;;  %15870 = vmatpush3.msra.mxu0 %v8939_v14 }
0x2836   : > { %15871 = vmatprep.subr.mxu0 %v19485_v28 }
0x2837   : > { %15872 = vmatpush3.msra.mxu0 %v8938_v61 }
0x2838   : > { %15873 = vmatprep.subr.mxu0 %v19485_v28 }
0x2839   : > { %15874 = vmatpush3.msra.mxu0 %v8937_v7 }
0x283a   : > { %15875 = vmatprep.subr.mxu0 %v19485_v28 }
0x2842   : > { %v17083_v15 = vpop.eup %17082 }
0x2843   : > { %v7592_v17 = vmul.f32 %v17083_v15, %v7576_v62  ;;  %v8936_v15 = vld [vmem:[%s22176_s1] sm:$0xff]  ;;  %s22179_s1 = sld [smem:[#allocation190_spill]] }
0x2844   : > { %15876 = vmatpush3.msra.mxu0 %v8936_v15 }
0x2845   : > { %v7601_v18 = vmul.f32 %v14964_v16, %v7592_v17  ;;  %v9115_v16 = vld [vmem:[%s22177_s6 + $0x18] sm:$0xff] }
0x2846   : > { %15891 = vmatprep.subr.mxu0 %v9115_v16 }
0x2847   : > { %v7610_v34 = vadd.f32 %v14965_v21, %v7601_v18 }
0x2849   : > { %v7612_v22 = vsel %vm4208_vm0, %v7610_v34, 0.0 }
0x284a   : > { %7613 = vadd.xlane.f32.xlu1 %v7612_v22 }
0x284e   : > { %7616 = vadd.xlane.f32.xlu1 %v7615_v23 }
0x28bd   : > { %v8884_v24 = vpop.xlane.xlu1 %8883 }
0x28be   : > { %v8885_v25 = vmul.f32 0.03125, %v8884_v24 }
0x28c0   : > { %v8886_v27 = vadd.f32 1e-05, %v8885_v25 }
0x28c2   : > { %17084 = vrsqrt.f32 %v8886_v27  ;;  %v9114_v27 = vld [vmem:[%s22177_s6 + $0x10] sm:$0xff] }
0x28cf   : > { %v17085_v32 = vpop.eup %17084 }
0x28d0   : > { %v8888_v29 = vmul.f32 %v17085_v32, %v8880_v12  ;;  %v17165_v12 = vld [vmem:[%s20689_s3] sm:$0xff]  ;;  %v9113_v32 = vld [vmem:[%s22177_s6 + $0x8] sm:$0xff]  ;;  %s22178_s3 = sld [smem:[#allocation180_spill]] }
0x28d2   : > { %v8896_v26 = vmul.f32 %v14990_v39, %v8888_v29  ;;  %v9112_v39 = vld [vmem:[%s22177_s6] sm:$0xff] }
0x28d3   : > { %v7614_v8 = vpop.xlane.xlu1 %7613 }
0x28d4   : > { %v7618_v9 = vmul.f32 0.03125, %v7614_v8  ;;  %v8904_v35 = vadd.f32 %v14991_v30, %v8896_v26 }
0x28d6   : > { %v7620_v37 = vsub.f32 %v7610_v34, %v7618_v9  ;;  %v8906_v38 = vsel %vm4208_vm0, %v8904_v35, 0.0  ;;  %v14992_v34 = vld [vmem:[#allocation20] ss:$0 sm:$0xff]  ;;  %v14994_v9 = vld [vmem:[#allocation13] ss:$0 sm:$0xff]  ;;  %v9204_v15 = vld [vmem:[%s22178_s3] sm:$0xff] }
0x28d7   : > { %8907 = vadd.xlane.f32.xlu1 %v8906_v38  ;;  %v7617_v20 = vpop.xlane.xlu1 %7616 }
0x28d8   : > { %v7619_v36 = vmul.f32 0.03125, %v7617_v20  ;;  %v7622_v31 = vmul.f32 %v7620_v37, %v7620_v37 }
0x28da   : > { %v7621_v42 = vsub.f32 %v7611_v33, %v7619_v36  ;;  %v7624_v50 = vsel %vm4208_vm0, %v7622_v31, 0.0  ;;  %v14993_v33 = vld [vmem:[#allocation19] ss:$0 sm:$0xff]  ;;  %v14999_v36 = vld [vmem:[#allocation14] ss:$0 sm:$0xff] }
0x28db   : > { %7625 = vadd.xlane.f32.xlu1 %v7624_v50 }
0x28dc   : > { %v7623_v43 = vmul.f32 %v7621_v42, %v7621_v42 }
0x28de   : > { %v7627_v44 = vsel %vm4208_vm0, %v7623_v43, 0.0 }
0x28df   : > { %7628 = vadd.xlane.f32.xlu1 %v7627_v44 }
0x2960   : > { %v8908_v48 = vpop.xlane.xlu1 %8907 }
0x2961   : > { %v8909_v52 = vmul.f32 0.03125, %v8908_v48  ;;  %v21291_v48 = vld [vmem:[%s20739_s26] ss:$0 sm:$0xff] }
0x2963   : > { %v8910_v53 = vsub.f32 %v8904_v35, %v8909_v52 }
0x2964   : > { %v7626_v55 = vpop.xlane.xlu1 %7625 }
0x2965   : > { %v7630_v56 = vmul.f32 0.03125, %v7626_v55  ;;  %v8911_v40 = vmul.f32 %v8910_v53, %v8910_v53 }
0x2967   : > { %v7632_v57 = vadd.f32 1e-05, %v7630_v56  ;;  %v8912_v58 = vsel %vm4208_vm0, %v8911_v40, 0.0 }
0x2968   : > { %8913 = vadd.xlane.f32.xlu1 %v8912_v58  ;;  %v7629_v59 = vpop.xlane.xlu1 %7628 }
0x2969   : > { %17086 = vrsqrt.f32 %v7632_v57  ;;  %v7631_v62 = vmul.f32 0.03125, %v7629_v59 }
0x296b   : > { %v7633_v45 = vadd.f32 1e-05, %v7631_v62 }
0x296d   : > { %17088 = vrsqrt.f32 %v7633_v45 }
0x2976   : > { %v17087_v46 = vpop.eup %17086 }
0x2977   : > { %v7636_v0 = vmul.f32 %v17087_v46, %v7620_v37 }
0x2979   : > { %v7645_v2 = vmul.f32 %v21208_v63, %v7636_v0 }
0x297a   : > { %v17089_v3 = vpop.eup %17088 }
0x297b   : > { %v7637_v4 = vmul.f32 %v17089_v3, %v7621_v42  ;;  %v21214_v5 = vadd.f32 %v21210_v1, %v7645_v2 }
0x297d   : > { %v7646_v6 = vmul.f32 %v21208_v63, %v7637_v4  ;;  %v21219_v10 = vadd.f32 %v17165_v12, %v21214_v5 }
0x297f   : > { %15888 = vmatprep.mubr.msk.f32.mxu1 %vm4208_vm0, %v21219_v10  ;;  %v21224_v60 = vadd.f32 %v21210_v1, %v7646_v6 }
0x2981   : > { %v21228_v13 = vadd.f32 %v17166_v11, %v21224_v60 }
0x2983   : > { %15889 = vmatmul.mubr.msk.f32.vlgmr.msra.gmra.mxu1 %vm4208_vm0, %v21228_v13 }
0x2984   : > { %15906 = vmatprep.mubr.msk.f32.mxu1 %vm19486_vm4, %v19485_v28 }
0x29f1   : > { %v8914_v17 = vpop.xlane.xlu1 %8913 }
0x29f2   : > { %v8915_v18 = vmul.f32 0.03125, %v8914_v17 }
0x29f4   : > { %v8916_v19 = vadd.f32 1e-05, %v8915_v18 }
0x29f6   : > { %17090 = vrsqrt.f32 %v8916_v19 }
0x2a03   : > { %v17091_v21 = vpop.eup %17090 }
0x2a04   : > { %v8918_v22 = vmul.f32 %v17091_v21, %v8910_v53  ;;  %v9205_v21 = vld [vmem:[%s22178_s3 + $0x8] sm:$0xff] }
0x2a06   : > { %v8926_v23 = vmul.f32 %v14992_v34, %v8918_v22 }
0x2a08   : > { %v8934_v24 = vadd.f32 %v14993_v33, %v8926_v23 }
0x2a0a   : > { %v21243_v25 = vadd.f32 %v8934_v24, %v21047_v54  ;;  %v14996_v54 = vld [vmem:[#allocation10] ss:$0 sm:$0xff] }
0x2a0c   : > { %15878 = vmatmul.mubr.msk.f32.vlgmr.msra.gmra.mxu0 %vm4208_vm0, %v21243_v25 }
0x2a0d   : > { %15892 = vmatpush3.msra.mxu0 %v9115_v16  ;;  %15899 = vmatprep.mubr.msk.f32.mxu0 %vm4208_vm0, %v21214_v5 }
0x2a0e   : > { %15893 = vmatprep.subr.mxu0 %v9114_v27 }
0x2a0f   : > { %15894 = vmatpush3.msra.mxu0 %v9114_v27 }
0x2a10   : > { %15895 = vmatprep.subr.mxu0 %v9113_v32 }
0x2a11   : > { %15896 = vmatpush3.msra.mxu0 %v9113_v32 }
0x2a12   : > { %15897 = vmatprep.subr.mxu0 %v9112_v39 }
0x2a13   : > { %15898 = vmatpush3.msra.mxu0 %v9112_v39 }
0x2a14   : > { %15900 = vmatmul.mubr.msk.f32.vlgmr.msra.gmra.mxu0 %vm4208_vm0, %v21224_v60  ;;  %15909 = vmatprep.subr.mxu0 %v19485_v28 }
0x2a15   : > { %15913 = vmatprep.mubr.msk.f32.mxu0 %vm19486_vm4, %v19485_v28 }
0x2a43   : > { %v15890_v29 = vpop.f32.mrf.mxu1 }
0x2a44   : > { %v21257_v30 = vadd.f32 %v15890_v29, %v14996_v54 }
0x2a45   : > { %v9103_v26 = vpop.f32.mrf.mxu1 }
0x2a46   : > { %v21259_v8 = vadd.f32 %v14996_v54, %v9103_v26  ;;  %9377 = vrot.lane.b32.xlu1 %v21257_v30, %s22169_s0  ;;  %15903 = vmatpush3.xpose.msk.msra.mxu1 %vm4472_vm1, %v21257_v30 }
0x2a47   : > { %15904 = vmatprep.subr.mxu1 %v19485_v28 }
0x2a48   : > { %9375 = vrot.lane.b32.xlu0 %v21259_v8, %s22169_s0 }
0x2a4a   : > { %15905 = vmatpush3.xpose.msk.msra.mxu1 %vm4472_vm1, %v21259_v8 }
0x2a4b   : > { %15916 = vmatprep.subr.mxu1 %v19485_v28 }
0x2ab8   : > { %v9378_v20 = vpop.permute.xlu1 %9377 }
0x2aba   : > { %v9376_v31 = vpop.permute.xlu0 %9375 }
0x2acc   : > { %v9016_v35 = vpop.f32.mrf.mxu0 }
0x2acd   : > { %v9017_v37 = vadd.f32 %v14994_v9, %v9016_v35 }
0x2ace   : > { %v15879_v38 = vpop.f32.mrf.mxu0 }
0x2acf   : > { %9373 = vrot.lane.b32.xlu1 %v9017_v37, %s22169_s0  ;;  %15907 = vmatmul.mubr.msk.f32.vlgmr.msra.gmra.mxu1 %vm4472_vm1, %v9017_v37 }
0x2ad0   : > { %15917 = vmatpush3.xpose.msk.msra.mxu1 %vm4472_vm1, %v9378_v20  ;;  %15920 = vmatprep.mubr.msk.f32.mxu1 %vm19486_vm4, %v19485_v28 }
0x2ad1   : > { %15918 = vmatprep.subr.mxu1 %v19485_v28 }
0x2ad4   : > { %v15901_v42 = vpop.f32.mrf.mxu0  ;;  %15919 = vmatpush3.xpose.msk.msra.mxu1 %vm4472_vm1, %v9376_v31 }
0x2ad5   : > { %v21278_v50 = vadd.f32 %v15901_v42, %v14999_v36  ;;  %15935 = vmatprep.subr.mxu1 %v19485_v28 }
0x2ad6   : > { %v9195_v43 = vpop.f32.mrf.mxu0 }
0x2ad7   : > { %v21281_v44 = vadd.f32 %v14999_v36, %v9195_v43  ;;  %15910 = vmatpush3.msra.mxu0 %v21278_v50 }
0x2ad8   : > { %15911 = vmatprep.subr.mxu0 %v19485_v28 }
0x2ad9   : > { %15912 = vmatpush3.msra.mxu0 %v21281_v44 }
0x2ada   : > { %15923 = vmatprep.subr.mxu0 %v19485_v28 }
0x2b41   : > { %v9374_v47 = vpop.permute.xlu1 %9373 }
0x2b42   : > { %15921 = vmatmul.mubr.msk.f32.vlgmr.msra.gmra.mxu1 %vm4472_vm1, %v9374_v47 }
0x2b43   : > { %15937 = vmatprep.mubr.msk.f32.mxu1 %vm19486_vm4, %v19485_v28  ;;  %15936 = vmatpush3.msra.mxu1 %v9204_v15 }
0x2b44   : > { %15947 = vmatprep.subr.mxu1 %v19485_v28 }
0x2b8f   : > { %v9283_v51 = vpop.f32.mrf.mxu1 }
0x2b90   : > { %v9287_v49 = vmul.f32 0.35355338, %v9283_v51 }
0x2b91   : > { %v15908_v41 = vpop.f32.mrf.mxu1 }
0x2b92   : > { %v9288_v52 = vadd.f32 %v21291_v48, %v9287_v49 }
0x2b94   : > { %v9289_v53 = vsel %vm4570_vm2, %v9288_v52, -inf }
0x2b95   : > { %9290 = vmax.xlane.f32.xlu1 %v9289_v53 }
0x2c02   : > { %v9451_v55 = vpop.f32.mrf.mxu1 }
0x2c03   : > { %v9455_v56 = vmul.f32 0.35355338, %v9451_v55 }
0x2c04   : > { %v15922_v40 = vpop.f32.mrf.mxu1 }
0x2c05   : > { %v9456_v57 = vadd.f32 %v21291_v48, %v9455_v56 }
0x2c07   : > { %v9457_v58 = vsel %vm4570_vm2, %v9456_v57, -inf }
0x2c08   : > { %9458 = vmax.xlane.f32.xlu0 %v9457_v58 }
0x2c1e   : > { %v9291_v59 = vpop.xlane.xlu1 %9290 }
0x2c1f   : > { %v9292_v62 = vsub.f32 %v9288_v52, %v9291_v59 }
0x2c21   : > { %v9293_v45 = vmul.f32 1.442695, %v9292_v62 }
0x2c23   : > { %17092 = vpow2.f32 %v9293_v45 }
0x2c30   : > { %v17093_v46 = vpop.eup %17092 }
0x2c31   : > { %v9295_v0 = vsel %vm4570_vm2, %v17093_v46, 0.0 }
0x2c32   : > { %9296 = vadd.xlane.f32.xlu0 %v9295_v0  ;;  %v9206_v0 = vld [vmem:[%s22178_s3 + $0x10] sm:$0xff] }
0x2c48   : > { %9472 = vrot.lane.b32.xlu0 %v21278_v50, %s22169_s0 }
0x2c4c   : > { %9697 = vrot.lane.b32.xlu0 %v21259_v8, %s22172_s2 }
0x2c50   : > { %9947 = vrot.lane.b32.xlu0 %v21257_v30, %s22173_s10 }
0x2c54   : > { %9943 = vrot.lane.b32.xlu0 %v9017_v37, %s22173_s10 }
0x2c91   : > { %v9459_v2 = vpop.xlane.xlu0 %9458 }
0x2c92   : > { %v9460_v3 = vsub.f32 %v9456_v57, %v9459_v2 }
0x2c94   : > { %v9461_v4 = vmul.f32 1.442695, %v9460_v3 }
0x2c96   : > { %17094 = vpow2.f32 %v9461_v4 }
0x2ca3   : > { %v17095_v6 = vpop.eup %17094 }
0x2ca4   : > { %v9463_v12 = vsel %vm4570_vm2, %v17095_v6, 0.0 }
0x2ca5   : > { %9464 = vadd.xlane.f32.xlu1 %v9463_v12 }
0x2cb6   : > { %9470 = vrot.lane.b32.xlu1 %v21281_v44, %s22169_s0 }
0x2cba   : > { %9699 = vrot.lane.b32.xlu1 %v21257_v30, %s22172_s2 }
0x2cbb   : > { %v9297_v11 = vpop.xlane.xlu0 %9296 }
0x2cbc   : > { %17096 = vrcp.f32 %v9297_v11 }
0x2cbe   : > { %9695 = vrot.lane.b32.xlu1 %v9017_v37, %s22172_s2 }
0x2cbf   : > { %v9473_v7 = vpop.permute.xlu0 %9472 }
0x2cc2   : > { %9945 = vrot.lane.b32.xlu1 %v21259_v8, %s22173_s10 }
0x2cc3   : > { %v9698_v27 = vpop.permute.xlu0 %9697 }
0x2cc7   : > { %v9948_v39 = vpop.permute.xlu0 %9947 }
0x2cc9   : > { %v17097_v14 = vpop.eup %17096 }
0x2cca   : > { %v9299_v61 = vmul.f32 %v17097_v14, %v17093_v46  ;;  %v9207_v14 = vld [vmem:[%s22178_s3 + $0x18] sm:$0xff]  ;;  %s22180_s3 = sld [smem:[#allocation191_spill]] }
0x2ccb   : > { %v9944_v29 = vpop.permute.xlu0 %9943 }
0x2ccc   : > { %15914 = vmatmul.mubr.msk.f32.vlgmr.msra.gmra.mxu0 %vm4570_vm2, %v9299_v61 }
0x2ccd   : > { %15924 = vmatpush3.msra.mxu0 %v9473_v7  ;;  %15927 = vmatprep.mubr.msk.f32.mxu0 %vm19486_vm4, %v19485_v28 }
0x2cce   : > { %15925 = vmatprep.subr.mxu0 %v19485_v28 }
0x2d2e   : > { %v9465_v16 = vpop.xlane.xlu1 %9464 }
0x2d2f   : > { %17098 = vrcp.f32 %v9465_v16 }
0x2d32   : > { %v9471_v17 = vpop.permute.xlu1 %9470 }
0x2d33   : > { %15926 = vmatpush3.msra.mxu0 %v9471_v17 }
0x2d34   : > { %15930 = vmatprep.subr.mxu0 %v19485_v28 }
0x2d36   : > { %v9700_v23 = vpop.permute.xlu1 %9699 }
0x2d3a   : > { %v9696_v32 = vpop.permute.xlu1 %9695 }
0x2d3c   : > { %v17099_v18 = vpop.eup %17098 }
0x2d3d   : > { %v9467_v19 = vmul.f32 %v17099_v18, %v17095_v6 }
0x2d3e   : > { %v9946_v54 = vpop.permute.xlu1 %9945 }
0x2d3f   : > { %15928 = vmatmul.mubr.msk.f32.vlgmr.msra.gmra.mxu0 %vm4570_vm2, %v9467_v19 }
0x2d40   : > { %15931 = vmatpush3.msra.mxu0 %v9205_v21  ;;  %15932 = vmatprep.mubr.msk.f32.mxu0 %vm19486_vm4, %v19485_v28  ;;  %v15022_v21 = vld [vmem:[#allocation11] ss:$0 sm:$0xff] }
0x2d41   : > { %15940 = vmatprep.subr.mxu0 %v19485_v28 }
0x2d8c   : > { %v9369_v34 = vpop.f32.mrf.mxu0 }
0x2d8d   : > { %15938 = vmatmul.mubr.msk.f32.vlgmr.msra.gmra.mxu1 %vm4472_vm1, %v9369_v34 }
0x2d8e   : > { %v15915_v22 = vpop.f32.mrf.mxu0  ;;  %15951 = vmatprep.mubr.msk.f32.mxu1 %vm19486_vm4, %v19485_v28 }
0x2dff   : > { %v9545_v33 = vpop.f32.mrf.mxu0 }
0x2e00   : > { %15933 = vmatmul.mubr.msk.f32.vlgmr.msra.gmra.mxu0 %vm4472_vm1, %v9545_v33 }
0x2e01   : > { %15941 = vmatpush3.xpose.msk.msra.mxu0 %vm4472_vm1, %v9700_v23  ;;  %v15929_v24 = vpop.f32.mrf.mxu0  ;;  %15944 = vmatprep.mubr.msk.f32.mxu0 %vm19486_vm4, %v19485_v28 }
0x2e02   : > { %15942 = vmatprep.subr.mxu0 %v19485_v28 }
0x2e05   : > { %15943 = vmatpush3.xpose.msk.msra.mxu0 %vm4472_vm1, %v9698_v27 }
0x2e06   : > { %15959 = vmatprep.subr.mxu0 %v19485_v28 }
0x2e08   : > { %15945 = vmatmul.mubr.msk.f32.vlgmr.msra.gmra.mxu0 %vm4472_vm1, %v9696_v32 }
0x2e09   : > { %15960 = vmatpush3.xpose.msk.msra.mxu0 %vm4472_vm1, %v9948_v39  ;;  %15963 = vmatprep.mubr.msk.f32.mxu0 %vm19486_vm4, %v19485_v28 }
0x2e0a   : > { %15961 = vmatprep.subr.mxu0 %v19485_v28 }
0x2e0d   : > { %15962 = vmatpush3.xpose.msk.msra.mxu0 %vm4472_vm1, %v9946_v54 }
0x2e0e   : > { %15978 = vmatprep.subr.mxu0 %v19485_v28 }
0x2e10   : > { %15964 = vmatmul.mubr.msk.f32.vlgmr.msra.gmra.mxu0 %vm4472_vm1, %v9944_v29 }
0x2e11   : > { %15986 = vmatprep.mubr.msk.f32.mxu0 %vm19486_vm4, %v19485_v28 }
0x2e4d   : > { %v21345_v30 = vpop.f32.mrf.mxu1 }
0x2e4f   : > { %v15939_v26 = vpop.f32.mrf.mxu1 }
0x2ec0   : > { %v21347_v8 = vpop.f32.mrf.mxu0 }
0x2ec1   : > { %v9692_v61 = vadd.f32 %v21345_v30, %v21347_v8 }
0x2ec2   : > { %v15934_v9 = vpop.f32.mrf.mxu0 }
0x2ec8   : > { %v9773_v35 = vpop.f32.mrf.mxu0 }
0x2ec9   : > { %v9777_v37 = vmul.f32 0.35355338, %v9773_v35  ;;  %v15023_v35 = vld [vmem:[#allocation17] ss:$0 sm:$0xff] }
0x2eca   : > { %v15946_v38 = vpop.f32.mrf.mxu0 }
0x2ecb   : > { %v9778_v20 = vadd.f32 %v21291_v48, %v9777_v37  ;;  %v15024_v38 = vld [vmem:[#allocation16] ss:$0 sm:$0xff] }
0x2ecd   : > { %v9779_v36 = vsel %vm4570_vm2, %v9778_v20, -inf }
0x2ece   : > { %9780 = vmax.xlane.f32.xlu1 %v9779_v36 }
0x2ed0   : > { %v10021_v31 = vpop.f32.mrf.mxu0 }
0x2ed1   : > { %v10025_v43 = vmul.f32 0.35355338, %v10021_v31 }
0x2ed2   : > { %v15965_v42 = vpop.f32.mrf.mxu0 }
0x2ed3   : > { %v10026_v47 = vadd.f32 %v21291_v48, %v10025_v43 }
0x2ed5   : > { %v10027_v51 = vsel %vm4570_vm2, %v10026_v47, -inf }
0x2edf   : > { %9790 = vrot.lane.b32.xlu1 %v21281_v44, %s22172_s2 }
0x2f03   : > { %10028 = vmax.xlane.f32.xlu1 %v10027_v51 }
0x2f14   : > { %10038 = vrot.lane.b32.xlu1 %v21281_v44, %s22173_s10 }
0x2f57   : > { %v9781_v49 = vpop.xlane.xlu1 %9780 }
0x2f58   : > { %v9782_v41 = vsub.f32 %v9778_v20, %v9781_v49 }
0x2f5a   : > { %v9783_v52 = vmul.f32 1.442695, %v9782_v41 }
0x2f5b   : > { %v9791_v56 = vpop.permute.xlu1 %9790 }
0x2f5c   : > { %17100 = vpow2.f32 %v9783_v52  ;;  %v10262_v52 = vld [vmem:[%s22179_s1 + $0x18] sm:$0xff] }
0x2f5d   : > { %15979 = vmatpush3.msra.mxu0 %v10262_v52  ;;  %v10479_v52 = vld [vmem:[#allocation73 + $0x8] sm:$0xff] }
0x2f5e   : > { %15980 = vmatprep.subr.mxu0 %v19485_v28 }
0x2f69   : > { %v17101_v53 = vpop.eup %17100 }
0x2f6a   : > { %v9785_v55 = vsel %vm4570_vm2, %v17101_v53, 0.0 }
0x2f6b   : > { %9786 = vadd.xlane.f32.xlu0 %v9785_v55  ;;  %v10259_v55 = vld [vmem:[%s22179_s1] sm:$0xff] }
0x2f81   : > { %9792 = vrot.lane.b32.xlu0 %v21278_v50, %s22172_s2 }
0x2f8c   : > { %v10029_v40 = vpop.xlane.xlu1 %10028 }
0x2f8d   : > { %v10030_v48 = vsub.f32 %v10026_v47, %v10029_v40  ;;  %v10350_v40 = vld [vmem:[%s22180_s3 + $0x30] sm:$0xff] }
0x2f8f   : > { %v10031_v57 = vmul.f32 1.442695, %v10030_v48  ;;  %v10349_v48 = vld [vmem:[%s22180_s3 + $0x28] sm:$0xff] }
0x2f90   : > { %v10039_v12 = vpop.permute.xlu1 %10038 }
0x2f91   : > { %17102 = vpow2.f32 %v10031_v57  ;;  %v10348_v57 = vld [vmem:[%s22180_s3 + $0x20] sm:$0xff] }
0x2f9e   : > { %v17103_v58 = vpop.eup %17102 }
0x2f9f   : > { %v10033_v44 = vsel %vm4570_vm2, %v17103_v58, 0.0 }
0x2fa0   : > { %10034 = vadd.xlane.f32.xlu0 %v10033_v44 }
0x2fb6   : > { %10040 = vrot.lane.b32.xlu0 %v21278_v50, %s22173_s10 }
0x2ff4   : > { %v9787_v59 = vpop.xlane.xlu0 %9786 }
0x2ff5   : > { %17104 = vrcp.f32 %v9787_v59 }
0x2ff8   : > { %v9793_v62 = vpop.permute.xlu0 %9792 }
0x2ff9   : > { %15948 = vmatpush3.msra.mxu1 %v9793_v62 }
0x2ffa   : > { %15949 = vmatprep.subr.mxu1 %v19485_v28 }
0x2ffb   : > { %15950 = vmatpush3.msra.mxu1 %v9791_v56  ;;  %v10351_v56 = vld [vmem:[%s22180_s3 + $0x38] sm:$0xff] }
0x2ffc   : > { %15954 = vmatprep.subr.mxu1 %v19485_v28 }
0x3002   : > { %v17105_v45 = vpop.eup %17104 }
0x3003   : > { %v9789_v46 = vmul.f32 %v17105_v45, %v17101_v53  ;;  %v10261_v53 = vld [vmem:[%s22179_s1 + $0x10] sm:$0xff] }
0x3004   : > { %15981 = vmatpush3.msra.mxu0 %v10261_v53  ;;  %v10643_v53 = vld [vmem:[#allocation74] sm:$0xff] }
0x3005   : > { %15952 = vmatmul.mubr.msk.f32.vlgmr.msra.gmra.mxu1 %vm4570_vm2, %v9789_v46  ;;  %15982 = vmatprep.subr.mxu0 %v19485_v28  ;;  %v15025_v46 = vld [vmem:[#allocation23] ss:$0 sm:$0xff] }
0x3006   : > { %15955 = vmatpush3.msra.mxu1 %v9206_v0  ;;  %15956 = vmatprep.mubr.msk.f32.mxu1 %vm19486_vm4, %v19485_v28 }
0x3007   : > { %15966 = vmatprep.subr.mxu1 %v19485_v28 }
0x3029   : > { %v10035_v50 = vpop.xlane.xlu0 %10034 }
0x302a   : > { %17106 = vrcp.f32 %v10035_v50  ;;  %v15026_v50 = vld [vmem:[#allocation22] ss:$0 sm:$0xff] }
0x302d   : > { %v10041_v4 = vpop.permute.xlu0 %10040 }
0x3037   : > { %v17107_v2 = vpop.eup %17106 }
0x3038   : > { %v10037_v11 = vmul.f32 %v17107_v2, %v17103_v58  ;;  %v10347_v58 = vld [vmem:[%s22180_s3 + $0x18] sm:$0xff] }
0x30c5   : > { %v9865_v3 = vpop.f32.mrf.mxu1 }
0x30c6   : > { %15957 = vmatmul.mubr.msk.f32.vlgmr.msra.gmra.mxu1 %vm4472_vm1, %v9865_v3 }
0x30c7   : > { %15967 = vmatpush3.msra.mxu1 %v10041_v4  ;;  %v15953_v6 = vpop.f32.mrf.mxu1  ;;  %15970 = vmatprep.mubr.msk.f32.mxu1 %vm19486_vm4, %v19485_v28  ;;  %v10346_v4 = vld [vmem:[%s22180_s3 + $0x10] sm:$0xff] }
0x30c8   : > { %15968 = vmatprep.subr.mxu1 %v19485_v28  ;;  %v10345_v6 = vld [vmem:[%s22180_s3 + $0x8] sm:$0xff] }
0x30c9   : > { %15969 = vmatpush3.msra.mxu1 %v10039_v12  ;;  %v10344_v12 = vld [vmem:[%s22180_s3] sm:$0xff]  ;;  %s22184_s3 = sld [smem:[#allocation208_spill]] }
0x30ca   : > { %15971 = vmatmul.mubr.msk.f32.vlgmr.msra.gmra.mxu1 %vm4570_vm2, %v10037_v11  ;;  %15973 = vmatprep.subr.mxu1 %v19485_v28  ;;  %v15027_v11 = vld [vmem:[#allocation25] ss:$0 sm:$0xff] }
0x30cb   : > { %15975 = vmatprep.mubr.msk.f32.mxu1 %vm19486_vm4, %v19485_v28  ;;  %15974 = vmatpush3.msra.mxu1 %v9207_v14 }
0x30cc   : > { %15989 = vmatprep.subr.mxu1 %v19485_v28 }
0x3186   : > { %v9938_v7 = vpop.f32.mrf.mxu1 }
0x3187   : > { %v9942_v15 = vadd.f32 %v9938_v7, %v9692_v61 }
0x3188   : > { %v15958_v16 = vpop.f32.mrf.mxu1 }
0x3189   : > { %v15029_v16 = vld [vmem:[#allocation26] ss:$0 sm:$0xff] }
0x318a   : > { %v10113_v17 = vpop.f32.mrf.mxu1 }
0x318b   : > { %15976 = vmatmul.mubr.msk.f32.vlgmr.msra.gmra.mxu1 %vm4472_vm1, %v10113_v17 }
0x318c   : > { %v15972_v18 = vpop.f32.mrf.mxu1  ;;  %16005 = vmatprep.mubr.msk.f32.mxu1 %vm19486_vm4, %v19485_v28  ;;  %15990 = vmatpush3.msra.mxu1 %v10351_v56 }
0x318d   : > { %15991 = vmatprep.subr.mxu1 %v19485_v28 }
0x318e   : > { %15992 = vmatpush3.msra.mxu1 %v10350_v40 }
0x318f   : > { %15993 = vmatprep.subr.mxu1 %v19485_v28 }
0x3190   : > { %15994 = vmatpush3.msra.mxu1 %v10349_v48 }
0x3191   : > { %15995 = vmatprep.subr.mxu1 %v19485_v28 }
0x3192   : > { %15996 = vmatpush3.msra.mxu1 %v10348_v57 }
0x3193   : > { %15997 = vmatprep.subr.mxu1 %v19485_v28 }
0x3194   : > { %15998 = vmatpush3.msra.mxu1 %v10347_v58 }
0x3195   : > { %15999 = vmatprep.subr.mxu1 %v19485_v28 }
0x3196   : > { %16000 = vmatpush3.msra.mxu1 %v10346_v4 }
0x3197   : > { %16001 = vmatprep.subr.mxu1 %v19485_v28 }
0x3198   : > { %16002 = vmatpush3.msra.mxu1 %v10345_v6 }
0x3199   : > { %16003 = vmatprep.subr.mxu1 %v19485_v28 }
0x319a   : > { %16004 = vmatpush3.msra.mxu1 %v10344_v12 }
0x319b   : > { %16030 = vmatprep.subr.mxu1 %v19485_v28 }
0x324b   : > { %v10186_v19 = vpop.f32.mrf.mxu1 }
0x324c   : > { %v10190_v34 = vadd.f32 %v10186_v19, %v9942_v15 }
0x324d   : > { %v15977_v22 = vpop.f32.mrf.mxu1 }
0x324e   : > { %v10198_v33 = vadd.f32 %v15022_v21, %v10190_v34 }
0x3250   : > { %v10199_v23 = vadd.f32 %v10198_v33, %v21243_v25 }
0x3252   : > { %v10200_v24 = vsel %vm4208_vm0, %v10199_v23, 0.0 }
0x3253   : > { %10201 = vadd.xlane.f32.xlu1 %v10200_v24 }
0x32dc   : > { %v10202_v27 = vpop.xlane.xlu1 %10201 }
0x32dd   : > { %v10203_v32 = vmul.f32 0.03125, %v10202_v27 }
0x32df   : > { %v10204_v39 = vsub.f32 %v10199_v23, %v10203_v32 }
0x32e1   : > { %v10205_v54 = vmul.f32 %v10204_v39, %v10204_v39 }
0x32e3   : > { %v10206_v29 = vsel %vm4208_vm0, %v10205_v54, 0.0 }
0x32e4   : > { %10207 = vadd.xlane.f32.xlu0 %v10206_v29 }
0x336d   : > { %v10208_v30 = vpop.xlane.xlu0 %10207 }
0x336e   : > { %v10209_v26 = vmul.f32 0.03125, %v10208_v30  ;;  %v15031_v30 = vld [vmem:[#allocation29] ss:$0 sm:$0xff] }
0x3370   : > { %v10210_v8 = vadd.f32 1e-05, %v10209_v26 }
0x3372   : > { %17108 = vrsqrt.f32 %v10210_v8  ;;  %v15032_v8 = vld [vmem:[#allocation28] ss:$0 sm:$0xff] }
0x337f   : > { %v17109_v9 = vpop.eup %17108 }
0x3380   : > { %v10212_v37 = vmul.f32 %v17109_v9, %v10204_v39 }
0x3382   : > { %v10220_v20 = vmul.f32 %v15023_v35, %v10212_v37 }
0x3384   : > { %v10228_v36 = vadd.f32 %v15024_v38, %v10220_v20 }
0x3386   : > { %v10229_v31 = vadd.f32 %v10228_v36, %v21243_v25  ;;  %v10260_v25 = vld [vmem:[%s22179_s1 + $0x8] sm:$0xff]  ;;  %s22181_s1 = sld [smem:[#allocation225_spill]] }
0x3387   : > { %15983 = vmatpush3.msra.mxu0 %v10260_v25  ;;  %v10478_v25 = vld [vmem:[#allocation73] sm:$0xff] }
0x3388   : > { %v10230_v42 = vsel %vm4208_vm0, %v10229_v31, 0.0  ;;  %15984 = vmatprep.subr.mxu0 %v19485_v28 }
0x3389   : > { %10231 = vadd.xlane.f32.xlu0 %v10230_v42  ;;  %15985 = vmatpush3.msra.mxu0 %v10259_v55 }
0x338a   : > { %16008 = vmatprep.subr.mxu0 %v19485_v28 }
0x3412   : > { %v10232_v43 = vpop.xlane.xlu0 %10231 }
0x3413   : > { %v10233_v47 = vmul.f32 0.03125, %v10232_v43  ;;  %v10646_v43 = vld [vmem:[#allocation74 + $0x18] sm:$0xff] }
0x3415   : > { %v10234_v51 = vsub.f32 %v10229_v31, %v10233_v47  ;;  %v10481_v47 = vld [vmem:[#allocation73 + $0x18] sm:$0xff] }
0x3417   : > { %v10235_v49 = vmul.f32 %v10234_v51, %v10234_v51 }
0x3419   : > { %v10236_v41 = vsel %vm4208_vm0, %v10235_v49, 0.0  ;;  %v10480_v49 = vld [vmem:[#allocation73 + $0x10] sm:$0xff] }
0x341a   : > { %10237 = vadd.xlane.f32.xlu1 %v10236_v41  ;;  %v10644_v41 = vld [vmem:[#allocation74 + $0x8] sm:$0xff] }
0x34a3   : > { %v10238_v44 = vpop.xlane.xlu1 %10237 }
0x34a4   : > { %v10239_v59 = vmul.f32 0.03125, %v10238_v44 }
0x34a6   : > { %v10240_v62 = vadd.f32 1e-05, %v10239_v59  ;;  %v21440_v59 = vld [vmem:[%s22165_s22] sm:$0xff] }
0x34a8   : > { %17110 = vrsqrt.f32 %v10240_v62 }
0x34b5   : > { %v17111_v45 = vpop.eup %17110 }
0x34b6   : > { %v10242_v0 = vmul.f32 %v17111_v45, %v10234_v51  ;;  %v10645_v51 = vld [vmem:[#allocation74 + $0x10] sm:$0xff]  ;;  %v10565_v45 = vld [vmem:[%s22181_s1 + $0x18] sm:$0xff] }
0x34b8   : > { %v10250_v2 = vmul.f32 %v15025_v46, %v10242_v0  ;;  %v10562_v46 = vld [vmem:[%s22181_s1] sm:$0xff]  ;;  %v15037_v0 = vld [vmem:[#allocation67] ss:$0 sm:$0xff] }
0x34ba   : > { %v10258_v3 = vadd.f32 %v15026_v50, %v10250_v2  ;;  %v15033_v2 = vld [vmem:[#allocation65] ss:$0 sm:$0xff] }
0x34bc   : > { %15987 = vmatmul.mubr.msk.f32.vlgmr.msra.gmra.mxu0 %vm4208_vm0, %v10258_v3 }
0x34bd   : > { %16016 = vmatprep.mubr.msk.f32.mxu0 %vm19486_vm4, %v19485_v28  ;;  %16009 = vmatpush3.msra.mxu0 %v10481_v47 }
0x34be   : > { %16010 = vmatprep.subr.mxu0 %v19485_v28 }
0x34bf   : > { %16011 = vmatpush3.msra.mxu0 %v10480_v49 }
0x34c0   : > { %16012 = vmatprep.subr.mxu0 %v19485_v28 }
0x34c1   : > { %16013 = vmatpush3.msra.mxu0 %v10479_v52 }
0x34c2   : > { %16014 = vmatprep.subr.mxu0 %v19485_v28 }
0x34c3   : > { %16015 = vmatpush3.msra.mxu0 %v10478_v25 }
0x34c4   : > { %16019 = vmatprep.subr.mxu0 %v19485_v28 }
0x357c   : > { %v10339_v14 = vpop.f32.mrf.mxu0 }
0x357d   : > { %v10340_v61 = vadd.f32 %v15027_v11, %v10339_v14  ;;  %v15035_v14 = vld [vmem:[#allocation62] ss:$0 sm:$0xff] }
0x357e   : > { %v15988_v7 = vpop.f32.mrf.mxu0 }
0x357f   : > { %v10343_v15 = vmax.f32 %v10340_v61, 0.0 }
0x3581   : > { %16006 = vmatmul.mubr.msk.f32.vlgmr.msra.gmra.mxu1 %vm5781_vm3, %v10343_v15 }
0x3582   : > { %16038 = vmatprep.mubr.msk.f32.mxu1 %vm19486_vm4, %v19485_v28  ;;  %16031 = vmatpush3.msra.mxu1 %v10646_v43 }
0x3583   : > { %16032 = vmatprep.subr.mxu1 %v19485_v28 }
0x3584   : > { %16033 = vmatpush3.msra.mxu1 %v10645_v51  ;;  %v10727_v51 = vld [vmem:[#allocation71] sm:$0xff] }
0x3585   : > { %16034 = vmatprep.subr.mxu1 %v19485_v28 }
0x3586   : > { %16035 = vmatpush3.msra.mxu1 %v10644_v41 }
0x3587   : > { %16036 = vmatprep.subr.mxu1 %v19485_v28 }
0x3588   : > { %16037 = vmatpush3.msra.mxu1 %v10643_v53 }
0x3589   : > { %16046 = vmatprep.subr.mxu1 %v19485_v28 }
0x3641   : > { %v10428_v17 = vpop.f32.mrf.mxu1 }
0x3642   : > { %v10429_v18 = vadd.f32 %v15029_v16, %v10428_v17 }
0x3643   : > { %v16007_v19 = vpop.f32.mrf.mxu1 }
0x3644   : > { %v10432_v21 = vadd.f32 %v10429_v18, %v10258_v3 }
0x3646   : > { %v10433_v34 = vsel %vm4208_vm0, %v10432_v21, 0.0 }
0x3647   : > { %10434 = vadd.xlane.f32.xlu0 %v10433_v34 }
0x36d0   : > { %v10435_v22 = vpop.xlane.xlu0 %10434 }
0x36d1   : > { %v10436_v33 = vmul.f32 0.03125, %v10435_v22 }
0x36d3   : > { %v10437_v23 = vsub.f32 %v10432_v21, %v10436_v33 }
0x36d5   : > { %v10438_v24 = vmul.f32 %v10437_v23, %v10437_v23 }
0x36d7   : > { %v10439_v27 = vsel %vm4208_vm0, %v10438_v24, 0.0 }
0x36d8   : > { %10440 = vadd.xlane.f32.xlu1 %v10439_v27 }
0x3761   : > { %v10441_v32 = vpop.xlane.xlu1 %10440 }
0x3762   : > { %v10442_v39 = vmul.f32 0.03125, %v10441_v32 }
0x3764   : > { %v10443_v54 = vadd.f32 1e-05, %v10442_v39 }
0x3766   : > { %17112 = vrsqrt.f32 %v10443_v54 }
0x3773   : > { %v17113_v29 = vpop.eup %17112 }
0x3774   : > { %v10445_v26 = vmul.f32 %v17113_v29, %v10437_v23 }
0x3776   : > { %v10453_v9 = vmul.f32 %v15031_v30, %v10445_v26 }
0x3778   : > { %v10461_v35 = vadd.f32 %v15032_v8, %v10453_v9 }
0x377a   : > { %v10462_v37 = vsel %vm4208_vm0, %v10461_v35, 0.0 }
0x377b   : > { %10463 = vadd.xlane.f32.xlu0 %v10462_v37 }
0x3804   : > { %v10464_v38 = vpop.xlane.xlu0 %10463 }
0x3805   : > { %v10465_v20 = vmul.f32 0.03125, %v10464_v38 }
0x3807   : > { %v10466_v36 = vsub.f32 %v10461_v35, %v10465_v20 }
0x3809   : > { %v10467_v31 = vmul.f32 %v10466_v36, %v10466_v36 }
0x380b   : > { %v10468_v42 = vsel %vm4208_vm0, %v10467_v31, 0.0  ;;  %v10728_v31 = vld [vmem:[#allocation71 + $0x8] sm:$0xff] }
0x380c   : > { %10469 = vadd.xlane.f32.xlu1 %v10468_v42 }
0x3895   : > { %v10470_v55 = vpop.xlane.xlu1 %10469 }
0x3896   : > { %v10471_v56 = vmul.f32 0.03125, %v10470_v55 }
0x3898   : > { %v10472_v40 = vadd.f32 1e-05, %v10471_v56 }
0x389a   : > { %17114 = vrsqrt.f32 %v10472_v40 }
0x38a7   : > { %v17115_v48 = vpop.eup %17114 }
0x38a8   : > { %v10474_v57 = vmul.f32 %v17115_v48, %v10466_v36 }
0x38aa   : > { %v10475_v58 = vmul.f32 %v21208_v63, %v10474_v57  ;;  %v10564_v63 = vld [vmem:[%s22181_s1 + $0x10] sm:$0xff] }
0x38ac   : > { %v21435_v44 = vadd.f32 %v21210_v1, %v10475_v58  ;;  %v10563_v1 = vld [vmem:[%s22181_s1 + $0x8] sm:$0xff]  ;;  %s22182_s1 = sld [smem:[#allocation205_spill]] }
0x38ae   : > { %16039 = vmatmul.mubr.msk.f32.vlgmr.msra.gmra.mxu1 %vm4208_vm0, %v21435_v44  ;;  %v21444_v62 = vadd.f32 %v21440_v59, %v21435_v44 }
0x38af   : > { %16048 = vmatprep.mubr.msk.f32.mxu1 %vm19486_vm4, %v19485_v28 }
0x38b0   : > { %16017 = vmatmul.mubr.msk.f32.vlgmr.msra.gmra.mxu0 %vm4208_vm0, %v21444_v62 }
0x38b1   : > { %16020 = vmatpush3.msra.mxu0 %v10565_v45  ;;  %16027 = vmatprep.mubr.msk.f32.mxu0 %vm19486_vm4, %v19485_v28 }
0x38b2   : > { %16021 = vmatprep.subr.mxu0 %v19485_v28 }
0x38b3   : > { %16022 = vmatpush3.msra.mxu0 %v10564_v63 }
0x38b4   : > { %16023 = vmatprep.subr.mxu0 %v19485_v28 }
0x38b5   : > { %16024 = vmatpush3.msra.mxu0 %v10563_v1 }
0x38b6   : > { %16025 = vmatprep.subr.mxu0 %v19485_v28 }
0x38b7   : > { %16026 = vmatpush3.msra.mxu0 %v10562_v46 }
0x38b8   : > { %16028 = vmatmul.mubr.msk.f32.vlgmr.msra.gmra.mxu0 %vm4208_vm0, %v21444_v62  ;;  %16041 = vmatprep.subr.mxu0 %v19485_v28 }
0x38b9   : > { %16043 = vmatprep.mubr.msk.f32.mxu0 %vm19486_vm4, %v19485_v28 }
0x396e   : > { %v10723_v50 = vpop.f32.mrf.mxu1 }
0x396f   : > { %v21464_v3 = vadd.f32 %v15037_v0, %v10723_v50 }
0x3970   : > { %v10558_v4 = vpop.f32.mrf.mxu0  ;;  %v16040_v6 = vpop.f32.mrf.mxu1 }
0x3971   : > { %v21466_v12 = vadd.f32 %v15033_v2, %v10558_v4  ;;  %16047 = vmatpush3.msra.mxu1 %v21464_v3 }
0x3972   : > { %v16018_v11 = vpop.f32.mrf.mxu0  ;;  %16056 = vmatprep.subr.mxu1 %v19485_v28 }
0x3973   : > { %10892 = vrot.lane.b32.xlu1 %v21466_v12, %s22169_s0 }
0x3978   : > { %v10639_v61 = vpop.f32.mrf.mxu0 }
0x3979   : > { %v21472_v7 = vadd.f32 %v15035_v14, %v10639_v61 }
0x397a   : > { %v16029_v15 = vpop.f32.mrf.mxu0 }
0x397b   : > { %10894 = vrot.lane.b32.xlu0 %v21472_v7, %s22169_s0  ;;  %16042 = vmatpush3.xpose.msk.msra.mxu0 %vm4472_vm1, %v21472_v7 }
0x397c   : > { %16051 = vmatprep.subr.mxu0 %v19485_v28 }
0x397e   : > { %16044 = vmatmul.mubr.msk.f32.vlgmr.msra.gmra.mxu0 %vm4472_vm1, %v21466_v12 }
0x397f   : > { %16053 = vmatprep.mubr.msk.f32.mxu0 %vm19486_vm4, %v19485_v28 }
0x39e5   : > { %v10893_v17 = vpop.permute.xlu1 %10892 }
0x39ed   : > { %v10895_v16 = vpop.permute.xlu0 %10894 }
0x39ee   : > { %16052 = vmatpush3.xpose.msk.msra.mxu0 %vm4472_vm1, %v10895_v16 }
0x39ef   : > { %16061 = vmatprep.subr.mxu0 %v19485_v28 }
0x39f1   : > { %16054 = vmatmul.mubr.msk.f32.vlgmr.msra.gmra.mxu0 %vm4472_vm1, %v10893_v17 }
0x39f2   : > { %16063 = vmatprep.mubr.msk.f32.mxu0 %vm19486_vm4, %v19485_v28  ;;  %16062 = vmatpush3.msra.mxu0 %v10728_v31  ;;  %v11838_v31 = vld [vmem:[%s22182_s1] sm:$0xff] }
0x39f3   : > { %16071 = vmatprep.subr.mxu0 %v19485_v28 }
0x3a3e   : > { %v10803_v18 = vpop.f32.mrf.mxu0 }
0x3a3f   : > { %v10807_v19 = vmul.f32 0.35355338, %v10803_v18 }
0x3a40   : > { %v16045_v21 = vpop.f32.mrf.mxu0 }
0x3a41   : > { %v10808_v34 = vsel %vm4472_vm1, %v10807_v19, -inf }
0x3a42   : > { %10809 = vmax.xlane.f32.xlu1 %v10808_v34 }
0x3ab1   : > { %v10966_v22 = vpop.f32.mrf.mxu0 }
0x3ab2   : > { %v10970_v33 = vmul.f32 0.35355338, %v10966_v22 }
0x3ab3   : > { %v16055_v23 = vpop.f32.mrf.mxu0 }
0x3ab4   : > { %v10971_v24 = vsel %vm4472_vm1, %v10970_v33, -inf }
0x3ab5   : > { %10972 = vmax.xlane.f32.xlu0 %v10971_v24 }
0x3acb   : > { %v10810_v27 = vpop.xlane.xlu1 %10809 }
0x3acc   : > { %v10811_v32 = vsub.f32 %v10807_v19, %v10810_v27 }
0x3ace   : > { %v10812_v39 = vmul.f32 1.442695, %v10811_v32  ;;  %v10730_v32 = vld [vmem:[#allocation71 + $0x18] sm:$0xff] }
0x3ad0   : > { %17116 = vpow2.f32 %v10812_v39 }
0x3add   : > { %v17117_v54 = vpop.eup %17116 }
0x3ade   : > { %v10814_v29 = vsel %vm4472_vm1, %v17117_v54, 0.0 }
0x3adf   : > { %10815 = vadd.xlane.f32.xlu0 %v10814_v29 }
0x3af5   : > { %10983 = vrot.lane.b32.xlu0 %v21464_v3, %s22169_s0 }
0x3b3e   : > { %v10973_v30 = vpop.xlane.xlu0 %10972 }
0x3b3f   : > { %v10974_v26 = vsub.f32 %v10970_v33, %v10973_v30 }
0x3b41   : > { %v10975_v8 = vmul.f32 1.442695, %v10974_v26 }
0x3b43   : > { %17118 = vpow2.f32 %v10975_v8 }
0x3b50   : > { %v17119_v9 = vpop.eup %17118 }
0x3b51   : > { %v10977_v35 = vsel %vm4472_vm1, %v17119_v9, 0.0 }
0x3b52   : > { %10978 = vadd.xlane.f32.xlu1 %v10977_v35 }
0x3b63   : > { %11207 = vrot.lane.b32.xlu1 %v21472_v7, %s22172_s2 }
0x3b67   : > { %11205 = vrot.lane.b32.xlu1 %v21466_v12, %s22172_s2 }
0x3b68   : > { %v10816_v37 = vpop.xlane.xlu0 %10815 }
0x3b69   : > { %17120 = vrcp.f32 %v10816_v37 }
0x3b6c   : > { %v10984_v36 = vpop.permute.xlu0 %10983 }
0x3b76   : > { %v17121_v38 = vpop.eup %17120 }
0x3b77   : > { %v10818_v20 = vmul.f32 %v17121_v38, %v17117_v54  ;;  %v11840_v38 = vld [vmem:[%s22182_s1 + $0x10] sm:$0xff] }
0x3b79   : > { %16049 = vmatmul.mubr.msk.f32.vlgmr.msra.gmra.mxu1 %vm4472_vm1, %v10818_v20 }
0x3b7a   : > { %16057 = vmatpush3.msra.mxu1 %v10984_v36  ;;  %16058 = vmatprep.mubr.msk.f32.mxu1 %vm19486_vm4, %v19485_v28  ;;  %v11839_v36 = vld [vmem:[%s22182_s1 + $0x8] sm:$0xff] }
0x3b7b   : > { %16066 = vmatprep.subr.mxu1 %v19485_v28 }
0x3bdb   : > { %v10979_v42 = vpop.xlane.xlu1 %10978 }
0x3bdc   : > { %17122 = vrcp.f32 %v10979_v42 }
0x3bdf   : > { %v11208_v52 = vpop.permute.xlu1 %11207 }
0x3be3   : > { %v11206_v55 = vpop.permute.xlu1 %11205 }
0x3be9   : > { %v17123_v43 = vpop.eup %17122 }
0x3bea   : > { %v10981_v47 = vmul.f32 %v17123_v43, %v17119_v9  ;;  %v15055_v43 = vld [vmem:[#allocation64] ss:$0 sm:$0xff] }
0x3bec   : > { %16059 = vmatmul.mubr.msk.f32.vlgmr.msra.gmra.mxu1 %vm4472_vm1, %v10981_v47 }
0x3bed   : > { %16067 = vmatpush3.msra.mxu1 %v10727_v51  ;;  %16068 = vmatprep.mubr.msk.f32.mxu1 %vm19486_vm4, %v19485_v28 }
0x3bee   : > { %16076 = vmatprep.subr.mxu1 %v19485_v28 }
0x3c39   : > { %v10888_v49 = vpop.f32.mrf.mxu1 }
0x3c3a   : > { %16069 = vmatmul.mubr.msk.f32.vlgmr.msra.gmra.mxu1 %vm4472_vm1, %v10888_v49 }
0x3c3b   : > { %v16050_v41 = vpop.f32.mrf.mxu1  ;;  %16078 = vmatprep.mubr.msk.f32.mxu1 %vm19486_vm4, %v19485_v28 }
0x3c3c   : > { %v15062_v41 = vld [vmem:[#allocation40] ss:$0 sm:$0xff] }
0x3cac   : > { %v11055_v53 = vpop.f32.mrf.mxu1 }
0x3cad   : > { %16064 = vmatmul.mubr.msk.f32.vlgmr.msra.gmra.mxu0 %vm4472_vm1, %v11055_v53 }
0x3cae   : > { %16072 = vmatpush3.xpose.msk.msra.mxu0 %vm4472_vm1, %v11208_v52  ;;  %v16060_v25 = vpop.f32.mrf.mxu1  ;;  %16073 = vmatprep.mubr.msk.f32.mxu0 %vm19486_vm4, %v19485_v28 }
0x3caf   : > { %16081 = vmatprep.subr.mxu0 %v19485_v28 }
0x3cb1   : > { %16074 = vmatmul.mubr.msk.f32.vlgmr.msra.gmra.mxu0 %vm4472_vm1, %v11206_v55 }
0x3cb2   : > { %16083 = vmatprep.mubr.msk.f32.mxu0 %vm19486_vm4, %v19485_v28 }
0x3cfa   : > { %v11201_v56 = vpop.f32.mrf.mxu1 }
0x3cfc   : > { %v16070_v40 = vpop.f32.mrf.mxu1 }
0x3d6d   : > { %v11128_v48 = vpop.f32.mrf.mxu0 }
0x3d6e   : > { %v11202_v39 = vadd.f32 %v11201_v56, %v11128_v48 }
0x3d6f   : > { %v16065_v57 = vpop.f32.mrf.mxu0 }
0x3d71   : > { %v11279_v58 = vpop.f32.mrf.mxu0 }
0x3d72   : > { %v11283_v45 = vmul.f32 0.35355338, %v11279_v58 }
0x3d73   : > { %v16075_v63 = vpop.f32.mrf.mxu0 }
0x3d74   : > { %v11284_v1 = vsel %vm4472_vm1, %v11283_v45, -inf }
0x3d75   : > { %11285 = vmax.xlane.f32.xlu0 %v11284_v1 }
0x3d8b   : > { %11295 = vrot.lane.b32.xlu0 %v21464_v3, %s22172_s2 }
0x3d8f   : > { %11445 = vrot.lane.b32.xlu0 %v21466_v12, %s22173_s10 }
0x3dfe   : > { %v11286_v46 = vpop.xlane.xlu0 %11285 }
0x3dff   : > { %v11287_v0 = vsub.f32 %v11283_v45, %v11286_v46  ;;  %v15056_v46 = vld [vmem:[#allocation70] ss:$0 sm:$0xff] }
0x3e01   : > { %v11288_v50 = vmul.f32 1.442695, %v11287_v0 }
0x3e02   : > { %v11296_v2 = vpop.permute.xlu0 %11295 }
0x3e03   : > { %17124 = vpow2.f32 %v11288_v50  ;;  %16077 = vmatpush3.msra.mxu1 %v11296_v2  ;;  %v15057_v50 = vld [vmem:[#allocation68] ss:$0 sm:$0xff] }
0x3e04   : > { %16086 = vmatprep.subr.mxu1 %v19485_v28 }
0x3e06   : > { %v11446_v15 = vpop.permute.xlu0 %11445 }
0x3e10   : > { %v17125_v4 = vpop.eup %17124 }
0x3e11   : > { %v11290_v6 = vsel %vm4472_vm1, %v17125_v4, 0.0 }
0x3e12   : > { %11291 = vadd.xlane.f32.xlu1 %v11290_v6 }
0x3e23   : > { %11447 = vrot.lane.b32.xlu1 %v21472_v7, %s22173_s10  ;;  %v10729_v7 = vld [vmem:[#allocation71 + $0x10] sm:$0xff] }
0x3e24   : > { %16082 = vmatpush3.msra.mxu0 %v10729_v7 }
0x3e25   : > { %16091 = vmatprep.subr.mxu0 %v19485_v28 }
0x3e9b   : > { %v11292_v11 = vpop.xlane.xlu1 %11291 }
0x3e9c   : > { %17126 = vrcp.f32 %v11292_v11 }
0x3e9f   : > { %v11448_v12 = vpop.permute.xlu1 %11447 }
0x3ea9   : > { %v17127_v14 = vpop.eup %17126 }
0x3eaa   : > { %v11294_v61 = vmul.f32 %v17127_v14, %v17125_v4 }
0x3eac   : > { %16079 = vmatmul.mubr.msk.f32.vlgmr.msra.gmra.mxu1 %vm4472_vm1, %v11294_v61 }
0x3ead   : > { %16087 = vmatpush3.xpose.msk.msra.mxu1 %vm4472_vm1, %v11448_v12  ;;  %16088 = vmatprep.mubr.msk.f32.mxu1 %vm19486_vm4, %v19485_v28 }
0x3eae   : > { %16096 = vmatprep.subr.mxu1 %v19485_v28 }
0x3eb0   : > { %16089 = vmatmul.mubr.msk.f32.vlgmr.msra.gmra.mxu1 %vm4472_vm1, %v11446_v15 }
0x3eb1   : > { %16098 = vmatprep.mubr.msk.f32.mxu1 %vm19486_vm4, %v19485_v28  ;;  %16097 = vmatpush3.msra.mxu1 %v10730_v32 }
0x3f6c   : > { %v11367_v16 = vpop.f32.mrf.mxu1 }
0x3f6d   : > { %16084 = vmatmul.mubr.msk.f32.vlgmr.msra.gmra.mxu0 %vm4472_vm1, %v11367_v16 }
0x3f6e   : > { %v16080_v17 = vpop.f32.mrf.mxu1  ;;  %16093 = vmatprep.mubr.msk.f32.mxu0 %vm19486_vm4, %v19485_v28 }
0x3f70   : > { %v11519_v18 = vpop.f32.mrf.mxu1 }
0x3f71   : > { %v11523_v19 = vmul.f32 0.35355338, %v11519_v18 }
0x3f72   : > { %v16090_v21 = vpop.f32.mrf.mxu1 }
0x3f73   : > { %v11524_v34 = vsel %vm4472_vm1, %v11523_v19, -inf }
0x3f74   : > { %11525 = vmax.xlane.f32.xlu1 %v11524_v34 }
0x3ffd   : > { %v11526_v22 = vpop.xlane.xlu1 %11525 }
0x3ffe   : > { %v11527_v33 = vsub.f32 %v11523_v19, %v11526_v22  ;;  %v11927_v19 = vld [vmem:[%s22184_s3 + $0x18] sm:$0xff] }
0x4000   : > { %v11528_v23 = vmul.f32 1.442695, %v11527_v33 }
0x4002   : > { %17128 = vpow2.f32 %v11528_v23  ;;  %v15058_v23 = vld [vmem:[#allocation50] ss:$0 sm:$0xff] }
0x400f   : > { %v17129_v24 = vpop.eup %17128 }
0x4010   : > { %v11530_v27 = vsel %vm4472_vm1, %v17129_v24, 0.0 }
0x4011   : > { %11531 = vadd.xlane.f32.xlu0 %v11530_v27  ;;  %v15059_v27 = vld [vmem:[#allocation49] ss:$0 sm:$0xff] }
0x4027   : > { %11535 = vrot.lane.b32.xlu0 %v21464_v3, %s22173_s10  ;;  %v11841_v3 = vld [vmem:[%s22182_s1 + $0x18] sm:$0xff]  ;;  %s22183_s1 = sld [smem:[#allocation207_spill]] }
0x4028   : > { %16112 = vmatprep.subr.mxu1 %v11841_v3 }
0x402d   : > { %v11440_v54 = vpop.f32.mrf.mxu0  ;;  %v11757_v16 = vld [vmem:[%s22183_s1 + $0x18] sm:$0xff]  ;;  %v11756_v17 = vld [vmem:[%s22183_s1 + $0x10] sm:$0xff]  ;;  %v11754_v18 = vld [vmem:[%s22183_s1] sm:$0xff] }
0x402e   : > { %v11444_v29 = vadd.f32 %v11440_v54, %v11202_v39 }
0x402f   : > { %v16085_v30 = vpop.f32.mrf.mxu0 }
0x4030   : > { %v11925_v30 = vld [vmem:[%s22184_s3 + $0x8] sm:$0xff] }
0x409a   : > { %v11532_v26 = vpop.xlane.xlu0 %11531 }
0x409b   : > { %17130 = vrcp.f32 %v11532_v26  ;;  %v11924_v26 = vld [vmem:[%s22184_s3] sm:$0xff] }
0x409e   : > { %v11536_v8 = vpop.permute.xlu0 %11535 }
0x409f   : > { %16092 = vmatpush3.msra.mxu0 %v11536_v8  ;;  %v15060_v8 = vld [vmem:[#allocation43] ss:$0 sm:$0xff] }
0x40a0   : > { %16101 = vmatprep.subr.mxu0 %v19485_v28 }
0x40a8   : > { %v17131_v9 = vpop.eup %17130 }
0x40a9   : > { %v11534_v35 = vmul.f32 %v17131_v9, %v17129_v24 }
0x40ab   : > { %16094 = vmatmul.mubr.msk.f32.vlgmr.msra.gmra.mxu0 %vm4472_vm1, %v11534_v35 }
0x40ac   : > { %16109 = vmatprep.mubr.msk.f32.mxu0 %vm19486_vm4, %v19485_v28  ;;  %16102 = vmatpush3.msra.mxu0 %v11757_v16 }
0x40ad   : > { %16103 = vmatprep.subr.mxu0 %v19485_v28 }
0x40ae   : > { %16104 = vmatpush3.msra.mxu0 %v11756_v17 }
0x40af   : > { %16105 = vmatprep.subr.mxu0 %v19485_v28 }
0x416b   : > { %v11607_v37 = vpop.f32.mrf.mxu0 }
0x416c   : > { %16099 = vmatmul.mubr.msk.f32.vlgmr.msra.gmra.mxu1 %vm4472_vm1, %v11607_v37 }
0x416d   : > { %16113 = vmatpush3.msra.mxu1 %v11841_v3  ;;  %v16095_v20 = vpop.f32.mrf.mxu0  ;;  %16120 = vmatprep.mubr.msk.f32.mxu1 %vm4208_vm0, %v21219_v10 }
0x416e   : > { %16114 = vmatprep.subr.mxu1 %v11840_v38 }
0x416f   : > { %16115 = vmatpush3.msra.mxu1 %v11840_v38 }
0x4170   : > { %16116 = vmatprep.subr.mxu1 %v11839_v36 }
0x4171   : > { %16117 = vmatpush3.msra.mxu1 %v11839_v36 }
0x4172   : > { %16118 = vmatprep.subr.mxu1 %v11838_v31 }
0x4173   : > { %16119 = vmatpush3.msra.mxu1 %v11838_v31 }
0x4174   : > { %16121 = vmatmul.mubr.msk.f32.vlgmr.msra.gmra.mxu1 %vm4208_vm0, %v21228_v13  ;;  %16134 = vmatprep.subr.mxu1 %v19485_v28 }
0x4175   : > { %16138 = vmatprep.mubr.msk.f32.mxu1 %vm19486_vm4, %v19485_v28 }
0x422c   : > { %v11680_v42 = vpop.f32.mrf.mxu1 }
0x422d   : > { %v11684_v47 = vadd.f32 %v11680_v42, %v11444_v29  ;;  %v11926_v29 = vld [vmem:[%s22184_s3 + $0x10] sm:$0xff] }
0x422e   : > { %v16100_v10 = vpop.f32.mrf.mxu1 }
0x422f   : > { %v11692_v51 = vadd.f32 %v15055_v43, %v11684_v47 }
0x4231   : > { %v11693_v49 = vadd.f32 %v11692_v51, %v21444_v62  ;;  %v21622_v51 = vld [vmem:[%s20739_s26] ss:$0 sm:$0xff]  ;;  %s22185_s26 = sld [smem:[#allocation206_spill]] }
0x4233   : > { %v11694_v52 = vsel %vm4208_vm0, %v11693_v49, 0.0 }
0x4234   : > { %v16122_v53 = vpop.f32.mrf.mxu1  ;;  %11695 = vadd.xlane.f32.xlu1 %v11694_v52 }
0x4235   : > { %v21561_v25 = vadd.f32 %v16122_v53, %v15062_v41 }
0x4236   : > { %v11915_v13 = vpop.f32.mrf.mxu1 }
0x4237   : > { %v21563_v55 = vadd.f32 %v15062_v41, %v11915_v13  ;;  %16135 = vmatpush3.xpose.msk.msra.mxu1 %vm4472_vm1, %v21561_v25 }
0x4238   : > { %16136 = vmatprep.subr.mxu1 %v19485_v28 }
0x4239   : > { %12181 = vrot.lane.b32.xlu0 %v21563_v55, %s22169_s0 }
0x423b   : > { %16137 = vmatpush3.xpose.msk.msra.mxu1 %vm4472_vm1, %v21563_v55 }
0x423c   : > { %16148 = vmatprep.subr.mxu1 %v19485_v28 }
0x42ab   : > { %v12182_v37 = vpop.permute.xlu0 %12181 }
0x42bd   : > { %v11696_v62 = vpop.xlane.xlu1 %11695 }
0x42be   : > { %v11697_v56 = vmul.f32 0.03125, %v11696_v62 }
0x42c0   : > { %v11698_v40 = vsub.f32 %v11693_v49, %v11697_v56 }
0x42c2   : > { %v11699_v48 = vmul.f32 %v11698_v40, %v11698_v40 }
0x42c4   : > { %v11700_v57 = vsel %vm4208_vm0, %v11699_v48, 0.0 }
0x42c5   : > { %11701 = vadd.xlane.f32.xlu1 %v11700_v57 }
0x434e   : > { %v11702_v58 = vpop.xlane.xlu1 %11701 }
0x434f   : > { %v11703_v45 = vmul.f32 0.03125, %v11702_v58 }
0x4351   : > { %v11704_v63 = vadd.f32 1e-05, %v11703_v45 }
0x4353   : > { %17132 = vrsqrt.f32 %v11704_v63 }
0x4360   : > { %v17133_v1 = vpop.eup %17132 }
0x4361   : > { %v11706_v0 = vmul.f32 %v17133_v1, %v11698_v40 }
0x4363   : > { %v11714_v2 = vmul.f32 %v15056_v46, %v11706_v0 }
0x4365   : > { %v11722_v4 = vadd.f32 %v15057_v50, %v11714_v2 }
0x4367   : > { %v11723_v6 = vadd.f32 %v11722_v4, %v21435_v44  ;;  %v11755_v44 = vld [vmem:[%s22183_s1 + $0x8] sm:$0xff] }
0x4368   : > { %16106 = vmatpush3.msra.mxu0 %v11755_v44 }
0x4369   : > { %v11724_v11 = vsel %vm4208_vm0, %v11723_v6, 0.0  ;;  %16107 = vmatprep.subr.mxu0 %v19485_v28 }
0x436a   : > { %11725 = vadd.xlane.f32.xlu1 %v11724_v11  ;;  %16108 = vmatpush3.msra.mxu0 %v11754_v18  ;;  %v12010_v11 = vld [vmem:[%s22185_s26] sm:$0xff] }
0x436b   : > { %16123 = vmatprep.subr.mxu0 %v11927_v19 }
0x43f3   : > { %v11726_v14 = vpop.xlane.xlu1 %11725 }
0x43f4   : > { %v11727_v61 = vmul.f32 0.03125, %v11726_v14 }
0x43f6   : > { %v11728_v12 = vsub.f32 %v11723_v6, %v11727_v61 }
0x43f8   : > { %v11729_v15 = vmul.f32 %v11728_v12, %v11728_v12 }
0x43fa   : > { %v11730_v7 = vsel %vm4208_vm0, %v11729_v15, 0.0  ;;  %v12011_v15 = vld [vmem:[%s22185_s26 + $0x8] sm:$0xff] }
0x43fb   : > { %11731 = vadd.xlane.f32.xlu1 %v11730_v7 }
0x440c   : > { %12183 = vrot.lane.b32.xlu1 %v21561_v25, %s22169_s0 }
0x4484   : > { %v11732_v21 = vpop.xlane.xlu1 %11731 }
0x4485   : > { %v11733_v34 = vmul.f32 0.03125, %v11732_v21 }
0x4487   : > { %v11734_v22 = vadd.f32 1e-05, %v11733_v34 }
0x4488   : > { %v12184_v3 = vpop.permute.xlu1 %12183 }
0x4489   : > { %17134 = vrsqrt.f32 %v11734_v22 }
0x4496   : > { %v17135_v33 = vpop.eup %17134 }
0x4497   : > { %v11736_v24 = vmul.f32 %v17135_v33, %v11728_v12 }
0x4499   : > { %v11744_v32 = vmul.f32 %v15058_v23, %v11736_v24 }
0x449b   : > { %v11752_v39 = vadd.f32 %v15059_v27, %v11744_v32 }
0x449d   : > { %v21588_v54 = vadd.f32 %v21440_v59, %v11752_v39 }
0x449f   : > { %16110 = vmatmul.mubr.msk.f32.vlgmr.msra.gmra.mxu0 %vm4208_vm0, %v21588_v54 }
0x44a0   : > { %16124 = vmatpush3.msra.mxu0 %v11927_v19  ;;  %16131 = vmatprep.mubr.msk.f32.mxu0 %vm4208_vm0, %v21214_v5 }
0x44a1   : > { %16125 = vmatprep.subr.mxu0 %v11926_v29 }
0x44a2   : > { %16126 = vmatpush3.msra.mxu0 %v11926_v29 }
0x44a3   : > { %16127 = vmatprep.subr.mxu0 %v11925_v30 }
0x44a4   : > { %16128 = vmatpush3.msra.mxu0 %v11925_v30 }
0x44a5   : > { %16129 = vmatprep.subr.mxu0 %v11924_v26 }
0x44a6   : > { %16130 = vmatpush3.msra.mxu0 %v11924_v26 }
0x44a7   : > { %16132 = vmatmul.mubr.msk.f32.vlgmr.msra.gmra.mxu0 %vm4208_vm0, %v21224_v60  ;;  %16141 = vmatprep.subr.mxu0 %v19485_v28  ;;  %v15065_v60 = vld [vmem:[#allocation44] ss:$0 sm:$0xff] }
0x44a8   : > { %16145 = vmatprep.mubr.msk.f32.mxu0 %vm19486_vm4, %v19485_v28 }
0x455f   : > { %v11834_v9 = vpop.f32.mrf.mxu0 }
0x4560   : > { %v11835_v35 = vadd.f32 %v15060_v8, %v11834_v9 }
0x4561   : > { %v16111_v5 = vpop.f32.mrf.mxu0 }
0x4562   : > { %12179 = vrot.lane.b32.xlu0 %v11835_v35, %s22169_s0  ;;  %16139 = vmatmul.mubr.msk.f32.vlgmr.msra.gmra.mxu1 %vm4472_vm1, %v11835_v35 }
0x4563   : > { %16149 = vmatpush3.xpose.msk.msra.mxu1 %vm4472_vm1, %v12184_v3  ;;  %16152 = vmatprep.mubr.msk.f32.mxu1 %vm19486_vm4, %v19485_v28 }
0x4564   : > { %16150 = vmatprep.subr.mxu1 %v19485_v28 }
0x4567   : > { %v16133_v38 = vpop.f32.mrf.mxu0  ;;  %16151 = vmatpush3.xpose.msk.msra.mxu1 %vm4472_vm1, %v12182_v37 }
0x4568   : > { %v21609_v20 = vadd.f32 %v16133_v38, %v15065_v60  ;;  %16167 = vmatprep.subr.mxu1 %v19485_v28 }
0x4569   : > { %v12001_v36 = vpop.f32.mrf.mxu0 }
0x456a   : > { %v21612_v31 = vadd.f32 %v15065_v60, %v12001_v36  ;;  %16142 = vmatpush3.msra.mxu0 %v21609_v20 }
0x456b   : > { %16143 = vmatprep.subr.mxu0 %v19485_v28 }
0x456c   : > { %16144 = vmatpush3.msra.mxu0 %v21612_v31 }
0x456d   : > { %16155 = vmatprep.subr.mxu0 %v19485_v28 }
0x45d4   : > { %v12180_v42 = vpop.permute.xlu0 %12179 }
0x45d5   : > { %16153 = vmatmul.mubr.msk.f32.vlgmr.msra.gmra.mxu1 %vm4472_vm1, %v12180_v42 }
0x45d6   : > { %16169 = vmatprep.mubr.msk.f32.mxu1 %vm19486_vm4, %v19485_v28  ;;  %16168 = vmatpush3.msra.mxu1 %v12010_v11 }
0x45d7   : > { %16179 = vmatprep.subr.mxu1 %v19485_v28 }
0x4622   : > { %v12089_v43 = vpop.f32.mrf.mxu1 }
0x4623   : > { %v12093_v47 = vmul.f32 0.35355338, %v12089_v43 }
0x4624   : > { %v16140_v10 = vpop.f32.mrf.mxu1 }
0x4625   : > { %v12094_v49 = vadd.f32 %v21622_v51, %v12093_v47 }
0x4627   : > { %v12095_v41 = vsel %vm4570_vm2, %v12094_v49, -inf }
0x4628   : > { %12096 = vmax.xlane.f32.xlu0 %v12095_v41 }
0x4695   : > { %v12257_v52 = vpop.f32.mrf.mxu1 }
0x4696   : > { %v12261_v53 = vmul.f32 0.35355338, %v12257_v52 }
0x4697   : > { %v16154_v13 = vpop.f32.mrf.mxu1 }
0x4698   : > { %v12262_v62 = vadd.f32 %v21622_v51, %v12261_v53 }
0x469a   : > { %v12263_v56 = vsel %vm4570_vm2, %v12262_v62, -inf }
0x469b   : > { %12264 = vmax.xlane.f32.xlu1 %v12263_v56  ;;  %v12012_v56 = vld [vmem:[%s22185_s26 + $0x10] sm:$0xff] }
0x46ac   : > { %12276 = vrot.lane.b32.xlu1 %v21612_v31, %s22169_s0 }
0x46b0   : > { %12505 = vrot.lane.b32.xlu1 %v21561_v25, %s22172_s2 }
0x46b1   : > { %v12097_v40 = vpop.xlane.xlu0 %12096 }
0x46b2   : > { %v12098_v48 = vsub.f32 %v12094_v49, %v12097_v40 }
0x46b4   : > { %v12099_v57 = vmul.f32 1.442695, %v12098_v48  ;;  %12501 = vrot.lane.b32.xlu1 %v11835_v35, %s22172_s2 }
0x46b6   : > { %17136 = vpow2.f32 %v12099_v57 }
0x46b8   : > { %12751 = vrot.lane.b32.xlu1 %v21563_v55, %s22173_s10 }
0x46c3   : > { %v17137_v58 = vpop.eup %17136 }
0x46c4   : > { %v12101_v45 = vsel %vm4570_vm2, %v17137_v58, 0.0 }
0x46c5   : > { %12102 = vadd.xlane.f32.xlu0 %v12101_v45 }
0x4724   : > { %v12265_v63 = vpop.xlane.xlu1 %12264 }
0x4725   : > { %v12266_v1 = vsub.f32 %v12262_v62, %v12265_v63 }
0x4727   : > { %v12267_v46 = vmul.f32 1.442695, %v12266_v1  ;;  %v12013_v1 = vld [vmem:[%s22185_s26 + $0x18] sm:$0xff] }
0x4728   : > { %v12277_v61 = vpop.permute.xlu1 %12276 }
0x4729   : > { %17138 = vpow2.f32 %v12267_v46 }
0x472c   : > { %v12506_v44 = vpop.permute.xlu1 %12505 }
0x4730   : > { %v12502_v21 = vpop.permute.xlu1 %12501 }
0x4734   : > { %v12752_v22 = vpop.permute.xlu1 %12751 }
0x4736   : > { %v17139_v0 = vpop.eup %17138 }
0x4737   : > { %v12269_v50 = vsel %vm4570_vm2, %v17139_v0, 0.0 }
0x4738   : > { %12270 = vadd.xlane.f32.xlu0 %v12269_v50 }
0x474e   : > { %v12103_v2 = vpop.xlane.xlu0 %12102  ;;  %12278 = vrot.lane.b32.xlu0 %v21609_v20, %s22169_s0  ;;  %s22187_s0 = sld [smem:[#allocation174_spill]] }
0x474f   : > { %17140 = vrcp.f32 %v12103_v2 }
0x4752   : > { %12503 = vrot.lane.b32.xlu0 %v21563_v55, %s22172_s2 }
0x4754   : > { %s22188_s1 = smov %s22187_s0 }
0x4756   : > { %12753 = vrot.lane.b32.xlu0 %v21561_v25, %s22173_s10 }
0x475a   : > { %12749 = vrot.lane.b32.xlu0 %v11835_v35, %s22173_s10 }
0x475c   : > { %v17141_v4 = vpop.eup %17140 }
0x475d   : > { %v12105_v6 = vmul.f32 %v17141_v4, %v17137_v58 }
0x475f   : > { %16146 = vmatmul.mubr.msk.f32.vlgmr.msra.gmra.mxu0 %vm4570_vm2, %v12105_v6 }
0x4760   : > { %16159 = vmatprep.mubr.msk.f32.mxu0 %vm19486_vm4, %v19485_v28 }
0x47c1   : > { %v12271_v14 = vpop.xlane.xlu0 %12270 }
0x47c2   : > { %17142 = vrcp.f32 %v12271_v14  ;;  %v15088_v14 = vld [vmem:[#allocation41] ss:$0 sm:$0xff] }
0x47c5   : > { %v12279_v55 = vpop.permute.xlu0 %12278 }
0x47c6   : > { %16156 = vmatpush3.msra.mxu0 %v12279_v55 }
0x47c7   : > { %16157 = vmatprep.subr.mxu0 %v19485_v28 }
0x47c8   : > { %16158 = vmatpush3.msra.mxu0 %v12277_v61 }
0x47c9   : > { %16162 = vmatprep.subr.mxu0 %v19485_v28  ;;  %v12504_v19 = vpop.permute.xlu0 %12503 }
0x47cd   : > { %v12754_v34 = vpop.permute.xlu0 %12753 }
0x47cf   : > { %v17143_v25 = vpop.eup %17142 }
0x47d0   : > { %v12273_v12 = vmul.f32 %v17143_v25, %v17139_v0 }
0x47d1   : > { %v12750_v33 = vpop.permute.xlu0 %12749 }
0x47d2   : > { %16160 = vmatmul.mubr.msk.f32.vlgmr.msra.gmra.mxu0 %vm4570_vm2, %v12273_v12 }
0x47d3   : > { %16163 = vmatpush3.msra.mxu0 %v12011_v15  ;;  %16164 = vmatprep.mubr.msk.f32.mxu0 %vm19486_vm4, %v19485_v28 }
0x47d4   : > { %16172 = vmatprep.subr.mxu0 %v19485_v28 }
0x481f   : > { %v12175_v7 = vpop.f32.mrf.mxu0 }
0x4820   : > { %16170 = vmatmul.mubr.msk.f32.vlgmr.msra.gmra.mxu1 %vm4472_vm1, %v12175_v7 }
0x4821   : > { %v16147_v16 = vpop.f32.mrf.mxu0  ;;  %16183 = vmatprep.mubr.msk.f32.mxu1 %vm19486_vm4, %v19485_v28 }
0x4892   : > { %v12351_v17 = vpop.f32.mrf.mxu0 }
0x4893   : > { %16165 = vmatmul.mubr.msk.f32.vlgmr.msra.gmra.mxu0 %vm4472_vm1, %v12351_v17 }
0x4894   : > { %16173 = vmatpush3.xpose.msk.msra.mxu0 %vm4472_vm1, %v12506_v44  ;;  %v16161_v18 = vpop.f32.mrf.mxu0  ;;  %16176 = vmatprep.mubr.msk.f32.mxu0 %vm19486_vm4, %v19485_v28 }
0x4895   : > { %16174 = vmatprep.subr.mxu0 %v19485_v28 }
0x4898   : > { %16175 = vmatpush3.xpose.msk.msra.mxu0 %vm4472_vm1, %v12504_v19 }
0x4899   : > { %16191 = vmatprep.subr.mxu0 %v19485_v28 }
0x489b   : > { %16177 = vmatmul.mubr.msk.f32.vlgmr.msra.gmra.mxu0 %vm4472_vm1, %v12502_v21 }
0x489c   : > { %16192 = vmatpush3.xpose.msk.msra.mxu0 %vm4472_vm1, %v12754_v34  ;;  %16195 = vmatprep.mubr.msk.f32.mxu0 %vm19486_vm4, %v19485_v28 }
0x489d   : > { %16193 = vmatprep.subr.mxu0 %v19485_v28 }
0x48a0   : > { %16194 = vmatpush3.xpose.msk.msra.mxu0 %vm4472_vm1, %v12752_v22 }
0x48a1   : > { %16210 = vmatprep.subr.mxu0 %v19485_v28 }
0x48a3   : > { %16196 = vmatmul.mubr.msk.f32.vlgmr.msra.gmra.mxu0 %vm4472_vm1, %v12750_v33  ;;  %v15089_v33 = vld [vmem:[#allocation47] ss:$0 sm:$0xff] }
0x48a4   : > { %16218 = vmatprep.mubr.msk.f32.mxu0 %vm19486_vm4, %v19485_v28 }
0x48e0   : > { %v21676_v23 = vpop.f32.mrf.mxu1 }
0x48e2   : > { %v16171_v24 = vpop.f32.mrf.mxu1 }
0x48e3   : > { %v15090_v24 = vld [vmem:[#allocation46] ss:$0 sm:$0xff] }
0x4953   : > { %v21678_v27 = vpop.f32.mrf.mxu0 }
0x4954   : > { %v12498_v46 = vadd.f32 %v21676_v23, %v21678_v27 }
0x4955   : > { %v16166_v32 = vpop.f32.mrf.mxu0 }
0x495b   : > { %v12579_v39 = vpop.f32.mrf.mxu0 }
0x495c   : > { %v12583_v29 = vmul.f32 0.35355338, %v12579_v39 }
0x495d   : > { %v16178_v30 = vpop.f32.mrf.mxu0 }
0x495e   : > { %v12584_v26 = vadd.f32 %v21622_v51, %v12583_v29 }
0x4960   : > { %v12585_v8 = vsel %vm4570_vm2, %v12584_v26, -inf }
0x4961   : > { %12586 = vmax.xlane.f32.xlu1 %v12585_v8 }
0x4963   : > { %v12827_v9 = vpop.f32.mrf.mxu0 }
0x4964   : > { %v12831_v5 = vmul.f32 0.35355338, %v12827_v9 }
0x4965   : > { %v16197_v35 = vpop.f32.mrf.mxu0 }
0x4966   : > { %v12832_v3 = vadd.f32 %v21622_v51, %v12831_v5  ;;  %v13068_v5 = vld [vmem:[#allocation61 + $0x18] sm:$0xff] }
0x4967   : > { %16211 = vmatpush3.msra.mxu0 %v13068_v5 }
0x4968   : > { %v12833_v60 = vsel %vm4570_vm2, %v12832_v3, -inf  ;;  %16212 = vmatprep.subr.mxu0 %v19485_v28 }
0x4972   : > { %12596 = vrot.lane.b32.xlu1 %v21612_v31, %s22172_s2 }
0x4996   : > { %12834 = vmax.xlane.f32.xlu1 %v12833_v60  ;;  %v13065_v60 = vld [vmem:[#allocation61] sm:$0xff] }
0x49a7   : > { %12844 = vrot.lane.b32.xlu1 %v21612_v31, %s22173_s10 }
0x49ea   : > { %v12587_v37 = vpop.xlane.xlu1 %12586 }
0x49eb   : > { %v12588_v38 = vsub.f32 %v12584_v26, %v12587_v37 }
0x49ed   : > { %v12589_v36 = vmul.f32 1.442695, %v12588_v38 }
0x49ee   : > { %v12597_v47 = vpop.permute.xlu1 %12596 }
0x49ef   : > { %17144 = vpow2.f32 %v12589_v36 }
0x49fc   : > { %v17145_v42 = vpop.eup %17144 }
0x49fd   : > { %v12591_v43 = vsel %vm4570_vm2, %v17145_v42, 0.0 }
0x49fe   : > { %12592 = vadd.xlane.f32.xlu0 %v12591_v43 }
0x4a14   : > { %12598 = vrot.lane.b32.xlu0 %v21609_v20, %s22172_s2  ;;  %s22186_s2 = sld [smem:[#allocation218_spill]] }
0x4a1a   : > { %v13157_v37 = vld [vmem:[%s22186_s2 + $0x38] sm:$0xff]  ;;  %v13156_v38 = vld [vmem:[%s22186_s2 + $0x30] sm:$0xff]  ;;  %v13155_v36 = vld [vmem:[%s22186_s2 + $0x28] sm:$0xff] }
0x4a1b   : > { %v13153_v43 = vld [vmem:[%s22186_s2 + $0x18] sm:$0xff] }
0x4a1f   : > { %v12835_v10 = vpop.xlane.xlu1 %12834 }
0x4a20   : > { %v12836_v51 = vsub.f32 %v12832_v3, %v12835_v10  ;;  %v13067_v3 = vld [vmem:[#allocation61 + $0x10] sm:$0xff] }
0x4a21   : > { %16213 = vmatpush3.msra.mxu0 %v13067_v3  ;;  %v17171_v3 = vld [vmem:[#allocation118] ss:$0 sm:$0xff] }
0x4a22   : > { %v12837_v49 = vmul.f32 1.442695, %v12836_v51  ;;  %16214 = vmatprep.subr.mxu0 %v19485_v28 }
0x4a23   : > { %v12845_v45 = vpop.permute.xlu1 %12844 }
0x4a24   : > { %17146 = vpow2.f32 %v12837_v49 }
0x4a31   : > { %v17147_v41 = vpop.eup %17146 }
0x4a32   : > { %v12839_v31 = vsel %vm4570_vm2, %v17147_v41, 0.0 }
0x4a33   : > { %12840 = vadd.xlane.f32.xlu0 %v12839_v31 }
0x4a49   : > { %12846 = vrot.lane.b32.xlu0 %v21609_v20, %s22173_s10  ;;  %s22189_s10 = sld [smem:[#allocation170_spill]] }
0x4a87   : > { %v12593_v52 = vpop.xlane.xlu0 %12592 }
0x4a88   : > { %17148 = vrcp.f32 %v12593_v52  ;;  %v15092_v52 = vld [vmem:[#allocation52] ss:$0 sm:$0xff] }
0x4a8b   : > { %v12599_v53 = vpop.permute.xlu0 %12598 }
0x4a8c   : > { %16180 = vmatpush3.msra.mxu1 %v12599_v53 }
0x4a8d   : > { %16181 = vmatprep.subr.mxu1 %v19485_v28 }
0x4a8e   : > { %16182 = vmatpush3.msra.mxu1 %v12597_v47 }
0x4a8f   : > { %16186 = vmatprep.subr.mxu1 %v19485_v28 }
0x4a95   : > { %v17149_v13 = vpop.eup %17148 }
0x4a96   : > { %v12595_v62 = vmul.f32 %v17149_v13, %v17145_v42  ;;  %v13154_v42 = vld [vmem:[%s22186_s2 + $0x20] sm:$0xff] }
0x4a98   : > { %16184 = vmatmul.mubr.msk.f32.vlgmr.msra.gmra.mxu1 %vm4570_vm2, %v12595_v62  ;;  %v13152_v62 = vld [vmem:[%s22186_s2 + $0x10] sm:$0xff] }
0x4a99   : > { %16187 = vmatpush3.msra.mxu1 %v12012_v56  ;;  %16188 = vmatprep.mubr.msk.f32.mxu1 %vm19486_vm4, %v19485_v28  ;;  %v13151_v56 = vld [vmem:[%s22186_s2 + $0x8] sm:$0xff] }
0x4a9a   : > { %16198 = vmatprep.subr.mxu1 %v19485_v28 }
0x4abc   : > { %v12841_v20 = vpop.xlane.xlu0 %12840 }
0x4abd   : > { %17150 = vrcp.f32 %v12841_v20  ;;  %v13150_v20 = vld [vmem:[%s22186_s2] sm:$0xff]  ;;  %s22190_s2 = smov %s22189_s10 }
0x4ac0   : > { %v12847_v57 = vpop.permute.xlu0 %12846 }
0x4aca   : > { %v17151_v40 = vpop.eup %17150 }
0x4acb   : > { %v12843_v63 = vmul.f32 %v17151_v40, %v17147_v41  ;;  %v15091_v41 = vld [vmem:[#allocation53] ss:$0 sm:$0xff]  ;;  %v15093_v40 = vld [vmem:[#allocation55] ss:$0 sm:$0xff] }
0x4b58   : > { %v12671_v48 = vpop.f32.mrf.mxu1 }
0x4b59   : > { %16189 = vmatmul.mubr.msk.f32.vlgmr.msra.gmra.mxu1 %vm4472_vm1, %v12671_v48 }
0x4b5a   : > { %16199 = vmatpush3.msra.mxu1 %v12847_v57  ;;  %v16185_v58 = vpop.f32.mrf.mxu1  ;;  %16202 = vmatprep.mubr.msk.f32.mxu1 %vm19486_vm4, %v19485_v28 }
0x4b5b   : > { %16200 = vmatprep.subr.mxu1 %v19485_v28 }
0x4b5c   : > { %16201 = vmatpush3.msra.mxu1 %v12845_v45 }
0x4b5d   : > { %16203 = vmatmul.mubr.msk.f32.vlgmr.msra.gmra.mxu1 %vm4570_vm2, %v12843_v63  ;;  %16205 = vmatprep.subr.mxu1 %v19485_v28  ;;  %v15095_v63 = vld [vmem:[#allocation56] ss:$0 sm:$0xff] }
0x4b5e   : > { %16207 = vmatprep.mubr.msk.f32.mxu1 %vm19486_vm4, %v19485_v28  ;;  %16206 = vmatpush3.msra.mxu1 %v12013_v1 }
0x4b5f   : > { %16221 = vmatprep.subr.mxu1 %v19485_v28 }
0x4c19   : > { %v12744_v0 = vpop.f32.mrf.mxu1 }
0x4c1a   : > { %v12748_v50 = vadd.f32 %v12744_v0, %v12498_v46 }
0x4c1b   : > { %v16190_v2 = vpop.f32.mrf.mxu1 }
0x4c1d   : > { %v12919_v4 = vpop.f32.mrf.mxu1 }
0x4c1e   : > { %16208 = vmatmul.mubr.msk.f32.vlgmr.msra.gmra.mxu1 %vm4472_vm1, %v12919_v4 }
0x4c1f   : > { %v16204_v6 = vpop.f32.mrf.mxu1  ;;  %16237 = vmatprep.mubr.msk.f32.mxu1 %vm19486_vm4, %v19485_v28  ;;  %16222 = vmatpush3.msra.mxu1 %v13157_v37  ;;  %v13369_v37 = vld [vmem:[%s22190_s2 + $0x10] sm:$0xff] }
0x4c20   : > { %16223 = vmatprep.subr.mxu1 %v19485_v28 }
0x4c21   : > { %16224 = vmatpush3.msra.mxu1 %v13156_v38  ;;  %v13368_v38 = vld [vmem:[%s22190_s2 + $0x8] sm:$0xff] }
0x4c22   : > { %16225 = vmatprep.subr.mxu1 %v19485_v28 }
0x4c23   : > { %16226 = vmatpush3.msra.mxu1 %v13155_v36  ;;  %v13367_v36 = vld [vmem:[%s22190_s2] sm:$0xff] }
0x4c24   : > { %16227 = vmatprep.subr.mxu1 %v19485_v28 }
0x4c25   : > { %16228 = vmatpush3.msra.mxu1 %v13154_v42 }
0x4c26   : > { %16229 = vmatprep.subr.mxu1 %v19485_v28 }
0x4c27   : > { %16230 = vmatpush3.msra.mxu1 %v13153_v43 }
0x4c28   : > { %16231 = vmatprep.subr.mxu1 %v19485_v28 }
0x4c29   : > { %16232 = vmatpush3.msra.mxu1 %v13152_v62 }
0x4c2a   : > { %16233 = vmatprep.subr.mxu1 %v19485_v28 }
0x4c2b   : > { %16234 = vmatpush3.msra.mxu1 %v13151_v56 }
0x4c2c   : > { %16235 = vmatprep.subr.mxu1 %v19485_v28 }
0x4c2d   : > { %16236 = vmatpush3.msra.mxu1 %v13150_v20 }
0x4c2e   : > { %16262 = vmatprep.subr.mxu1 %v19485_v28 }
0x4cde   : > { %v12992_v11 = vpop.f32.mrf.mxu1 }
0x4cdf   : > { %v12996_v55 = vadd.f32 %v12992_v11, %v12748_v50 }
0x4ce0   : > { %v16209_v61 = vpop.f32.mrf.mxu1 }
0x4ce1   : > { %v13004_v25 = vadd.f32 %v15088_v14, %v12996_v55 }
0x4ce3   : > { %v13005_v12 = vadd.f32 %v13004_v25, %v21588_v54 }
0x4ce5   : > { %v13006_v15 = vsel %vm4208_vm0, %v13005_v12, 0.0 }
0x4ce6   : > { %13007 = vadd.xlane.f32.xlu1 %v13006_v15 }
0x4d6f   : > { %v13008_v7 = vpop.xlane.xlu1 %13007 }
0x4d70   : > { %v13009_v16 = vmul.f32 0.03125, %v13008_v7  ;;  %v15097_v7 = vld [vmem:[#allocation59] ss:$0 sm:$0xff] }
0x4d72   : > { %v13010_v17 = vsub.f32 %v13005_v12, %v13009_v16 }
0x4d74   : > { %v13011_v44 = vmul.f32 %v13010_v17, %v13010_v17 }
0x4d76   : > { %v13012_v18 = vsel %vm4208_vm0, %v13011_v44, 0.0 }
0x4d77   : > { %13013 = vadd.xlane.f32.xlu0 %v13012_v18 }
0x4e00   : > { %v13014_v19 = vpop.xlane.xlu0 %13013 }
0x4e01   : > { %v13015_v21 = vmul.f32 0.03125, %v13014_v19 }
0x4e03   : > { %v13016_v34 = vadd.f32 1e-05, %v13015_v21 }
0x4e05   : > { %17152 = vrsqrt.f32 %v13016_v34 }
0x4e12   : > { %v17153_v22 = vpop.eup %17152 }
0x4e13   : > { %v13018_v23 = vmul.f32 %v17153_v22, %v13010_v17  ;;  %v15098_v17 = vld [vmem:[#allocation58] ss:$0 sm:$0xff] }
0x4e15   : > { %v13026_v27 = vmul.f32 %v15089_v33, %v13018_v23 }
0x4e17   : > { %v13034_v32 = vadd.f32 %v15090_v24, %v13026_v27  ;;  %v13286_v24 = vld [vmem:[%s22187_s0 + $0x18] sm:$0xff]  ;;  %v13285_v27 = vld [vmem:[%s22188_s1 + $0x10] sm:$0xff]  ;;  %s21960_s0 = sand.u32 1, %s19284_s7  }
0x4e18   : > { %s21763_s3 = sshll.u32 %s21960_s0, 3 }
0x4e19   : > { %v13035_v39 = vadd.f32 %v13034_v32, %v21588_v54  ;;  %v13066_v54 = vld [vmem:[#allocation61 + $0x8] sm:$0xff]  ;;  %v13284_v32 = vld [vmem:[%s22188_s1 + $0x8] sm:$0xff]  ;;  %s21961_s6 = scalar_lea.vmem [#allocation120], %s21763_s3  ;;  %s22194_s2 = scalar_lea.vmem [#allocation120], %s21763_s3 }
0x4e1a   : > { %16215 = vmatpush3.msra.mxu0 %v13066_v54 }
0x4e1b   : > { %v13036_v29 = vsel %vm4208_vm0, %v13035_v39, 0.0  ;;  %16216 = vmatprep.subr.mxu0 %v19485_v28 }
0x4e1c   : > { %13037 = vadd.xlane.f32.xlu0 %v13036_v29  ;;  %16217 = vmatpush3.msra.mxu0 %v13065_v60  ;;  %v13370_v60 = vld [vmem:[%s22189_s10 + $0x18] sm:$0xff]  ;;  %s22192_s10 = sld [smem:[#allocation172_spill]] }
0x4e1d   : > { %16240 = vmatprep.subr.mxu0 %v19485_v28 }
0x4e22   : > { %s22193_s0 = smov %s22192_s10 }
0x4ea5   : > { %v13038_v30 = vpop.xlane.xlu0 %13037 }
0x4ea6   : > { %v13039_v26 = vmul.f32 0.03125, %v13038_v30 }
0x4ea8   : > { %v13040_v8 = vsub.f32 %v13035_v39, %v13039_v26  ;;  %v13283_v39 = vld [vmem:[%s22188_s1] sm:$0xff]  ;;  %s22191_s1 = sld [smem:[#allocation171_spill]] }
0x4eaa   : > { %v13041_v9 = vmul.f32 %v13040_v8, %v13040_v8 }
0x4eac   : > { %v13042_v35 = vsel %vm4208_vm0, %v13041_v9, 0.0 }
0x4ead   : > { %13043 = vadd.xlane.f32.xlu1 %v13042_v35  ;;  %v17170_v35 = vld [vmem:[%s22175_s5] ss:$0 sm:$0xff]  ;;  %s13674_s5 = sshll.u32 %s22194_s2, 4  ;;  %s13675_s5 = int_to_ptr.vmem [resolvable:$true] %s13674_s5 }
0x4eae   : > { %v13452_v42 = vld [vmem:[%s22191_s1 + $0x18] sm:$0xff]  ;;  %v13451_v43 = vld [vmem:[%s22191_s1 + $0x10] sm:$0xff]  ;;  %s19020_s12 = scalar_lea.vmem %s13675_s5, 128  ;;  %p19027_p0 = scmp.lt.s32.totalorder %s13675_s5, %s19025_s14 }
0x4eaf   : > { %p19021_p10 = scmp.ne.s32.totalorder %s13675_s5, %s19020_s12 }
0x4eb1   : > { %p19022_p12 = pnand %p19021_p10, %p22195_p11 }
0x4eb3   : > { %p19023_p13 = pneg %p19022_p12 }
0x4f36   : > { %v13044_v47 = vpop.xlane.xlu1 %13043 }
0x4f37   : > { %v13045_v10 = vmul.f32 0.03125, %v13044_v47  ;;  %v13450_v47 = vld [vmem:[%s22191_s1 + $0x8] sm:$0xff] }
0x4f39   : > { %v13046_v51 = vadd.f32 1e-05, %v13045_v10  ;;  %v13449_v10 = vld [vmem:[%s22191_s1] sm:$0xff] }
0x4f3b   : > { %17154 = vrsqrt.f32 %v13046_v51  ;;  %v13537_v51 = vld [vmem:[%s22192_s10 + $0x18] sm:$0xff]  ;;  %s13639_s10 = sand.u32 1, %s20066_s15  }
0x4f3c   : > { %s21817_s8 = scalar_lea.sflag [#allocation121], %s13639_s10 }
0x4f48   : > { %v17155_v49 = vpop.eup %17154 }
0x4f49   : > { %v13048_v31 = vmul.f32 %v17155_v49, %v13040_v8  ;;  %v15099_v49 = vld [vmem:[#allocation8] ss:$0 sm:$0xff] }
0x4f4b   : > { %v13056_v53 = vmul.f32 %v15091_v41, %v13048_v31 }
0x4f4d   : > { %v13064_v13 = vadd.f32 %v15092_v52, %v13056_v53  ;;  %v15101_v53 = vld [vmem:[#allocation2] ss:$0 sm:$0xff] }
0x4f4f   : > { %16219 = vmatmul.mubr.msk.f32.vlgmr.msra.gmra.mxu0 %vm4208_vm0, %v13064_v13 }
0x4f50   : > { %16248 = vmatprep.mubr.msk.f32.mxu0 %vm19486_vm4, %v19485_v28  ;;  %16241 = vmatpush3.msra.mxu0 %v13286_v24 }
0x4f51   : > { %16242 = vmatprep.subr.mxu0 %v19485_v28 }
0x4f52   : > { %16243 = vmatpush3.msra.mxu0 %v13285_v27 }
0x4f53   : > { %16244 = vmatprep.subr.mxu0 %v19485_v28 }
0x4f54   : > { %16245 = vmatpush3.msra.mxu0 %v13284_v32 }
0x4f55   : > { %16246 = vmatprep.subr.mxu0 %v19485_v28 }
0x4f56   : > { %16247 = vmatpush3.msra.mxu0 %v13283_v39 }
0x4f57   : > { %16251 = vmatprep.subr.mxu0 %v19485_v28 }
0x500f   : > { %v13145_v48 = vpop.f32.mrf.mxu0 }
0x5010   : > { %v13146_v57 = vadd.f32 %v15093_v40, %v13145_v48  ;;  %v13536_v40 = vld [vmem:[%s22193_s0 + $0x10] sm:$0xff]  ;;  %v13535_v48 = vld [vmem:[%s22193_s0 + $0x8] sm:$0xff] }
0x5011   : > { %v16220_v58 = vpop.f32.mrf.mxu0 }
0x5012   : > { %v13149_v45 = vmax.f32 %v13146_v57, 0.0  ;;  %v13534_v57 = vld [vmem:[%s22193_s0] sm:$0xff] }
0x5013   : > { %v15103_v58 = vld [vmem:[#allocation5] ss:$0 sm:$0xff] }
0x5014   : > { %16238 = vmatmul.mubr.msk.f32.vlgmr.msra.gmra.mxu1 %vm5781_vm3, %v13149_v45 }
0x5015   : > { %16270 = vmatprep.mubr.msk.f32.mxu1 %vm19486_vm4, %v19485_v28  ;;  %16263 = vmatpush3.msra.mxu1 %v13452_v42 }
0x5016   : > { %16264 = vmatprep.subr.mxu1 %v19485_v28 }
0x5017   : > { %16265 = vmatpush3.msra.mxu1 %v13451_v43 }
0x5018   : > { %16266 = vmatprep.subr.mxu1 %v19485_v28 }
0x5019   : > { %16267 = vmatpush3.msra.mxu1 %v13450_v47 }
0x501a   : > { %16268 = vmatprep.subr.mxu1 %v19485_v28 }
0x501b   : > { %16269 = vmatpush3.msra.mxu1 %v13449_v10 }
0x50d4   : > { %v13234_v1 = vpop.f32.mrf.mxu1 }
0x50d5   : > { %v13235_v46 = vadd.f32 %v15095_v63, %v13234_v1 }
0x50d6   : > { %v16239_v0 = vpop.f32.mrf.mxu1 }
0x50d7   : > { %v13238_v50 = vadd.f32 %v13235_v46, %v13064_v13 }
0x50d9   : > { %v13239_v2 = vsel %vm4208_vm0, %v13238_v50, 0.0 }
0x50da   : > { %13240 = vadd.xlane.f32.xlu0 %v13239_v2 }
0x5163   : > { %v13241_v4 = vpop.xlane.xlu0 %13240 }
0x5164   : > { %v13242_v6 = vmul.f32 0.03125, %v13241_v4 }
0x5166   : > { %v13243_v11 = vsub.f32 %v13238_v50, %v13242_v6 }
0x5168   : > { %v13244_v14 = vmul.f32 %v13243_v11, %v13243_v11 }
0x516a   : > { %v13245_v55 = vsel %vm4208_vm0, %v13244_v14, 0.0 }
0x516b   : > { %13246 = vadd.xlane.f32.xlu1 %v13245_v55 }
0x51f4   : > { %v13247_v61 = vpop.xlane.xlu1 %13246 }
0x51f5   : > { %v13248_v25 = vmul.f32 0.03125, %v13247_v61 }
0x51f7   : > { %v13249_v12 = vadd.f32 1e-05, %v13248_v25 }
0x51f9   : > { %17156 = vrsqrt.f32 %v13249_v12 }
0x5206   : > { %v17157_v15 = vpop.eup %17156 }
0x5207   : > { %v13251_v16 = vmul.f32 %v17157_v15, %v13243_v11 }
0x5209   : > { %v13259_v44 = vmul.f32 %v15097_v7, %v13251_v16 }
0x520b   : > { %v13267_v18 = vadd.f32 %v15098_v17, %v13259_v44 }
0x520d   : > { %v13268_v19 = vsel %vm4208_vm0, %v13267_v18, 0.0 }
0x520e   : > { %13269 = vadd.xlane.f32.xlu0 %v13268_v19 }
0x5297   : > { %v13270_v21 = vpop.xlane.xlu0 %13269 }
0x5298   : > { %v13271_v34 = vmul.f32 0.03125, %v13270_v21 }
0x529a   : > { %v13272_v22 = vsub.f32 %v13267_v18, %v13271_v34 }
0x529c   : > { %v13273_v33 = vmul.f32 %v13272_v22, %v13272_v22 }
0x529e   : > { %v13274_v23 = vsel %vm4208_vm0, %v13273_v33, 0.0 }
0x529f   : > { %13275 = vadd.xlane.f32.xlu1 %v13274_v23 }
0x5328   : > { %v13276_v29 = vpop.xlane.xlu1 %13275 }
0x5329   : > { %v13277_v30 = vmul.f32 0.03125, %v13276_v29 }
0x532b   : > { %v13278_v26 = vadd.f32 1e-05, %v13277_v30 }
0x532d   : > { %17158 = vrsqrt.f32 %v13278_v26 }
0x533a   : > { %v17159_v8 = vpop.eup %17158 }
0x533b   : > { %v13280_v9 = vmul.f32 %v17159_v8, %v13272_v22 }
0x533d   : > { %v13281_v5 = vmul.f32 %v17170_v35, %v13280_v9 }
0x533f   : > { %v13282_v54 = vadd.f32 %v17171_v3, %v13281_v5 }
0x5341   : > { %16249 = vmatmul.mubr.msk.f32.vlgmr.msra.gmra.mxu0 %vm4208_vm0, %v13282_v54  ;;  %13628 = vst.msk [vmem:[%s21961_s6] sm:$0xff] %vm4208_vm0, %v13282_v54  ;;  %s21962_s6 = scalar_lea.vmem [#allocation119], %s21763_s3 }
0x5342   : > { %16252 = vmatpush3.msra.mxu0 %v13370_v60  ;;  %16259 = vmatprep.mubr.msk.f32.mxu0 %vm19486_vm4, %v19485_v28 }
0x5343   : > { %16253 = vmatprep.subr.mxu0 %v19485_v28 }
0x5344   : > { %16254 = vmatpush3.msra.mxu0 %v13369_v37 }
0x5345   : > { %16255 = vmatprep.subr.mxu0 %v19485_v28 }
0x5346   : > { %16256 = vmatpush3.msra.mxu0 %v13368_v38 }
0x5347   : > { %16257 = vmatprep.subr.mxu0 %v19485_v28 }
0x5348   : > { %16258 = vmatpush3.msra.mxu0 %v13367_v36 }
0x5349   : > { %16260 = vmatmul.mubr.msk.f32.vlgmr.msra.gmra.mxu0 %vm4208_vm0, %v13282_v54  ;;  %16273 = vmatprep.subr.mxu0 %v19485_v28 }
0x534a   : > { %16281 = vmatprep.mubr.msk.f32.mxu0 %vm19486_vm4, %v19485_v28  ;;  %16274 = vmatpush3.msra.mxu0 %v13537_v51 }
0x534b   : > { %16275 = vmatprep.subr.mxu0 %v19485_v28 }
0x534c   : > { %16276 = vmatpush3.msra.mxu0 %v13536_v40 }
0x534d   : > { %16277 = vmatprep.subr.mxu0 %v19485_v28 }
0x534e   : > { %16278 = vmatpush3.msra.mxu0 %v13535_v48 }
0x534f   : > { %16279 = vmatprep.subr.mxu0 %v19485_v28 }
0x5350   : > { %16280 = vmatpush3.msra.mxu0 %v13534_v57 }
0x5401   : > { %v13363_v41 = vpop.f32.mrf.mxu0 }
0x5402   : > { %v13364_v31 = vadd.f32 %v15099_v49, %v13363_v41 }
0x5403   : > { %v16250_v52 = vpop.f32.mrf.mxu0 }
0x5404   : > { %13625 = vst.msk [vmem:[%s21962_s6] sm:$0xff] %vm13624_vm5, %v13364_v31  ;;  %s21805_s6 = sshll.u32 %s20066_s15, 7  ;;  %s19026_s15 = scalar_lea.vmem %s19025_s14, 256 }
0x5405   : > { %s21809_s1 = scalar_lea.hbm %s22071_s17, %s21805_s6  ;;  %s21815_s0 = scalar_lea.hbm %s20028_s25, %s21805_s6 }
0x5406   : > { %p19028_p1 = scmp.lt.s32.totalorder %s19026_s15, %s19020_s12 }
0x5408   : > { %p19029_p2 = por %p19028_p1, %p19027_p0 }
0x5409   : > { %v13444_v13 = vpop.f32.mrf.mxu0 }
0x540a   : > { %v13445_v62 = vadd.f32 %v15101_v53, %v13444_v13  ;;  %p19030_p3 = pnand %p19029_p2, %p19023_p13 }
0x540b   : > { %v16261_v56 = vpop.f32.mrf.mxu0 }
0x540c   : > { %v13448_v20 = vmax.f32 %v13445_v62, 0.0 }
0x540e   : > { %16271 = vmatmul.mubr.msk.f32.vlgmr.msra.gmra.mxu1 %vm4208_vm0, %v13448_v20 }
0x54ce   : > { %v13529_v45 = vpop.f32.mrf.mxu1 }
0x54cf   : > { %v13530_v63 = vadd.f32 %v15103_v58, %v13529_v45 }
0x54d0   : > { %v16272_v1 = vpop.f32.mrf.mxu1 }
0x54d1   : > { %v13533_v46 = vmax.f32 %v13530_v63, 0.0 }
0x54d3   : > { %16282 = vmatmul.mubr.msk.f32.vlgmr.msra.gmra.mxu0 %vm4208_vm0, %v13533_v46 }
0x54d4   : > { %19033 = shalt.err (!%p19030_p3)
}
0x54d5   : > { %s19034_s2 = scalar_lea.hbm %s21809_s1, 128  ;;  %s19038_s10 = scalar_lea.hbm %s22071_s17, 256 }
0x54d6   : > { %p19035_p6 = scmp.ne.s32.totalorder %s21809_s1, %s19034_s2  ;;  %p19039_p7 = scmp.lt.s32.totalorder %s21809_s1, %s22071_s17 }
0x54d7   : > { %p19040_p8 = scmp.lt.s32.totalorder %s19038_s10, %s19034_s2 }
0x54d8   : > { %p19036_p5 = pnand %p19035_p6, %p22195_p11 }
0x54d9   : > { %p19041_p9 = por %p19040_p8, %p19039_p7 }
0x54da   : > { %p19037_p4 = pneg %p19036_p5 }
0x54dc   : > { %p19042_p10 = pnand %p19041_p9, %p19037_p4 }
0x54de   : > { %19045 = shalt.err (!%p19042_p10)
}
0x54df   : > { %16593 = dma.vmem_to_hbm [thread:$0]  (%p22195_p11), %s13675_s5, 128, %s21809_s1, %s21817_s8  }
0x54e0   : > { %s22196_s13 = scalar_lea.vmem [#allocation119], %s21763_s3  ;;  %s4172_s12 = scalar_lea.vmem [#allocation122], %s21763_s3 }
0x54e1   : > { %s13658_s14 = sshll.u32 %s22196_s13, 4  ;;  %13629 = vst.msk [vmem:[%s4172_s12] sm:$0xff] %vm4208_vm0, %v21440_v59  ;;  %s21843_s15 = scalar_lea.hbm %s20043_s4, %s21805_s6  ;;  %s21834_s14 = int_to_ptr.vmem [resolvable:$true] %s13658_s14 }
0x54e2   : > { %s22197_s2 = sand.u32 1, %s19284_s7   ;;  %s19046_s17 = scalar_lea.vmem %s21834_s14, 128 }
0x54e3   : > { %s13631_s10 = scalar_lea.sflag [#allocation4], %s22197_s2  ;;  %p19047_p12 = scmp.ne.s32.totalorder %s21834_s14, %s19046_s17 }
0x54e4   : > { %s19488_s1 = smov [#allocation119]  }
0x54e5   : > { %p19048_p13 = pnand %p19047_p12, %p22195_p11  ;;  %s19050_s5 = sshll.u32 %s19488_s1, 4  ;;  %s19051_s5 = int_to_ptr.vmem [resolvable:$false] %s19050_s5 }
0x54e6   : > { %s19052_s13 = scalar_lea.vmem %s19051_s5, 256  ;;  %p19053_p1 = scmp.lt.s32.totalorder %s21834_s14, %s19051_s5 }
0x54e7   : > { %p19049_p0 = pneg %p19048_p13  ;;  %p19054_p2 = scmp.lt.s32.totalorder %s19052_s13, %s19046_s17 }
0x54e9   : > { %p19055_p3 = por %p19054_p2, %p19053_p1 }
0x54eb   : > { %p19056_p6 = pnand %p19055_p3, %p19049_p0 }
0x54ed   : > { %19059 = shalt.err (!%p19056_p6)
}
0x54ee   : > { %s19060_s6 = scalar_lea.hbm %s21815_s0, 128  ;;  %s19064_s2 = scalar_lea.hbm %s20028_s25, 256 }
0x54ef   : > { %p19061_p5 = scmp.ne.s32.totalorder %s21815_s0, %s19060_s6  ;;  %p19065_p8 = scmp.lt.s32.totalorder %s21815_s0, %s20028_s25 }
0x54f0   : > { %p19066_p9 = scmp.lt.s32.totalorder %s19064_s2, %s19060_s6 }
0x54f1   : > { %p19062_p4 = pnand %p19061_p5, %p22195_p11 }
0x54f2   : > { %p19067_p10 = por %p19066_p9, %p19065_p8 }
0x54f3   : > { %p19063_p7 = pneg %p19062_p4 }
0x54f5   : > { %p19068_p12 = pnand %p19067_p10, %p19063_p7 }
0x54f7   : > { %19071 = shalt.err (!%p19068_p12)
}
0x54f8   : > { %16592 = dma.vmem_to_hbm [thread:$0]  (%p22195_p11), %s21834_s14, 128, %s21815_s0, %s13631_s10  }
0x54f9   : > { %s13687_s17 = sshll.u32 %s4172_s12, 4  ;;  %s19489_s5 = smov [#allocation122]   ;;  %s13688_s17 = int_to_ptr.vmem [resolvable:$true] %s13687_s17 }
0x54fa   : > { %s19072_s1 = scalar_lea.vmem %s13688_s17, 128  ;;  %s19076_s13 = sshll.u32 %s19489_s5, 4  ;;  %s19077_s13 = int_to_ptr.vmem [resolvable:$false] %s19076_s13 }
0x54fb   : > { %p19073_p13 = scmp.ne.s32.totalorder %s13688_s17, %s19072_s1  ;;  %s19078_s6 = scalar_lea.vmem %s19077_s13, 256 }
0x54fc   : > { %p19079_p2 = scmp.lt.s32.totalorder %s13688_s17, %s19077_s13  ;;  %p19080_p3 = scmp.lt.s32.totalorder %s19078_s6, %s19072_s1 }
0x54fd   : > { %p19074_p0 = pnand %p19073_p13, %p22195_p11 }
0x54fe   : > { %p19081_p6 = por %p19080_p3, %p19079_p2 }
0x54ff   : > { %p19075_p1 = pneg %p19074_p0 }
0x5501   : > { %p19082_p5 = pnand %p19081_p6, %p19075_p1 }
0x5503   : > { %19085 = shalt.err (!%p19082_p5)
}
0x5504   : > { %s19086_s3 = scalar_lea.hbm %s21843_s15, 128  ;;  %s19090_s0 = scalar_lea.hbm %s20043_s4, 256 }
0x5505   : > { %p19087_p4 = scmp.ne.s32.totalorder %s21843_s15, %s19086_s3  ;;  %p19091_p9 = scmp.lt.s32.totalorder %s21843_s15, %s20043_s4 }
0x5506   : > { %p19092_p10 = scmp.lt.s32.totalorder %s19090_s0, %s19086_s3 }
0x5507   : > { %p19088_p7 = pnand %p19087_p4, %p22195_p11 }
0x5508   : > { %p19093_p12 = por %p19092_p10, %p19091_p9 }
0x5509   : > { %p19089_p8 = pneg %p19088_p7 }
0x550b   : > { %p19094_p13 = pnand %p19093_p12, %p19089_p8 }
0x550d   : > { %19097 = shalt.err (!%p19094_p13)
}
0x550e   : > { %16594 = dma.vmem_to_hbm [thread:$0]  (%p22195_p11), %s13688_s17, 128, %s21843_s15, %s21817_s8   ;;  %v15105_v28 = vld [vmem:[#allocation7] ss:$0 sm:$0xff]  ;;  %vm13626_vm6 = vcmask 31744  }
0x550f   : > { %s14860_s14 = sshll.u32 %s20684_s16, 3 }
0x5510   : > { %s4189_s12 = scalar_lea.vmem %s20033_s9, %s14860_s14 }
0x5593   : > { %v13614_v59 = vpop.f32.mrf.mxu0 }
0x5594   : > { %v13615_v0 = vadd.f32 %v15105_v28, %v13614_v59 }
0x5595   : > { %v16283_v50 = vpop.f32.mrf.mxu0 }
0x5596   : > { %v15107_v2 = vmul.f32 -1.442695, %v13615_v0 }
0x5598   : > { %17160 = vpow2.f32 %v15107_v2 }
0x55a5   : > { %v17161_v4 = vpop.eup %17160 }
0x55a6   : > { %v13621_v6 = vadd.f32 1.0, %v17161_v4 }
0x55a8   : > { %17162 = vrcp.f32 %v13621_v6 }
0x55b5   : > { %v17163_v11 = vpop.eup %17162 }
0x55b6   : > { %13627 = vst.msk [vmem:[%s4189_s12] sm:$0xff] %vm13626_vm6, %v17163_v11 }
0x55b7 PF: > { %s22198_s28 = sld [smem:[#allocation265_spill]]  ;;  %p16762_p0 = scmp.ge.s32.totalorder %s19292_s11, 2 }
0x55b8   : > { %s22199_s10 = sld [smem:[#allocation269_spill]] }
0x55bd   : > { %s13699_s8 = sand.u32 1, %s22198_s28  }
0x55be   : > { %p22200_p11 = scmp.ne.s32.totalorder %s22199_s10, 0  ;;  %s13700_s15 = scalar_lea.sflag [#allocation4], %s13699_s8 }
0x55c0   : > { %p16599_p1 = pnand %p16762_p0, %p22200_p11 }
0x55c2   : > { %p16600_p2 = pneg %p16599_p1 }
0x55c4   : > { %19271 = dma.done.wait (%p16600_p2), %s13700_s15, 128  }
0x55c5   : > { %19273 = vsyncadd (%p16600_p2), %s13700_s15, 4294967168  ;;  %s22201_s2 = sadd.s32 4294967294, %s19292_s11  }
0x55c6   : > { %s13715_s17 = sand.u32 1, %s22201_s2  }
0x55c7   : > { %s13716_s16 = scalar_lea.sflag [#allocation121], %s13715_s17 }
0x55c8   : > { %19275 = dma.done.wait (%p16600_p2), %s13716_s16, 256  }
0x55c9   : > { %19277 = vsyncadd (%p16600_p2), %s13716_s16, 4294967040  ;;  %s22202_s11 = sld [smem:[#allocation267_spill]] }
0x55ca   : > { %s22203_s1 = sld [smem:[#allocation266_spill]] }
0x55cb   : > { %s22204_s10 = sld [smem:[#allocation268_spill]] }
0x55cc   : > { %22205 = sst [smem:[#allocation265_spill]] %s19284_s7 }
0x55cf   : > { %p272_p3 = scmp.ge.s32.totalorder %s22202_s11, 4  }
0x55d0   : > { %s22206_s7 = smov %s22203_s1 }
0x55d1   :  { %274 = sbr.rel (!%p272_p3) target bundleno = 261 (0x105), region = 947 }
0x55d6   :  { %13730 = vsyncpa [#allocation3], 1 }
0x55d7   :  { %13732 = vsyncpa [#allocation3 + $0x1], 1 }
0x55d8   :  { %13733 = vsyncpa [#allocation6], 1 }
0x55d9   :  { %13734 = vsyncpa [#allocation9], 1 }
0x55da   :  { %13735 = vsyncpa [#allocation12], 1 }
0x55db   :  { %13736 = vsyncpa [#allocation15], 1 }
0x55dc   :  { %13737 = vsyncpa [#allocation18], 1 }
0x55dd   :  { %13738 = vsyncpa [#allocation21], 1 }
0x55de   :  { %13739 = vsyncpa [#allocation24], 1 }
0x55df   :  { %13740 = vsyncpa [#allocation27], 1 }
0x55e0   :  { %13741 = vsyncpa [#allocation30], 1 }
0x55e1   :  { %13742 = vsyncpa [#allocation33], 1 }
0x55e2   :  { %13743 = vsyncpa [#allocation36], 1 }
0x55e3   :  { %13744 = vsyncpa [#allocation39], 1 }
0x55e4   :  { %13745 = vsyncpa [#allocation42], 1 }
0x55e5   :  { %13746 = vsyncpa [#allocation45], 1 }
0x55e6   :  { %13747 = vsyncpa [#allocation48], 1 }
0x55e7   :  { %13748 = vsyncpa [#allocation51], 1 }
0x55e8   :  { %13749 = vsyncpa [#allocation54], 1 }
0x55e9   :  { %13750 = vsyncpa [#allocation57], 1 }
0x55ea   :  { %13751 = vsyncpa [#allocation60], 1 }
0x55eb   :  { %13752 = vsyncpa [#allocation63], 1 }
0x55ec   :  { %13753 = vsyncpa [#allocation66], 1 }
0x55ed   :  { %13754 = vsyncpa [#allocation69], 1 }
0x55ee   :  { %13755 = vsyncpa [#allocation72], 1 }
0x55ef   :  { %13756 = vsyncpa [#allocation75], 1 }
0x55f0   :  { %13757 = vsyncpa [#allocation78], 1 }
0x55f1   :  { %13758 = vsyncpa [#allocation81], 1 }
0x55f2   :  { %13759 = vsyncpa [#allocation84], 1 }
0x55f3   :  { %13760 = vsyncpa [#allocation87], 1 }
0x55f4   :  { %13761 = vsyncpa [#allocation90], 1 }
0x55f5   :  { %13762 = vsyncpa [#allocation93], 1 }
0x55f6   :  { %13763 = vsyncpa [#allocation96], 1 }
0x55f7   :  { %13764 = vsyncpa [#allocation99], 1 }
0x55f8   :  { %13765 = vsyncpa [#allocation102], 1 }
0x55f9   :  { %13766 = vsyncpa [#allocation105], 1 }
0x55fa   :  { %13767 = vsyncpa [#allocation108], 1 }
0x55fb   :  { %13768 = vsyncpa [#allocation111], 1 }
0x55fc   :  { %13769 = vsyncpa [#allocation114], 1 }
0x55fd   :  { %13770 = vsyncpa [#allocation117], 1 }
0x55fe   :  { %13771 = vsyncpa [#allocation4], 1 }
0x55ff   :  { %13773 = vsyncpa [#allocation4 + $0x1], 1 }
0x5600   :  { %13774 = vsyncpa [#allocation121], 1 }
0x5601   :  { %13776 = vsyncpa [#allocation121 + $0x1], 1 }

</bundles_post_ra>
